<compile_context>
chip_gen: v7x
topology: tpu7x:2x2x1
jax: 0.10.0
libtpu: 0.0.40
codegen_flags: <defaults>
</compile_context>

<pallas_src>
import functools
import math

import jax
import jax.numpy as jnp
from jax.experimental import pallas as pl
from jax.experimental.pallas import tpu as pltpu


def _ru(x, m):
    return ((x + m - 1) // m) * m


def _pick(d, align, max_tile):
    """Return (padded_dim, tile) with tile | padded_dim and tile <= max_tile."""
    p = _ru(d, align)
    if p <= max_tile:
        return p, p
    return _ru(p, max_tile), max_tile


# ----------------------------- Pallas kernels --------------------------------

def _mm_kernel(a_ref, b_ref, s_ref, c_ref, *rest, relu, has_residual):
    """acc += a @ b over the K grid axis; epilogue: acc*s + c (+res) (+ReLU)."""
    if has_residual:
        r_ref, o_ref, acc_ref = rest
    else:
        o_ref, acc_ref = rest
    k = pl.program_id(2)

    @pl.when(k == 0)
    def _():
        acc_ref[...] = jnp.zeros_like(acc_ref)

    acc_ref[...] += jnp.dot(a_ref[...], b_ref[...],
                            preferred_element_type=jnp.float32)

    @pl.when(k == pl.num_programs(2) - 1)
    def _():
        out = acc_ref[...] * s_ref[...] + c_ref[...]
        if has_residual:
            out = out + r_ref[...]
        if relu:
            out = jnp.maximum(out, 0.0)
        o_ref[...] = out.astype(o_ref.dtype)


def matmul_fused(a, b_p, s_p, c_p, n_out, relu=False, residual=None):
    """act((a @ B) * s + c [+ residual])[:M, :n_out].

    a: (M, K) any float dtype (cast to bf16 here).
    b_p: (Kp, Np) bf16, pre-padded.  s_p, c_p: (1, Np) f32, pre-padded.
    residual: optional (M, n_out) f32 added before the ReLU.
    """
    M, K = a.shape
    Kp, Np = b_p.shape
    Mp, tm = _pick(M, 16, 256)
    tk = Kp if Kp <= 256 else 256
    tn = Np if Np <= 256 else 256

    a_p = jnp.pad(a.astype(jnp.bfloat16), ((0, Mp - M), (0, Kp - K)))
    args = [a_p, b_p, s_p, c_p]
    in_specs = [
        pl.BlockSpec((tm, tk), lambda i, j, k: (i, k)),
        pl.BlockSpec((tk, tn), lambda i, j, k: (k, j)),
        pl.BlockSpec((1, tn), lambda i, j, k: (0, j)),
        pl.BlockSpec((1, tn), lambda i, j, k: (0, j)),
    ]
    if residual is not None:
        r_p = jnp.pad(residual.astype(jnp.float32),
                      ((0, Mp - M), (0, Np - residual.shape[1])))
        args.append(r_p)
        in_specs.append(pl.BlockSpec((tm, tn), lambda i, j, k: (i, j)))

    out = pl.pallas_call(
        functools.partial(_mm_kernel, relu=relu,
                          has_residual=residual is not None),
        out_shape=jax.ShapeDtypeStruct((Mp, Np), jnp.float32),
        grid_spec=pltpu.PrefetchScalarGridSpec(
            num_scalar_prefetch=0,
            grid=(Mp // tm, Np // tn, Kp // tk),
            in_specs=in_specs,
            out_specs=pl.BlockSpec((tm, tn), lambda i, j, k: (i, j)),
            scratch_shapes=[pltpu.VMEM((tm, tn), jnp.float32)],
        ),
        compiler_params=pltpu.CompilerParams(
            dimension_semantics=("parallel", "parallel", "arbitrary")),
    )(*args)
    return out[:M, :n_out]


def _lstm_layer_kernel(xs_ref, h0_ref, c0_ref, wih_ref, whh_ref, b_ref,
                       ys_ref, hn_ref, cn_ref, h_sc, c_sc, *, hidden):
    """Full-sequence single-layer LSTM; weights + h/c stay resident in VMEM."""
    H = hidden
    T = xs_ref.shape[0]
    h_sc[...] = h0_ref[...]
    c_sc[...] = c0_ref[...]

    def step(t, carry):
        x = xs_ref[t]                                     # (Bp, In)
        h = h_sc[...]
        gates = (jnp.dot(x, wih_ref[...], preferred_element_type=jnp.float32)
                 + jnp.dot(h, whh_ref[...], preferred_element_type=jnp.float32)
                 + b_ref[...])                            # (Bp, 4H), order [i|f|g|o]
        i_g = jax.nn.sigmoid(gates[:, 0 * H:1 * H])
        f_g = jax.nn.sigmoid(gates[:, 1 * H:2 * H])
        g_g = jnp.tanh(gates[:, 2 * H:3 * H])
        o_g = jax.nn.sigmoid(gates[:, 3 * H:4 * H])
        c_new = f_g * c_sc[...] + i_g * g_g
        h_new = o_g * jnp.tanh(c_new)
        h_sc[...] = h_new
        c_sc[...] = c_new
        ys_ref[t] = h_new
        return carry

    jax.lax.fori_loop(0, T, step, 0)
    hn_ref[...] = h_sc[...]
    cn_ref[...] = c_sc[...]


def lstm_layer(xs, h0, c0, p):
    """xs: (T, Bp, In) f32; h0, c0: (Bp, H) f32; p: prepared layer params."""
    T, Bp, In = xs.shape
    H = h0.shape[-1]

    def full(shape):
        nd = len(shape)
        return pl.BlockSpec(shape, lambda i, _nd=nd: (0,) * _nd)

    return pl.pallas_call(
        functools.partial(_lstm_layer_kernel, hidden=H),
        out_shape=(jax.ShapeDtypeStruct((T, Bp, H), jnp.float32),
                   jax.ShapeDtypeStruct((Bp, H), jnp.float32),
                   jax.ShapeDtypeStruct((Bp, H), jnp.float32)),
        grid=(1,),
        in_specs=[full((T, Bp, In)), full((Bp, H)), full((Bp, H)),
                  full((In, 4 * H)), full((H, 4 * H)), full((1, 4 * H))],
        out_specs=(full((T, Bp, H)), full((Bp, H)), full((Bp, H))),
        scratch_shapes=[pltpu.VMEM((Bp, H), jnp.float32),
                        pltpu.VMEM((Bp, H), jnp.float32)],
    )(xs, h0, c0, p['w_ih'], p['w_hh'], p['b'])


# --------------------------- JAX glue (model graph) ---------------------------

def conv2d_bn(x, cp, relu, residual=None):
    """x: NHWC f32; cp: prepared conv params (bf16 weight matrix + fused BN)."""
    N, H, W, Cin = x.shape
    KH, KW = cp['kh'], cp['kw']
    stride, padding = cp['stride'], cp['pad']
    OH = (H + 2 * padding - KH) // stride + 1
    OW = (W + 2 * padding - KW) // stride + 1
    if padding:
        x = jnp.pad(x, ((0, 0), (padding, padding), (padding, padding), (0, 0)))
    patches = []
    for dh in range(KH):
        for dw in range(KW):
            patches.append(
                x[:, dh:dh + stride * OH:stride, dw:dw + stride * OW:stride, :]
                .astype(jnp.bfloat16))
    A = patches[0] if len(patches) == 1 else jnp.concatenate(patches, axis=-1)
    A = A.reshape(N * OH * OW, KH * KW * Cin)
    res = None
    if residual is not None:
        res = residual.reshape(N * OH * OW, cp['cout'])
    out = matmul_fused(A, cp['w'], cp['s'], cp['b'], n_out=cp['cout'],
                       relu=relu, residual=res)
    return out.reshape(N, OH, OW, cp['cout'])


def maxpool_3x3_s2_p1(x):
    return jax.lax.reduce_window(
        x, jnp.array(-jnp.inf, x.dtype), jax.lax.max,
        window_dimensions=(1, 3, 3, 1),
        window_strides=(1, 2, 2, 1),
        padding=((0, 0), (1, 1), (1, 1), (0, 0)))


def basic_block(x, bp):
    out = conv2d_bn(x, bp['conv1'], relu=True)
    if 'down' in bp:
        identity = conv2d_bn(x, bp['down'], relu=False)
    else:
        identity = x
    # Residual add + ReLU fused into the second conv's matmul epilogue.
    return conv2d_bn(out, bp['conv2'], relu=True, residual=identity)


def resnet18_features(x_nchw, rp):
    """torchvision resnet18 with fc=Identity. x:(N,3,H,W) -> (N,512)."""
    x = jnp.transpose(x_nchw, (0, 2, 3, 1))                 # NCHW -> NHWC
    x = conv2d_bn(x, rp['conv1'], relu=True)
    x = maxpool_3x3_s2_p1(x)
    for lname in ('layer1', 'layer2', 'layer3', 'layer4'):
        for bp in rp[lname]:
            x = basic_block(x, bp)
    return jnp.mean(x, axis=(1, 2))                         # AdaptiveAvgPool2d((1,1))


def run_lstm(inp, lstm_params, h0, c0):
    """Multi-layer LSTM. inp: (T, B, In); h0, c0: (L, B, H)."""
    T, B, _ = inp.shape
    Bp = _ru(B, 8)
    layer_in = jnp.pad(inp, ((0, 0), (0, Bp - B), (0, 0)))
    hn, cn = [], []
    for l, p in enumerate(lstm_params):
        h_l = jnp.pad(h0[l], ((0, Bp - B), (0, 0)))
        c_l = jnp.pad(c0[l], ((0, Bp - B), (0, 0)))
        ys, h_l, c_l = lstm_layer(layer_in, h_l, c_l, p)
        layer_in = ys
        hn.append(h_l[:B])
        cn.append(c_l[:B])
    return layer_in[:, :B, :], jnp.stack(hn, 0), jnp.stack(cn, 0)


def resnet18_rnn_forward(x, params, *, hidden, num_layers, num_classes):
    """x: (b_z, ts, c, h, w) float32 -> (b_z-1, 1, num_classes)."""
    b_z, ts = x.shape[0], x.shape[1]
    h = jnp.zeros((num_layers, 1, hidden), jnp.float32)
    c = jnp.zeros((num_layers, 1, hidden), jnp.float32)

    out = None
    for ii in range(ts):                                    # ii=0: zero initial state
        y = resnet18_features(x[:, ii], params['resnet'])   # (b_z, 512)
        out, h, c = run_lstm(y[:, None, :], params['lstm'], h, c)  # seq=b_z, batch=1

    # Dropout: eval-mode semantics (identity).
    out = out[:-1]                                          # (b_z-1, 1, hidden)
    flat = out.reshape((-1, hidden))
    fc = params['fc1']
    logits = matmul_fused(flat, fc['w'], fc['s'], fc['b'],
                          n_out=num_classes, relu=False)
    return logits.reshape(out.shape[0], out.shape[1], num_classes)


# --------------------------- parameter preparation ----------------------------

def prepare_params(raw, hidden, num_classes):
    """One-time hoist of weight transposes/reshapes, BN folding and padding."""
    eps = 1e-5

    def prep_conv(w, bn_p, stride, padding):
        Cout, Cin, KH, KW = w.shape
        K = KH * KW * Cin
        Wm = jnp.transpose(w, (2, 3, 1, 0)).reshape(K, Cout)      # (kh,kw,cin) major
        s = bn_p['gamma'] / jnp.sqrt(bn_p['var'] + eps)
        t = bn_p['beta'] - bn_p['mean'] * s
        Kp, _ = _pick(K, 128, 256)
        Np, _ = _pick(Cout, 128, 256)
        return {
            'w': jnp.pad(Wm.astype(jnp.bfloat16), ((0, Kp - K), (0, Np - Cout))),
            's': jnp.pad(s.astype(jnp.float32), (0, Np - Cout)).reshape(1, Np),
            'b': jnp.pad(t.astype(jnp.float32), (0, Np - Cout)).reshape(1, Np),
            'cout': Cout, 'kh': KH, 'kw': KW, 'stride': stride, 'pad': padding,
        }

    r = raw['resnet']
    resnet = {'conv1': prep_conv(r['conv1_w'], r['bn1'], 2, 3)}
    for lname, stride in (('layer1', 1), ('layer2', 2), ('layer3', 2), ('layer4', 2)):
        blocks = []
        for bi, blk in enumerate(r[lname]):
            s = stride if bi == 0 else 1
            pb = {'conv1': prep_conv(blk['conv1_w'], blk['bn1'], s, 1),
                  'conv2': prep_conv(blk['conv2_w'], blk['bn2'], 1, 1)}
            if 'down_conv_w' in blk:
                pb['down'] = prep_conv(blk['down_conv_w'], blk['down_bn'], s, 0)
            blocks.append(pb)
        resnet[lname] = blocks

    lstm = []
    for p in raw['lstm']:
        lstm.append({
            'w_ih': p['w_ih'].T.astype(jnp.float32),          # (In, 4H), [i|f|g|o]
            'w_hh': p['w_hh'].T.astype(jnp.float32),          # (H, 4H)
            'b': (p['b_ih'] + p['b_hh']).reshape(1, 4 * hidden).astype(jnp.float32),
        })

    Wt = raw['fc1']['w'].T                                     # (hidden, num_classes)
    K, N = Wt.shape
    Kp, _ = _pick(K, 128, 256)
    Np, _ = _pick(N, 128, 256)
    fc = {'w': jnp.pad(Wt.astype(jnp.bfloat16), ((0, Kp - K), (0, Np - N))),
          's': jnp.pad(jnp.ones((N,), jnp.float32), (0, Np - N)).reshape(1, Np),
          'b': jnp.pad(raw['fc1']['b'].astype(jnp.float32), (0, Np - N)).reshape(1, Np)}

    return {'resnet': resnet, 'lstm': lstm, 'fc1': fc}


# ----------------------------- parameter init ---------------------------------

def init_params(key, num_classes, hidden, num_layers):
    keys = iter(jax.random.split(key, 256))

    def conv_w(cout, cin, kh, kw):
        std = math.sqrt(2.0 / (cin * kh * kw))
        return jax.random.normal(next(keys), (cout, cin, kh, kw), jnp.float32) * std

    def bn(ch):
        return {'gamma': jnp.ones((ch,), jnp.float32),
                'beta': jnp.zeros((ch,), jnp.float32),
                'mean': jnp.zeros((ch,), jnp.float32),
                'var': jnp.ones((ch,), jnp.float32)}

    resnet = {'conv1_w': conv_w(64, 3, 7, 7), 'bn1': bn(64)}
    inplanes = 64
    for lname, planes, stride in (('layer1', 64, 1), ('layer2', 128, 2),
                                  ('layer3', 256, 2), ('layer4', 512, 2)):
        blocks = []
        for b in range(2):
            s = stride if b == 0 else 1
            blk = {'conv1_w': conv_w(planes, inplanes, 3, 3), 'bn1': bn(planes),
                   'conv2_w': conv_w(planes, planes, 3, 3), 'bn2': bn(planes)}
            if s != 1 or inplanes != planes:
                blk['down_conv_w'] = conv_w(planes, inplanes, 1, 1)
                blk['down_bn'] = bn(planes)
            blocks.append(blk)
            inplanes = planes
        resnet[lname] = blocks

    num_features = 512
    lstm = []
    for l in range(num_layers):
        in_sz = num_features if l == 0 else hidden
        std = 1.0 / math.sqrt(hidden)
        lstm.append({
            'w_ih': jax.random.uniform(next(keys), (4 * hidden, in_sz), jnp.float32, -std, std),
            'w_hh': jax.random.uniform(next(keys), (4 * hidden, hidden), jnp.float32, -std, std),
            'b_ih': jax.random.uniform(next(keys), (4 * hidden,), jnp.float32, -std, std),
            'b_hh': jax.random.uniform(next(keys), (4 * hidden,), jnp.float32, -std, std),
        })

    fc1 = {'w': jax.random.normal(next(keys), (num_classes, hidden), jnp.float32) * 0.05,
           'b': jnp.zeros((num_classes,), jnp.float32)}
    return {'resnet': resnet, 'lstm': lstm, 'fc1': fc1}


# ----------------------------------- main --------------------------------------

if __name__ == "__main__":
    B, T, C, H, W = 2, 3, 3, 16, 16            # (b_z, ts, c, h, w)
    NUM_CLASSES, HIDDEN, NUM_LAYERS = 5, 32, 2

    key = jax.random.PRNGKey(0)
    pkey, xkey = jax.random.split(key)
    raw_params = init_params(pkey, NUM_CLASSES, HIDDEN, NUM_LAYERS)
    params = prepare_params(raw_params, HIDDEN, NUM_CLASSES)
    x = jax.random.normal(xkey, (B, T, C, H, W), jnp.float32)

    fwd = jax.jit(functools.partial(resnet18_rnn_forward, params=params,
                                    hidden=HIDDEN, num_layers=NUM_LAYERS,
                                    num_classes=NUM_CLASSES))
    out = fwd(x)
    out = jax.block_until_ready(out)
    assert out.shape == (B - 1, 1, NUM_CLASSES), out.shape
    assert bool(jnp.all(jnp.isfinite(out)))
    print("KERNEL_OK")
</pallas_src>

<mosaic_0001>
module attributes {stable_mosaic.version = 11 : i64} {
  func.func @_mm_kernel(%arg0: i32, %arg1: i32, %arg2: i32, %arg3: memref<128x256xbf16, #tpu.memory_space<vmem>>, %arg4: memref<256x128xbf16, #tpu.memory_space<vmem>>, %arg5: memref<1x128xf32, #tpu.memory_space<vmem>>, %arg6: memref<1x128xf32, #tpu.memory_space<vmem>>, %arg7: memref<128x128xf32, #tpu.memory_space<vmem>>, %arg8: memref<128x128xf32, #tpu.memory_space<vmem>>) attributes {dimension_semantics = [#tpu.dimension_semantics<parallel>, #tpu.dimension_semantics<parallel>, #tpu.dimension_semantics<arbitrary>], iteration_bounds = array<i64: 1, 1, 1>, scalar_prefetch = 0 : i64, scratch_operands = 1 : i64, tpu.core_type = #tpu.core_type<tc>, window_params = [{transform_indices = @transform_0, window_bounds = array<i64: 128, 256>}, {transform_indices = @transform_1, window_bounds = array<i64: 256, 128>}, {transform_indices = @transform_2, window_bounds = array<i64: 1, 128>}, {transform_indices = @transform_3, window_bounds = array<i64: 1, 128>}, {transform_indices = @transform_4, window_bounds = array<i64: 128, 128>}]} {
    %c0_i32 = arith.constant 0 : i32
    %0 = arith.cmpi eq, %arg2, %c0_i32 : i32
    %1 = arith.extui %0 : i1 to i32
    %c0_i32_0 = arith.constant 0 : i32
    %2 = arith.cmpi ne, %1, %c0_i32_0 : i32
    scf.if %2 {
      %cst_10 = arith.constant 0.000000e+00 : f32
      %12 = vector.broadcast %cst_10 : f32 to vector<128x128xf32>
      %c0_11 = arith.constant 0 : index
      %c0_12 = arith.constant 0 : index
      %13 = vector.load %arg8[%c0_11, %c0_12] : memref<128x128xf32, #tpu.memory_space<vmem>>, vector<128x128xf32>
      tpu.vector_store %arg8[%c0_11, %c0_12], %12 {strides = array<i32>} : memref<128x128xf32, #tpu.memory_space<vmem>>, vector<128x128xf32>,
    } else {
    }
    %c0 = arith.constant 0 : index
    %c0_1 = arith.constant 0 : index
    %3 = vector.load %arg8[%c0, %c0_1] : memref<128x128xf32, #tpu.memory_space<vmem>>, vector<128x128xf32>
    %c0_2 = arith.constant 0 : index
    %c0_3 = arith.constant 0 : index
    %4 = vector.load %arg3[%c0_2, %c0_3] : memref<128x256xbf16, #tpu.memory_space<vmem>>, vector<128x256xbf16>
    %c0_4 = arith.constant 0 : index
    %c0_5 = arith.constant 0 : index
    %5 = vector.load %arg4[%c0_4, %c0_5] : memref<256x128xbf16, #tpu.memory_space<vmem>>, vector<256x128xbf16>
    %cst = arith.constant dense<0.000000e+00> : vector<128x128xf32>
    %6 = tpu.matmul %4, %5, %cst {dimension_numbers = #tpu.dot_dimension_numbers<[1], [0], [0], [1], [0, 0, 1, 1], [], []>} : vector<128x256xbf16>, vector<256x128xbf16>, vector<128x128xf32> -> vector<128x128xf32>
    %7 = arith.addf %3, %6 : vector<128x128xf32>
    %c0_6 = arith.constant 0 : index
    %c0_7 = arith.constant 0 : index
    %8 = vector.load %arg8[%c0_6, %c0_7] : memref<128x128xf32, #tpu.memory_space<vmem>>, vector<128x128xf32>
    tpu.vector_store %arg8[%c0_6, %c0_7], %7 {strides = array<i32>} : memref<128x128xf32, #tpu.memory_space<vmem>>, vector<128x128xf32>,
    %c0_i32_8 = arith.constant 0 : i32
    %9 = arith.cmpi eq, %arg2, %c0_i32_8 : i32
    %10 = arith.extui %9 : i1 to i32
    %c0_i32_9 = arith.constant 0 : i32
    %11 = arith.cmpi ne, %10, %c0_i32_9 : i32
    scf.if %11 {
      %c0_10 = arith.constant 0 : index
      %c0_11 = arith.constant 0 : index
      %12 = vector.load %arg8[%c0_10, %c0_11] : memref<128x128xf32, #tpu.memory_space<vmem>>, vector<128x128xf32>
      %c0_12 = arith.constant 0 : index
      %c0_13 = arith.constant 0 : index
      %13 = vector.load %arg5[%c0_12, %c0_13] : memref<1x128xf32, #tpu.memory_space<vmem>>, vector<1x128xf32>
      %14 = vector.broadcast %13 : vector<1x128xf32> to vector<128x128xf32>
      %15 = arith.mulf %12, %14 : vector<128x128xf32>
      %c0_14 = arith.constant 0 : index
      %c0_15 = arith.constant 0 : index
      %16 = vector.load %arg6[%c0_14, %c0_15] : memref<1x128xf32, #tpu.memory_space<vmem>>, vector<1x128xf32>
      %17 = vector.broadcast %16 : vector<1x128xf32> to vector<128x128xf32>
      %18 = arith.addf %15, %17 : vector<128x128xf32>
      %cst_16 = arith.constant 0.000000e+00 : f32
      %19 = vector.broadcast %cst_16 : f32 to vector<128x128xf32>
      %20 = arith.maximumf %18, %19 : vector<128x128xf32>
      %c0_17 = arith.constant 0 : index
      %c0_18 = arith.constant 0 : index
      %21 = vector.load %arg7[%c0_17, %c0_18] : memref<128x128xf32, #tpu.memory_space<vmem>>, vector<128x128xf32>
      tpu.vector_store %arg7[%c0_17, %c0_18], %20 {strides = array<i32>} : memref<128x128xf32, #tpu.memory_space<vmem>>, vector<128x128xf32>,
    } else {
    }
    return
  }
  func.func @transform_0(%arg0: i32, %arg1: i32, %arg2: i32) -> (i32, i32) {
    %c0_i32 = arith.constant 0 : i32
    return %arg0, %arg2 : i32, i32
  }
  func.func @transform_1(%arg0: i32, %arg1: i32, %arg2: i32) -> (i32, i32) {
    %c0_i32 = arith.constant 0 : i32
    return %arg2, %arg1 : i32, i32
  }
  func.func @transform_2(%arg0: i32, %arg1: i32, %arg2: i32) -> (i32, i32) {
    %c0_i32 = arith.constant 0 : i32
    %c0_i32_0 = arith.constant 0 : i32
    return %c0_i32, %arg1 : i32, i32
  }
  func.func @transform_3(%arg0: i32, %arg1: i32, %arg2: i32) -> (i32, i32) {
    %c0_i32 = arith.constant 0 : i32
    %c0_i32_0 = arith.constant 0 : i32
    return %c0_i32, %arg1 : i32, i32
  }
  func.func @transform_4(%arg0: i32, %arg1: i32, %arg2: i32) -> (i32, i32) {
    %c0_i32 = arith.constant 0 : i32
    return %arg0, %arg1 : i32, i32
  }
}

module attributes {stable_mosaic.version = 11 : i64} {
  func.func @_mm_kernel(%arg0: i32, %arg1: i32, %arg2: i32, %arg3: memref<32x256xbf16, #tpu.memory_space<vmem>>, %arg4: memref<256x128xbf16, #tpu.memory_space<vmem>>, %arg5: memref<1x128xf32, #tpu.memory_space<vmem>>, %arg6: memref<1x128xf32, #tpu.memory_space<vmem>>, %arg7: memref<32x128xf32, #tpu.memory_space<vmem>>, %arg8: memref<32x128xf32, #tpu.memory_space<vmem>>, %arg9: memref<32x128xf32, #tpu.memory_space<vmem>>) attributes {dimension_semantics = [#tpu.dimension_semantics<parallel>, #tpu.dimension_semantics<parallel>, #tpu.dimension_semantics<arbitrary>], iteration_bounds = array<i64: 1, 1, 3>, scalar_prefetch = 0 : i64, scratch_operands = 1 : i64, tpu.core_type = #tpu.core_type<tc>, window_params = [{transform_indices = @transform_0, window_bounds = array<i64: 32, 256>}, {transform_indices = @transform_1, window_bounds = array<i64: 256, 128>}, {transform_indices = @transform_2, window_bounds = array<i64: 1, 128>}, {transform_indices = @transform_3, window_bounds = array<i64: 1, 128>}, {transform_indices = @transform_4, window_bounds = array<i64: 32, 128>}, {transform_indices = @transform_5, window_bounds = array<i64: 32, 128>}]} {
    %c0_i32 = arith.constant 0 : i32
    %0 = arith.cmpi eq, %arg2, %c0_i32 : i32
    %1 = arith.extui %0 : i1 to i32
    %c0_i32_0 = arith.constant 0 : i32
    %2 = arith.cmpi ne, %1, %c0_i32_0 : i32
    scf.if %2 {
      %cst_9 = arith.constant 0.000000e+00 : f32
      %12 = vector.broadcast %cst_9 : f32 to vector<32x128xf32>
      %c0_10 = arith.constant 0 : index
      %c0_11 = arith.constant 0 : index
      %13 = vector.load %arg9[%c0_10, %c0_11] : memref<32x128xf32, #tpu.memory_space<vmem>>, vector<32x128xf32>
      tpu.vector_store %arg9[%c0_10, %c0_11], %12 {strides = array<i32>} : memref<32x128xf32, #tpu.memory_space<vmem>>, vector<32x128xf32>,
    } else {
    }
    %c0 = arith.constant 0 : index
    %c0_1 = arith.constant 0 : index
    %3 = vector.load %arg9[%c0, %c0_1] : memref<32x128xf32, #tpu.memory_space<vmem>>, vector<32x128xf32>
    %c0_2 = arith.constant 0 : index
    %c0_3 = arith.constant 0 : index
    %4 = vector.load %arg3[%c0_2, %c0_3] : memref<32x256xbf16, #tpu.memory_space<vmem>>, vector<32x256xbf16>
    %c0_4 = arith.constant 0 : index
    %c0_5 = arith.constant 0 : index
    %5 = vector.load %arg4[%c0_4, %c0_5] : memref<256x128xbf16, #tpu.memory_space<vmem>>, vector<256x128xbf16>
    %cst = arith.constant dense<0.000000e+00> : vector<32x128xf32>
    %6 = tpu.matmul %4, %5, %cst {dimension_numbers = #tpu.dot_dimension_numbers<[1], [0], [0], [1], [0, 0, 1, 1], [], []>} : vector<32x256xbf16>, vector<256x128xbf16>, vector<32x128xf32> -> vector<32x128xf32>
    %7 = arith.addf %3, %6 : vector<32x128xf32>
    %c0_6 = arith.constant 0 : index
    %c0_7 = arith.constant 0 : index
    %8 = vector.load %arg9[%c0_6, %c0_7] : memref<32x128xf32, #tpu.memory_space<vmem>>, vector<32x128xf32>
    tpu.vector_store %arg9[%c0_6, %c0_7], %7 {strides = array<i32>} : memref<32x128xf32, #tpu.memory_space<vmem>>, vector<32x128xf32>,
    %c2_i32 = arith.constant 2 : i32
    %9 = arith.cmpi eq, %arg2, %c2_i32 : i32
    %10 = arith.extui %9 : i1 to i32
    %c0_i32_8 = arith.constant 0 : i32
    %11 = arith.cmpi ne, %10, %c0_i32_8 : i32
    scf.if %11 {
      %c0_9 = arith.constant 0 : index
      %c0_10 = arith.constant 0 : index
      %12 = vector.load %arg9[%c0_9, %c0_10] : memref<32x128xf32, #tpu.memory_space<vmem>>, vector<32x128xf32>
      %c0_11 = arith.constant 0 : index
      %c0_12 = arith.constant 0 : index
      %13 = vector.load %arg5[%c0_11, %c0_12] : memref<1x128xf32, #tpu.memory_space<vmem>>, vector<1x128xf32>
      %14 = vector.broadcast %13 : vector<1x128xf32> to vector<32x128xf32>
      %15 = arith.mulf %12, %14 : vector<32x128xf32>
      %c0_13 = arith.constant 0 : index
      %c0_14 = arith.constant 0 : index
      %16 = vector.load %arg6[%c0_13, %c0_14] : memref<1x128xf32, #tpu.memory_space<vmem>>, vector<1x128xf32>
      %17 = vector.broadcast %16 : vector<1x128xf32> to vector<32x128xf32>
      %18 = arith.addf %15, %17 : vector<32x128xf32>
      %c0_15 = arith.constant 0 : index
      %c0_16 = arith.constant 0 : index
      %19 = vector.load %arg7[%c0_15, %c0_16] : memref<32x128xf32, #tpu.memory_space<vmem>>, vector<32x128xf32>
      %20 = arith.addf %18, %19 : vector<32x128xf32>
      %cst_17 = arith.constant 0.000000e+00 : f32
      %21 = vector.broadcast %cst_17 : f32 to vector<32x128xf32>
      %22 = arith.maximumf %20, %21 : vector<32x128xf32>
      %c0_18 = arith.constant 0 : index
      %c0_19 = arith.constant 0 : index
      %23 = vector.load %arg8[%c0_18, %c0_19] : memref<32x128xf32, #tpu.memory_space<vmem>>, vector<32x128xf32>
      tpu.vector_store %arg8[%c0_18, %c0_19], %22 {strides = array<i32>} : memref<32x128xf32, #tpu.memory_space<vmem>>, vector<32x128xf32>,
    } else {
    }
    return
  }
  func.func @transform_0(%arg0: i32, %arg1: i32, %arg2: i32) -> (i32, i32) {
    %c0_i32 = arith.constant 0 : i32
    return %arg0, %arg2 : i32, i32
  }
  func.func @transform_1(%arg0: i32, %arg1: i32, %arg2: i32) -> (i32, i32) {
    %c0_i32 = arith.constant 0 : i32
    return %arg2, %arg1 : i32, i32
  }
  func.func @transform_2(%arg0: i32, %arg1: i32, %arg2: i32) -> (i32, i32) {
    %c0_i32 = arith.constant 0 : i32
    %c0_i32_0 = arith.constant 0 : i32
    return %c0_i32, %arg1 : i32, i32
  }
  func.func @transform_3(%arg0: i32, %arg1: i32, %arg2: i32) -> (i32, i32) {
    %c0_i32 = arith.constant 0 : i32
    %c0_i32_0 = arith.constant 0 : i32
    return %c0_i32, %arg1 : i32, i32
  }
  func.func @transform_4(%arg0: i32, %arg1: i32, %arg2: i32) -> (i32, i32) {
    %c0_i32 = arith.constant 0 : i32
    return %arg0, %arg1 : i32, i32
  }
  func.func @transform_5(%arg0: i32, %arg1: i32, %arg2: i32) -> (i32, i32) {
    %c0_i32 = arith.constant 0 : i32
    return %arg0, %arg1 : i32, i32
  }
}

module attributes {stable_mosaic.version = 11 : i64} {
  func.func @_mm_kernel(%arg0: i32, %arg1: i32, %arg2: i32, %arg3: memref<16x128xbf16, #tpu.memory_space<vmem>>, %arg4: memref<128x128xbf16, #tpu.memory_space<vmem>>, %arg5: memref<1x128xf32, #tpu.memory_space<vmem>>, %arg6: memref<1x128xf32, #tpu.memory_space<vmem>>, %arg7: memref<16x128xf32, #tpu.memory_space<vmem>>, %arg8: memref<16x128xf32, #tpu.memory_space<vmem>>) attributes {dimension_semantics = [#tpu.dimension_semantics<parallel>, #tpu.dimension_semantics<parallel>, #tpu.dimension_semantics<arbitrary>], iteration_bounds = array<i64: 1, 1, 1>, scalar_prefetch = 0 : i64, scratch_operands = 1 : i64, tpu.core_type = #tpu.core_type<tc>, window_params = [{transform_indices = @transform_0, window_bounds = array<i64: 16, 128>}, {transform_indices = @transform_1, window_bounds = array<i64: 128, 128>}, {transform_indices = @transform_2, window_bounds = array<i64: 1, 128>}, {transform_indices = @transform_3, window_bounds = array<i64: 1, 128>}, {transform_indices = @transform_4, window_bounds = array<i64: 16, 128>}]} {
    %c0_i32 = arith.constant 0 : i32
    %0 = arith.cmpi eq, %arg2, %c0_i32 : i32
    %1 = arith.extui %0 : i1 to i32
    %c0_i32_0 = arith.constant 0 : i32
    %2 = arith.cmpi ne, %1, %c0_i32_0 : i32
    scf.if %2 {
      %cst_10 = arith.constant 0.000000e+00 : f32
      %12 = vector.broadcast %cst_10 : f32 to vector<16x128xf32>
      %c0_11 = arith.constant 0 : index
      %c0_12 = arith.constant 0 : index
      %13 = vector.load %arg8[%c0_11, %c0_12] : memref<16x128xf32, #tpu.memory_space<vmem>>, vector<16x128xf32>
      tpu.vector_store %arg8[%c0_11, %c0_12], %12 {strides = array<i32>} : memref<16x128xf32, #tpu.memory_space<vmem>>, vector<16x128xf32>,
    } else {
    }
    %c0 = arith.constant 0 : index
    %c0_1 = arith.constant 0 : index
    %3 = vector.load %arg8[%c0, %c0_1] : memref<16x128xf32, #tpu.memory_space<vmem>>, vector<16x128xf32>
    %c0_2 = arith.constant 0 : index
    %c0_3 = arith.constant 0 : index
    %4 = vector.load %arg3[%c0_2, %c0_3] : memref<16x128xbf16, #tpu.memory_space<vmem>>, vector<16x128xbf16>
    %c0_4 = arith.constant 0 : index
    %c0_5 = arith.constant 0 : index
    %5 = vector.load %arg4[%c0_4, %c0_5] : memref<128x128xbf16, #tpu.memory_space<vmem>>, vector<128x128xbf16>
    %cst = arith.constant dense<0.000000e+00> : vector<16x128xf32>
    %6 = tpu.matmul %4, %5, %cst {dimension_numbers = #tpu.dot_dimension_numbers<[1], [0], [0], [1], [0, 0, 1, 1], [], []>} : vector<16x128xbf16>, vector<128x128xbf16>, vector<16x128xf32> -> vector<16x128xf32>
    %7 = arith.addf %3, %6 : vector<16x128xf32>
    %c0_6 = arith.constant 0 : index
    %c0_7 = arith.constant 0 : index
    %8 = vector.load %arg8[%c0_6, %c0_7] : memref<16x128xf32, #tpu.memory_space<vmem>>, vector<16x128xf32>
    tpu.vector_store %arg8[%c0_6, %c0_7], %7 {strides = array<i32>} : memref<16x128xf32, #tpu.memory_space<vmem>>, vector<16x128xf32>,
    %c0_i32_8 = arith.constant 0 : i32
    %9 = arith.cmpi eq, %arg2, %c0_i32_8 : i32
    %10 = arith.extui %9 : i1 to i32
    %c0_i32_9 = arith.constant 0 : i32
    %11 = arith.cmpi ne, %10, %c0_i32_9 : i32
    scf.if %11 {
      %c0_10 = arith.constant 0 : index
      %c0_11 = arith.constant 0 : index
      %12 = vector.load %arg8[%c0_10, %c0_11] : memref<16x128xf32, #tpu.memory_space<vmem>>, vector<16x128xf32>
      %c0_12 = arith.constant 0 : index
      %c0_13 = arith.constant 0 : index
      %13 = vector.load %arg5[%c0_12, %c0_13] : memref<1x128xf32, #tpu.memory_space<vmem>>, vector<1x128xf32>
      %14 = vector.broadcast %13 : vector<1x128xf32> to vector<16x128xf32>
      %15 = arith.mulf %12, %14 : vector<16x128xf32>
      %c0_14 = arith.constant 0 : index
      %c0_15 = arith.constant 0 : index
      %16 = vector.load %arg6[%c0_14, %c0_15] : memref<1x128xf32, #tpu.memory_space<vmem>>, vector<1x128xf32>
      %17 = vector.broadcast %16 : vector<1x128xf32> to vector<16x128xf32>
      %18 = arith.addf %15, %17 : vector<16x128xf32>
      %c0_16 = arith.constant 0 : index
      %c0_17 = arith.constant 0 : index
      %19 = vector.load %arg7[%c0_16, %c0_17] : memref<16x128xf32, #tpu.memory_space<vmem>>, vector<16x128xf32>
      tpu.vector_store %arg7[%c0_16, %c0_17], %18 {strides = array<i32>} : memref<16x128xf32, #tpu.memory_space<vmem>>, vector<16x128xf32>,
    } else {
    }
    return
  }
  func.func @transform_0(%arg0: i32, %arg1: i32, %arg2: i32) -> (i32, i32) {
    %c0_i32 = arith.constant 0 : i32
    return %arg0, %arg2 : i32, i32
  }
  func.func @transform_1(%arg0: i32, %arg1: i32, %arg2: i32) -> (i32, i32) {
    %c0_i32 = arith.constant 0 : i32
    return %arg2, %arg1 : i32, i32
  }
  func.func @transform_2(%arg0: i32, %arg1: i32, %arg2: i32) -> (i32, i32) {
    %c0_i32 = arith.constant 0 : i32
    %c0_i32_0 = arith.constant 0 : i32
    return %c0_i32, %arg1 : i32, i32
  }
  func.func @transform_3(%arg0: i32, %arg1: i32, %arg2: i32) -> (i32, i32) {
    %c0_i32 = arith.constant 0 : i32
    %c0_i32_0 = arith.constant 0 : i32
    return %c0_i32, %arg1 : i32, i32
  }
  func.func @transform_4(%arg0: i32, %arg1: i32, %arg2: i32) -> (i32, i32) {
    %c0_i32 = arith.constant 0 : i32
    return %arg0, %arg1 : i32, i32
  }
}

module attributes {stable_mosaic.version = 11 : i64} {
  func.func @_mm_kernel(%arg0: i32, %arg1: i32, %arg2: i32, %arg3: memref<32x256xbf16, #tpu.memory_space<vmem>>, %arg4: memref<256x128xbf16, #tpu.memory_space<vmem>>, %arg5: memref<1x128xf32, #tpu.memory_space<vmem>>, %arg6: memref<1x128xf32, #tpu.memory_space<vmem>>, %arg7: memref<32x128xf32, #tpu.memory_space<vmem>>, %arg8: memref<32x128xf32, #tpu.memory_space<vmem>>) attributes {dimension_semantics = [#tpu.dimension_semantics<parallel>, #tpu.dimension_semantics<parallel>, #tpu.dimension_semantics<arbitrary>], iteration_bounds = array<i64: 1, 1, 3>, scalar_prefetch = 0 : i64, scratch_operands = 1 : i64, tpu.core_type = #tpu.core_type<tc>, window_params = [{transform_indices = @transform_0, window_bounds = array<i64: 32, 256>}, {transform_indices = @transform_1, window_bounds = array<i64: 256, 128>}, {transform_indices = @transform_2, window_bounds = array<i64: 1, 128>}, {transform_indices = @transform_3, window_bounds = array<i64: 1, 128>}, {transform_indices = @transform_4, window_bounds = array<i64: 32, 128>}]} {
    %c0_i32 = arith.constant 0 : i32
    %0 = arith.cmpi eq, %arg2, %c0_i32 : i32
    %1 = arith.extui %0 : i1 to i32
    %c0_i32_0 = arith.constant 0 : i32
    %2 = arith.cmpi ne, %1, %c0_i32_0 : i32
    scf.if %2 {
      %cst_9 = arith.constant 0.000000e+00 : f32
      %12 = vector.broadcast %cst_9 : f32 to vector<32x128xf32>
      %c0_10 = arith.constant 0 : index
      %c0_11 = arith.constant 0 : index
      %13 = vector.load %arg8[%c0_10, %c0_11] : memref<32x128xf32, #tpu.memory_space<vmem>>, vector<32x128xf32>
      tpu.vector_store %arg8[%c0_10, %c0_11], %12 {strides = array<i32>} : memref<32x128xf32, #tpu.memory_space<vmem>>, vector<32x128xf32>,
    } else {
    }
    %c0 = arith.constant 0 : index
    %c0_1 = arith.constant 0 : index
    %3 = vector.load %arg8[%c0, %c0_1] : memref<32x128xf32, #tpu.memory_space<vmem>>, vector<32x128xf32>
    %c0_2 = arith.constant 0 : index
    %c0_3 = arith.constant 0 : index
    %4 = vector.load %arg3[%c0_2, %c0_3] : memref<32x256xbf16, #tpu.memory_space<vmem>>, vector<32x256xbf16>
    %c0_4 = arith.constant 0 : index
    %c0_5 = arith.constant 0 : index
    %5 = vector.load %arg4[%c0_4, %c0_5] : memref<256x128xbf16, #tpu.memory_space<vmem>>, vector<256x128xbf16>
    %cst = arith.constant dense<0.000000e+00> : vector<32x128xf32>
    %6 = tpu.matmul %4, %5, %cst {dimension_numbers = #tpu.dot_dimension_numbers<[1], [0], [0], [1], [0, 0, 1, 1], [], []>} : vector<32x256xbf16>, vector<256x128xbf16>, vector<32x128xf32> -> vector<32x128xf32>
    %7 = arith.addf %3, %6 : vector<32x128xf32>
    %c0_6 = arith.constant 0 : index
    %c0_7 = arith.constant 0 : index
    %8 = vector.load %arg8[%c0_6, %c0_7] : memref<32x128xf32, #tpu.memory_space<vmem>>, vector<32x128xf32>
    tpu.vector_store %arg8[%c0_6, %c0_7], %7 {strides = array<i32>} : memref<32x128xf32, #tpu.memory_space<vmem>>, vector<32x128xf32>,
    %c2_i32 = arith.constant 2 : i32
    %9 = arith.cmpi eq, %arg2, %c2_i32 : i32
    %10 = arith.extui %9 : i1 to i32
    %c0_i32_8 = arith.constant 0 : i32
    %11 = arith.cmpi ne, %10, %c0_i32_8 : i32
    scf.if %11 {
      %c0_9 = arith.constant 0 : index
      %c0_10 = arith.constant 0 : index
      %12 = vector.load %arg8[%c0_9, %c0_10] : memref<32x128xf32, #tpu.memory_space<vmem>>, vector<32x128xf32>
      %c0_11 = arith.constant 0 : index
      %c0_12 = arith.constant 0 : index
      %13 = vector.load %arg5[%c0_11, %c0_12] : memref<1x128xf32, #tpu.memory_space<vmem>>, vector<1x128xf32>
      %14 = vector.broadcast %13 : vector<1x128xf32> to vector<32x128xf32>
      %15 = arith.mulf %12, %14 : vector<32x128xf32>
      %c0_13 = arith.constant 0 : index
      %c0_14 = arith.constant 0 : index
      %16 = vector.load %arg6[%c0_13, %c0_14] : memref<1x128xf32, #tpu.memory_space<vmem>>, vector<1x128xf32>
      %17 = vector.broadcast %16 : vector<1x128xf32> to vector<32x128xf32>
      %18 = arith.addf %15, %17 : vector<32x128xf32>
      %cst_15 = arith.constant 0.000000e+00 : f32
      %19 = vector.broadcast %cst_15 : f32 to vector<32x128xf32>
      %20 = arith.maximumf %18, %19 : vector<32x128xf32>
      %c0_16 = arith.constant 0 : index
      %c0_17 = arith.constant 0 : index
      %21 = vector.load %arg7[%c0_16, %c0_17] : memref<32x128xf32, #tpu.memory_space<vmem>>, vector<32x128xf32>
      tpu.vector_store %arg7[%c0_16, %c0_17], %20 {strides = array<i32>} : memref<32x128xf32, #tpu.memory_space<vmem>>, vector<32x128xf32>,
    } else {
    }
    return
  }
  func.func @transform_0(%arg0: i32, %arg1: i32, %arg2: i32) -> (i32, i32) {
    %c0_i32 = arith.constant 0 : i32
    return %arg0, %arg2 : i32, i32
  }
  func.func @transform_1(%arg0: i32, %arg1: i32, %arg2: i32) -> (i32, i32) {
    %c0_i32 = arith.constant 0 : i32
    return %arg2, %arg1 : i32, i32
  }
  func.func @transform_2(%arg0: i32, %arg1: i32, %arg2: i32) -> (i32, i32) {
    %c0_i32 = arith.constant 0 : i32
    %c0_i32_0 = arith.constant 0 : i32
    return %c0_i32, %arg1 : i32, i32
  }
  func.func @transform_3(%arg0: i32, %arg1: i32, %arg2: i32) -> (i32, i32) {
    %c0_i32 = arith.constant 0 : i32
    %c0_i32_0 = arith.constant 0 : i32
    return %c0_i32, %arg1 : i32, i32
  }
  func.func @transform_4(%arg0: i32, %arg1: i32, %arg2: i32) -> (i32, i32) {
    %c0_i32 = arith.constant 0 : i32
    return %arg0, %arg1 : i32, i32
  }
}

module attributes {stable_mosaic.version = 11 : i64} {
  func.func @_mm_kernel(%arg0: i32, %arg1: i32, %arg2: i32, %arg3: memref<16x256xbf16, #tpu.memory_space<vmem>>, %arg4: memref<256x128xbf16, #tpu.memory_space<vmem>>, %arg5: memref<1x128xf32, #tpu.memory_space<vmem>>, %arg6: memref<1x128xf32, #tpu.memory_space<vmem>>, %arg7: memref<16x128xf32, #tpu.memory_space<vmem>>, %arg8: memref<16x128xf32, #tpu.memory_space<vmem>>) attributes {dimension_semantics = [#tpu.dimension_semantics<parallel>, #tpu.dimension_semantics<parallel>, #tpu.dimension_semantics<arbitrary>], iteration_bounds = array<i64: 1, 1, 3>, scalar_prefetch = 0 : i64, scratch_operands = 1 : i64, tpu.core_type = #tpu.core_type<tc>, window_params = [{transform_indices = @transform_0, window_bounds = array<i64: 16, 256>}, {transform_indices = @transform_1, window_bounds = array<i64: 256, 128>}, {transform_indices = @transform_2, window_bounds = array<i64: 1, 128>}, {transform_indices = @transform_3, window_bounds = array<i64: 1, 128>}, {transform_indices = @transform_4, window_bounds = array<i64: 16, 128>}]} {
    %c0_i32 = arith.constant 0 : i32
    %0 = arith.cmpi eq, %arg2, %c0_i32 : i32
    %1 = arith.extui %0 : i1 to i32
    %c0_i32_0 = arith.constant 0 : i32
    %2 = arith.cmpi ne, %1, %c0_i32_0 : i32
    scf.if %2 {
      %cst_9 = arith.constant 0.000000e+00 : f32
      %12 = vector.broadcast %cst_9 : f32 to vector<16x128xf32>
      %c0_10 = arith.constant 0 : index
      %c0_11 = arith.constant 0 : index
      %13 = vector.load %arg8[%c0_10, %c0_11] : memref<16x128xf32, #tpu.memory_space<vmem>>, vector<16x128xf32>
      tpu.vector_store %arg8[%c0_10, %c0_11], %12 {strides = array<i32>} : memref<16x128xf32, #tpu.memory_space<vmem>>, vector<16x128xf32>,
    } else {
    }
    %c0 = arith.constant 0 : index
    %c0_1 = arith.constant 0 : index
    %3 = vector.load %arg8[%c0, %c0_1] : memref<16x128xf32, #tpu.memory_space<vmem>>, vector<16x128xf32>
    %c0_2 = arith.constant 0 : index
    %c0_3 = arith.constant 0 : index
    %4 = vector.load %arg3[%c0_2, %c0_3] : memref<16x256xbf16, #tpu.memory_space<vmem>>, vector<16x256xbf16>
    %c0_4 = arith.constant 0 : index
    %c0_5 = arith.constant 0 : index
    %5 = vector.load %arg4[%c0_4, %c0_5] : memref<256x128xbf16, #tpu.memory_space<vmem>>, vector<256x128xbf16>
    %cst = arith.constant dense<0.000000e+00> : vector<16x128xf32>
    %6 = tpu.matmul %4, %5, %cst {dimension_numbers = #tpu.dot_dimension_numbers<[1], [0], [0], [1], [0, 0, 1, 1], [], []>} : vector<16x256xbf16>, vector<256x128xbf16>, vector<16x128xf32> -> vector<16x128xf32>
    %7 = arith.addf %3, %6 : vector<16x128xf32>
    %c0_6 = arith.constant 0 : index
    %c0_7 = arith.constant 0 : index
    %8 = vector.load %arg8[%c0_6, %c0_7] : memref<16x128xf32, #tpu.memory_space<vmem>>, vector<16x128xf32>
    tpu.vector_store %arg8[%c0_6, %c0_7], %7 {strides = array<i32>} : memref<16x128xf32, #tpu.memory_space<vmem>>, vector<16x128xf32>,
    %c2_i32 = arith.constant 2 : i32
    %9 = arith.cmpi eq, %arg2, %c2_i32 : i32
    %10 = arith.extui %9 : i1 to i32
    %c0_i32_8 = arith.constant 0 : i32
    %11 = arith.cmpi ne, %10, %c0_i32_8 : i32
    scf.if %11 {
      %c0_9 = arith.constant 0 : index
      %c0_10 = arith.constant 0 : index
      %12 = vector.load %arg8[%c0_9, %c0_10] : memref<16x128xf32, #tpu.memory_space<vmem>>, vector<16x128xf32>
      %c0_11 = arith.constant 0 : index
      %c0_12 = arith.constant 0 : index
      %13 = vector.load %arg5[%c0_11, %c0_12] : memref<1x128xf32, #tpu.memory_space<vmem>>, vector<1x128xf32>
      %14 = vector.broadcast %13 : vector<1x128xf32> to vector<16x128xf32>
      %15 = arith.mulf %12, %14 : vector<16x128xf32>
      %c0_13 = arith.constant 0 : index
      %c0_14 = arith.constant 0 : index
      %16 = vector.load %arg6[%c0_13, %c0_14] : memref<1x128xf32, #tpu.memory_space<vmem>>, vector<1x128xf32>
      %17 = vector.broadcast %16 : vector<1x128xf32> to vector<16x128xf32>
      %18 = arith.addf %15, %17 : vector<16x128xf32>
      %cst_15 = arith.constant 0.000000e+00 : f32
      %19 = vector.broadcast %cst_15 : f32 to vector<16x128xf32>
      %20 = arith.maximumf %18, %19 : vector<16x128xf32>
      %c0_16 = arith.constant 0 : index
      %c0_17 = arith.constant 0 : index
      %21 = vector.load %arg7[%c0_16, %c0_17] : memref<16x128xf32, #tpu.memory_space<vmem>>, vector<16x128xf32>
      tpu.vector_store %arg7[%c0_16, %c0_17], %20 {strides = array<i32>} : memref<16x128xf32, #tpu.memory_space<vmem>>, vector<16x128xf32>,
    } else {
    }
    return
  }
  func.func @transform_0(%arg0: i32, %arg1: i32, %arg2: i32) -> (i32, i32) {
    %c0_i32 = arith.constant 0 : i32
    return %arg0, %arg2 : i32, i32
  }
  func.func @transform_1(%arg0: i32, %arg1: i32, %arg2: i32) -> (i32, i32) {
    %c0_i32 = arith.constant 0 : i32
    return %arg2, %arg1 : i32, i32
  }
  func.func @transform_2(%arg0: i32, %arg1: i32, %arg2: i32) -> (i32, i32) {
    %c0_i32 = arith.constant 0 : i32
    %c0_i32_0 = arith.constant 0 : i32
    return %c0_i32, %arg1 : i32, i32
  }
  func.func @transform_3(%arg0: i32, %arg1: i32, %arg2: i32) -> (i32, i32) {
    %c0_i32 = arith.constant 0 : i32
    %c0_i32_0 = arith.constant 0 : i32
    return %c0_i32, %arg1 : i32, i32
  }
  func.func @transform_4(%arg0: i32, %arg1: i32, %arg2: i32) -> (i32, i32) {
    %c0_i32 = arith.constant 0 : i32
    return %arg0, %arg1 : i32, i32
  }
}

module attributes {stable_mosaic.version = 11 : i64} {
  func.func @_mm_kernel(%arg0: i32, %arg1: i32, %arg2: i32, %arg3: memref<16x256xbf16, #tpu.memory_space<vmem>>, %arg4: memref<256x128xbf16, #tpu.memory_space<vmem>>, %arg5: memref<1x128xf32, #tpu.memory_space<vmem>>, %arg6: memref<1x128xf32, #tpu.memory_space<vmem>>, %arg7: memref<16x128xf32, #tpu.memory_space<vmem>>, %arg8: memref<16x128xf32, #tpu.memory_space<vmem>>) attributes {dimension_semantics = [#tpu.dimension_semantics<parallel>, #tpu.dimension_semantics<parallel>, #tpu.dimension_semantics<arbitrary>], iteration_bounds = array<i64: 1, 1, 5>, scalar_prefetch = 0 : i64, scratch_operands = 1 : i64, tpu.core_type = #tpu.core_type<tc>, window_params = [{transform_indices = @transform_0, window_bounds = array<i64: 16, 256>}, {transform_indices = @transform_1, window_bounds = array<i64: 256, 128>}, {transform_indices = @transform_2, window_bounds = array<i64: 1, 128>}, {transform_indices = @transform_3, window_bounds = array<i64: 1, 128>}, {transform_indices = @transform_4, window_bounds = array<i64: 16, 128>}]} {
    %c0_i32 = arith.constant 0 : i32
    %0 = arith.cmpi eq, %arg2, %c0_i32 : i32
    %1 = arith.extui %0 : i1 to i32
    %c0_i32_0 = arith.constant 0 : i32
    %2 = arith.cmpi ne, %1, %c0_i32_0 : i32
    scf.if %2 {
      %cst_9 = arith.constant 0.000000e+00 : f32
      %12 = vector.broadcast %cst_9 : f32 to vector<16x128xf32>
      %c0_10 = arith.constant 0 : index
      %c0_11 = arith.constant 0 : index
      %13 = vector.load %arg8[%c0_10, %c0_11] : memref<16x128xf32, #tpu.memory_space<vmem>>, vector<16x128xf32>
      tpu.vector_store %arg8[%c0_10, %c0_11], %12 {strides = array<i32>} : memref<16x128xf32, #tpu.memory_space<vmem>>, vector<16x128xf32>,
    } else {
    }
    %c0 = arith.constant 0 : index
    %c0_1 = arith.constant 0 : index
    %3 = vector.load %arg8[%c0, %c0_1] : memref<16x128xf32, #tpu.memory_space<vmem>>, vector<16x128xf32>
    %c0_2 = arith.constant 0 : index
    %c0_3 = arith.constant 0 : index
    %4 = vector.load %arg3[%c0_2, %c0_3] : memref<16x256xbf16, #tpu.memory_space<vmem>>, vector<16x256xbf16>
    %c0_4 = arith.constant 0 : index
    %c0_5 = arith.constant 0 : index
    %5 = vector.load %arg4[%c0_4, %c0_5] : memref<256x128xbf16, #tpu.memory_space<vmem>>, vector<256x128xbf16>
    %cst = arith.constant dense<0.000000e+00> : vector<16x128xf32>
    %6 = tpu.matmul %4, %5, %cst {dimension_numbers = #tpu.dot_dimension_numbers<[1], [0], [0], [1], [0, 0, 1, 1], [], []>} : vector<16x256xbf16>, vector<256x128xbf16>, vector<16x128xf32> -> vector<16x128xf32>
    %7 = arith.addf %3, %6 : vector<16x128xf32>
    %c0_6 = arith.constant 0 : index
    %c0_7 = arith.constant 0 : index
    %8 = vector.load %arg8[%c0_6, %c0_7] : memref<16x128xf32, #tpu.memory_space<vmem>>, vector<16x128xf32>
    tpu.vector_store %arg8[%c0_6, %c0_7], %7 {strides = array<i32>} : memref<16x128xf32, #tpu.memory_space<vmem>>, vector<16x128xf32>,
    %c4_i32 = arith.constant 4 : i32
    %9 = arith.cmpi eq, %arg2, %c4_i32 : i32
    %10 = arith.extui %9 : i1 to i32
    %c0_i32_8 = arith.constant 0 : i32
    %11 = arith.cmpi ne, %10, %c0_i32_8 : i32
    scf.if %11 {
      %c0_9 = arith.constant 0 : index
      %c0_10 = arith.constant 0 : index
      %12 = vector.load %arg8[%c0_9, %c0_10] : memref<16x128xf32, #tpu.memory_space<vmem>>, vector<16x128xf32>
      %c0_11 = arith.constant 0 : index
      %c0_12 = arith.constant 0 : index
      %13 = vector.load %arg5[%c0_11, %c0_12] : memref<1x128xf32, #tpu.memory_space<vmem>>, vector<1x128xf32>
      %14 = vector.broadcast %13 : vector<1x128xf32> to vector<16x128xf32>
      %15 = arith.mulf %12, %14 : vector<16x128xf32>
      %c0_13 = arith.constant 0 : index
      %c0_14 = arith.constant 0 : index
      %16 = vector.load %arg6[%c0_13, %c0_14] : memref<1x128xf32, #tpu.memory_space<vmem>>, vector<1x128xf32>
      %17 = vector.broadcast %16 : vector<1x128xf32> to vector<16x128xf32>
      %18 = arith.addf %15, %17 : vector<16x128xf32>
      %cst_15 = arith.constant 0.000000e+00 : f32
      %19 = vector.broadcast %cst_15 : f32 to vector<16x128xf32>
      %20 = arith.maximumf %18, %19 : vector<16x128xf32>
      %c0_16 = arith.constant 0 : index
      %c0_17 = arith.constant 0 : index
      %21 = vector.load %arg7[%c0_16, %c0_17] : memref<16x128xf32, #tpu.memory_space<vmem>>, vector<16x128xf32>
      tpu.vector_store %arg7[%c0_16, %c0_17], %20 {strides = array<i32>} : memref<16x128xf32, #tpu.memory_space<vmem>>, vector<16x128xf32>,
    } else {
    }
    return
  }
  func.func @transform_0(%arg0: i32, %arg1: i32, %arg2: i32) -> (i32, i32) {
    %c0_i32 = arith.constant 0 : i32
    return %arg0, %arg2 : i32, i32
  }
  func.func @transform_1(%arg0: i32, %arg1: i32, %arg2: i32) -> (i32, i32) {
    %c0_i32 = arith.constant 0 : i32
    return %arg2, %arg1 : i32, i32
  }
  func.func @transform_2(%arg0: i32, %arg1: i32, %arg2: i32) -> (i32, i32) {
    %c0_i32 = arith.constant 0 : i32
    %c0_i32_0 = arith.constant 0 : i32
    return %c0_i32, %arg1 : i32, i32
  }
  func.func @transform_3(%arg0: i32, %arg1: i32, %arg2: i32) -> (i32, i32) {
    %c0_i32 = arith.constant 0 : i32
    %c0_i32_0 = arith.constant 0 : i32
    return %c0_i32, %arg1 : i32, i32
  }
  func.func @transform_4(%arg0: i32, %arg1: i32, %arg2: i32) -> (i32, i32) {
    %c0_i32 = arith.constant 0 : i32
    return %arg0, %arg1 : i32, i32
  }
}

module attributes {stable_mosaic.version = 11 : i64} {
  func.func @_mm_kernel(%arg0: i32, %arg1: i32, %arg2: i32, %arg3: memref<16x256xbf16, #tpu.memory_space<vmem>>, %arg4: memref<256x128xbf16, #tpu.memory_space<vmem>>, %arg5: memref<1x128xf32, #tpu.memory_space<vmem>>, %arg6: memref<1x128xf32, #tpu.memory_space<vmem>>, %arg7: memref<16x128xf32, #tpu.memory_space<vmem>>, %arg8: memref<16x128xf32, #tpu.memory_space<vmem>>, %arg9: memref<16x128xf32, #tpu.memory_space<vmem>>) attributes {dimension_semantics = [#tpu.dimension_semantics<parallel>, #tpu.dimension_semantics<parallel>, #tpu.dimension_semantics<arbitrary>], iteration_bounds = array<i64: 1, 1, 5>, scalar_prefetch = 0 : i64, scratch_operands = 1 : i64, tpu.core_type = #tpu.core_type<tc>, window_params = [{transform_indices = @transform_0, window_bounds = array<i64: 16, 256>}, {transform_indices = @transform_1, window_bounds = array<i64: 256, 128>}, {transform_indices = @transform_2, window_bounds = array<i64: 1, 128>}, {transform_indices = @transform_3, window_bounds = array<i64: 1, 128>}, {transform_indices = @transform_4, window_bounds = array<i64: 16, 128>}, {transform_indices = @transform_5, window_bounds = array<i64: 16, 128>}]} {
    %c0_i32 = arith.constant 0 : i32
    %0 = arith.cmpi eq, %arg2, %c0_i32 : i32
    %1 = arith.extui %0 : i1 to i32
    %c0_i32_0 = arith.constant 0 : i32
    %2 = arith.cmpi ne, %1, %c0_i32_0 : i32
    scf.if %2 {
      %cst_9 = arith.constant 0.000000e+00 : f32
      %12 = vector.broadcast %cst_9 : f32 to vector<16x128xf32>
      %c0_10 = arith.constant 0 : index
      %c0_11 = arith.constant 0 : index
      %13 = vector.load %arg9[%c0_10, %c0_11] : memref<16x128xf32, #tpu.memory_space<vmem>>, vector<16x128xf32>
      tpu.vector_store %arg9[%c0_10, %c0_11], %12 {strides = array<i32>} : memref<16x128xf32, #tpu.memory_space<vmem>>, vector<16x128xf32>,
    } else {
    }
    %c0 = arith.constant 0 : index
    %c0_1 = arith.constant 0 : index
    %3 = vector.load %arg9[%c0, %c0_1] : memref<16x128xf32, #tpu.memory_space<vmem>>, vector<16x128xf32>
    %c0_2 = arith.constant 0 : index
    %c0_3 = arith.constant 0 : index
    %4 = vector.load %arg3[%c0_2, %c0_3] : memref<16x256xbf16, #tpu.memory_space<vmem>>, vector<16x256xbf16>
    %c0_4 = arith.constant 0 : index
    %c0_5 = arith.constant 0 : index
    %5 = vector.load %arg4[%c0_4, %c0_5] : memref<256x128xbf16, #tpu.memory_space<vmem>>, vector<256x128xbf16>
    %cst = arith.constant dense<0.000000e+00> : vector<16x128xf32>
    %6 = tpu.matmul %4, %5, %cst {dimension_numbers = #tpu.dot_dimension_numbers<[1], [0], [0], [1], [0, 0, 1, 1], [], []>} : vector<16x256xbf16>, vector<256x128xbf16>, vector<16x128xf32> -> vector<16x128xf32>
    %7 = arith.addf %3, %6 : vector<16x128xf32>
    %c0_6 = arith.constant 0 : index
    %c0_7 = arith.constant 0 : index
    %8 = vector.load %arg9[%c0_6, %c0_7] : memref<16x128xf32, #tpu.memory_space<vmem>>, vector<16x128xf32>
    tpu.vector_store %arg9[%c0_6, %c0_7], %7 {strides = array<i32>} : memref<16x128xf32, #tpu.memory_space<vmem>>, vector<16x128xf32>,
    %c4_i32 = arith.constant 4 : i32
    %9 = arith.cmpi eq, %arg2, %c4_i32 : i32
    %10 = arith.extui %9 : i1 to i32
    %c0_i32_8 = arith.constant 0 : i32
    %11 = arith.cmpi ne, %10, %c0_i32_8 : i32
    scf.if %11 {
      %c0_9 = arith.constant 0 : index
      %c0_10 = arith.constant 0 : index
      %12 = vector.load %arg9[%c0_9, %c0_10] : memref<16x128xf32, #tpu.memory_space<vmem>>, vector<16x128xf32>
      %c0_11 = arith.constant 0 : index
      %c0_12 = arith.constant 0 : index
      %13 = vector.load %arg5[%c0_11, %c0_12] : memref<1x128xf32, #tpu.memory_space<vmem>>, vector<1x128xf32>
      %14 = vector.broadcast %13 : vector<1x128xf32> to vector<16x128xf32>
      %15 = arith.mulf %12, %14 : vector<16x128xf32>
      %c0_13 = arith.constant 0 : index
      %c0_14 = arith.constant 0 : index
      %16 = vector.load %arg6[%c0_13, %c0_14] : memref<1x128xf32, #tpu.memory_space<vmem>>, vector<1x128xf32>
      %17 = vector.broadcast %16 : vector<1x128xf32> to vector<16x128xf32>
      %18 = arith.addf %15, %17 : vector<16x128xf32>
      %c0_15 = arith.constant 0 : index
      %c0_16 = arith.constant 0 : index
      %19 = vector.load %arg7[%c0_15, %c0_16] : memref<16x128xf32, #tpu.memory_space<vmem>>, vector<16x128xf32>
      %20 = arith.addf %18, %19 : vector<16x128xf32>
      %cst_17 = arith.constant 0.000000e+00 : f32
      %21 = vector.broadcast %cst_17 : f32 to vector<16x128xf32>
      %22 = arith.maximumf %20, %21 : vector<16x128xf32>
      %c0_18 = arith.constant 0 : index
      %c0_19 = arith.constant 0 : index
      %23 = vector.load %arg8[%c0_18, %c0_19] : memref<16x128xf32, #tpu.memory_space<vmem>>, vector<16x128xf32>
      tpu.vector_store %arg8[%c0_18, %c0_19], %22 {strides = array<i32>} : memref<16x128xf32, #tpu.memory_space<vmem>>, vector<16x128xf32>,
    } else {
    }
    return
  }
  func.func @transform_0(%arg0: i32, %arg1: i32, %arg2: i32) -> (i32, i32) {
    %c0_i32 = arith.constant 0 : i32
    return %arg0, %arg2 : i32, i32
  }
  func.func @transform_1(%arg0: i32, %arg1: i32, %arg2: i32) -> (i32, i32) {
    %c0_i32 = arith.constant 0 : i32
    return %arg2, %arg1 : i32, i32
  }
  func.func @transform_2(%arg0: i32, %arg1: i32, %arg2: i32) -> (i32, i32) {
    %c0_i32 = arith.constant 0 : i32
    %c0_i32_0 = arith.constant 0 : i32
    return %c0_i32, %arg1 : i32, i32
  }
  func.func @transform_3(%arg0: i32, %arg1: i32, %arg2: i32) -> (i32, i32) {
    %c0_i32 = arith.constant 0 : i32
    %c0_i32_0 = arith.constant 0 : i32
    return %c0_i32, %arg1 : i32, i32
  }
  func.func @transform_4(%arg0: i32, %arg1: i32, %arg2: i32) -> (i32, i32) {
    %c0_i32 = arith.constant 0 : i32
    return %arg0, %arg1 : i32, i32
  }
  func.func @transform_5(%arg0: i32, %arg1: i32, %arg2: i32) -> (i32, i32) {
    %c0_i32 = arith.constant 0 : i32
    return %arg0, %arg1 : i32, i32
  }
}

module attributes {stable_mosaic.version = 11 : i64} {
  func.func @_mm_kernel(%arg0: i32, %arg1: i32, %arg2: i32, %arg3: memref<16x128xbf16, #tpu.memory_space<vmem>>, %arg4: memref<128x256xbf16, #tpu.memory_space<vmem>>, %arg5: memref<1x256xf32, #tpu.memory_space<vmem>>, %arg6: memref<1x256xf32, #tpu.memory_space<vmem>>, %arg7: memref<16x256xf32, #tpu.memory_space<vmem>>, %arg8: memref<16x256xf32, #tpu.memory_space<vmem>>) attributes {dimension_semantics = [#tpu.dimension_semantics<parallel>, #tpu.dimension_semantics<parallel>, #tpu.dimension_semantics<arbitrary>], iteration_bounds = array<i64: 1, 1, 1>, scalar_prefetch = 0 : i64, scratch_operands = 1 : i64, tpu.core_type = #tpu.core_type<tc>, window_params = [{transform_indices = @transform_0, window_bounds = array<i64: 16, 128>}, {transform_indices = @transform_1, window_bounds = array<i64: 128, 256>}, {transform_indices = @transform_2, window_bounds = array<i64: 1, 256>}, {transform_indices = @transform_3, window_bounds = array<i64: 1, 256>}, {transform_indices = @transform_4, window_bounds = array<i64: 16, 256>}]} {
    %c0_i32 = arith.constant 0 : i32
    %0 = arith.cmpi eq, %arg2, %c0_i32 : i32
    %1 = arith.extui %0 : i1 to i32
    %c0_i32_0 = arith.constant 0 : i32
    %2 = arith.cmpi ne, %1, %c0_i32_0 : i32
    scf.if %2 {
      %cst_10 = arith.constant 0.000000e+00 : f32
      %12 = vector.broadcast %cst_10 : f32 to vector<16x256xf32>
      %c0_11 = arith.constant 0 : index
      %c0_12 = arith.constant 0 : index
      %13 = vector.load %arg8[%c0_11, %c0_12] : memref<16x256xf32, #tpu.memory_space<vmem>>, vector<16x256xf32>
      tpu.vector_store %arg8[%c0_11, %c0_12], %12 {strides = array<i32>} : memref<16x256xf32, #tpu.memory_space<vmem>>, vector<16x256xf32>,
    } else {
    }
    %c0 = arith.constant 0 : index
    %c0_1 = arith.constant 0 : index
    %3 = vector.load %arg8[%c0, %c0_1] : memref<16x256xf32, #tpu.memory_space<vmem>>, vector<16x256xf32>
    %c0_2 = arith.constant 0 : index
    %c0_3 = arith.constant 0 : index
    %4 = vector.load %arg3[%c0_2, %c0_3] : memref<16x128xbf16, #tpu.memory_space<vmem>>, vector<16x128xbf16>
    %c0_4 = arith.constant 0 : index
    %c0_5 = arith.constant 0 : index
    %5 = vector.load %arg4[%c0_4, %c0_5] : memref<128x256xbf16, #tpu.memory_space<vmem>>, vector<128x256xbf16>
    %cst = arith.constant dense<0.000000e+00> : vector<16x256xf32>
    %6 = tpu.matmul %4, %5, %cst {dimension_numbers = #tpu.dot_dimension_numbers<[1], [0], [0], [1], [0, 0, 1, 1], [], []>} : vector<16x128xbf16>, vector<128x256xbf16>, vector<16x256xf32> -> vector<16x256xf32>
    %7 = arith.addf %3, %6 : vector<16x256xf32>
    %c0_6 = arith.constant 0 : index
    %c0_7 = arith.constant 0 : index
    %8 = vector.load %arg8[%c0_6, %c0_7] : memref<16x256xf32, #tpu.memory_space<vmem>>, vector<16x256xf32>
    tpu.vector_store %arg8[%c0_6, %c0_7], %7 {strides = array<i32>} : memref<16x256xf32, #tpu.memory_space<vmem>>, vector<16x256xf32>,
    %c0_i32_8 = arith.constant 0 : i32
    %9 = arith.cmpi eq, %arg2, %c0_i32_8 : i32
    %10 = arith.extui %9 : i1 to i32
    %c0_i32_9 = arith.constant 0 : i32
    %11 = arith.cmpi ne, %10, %c0_i32_9 : i32
    scf.if %11 {
      %c0_10 = arith.constant 0 : index
      %c0_11 = arith.constant 0 : index
      %12 = vector.load %arg8[%c0_10, %c0_11] : memref<16x256xf32, #tpu.memory_space<vmem>>, vector<16x256xf32>
      %c0_12 = arith.constant 0 : index
      %c0_13 = arith.constant 0 : index
      %13 = vector.load %arg5[%c0_12, %c0_13] : memref<1x256xf32, #tpu.memory_space<vmem>>, vector<1x256xf32>
      %14 = vector.broadcast %13 : vector<1x256xf32> to vector<16x256xf32>
      %15 = arith.mulf %12, %14 : vector<16x256xf32>
      %c0_14 = arith.constant 0 : index
      %c0_15 = arith.constant 0 : index
      %16 = vector.load %arg6[%c0_14, %c0_15] : memref<1x256xf32, #tpu.memory_space<vmem>>, vector<1x256xf32>
      %17 = vector.broadcast %16 : vector<1x256xf32> to vector<16x256xf32>
      %18 = arith.addf %15, %17 : vector<16x256xf32>
      %c0_16 = arith.constant 0 : index
      %c0_17 = arith.constant 0 : index
      %19 = vector.load %arg7[%c0_16, %c0_17] : memref<16x256xf32, #tpu.memory_space<vmem>>, vector<16x256xf32>
      tpu.vector_store %arg7[%c0_16, %c0_17], %18 {strides = array<i32>} : memref<16x256xf32, #tpu.memory_space<vmem>>, vector<16x256xf32>,
    } else {
    }
    return
  }
  func.func @transform_0(%arg0: i32, %arg1: i32, %arg2: i32) -> (i32, i32) {
    %c0_i32 = arith.constant 0 : i32
    return %arg0, %arg2 : i32, i32
  }
  func.func @transform_1(%arg0: i32, %arg1: i32, %arg2: i32) -> (i32, i32) {
    %c0_i32 = arith.constant 0 : i32
    return %arg2, %arg1 : i32, i32
  }
  func.func @transform_2(%arg0: i32, %arg1: i32, %arg2: i32) -> (i32, i32) {
    %c0_i32 = arith.constant 0 : i32
    %c0_i32_0 = arith.constant 0 : i32
    return %c0_i32, %arg1 : i32, i32
  }
  func.func @transform_3(%arg0: i32, %arg1: i32, %arg2: i32) -> (i32, i32) {
    %c0_i32 = arith.constant 0 : i32
    %c0_i32_0 = arith.constant 0 : i32
    return %c0_i32, %arg1 : i32, i32
  }
  func.func @transform_4(%arg0: i32, %arg1: i32, %arg2: i32) -> (i32, i32) {
    %c0_i32 = arith.constant 0 : i32
    return %arg0, %arg1 : i32, i32
  }
}

module attributes {stable_mosaic.version = 11 : i64} {
  func.func @_mm_kernel(%arg0: i32, %arg1: i32, %arg2: i32, %arg3: memref<16x256xbf16, #tpu.memory_space<vmem>>, %arg4: memref<256x256xbf16, #tpu.memory_space<vmem>>, %arg5: memref<1x256xf32, #tpu.memory_space<vmem>>, %arg6: memref<1x256xf32, #tpu.memory_space<vmem>>, %arg7: memref<16x256xf32, #tpu.memory_space<vmem>>, %arg8: memref<16x256xf32, #tpu.memory_space<vmem>>) attributes {dimension_semantics = [#tpu.dimension_semantics<parallel>, #tpu.dimension_semantics<parallel>, #tpu.dimension_semantics<arbitrary>], iteration_bounds = array<i64: 1, 1, 5>, scalar_prefetch = 0 : i64, scratch_operands = 1 : i64, tpu.core_type = #tpu.core_type<tc>, window_params = [{transform_indices = @transform_0, window_bounds = array<i64: 16, 256>}, {transform_indices = @transform_1, window_bounds = array<i64: 256, 256>}, {transform_indices = @transform_2, window_bounds = array<i64: 1, 256>}, {transform_indices = @transform_3, window_bounds = array<i64: 1, 256>}, {transform_indices = @transform_4, window_bounds = array<i64: 16, 256>}]} {
    %c0_i32 = arith.constant 0 : i32
    %0 = arith.cmpi eq, %arg2, %c0_i32 : i32
    %1 = arith.extui %0 : i1 to i32
    %c0_i32_0 = arith.constant 0 : i32
    %2 = arith.cmpi ne, %1, %c0_i32_0 : i32
    scf.if %2 {
      %cst_9 = arith.constant 0.000000e+00 : f32
      %12 = vector.broadcast %cst_9 : f32 to vector<16x256xf32>
      %c0_10 = arith.constant 0 : index
      %c0_11 = arith.constant 0 : index
      %13 = vector.load %arg8[%c0_10, %c0_11] : memref<16x256xf32, #tpu.memory_space<vmem>>, vector<16x256xf32>
      tpu.vector_store %arg8[%c0_10, %c0_11], %12 {strides = array<i32>} : memref<16x256xf32, #tpu.memory_space<vmem>>, vector<16x256xf32>,
    } else {
    }
    %c0 = arith.constant 0 : index
    %c0_1 = arith.constant 0 : index
    %3 = vector.load %arg8[%c0, %c0_1] : memref<16x256xf32, #tpu.memory_space<vmem>>, vector<16x256xf32>
    %c0_2 = arith.constant 0 : index
    %c0_3 = arith.constant 0 : index
    %4 = vector.load %arg3[%c0_2, %c0_3] : memref<16x256xbf16, #tpu.memory_space<vmem>>, vector<16x256xbf16>
    %c0_4 = arith.constant 0 : index
    %c0_5 = arith.constant 0 : index
    %5 = vector.load %arg4[%c0_4, %c0_5] : memref<256x256xbf16, #tpu.memory_space<vmem>>, vector<256x256xbf16>
    %cst = arith.constant dense<0.000000e+00> : vector<16x256xf32>
    %6 = tpu.matmul %4, %5, %cst {dimension_numbers = #tpu.dot_dimension_numbers<[1], [0], [0], [1], [0, 0, 1, 1], [], []>} : vector<16x256xbf16>, vector<256x256xbf16>, vector<16x256xf32> -> vector<16x256xf32>
    %7 = arith.addf %3, %6 : vector<16x256xf32>
    %c0_6 = arith.constant 0 : index
    %c0_7 = arith.constant 0 : index
    %8 = vector.load %arg8[%c0_6, %c0_7] : memref<16x256xf32, #tpu.memory_space<vmem>>, vector<16x256xf32>
    tpu.vector_store %arg8[%c0_6, %c0_7], %7 {strides = array<i32>} : memref<16x256xf32, #tpu.memory_space<vmem>>, vector<16x256xf32>,
    %c4_i32 = arith.constant 4 : i32
    %9 = arith.cmpi eq, %arg2, %c4_i32 : i32
    %10 = arith.extui %9 : i1 to i32
    %c0_i32_8 = arith.constant 0 : i32
    %11 = arith.cmpi ne, %10, %c0_i32_8 : i32
    scf.if %11 {
      %c0_9 = arith.constant 0 : index
      %c0_10 = arith.constant 0 : index
      %12 = vector.load %arg8[%c0_9, %c0_10] : memref<16x256xf32, #tpu.memory_space<vmem>>, vector<16x256xf32>
      %c0_11 = arith.constant 0 : index
      %c0_12 = arith.constant 0 : index
      %13 = vector.load %arg5[%c0_11, %c0_12] : memref<1x256xf32, #tpu.memory_space<vmem>>, vector<1x256xf32>
      %14 = vector.broadcast %13 : vector<1x256xf32> to vector<16x256xf32>
      %15 = arith.mulf %12, %14 : vector<16x256xf32>
      %c0_13 = arith.constant 0 : index
      %c0_14 = arith.constant 0 : index
      %16 = vector.load %arg6[%c0_13, %c0_14] : memref<1x256xf32, #tpu.memory_space<vmem>>, vector<1x256xf32>
      %17 = vector.broadcast %16 : vector<1x256xf32> to vector<16x256xf32>
      %18 = arith.addf %15, %17 : vector<16x256xf32>
      %cst_15 = arith.constant 0.000000e+00 : f32
      %19 = vector.broadcast %cst_15 : f32 to vector<16x256xf32>
      %20 = arith.maximumf %18, %19 : vector<16x256xf32>
      %c0_16 = arith.constant 0 : index
      %c0_17 = arith.constant 0 : index
      %21 = vector.load %arg7[%c0_16, %c0_17] : memref<16x256xf32, #tpu.memory_space<vmem>>, vector<16x256xf32>
      tpu.vector_store %arg7[%c0_16, %c0_17], %20 {strides = array<i32>} : memref<16x256xf32, #tpu.memory_space<vmem>>, vector<16x256xf32>,
    } else {
    }
    return
  }
  func.func @transform_0(%arg0: i32, %arg1: i32, %arg2: i32) -> (i32, i32) {
    %c0_i32 = arith.constant 0 : i32
    return %arg0, %arg2 : i32, i32
  }
  func.func @transform_1(%arg0: i32, %arg1: i32, %arg2: i32) -> (i32, i32) {
    %c0_i32 = arith.constant 0 : i32
    return %arg2, %arg1 : i32, i32
  }
  func.func @transform_2(%arg0: i32, %arg1: i32, %arg2: i32) -> (i32, i32) {
    %c0_i32 = arith.constant 0 : i32
    %c0_i32_0 = arith.constant 0 : i32
    return %c0_i32, %arg1 : i32, i32
  }
  func.func @transform_3(%arg0: i32, %arg1: i32, %arg2: i32) -> (i32, i32) {
    %c0_i32 = arith.constant 0 : i32
    %c0_i32_0 = arith.constant 0 : i32
    return %c0_i32, %arg1 : i32, i32
  }
  func.func @transform_4(%arg0: i32, %arg1: i32, %arg2: i32) -> (i32, i32) {
    %c0_i32 = arith.constant 0 : i32
    return %arg0, %arg1 : i32, i32
  }
}

module attributes {stable_mosaic.version = 11 : i64} {
  func.func @_mm_kernel(%arg0: i32, %arg1: i32, %arg2: i32, %arg3: memref<16x256xbf16, #tpu.memory_space<vmem>>, %arg4: memref<256x256xbf16, #tpu.memory_space<vmem>>, %arg5: memref<1x256xf32, #tpu.memory_space<vmem>>, %arg6: memref<1x256xf32, #tpu.memory_space<vmem>>, %arg7: memref<16x256xf32, #tpu.memory_space<vmem>>, %arg8: memref<16x256xf32, #tpu.memory_space<vmem>>, %arg9: memref<16x256xf32, #tpu.memory_space<vmem>>) attributes {dimension_semantics = [#tpu.dimension_semantics<parallel>, #tpu.dimension_semantics<parallel>, #tpu.dimension_semantics<arbitrary>], iteration_bounds = array<i64: 1, 1, 9>, scalar_prefetch = 0 : i64, scratch_operands = 1 : i64, tpu.core_type = #tpu.core_type<tc>, window_params = [{transform_indices = @transform_0, window_bounds = array<i64: 16, 256>}, {transform_indices = @transform_1, window_bounds = array<i64: 256, 256>}, {transform_indices = @transform_2, window_bounds = array<i64: 1, 256>}, {transform_indices = @transform_3, window_bounds = array<i64: 1, 256>}, {transform_indices = @transform_4, window_bounds = array<i64: 16, 256>}, {transform_indices = @transform_5, window_bounds = array<i64: 16, 256>}]} {
    %c0_i32 = arith.constant 0 : i32
    %0 = arith.cmpi eq, %arg2, %c0_i32 : i32
    %1 = arith.extui %0 : i1 to i32
    %c0_i32_0 = arith.constant 0 : i32
    %2 = arith.cmpi ne, %1, %c0_i32_0 : i32
    scf.if %2 {
      %cst_9 = arith.constant 0.000000e+00 : f32
      %12 = vector.broadcast %cst_9 : f32 to vector<16x256xf32>
      %c0_10 = arith.constant 0 : index
      %c0_11 = arith.constant 0 : index
      %13 = vector.load %arg9[%c0_10, %c0_11] : memref<16x256xf32, #tpu.memory_space<vmem>>, vector<16x256xf32>
      tpu.vector_store %arg9[%c0_10, %c0_11], %12 {strides = array<i32>} : memref<16x256xf32, #tpu.memory_space<vmem>>, vector<16x256xf32>,
    } else {
    }
    %c0 = arith.constant 0 : index
    %c0_1 = arith.constant 0 : index
    %3 = vector.load %arg9[%c0, %c0_1] : memref<16x256xf32, #tpu.memory_space<vmem>>, vector<16x256xf32>
    %c0_2 = arith.constant 0 : index
    %c0_3 = arith.constant 0 : index
    %4 = vector.load %arg3[%c0_2, %c0_3] : memref<16x256xbf16, #tpu.memory_space<vmem>>, vector<16x256xbf16>
    %c0_4 = arith.constant 0 : index
    %c0_5 = arith.constant 0 : index
    %5 = vector.load %arg4[%c0_4, %c0_5] : memref<256x256xbf16, #tpu.memory_space<vmem>>, vector<256x256xbf16>
    %cst = arith.constant dense<0.000000e+00> : vector<16x256xf32>
    %6 = tpu.matmul %4, %5, %cst {dimension_numbers = #tpu.dot_dimension_numbers<[1], [0], [0], [1], [0, 0, 1, 1], [], []>} : vector<16x256xbf16>, vector<256x256xbf16>, vector<16x256xf32> -> vector<16x256xf32>
    %7 = arith.addf %3, %6 : vector<16x256xf32>
    %c0_6 = arith.constant 0 : index
    %c0_7 = arith.constant 0 : index
    %8 = vector.load %arg9[%c0_6, %c0_7] : memref<16x256xf32, #tpu.memory_space<vmem>>, vector<16x256xf32>
    tpu.vector_store %arg9[%c0_6, %c0_7], %7 {strides = array<i32>} : memref<16x256xf32, #tpu.memory_space<vmem>>, vector<16x256xf32>,
    %c8_i32 = arith.constant 8 : i32
    %9 = arith.cmpi eq, %arg2, %c8_i32 : i32
    %10 = arith.extui %9 : i1 to i32
    %c0_i32_8 = arith.constant 0 : i32
    %11 = arith.cmpi ne, %10, %c0_i32_8 : i32
    scf.if %11 {
      %c0_9 = arith.constant 0 : index
      %c0_10 = arith.constant 0 : index
      %12 = vector.load %arg9[%c0_9, %c0_10] : memref<16x256xf32, #tpu.memory_space<vmem>>, vector<16x256xf32>
      %c0_11 = arith.constant 0 : index
      %c0_12 = arith.constant 0 : index
      %13 = vector.load %arg5[%c0_11, %c0_12] : memref<1x256xf32, #tpu.memory_space<vmem>>, vector<1x256xf32>
      %14 = vector.broadcast %13 : vector<1x256xf32> to vector<16x256xf32>
      %15 = arith.mulf %12, %14 : vector<16x256xf32>
      %c0_13 = arith.constant 0 : index
      %c0_14 = arith.constant 0 : index
      %16 = vector.load %arg6[%c0_13, %c0_14] : memref<1x256xf32, #tpu.memory_space<vmem>>, vector<1x256xf32>
      %17 = vector.broadcast %16 : vector<1x256xf32> to vector<16x256xf32>
      %18 = arith.addf %15, %17 : vector<16x256xf32>
      %c0_15 = arith.constant 0 : index
      %c0_16 = arith.constant 0 : index
      %19 = vector.load %arg7[%c0_15, %c0_16] : memref<16x256xf32, #tpu.memory_space<vmem>>, vector<16x256xf32>
      %20 = arith.addf %18, %19 : vector<16x256xf32>
      %cst_17 = arith.constant 0.000000e+00 : f32
      %21 = vector.broadcast %cst_17 : f32 to vector<16x256xf32>
      %22 = arith.maximumf %20, %21 : vector<16x256xf32>
      %c0_18 = arith.constant 0 : index
      %c0_19 = arith.constant 0 : index
      %23 = vector.load %arg8[%c0_18, %c0_19] : memref<16x256xf32, #tpu.memory_space<vmem>>, vector<16x256xf32>
      tpu.vector_store %arg8[%c0_18, %c0_19], %22 {strides = array<i32>} : memref<16x256xf32, #tpu.memory_space<vmem>>, vector<16x256xf32>,
    } else {
    }
    return
  }
  func.func @transform_0(%arg0: i32, %arg1: i32, %arg2: i32) -> (i32, i32) {
    %c0_i32 = arith.constant 0 : i32
    return %arg0, %arg2 : i32, i32
  }
  func.func @transform_1(%arg0: i32, %arg1: i32, %arg2: i32) -> (i32, i32) {
    %c0_i32 = arith.constant 0 : i32
    return %arg2, %arg1 : i32, i32
  }
  func.func @transform_2(%arg0: i32, %arg1: i32, %arg2: i32) -> (i32, i32) {
    %c0_i32 = arith.constant 0 : i32
    %c0_i32_0 = arith.constant 0 : i32
    return %c0_i32, %arg1 : i32, i32
  }
  func.func @transform_3(%arg0: i32, %arg1: i32, %arg2: i32) -> (i32, i32) {
    %c0_i32 = arith.constant 0 : i32
    %c0_i32_0 = arith.constant 0 : i32
    return %c0_i32, %arg1 : i32, i32
  }
  func.func @transform_4(%arg0: i32, %arg1: i32, %arg2: i32) -> (i32, i32) {
    %c0_i32 = arith.constant 0 : i32
    return %arg0, %arg1 : i32, i32
  }
  func.func @transform_5(%arg0: i32, %arg1: i32, %arg2: i32) -> (i32, i32) {
    %c0_i32 = arith.constant 0 : i32
    return %arg0, %arg1 : i32, i32
  }
}

module attributes {stable_mosaic.version = 11 : i64} {
  func.func @_mm_kernel(%arg0: i32, %arg1: i32, %arg2: i32, %arg3: memref<16x256xbf16, #tpu.memory_space<vmem>>, %arg4: memref<256x256xbf16, #tpu.memory_space<vmem>>, %arg5: memref<1x256xf32, #tpu.memory_space<vmem>>, %arg6: memref<1x256xf32, #tpu.memory_space<vmem>>, %arg7: memref<16x256xf32, #tpu.memory_space<vmem>>, %arg8: memref<16x256xf32, #tpu.memory_space<vmem>>) attributes {dimension_semantics = [#tpu.dimension_semantics<parallel>, #tpu.dimension_semantics<parallel>, #tpu.dimension_semantics<arbitrary>], iteration_bounds = array<i64: 1, 1, 9>, scalar_prefetch = 0 : i64, scratch_operands = 1 : i64, tpu.core_type = #tpu.core_type<tc>, window_params = [{transform_indices = @transform_0, window_bounds = array<i64: 16, 256>}, {transform_indices = @transform_1, window_bounds = array<i64: 256, 256>}, {transform_indices = @transform_2, window_bounds = array<i64: 1, 256>}, {transform_indices = @transform_3, window_bounds = array<i64: 1, 256>}, {transform_indices = @transform_4, window_bounds = array<i64: 16, 256>}]} {
    %c0_i32 = arith.constant 0 : i32
    %0 = arith.cmpi eq, %arg2, %c0_i32 : i32
    %1 = arith.extui %0 : i1 to i32
    %c0_i32_0 = arith.constant 0 : i32
    %2 = arith.cmpi ne, %1, %c0_i32_0 : i32
    scf.if %2 {
      %cst_9 = arith.constant 0.000000e+00 : f32
      %12 = vector.broadcast %cst_9 : f32 to vector<16x256xf32>
      %c0_10 = arith.constant 0 : index
      %c0_11 = arith.constant 0 : index
      %13 = vector.load %arg8[%c0_10, %c0_11] : memref<16x256xf32, #tpu.memory_space<vmem>>, vector<16x256xf32>
      tpu.vector_store %arg8[%c0_10, %c0_11], %12 {strides = array<i32>} : memref<16x256xf32, #tpu.memory_space<vmem>>, vector<16x256xf32>,
    } else {
    }
    %c0 = arith.constant 0 : index
    %c0_1 = arith.constant 0 : index
    %3 = vector.load %arg8[%c0, %c0_1] : memref<16x256xf32, #tpu.memory_space<vmem>>, vector<16x256xf32>
    %c0_2 = arith.constant 0 : index
    %c0_3 = arith.constant 0 : index
    %4 = vector.load %arg3[%c0_2, %c0_3] : memref<16x256xbf16, #tpu.memory_space<vmem>>, vector<16x256xbf16>
    %c0_4 = arith.constant 0 : index
    %c0_5 = arith.constant 0 : index
    %5 = vector.load %arg4[%c0_4, %c0_5] : memref<256x256xbf16, #tpu.memory_space<vmem>>, vector<256x256xbf16>
    %cst = arith.constant dense<0.000000e+00> : vector<16x256xf32>
    %6 = tpu.matmul %4, %5, %cst {dimension_numbers = #tpu.dot_dimension_numbers<[1], [0], [0], [1], [0, 0, 1, 1], [], []>} : vector<16x256xbf16>, vector<256x256xbf16>, vector<16x256xf32> -> vector<16x256xf32>
    %7 = arith.addf %3, %6 : vector<16x256xf32>
    %c0_6 = arith.constant 0 : index
    %c0_7 = arith.constant 0 : index
    %8 = vector.load %arg8[%c0_6, %c0_7] : memref<16x256xf32, #tpu.memory_space<vmem>>, vector<16x256xf32>
    tpu.vector_store %arg8[%c0_6, %c0_7], %7 {strides = array<i32>} : memref<16x256xf32, #tpu.memory_space<vmem>>, vector<16x256xf32>,
    %c8_i32 = arith.constant 8 : i32
    %9 = arith.cmpi eq, %arg2, %c8_i32 : i32
    %10 = arith.extui %9 : i1 to i32
    %c0_i32_8 = arith.constant 0 : i32
    %11 = arith.cmpi ne, %10, %c0_i32_8 : i32
    scf.if %11 {
      %c0_9 = arith.constant 0 : index
      %c0_10 = arith.constant 0 : index
      %12 = vector.load %arg8[%c0_9, %c0_10] : memref<16x256xf32, #tpu.memory_space<vmem>>, vector<16x256xf32>
      %c0_11 = arith.constant 0 : index
      %c0_12 = arith.constant 0 : index
      %13 = vector.load %arg5[%c0_11, %c0_12] : memref<1x256xf32, #tpu.memory_space<vmem>>, vector<1x256xf32>
      %14 = vector.broadcast %13 : vector<1x256xf32> to vector<16x256xf32>
      %15 = arith.mulf %12, %14 : vector<16x256xf32>
      %c0_13 = arith.constant 0 : index
      %c0_14 = arith.constant 0 : index
      %16 = vector.load %arg6[%c0_13, %c0_14] : memref<1x256xf32, #tpu.memory_space<vmem>>, vector<1x256xf32>
      %17 = vector.broadcast %16 : vector<1x256xf32> to vector<16x256xf32>
      %18 = arith.addf %15, %17 : vector<16x256xf32>
      %cst_15 = arith.constant 0.000000e+00 : f32
      %19 = vector.broadcast %cst_15 : f32 to vector<16x256xf32>
      %20 = arith.maximumf %18, %19 : vector<16x256xf32>
      %c0_16 = arith.constant 0 : index
      %c0_17 = arith.constant 0 : index
      %21 = vector.load %arg7[%c0_16, %c0_17] : memref<16x256xf32, #tpu.memory_space<vmem>>, vector<16x256xf32>
      tpu.vector_store %arg7[%c0_16, %c0_17], %20 {strides = array<i32>} : memref<16x256xf32, #tpu.memory_space<vmem>>, vector<16x256xf32>,
    } else {
    }
    return
  }
  func.func @transform_0(%arg0: i32, %arg1: i32, %arg2: i32) -> (i32, i32) {
    %c0_i32 = arith.constant 0 : i32
    return %arg0, %arg2 : i32, i32
  }
  func.func @transform_1(%arg0: i32, %arg1: i32, %arg2: i32) -> (i32, i32) {
    %c0_i32 = arith.constant 0 : i32
    return %arg2, %arg1 : i32, i32
  }
  func.func @transform_2(%arg0: i32, %arg1: i32, %arg2: i32) -> (i32, i32) {
    %c0_i32 = arith.constant 0 : i32
    %c0_i32_0 = arith.constant 0 : i32
    return %c0_i32, %arg1 : i32, i32
  }
  func.func @transform_3(%arg0: i32, %arg1: i32, %arg2: i32) -> (i32, i32) {
    %c0_i32 = arith.constant 0 : i32
    %c0_i32_0 = arith.constant 0 : i32
    return %c0_i32, %arg1 : i32, i32
  }
  func.func @transform_4(%arg0: i32, %arg1: i32, %arg2: i32) -> (i32, i32) {
    %c0_i32 = arith.constant 0 : i32
    return %arg0, %arg1 : i32, i32
  }
}

module attributes {stable_mosaic.version = 11 : i64} {
  func.func @_mm_kernel(%arg0: i32, %arg1: i32, %arg2: i32, %arg3: memref<16x256xbf16, #tpu.memory_space<vmem>>, %arg4: memref<256x256xbf16, #tpu.memory_space<vmem>>, %arg5: memref<1x256xf32, #tpu.memory_space<vmem>>, %arg6: memref<1x256xf32, #tpu.memory_space<vmem>>, %arg7: memref<16x256xf32, #tpu.memory_space<vmem>>, %arg8: memref<16x256xf32, #tpu.memory_space<vmem>>) attributes {dimension_semantics = [#tpu.dimension_semantics<parallel>, #tpu.dimension_semantics<parallel>, #tpu.dimension_semantics<arbitrary>], iteration_bounds = array<i64: 1, 2, 1>, scalar_prefetch = 0 : i64, scratch_operands = 1 : i64, tpu.core_type = #tpu.core_type<tc>, window_params = [{transform_indices = @transform_0, window_bounds = array<i64: 16, 256>}, {transform_indices = @transform_1, window_bounds = array<i64: 256, 256>}, {transform_indices = @transform_2, window_bounds = array<i64: 1, 256>}, {transform_indices = @transform_3, window_bounds = array<i64: 1, 256>}, {transform_indices = @transform_4, window_bounds = array<i64: 16, 256>}]} {
    %c0_i32 = arith.constant 0 : i32
    %0 = arith.cmpi eq, %arg2, %c0_i32 : i32
    %1 = arith.extui %0 : i1 to i32
    %c0_i32_0 = arith.constant 0 : i32
    %2 = arith.cmpi ne, %1, %c0_i32_0 : i32
    scf.if %2 {
      %cst_10 = arith.constant 0.000000e+00 : f32
      %12 = vector.broadcast %cst_10 : f32 to vector<16x256xf32>
      %c0_11 = arith.constant 0 : index
      %c0_12 = arith.constant 0 : index
      %13 = vector.load %arg8[%c0_11, %c0_12] : memref<16x256xf32, #tpu.memory_space<vmem>>, vector<16x256xf32>
      tpu.vector_store %arg8[%c0_11, %c0_12], %12 {strides = array<i32>} : memref<16x256xf32, #tpu.memory_space<vmem>>, vector<16x256xf32>,
    } else {
    }
    %c0 = arith.constant 0 : index
    %c0_1 = arith.constant 0 : index
    %3 = vector.load %arg8[%c0, %c0_1] : memref<16x256xf32, #tpu.memory_space<vmem>>, vector<16x256xf32>
    %c0_2 = arith.constant 0 : index
    %c0_3 = arith.constant 0 : index
    %4 = vector.load %arg3[%c0_2, %c0_3] : memref<16x256xbf16, #tpu.memory_space<vmem>>, vector<16x256xbf16>
    %c0_4 = arith.constant 0 : index
    %c0_5 = arith.constant 0 : index
    %5 = vector.load %arg4[%c0_4, %c0_5] : memref<256x256xbf16, #tpu.memory_space<vmem>>, vector<256x256xbf16>
    %cst = arith.constant dense<0.000000e+00> : vector<16x256xf32>
    %6 = tpu.matmul %4, %5, %cst {dimension_numbers = #tpu.dot_dimension_numbers<[1], [0], [0], [1], [0, 0, 1, 1], [], []>} : vector<16x256xbf16>, vector<256x256xbf16>, vector<16x256xf32> -> vector<16x256xf32>
    %7 = arith.addf %3, %6 : vector<16x256xf32>
    %c0_6 = arith.constant 0 : index
    %c0_7 = arith.constant 0 : index
    %8 = vector.load %arg8[%c0_6, %c0_7] : memref<16x256xf32, #tpu.memory_space<vmem>>, vector<16x256xf32>
    tpu.vector_store %arg8[%c0_6, %c0_7], %7 {strides = array<i32>} : memref<16x256xf32, #tpu.memory_space<vmem>>, vector<16x256xf32>,
    %c0_i32_8 = arith.constant 0 : i32
    %9 = arith.cmpi eq, %arg2, %c0_i32_8 : i32
    %10 = arith.extui %9 : i1 to i32
    %c0_i32_9 = arith.constant 0 : i32
    %11 = arith.cmpi ne, %10, %c0_i32_9 : i32
    scf.if %11 {
      %c0_10 = arith.constant 0 : index
      %c0_11 = arith.constant 0 : index
      %12 = vector.load %arg8[%c0_10, %c0_11] : memref<16x256xf32, #tpu.memory_space<vmem>>, vector<16x256xf32>
      %c0_12 = arith.constant 0 : index
      %c0_13 = arith.constant 0 : index
      %13 = vector.load %arg5[%c0_12, %c0_13] : memref<1x256xf32, #tpu.memory_space<vmem>>, vector<1x256xf32>
      %14 = vector.broadcast %13 : vector<1x256xf32> to vector<16x256xf32>
      %15 = arith.mulf %12, %14 : vector<16x256xf32>
      %c0_14 = arith.constant 0 : index
      %c0_15 = arith.constant 0 : index
      %16 = vector.load %arg6[%c0_14, %c0_15] : memref<1x256xf32, #tpu.memory_space<vmem>>, vector<1x256xf32>
      %17 = vector.broadcast %16 : vector<1x256xf32> to vector<16x256xf32>
      %18 = arith.addf %15, %17 : vector<16x256xf32>
      %c0_16 = arith.constant 0 : index
      %c0_17 = arith.constant 0 : index
      %19 = vector.load %arg7[%c0_16, %c0_17] : memref<16x256xf32, #tpu.memory_space<vmem>>, vector<16x256xf32>
      tpu.vector_store %arg7[%c0_16, %c0_17], %18 {strides = array<i32>} : memref<16x256xf32, #tpu.memory_space<vmem>>, vector<16x256xf32>,
    } else {
    }
    return
  }
  func.func @transform_0(%arg0: i32, %arg1: i32, %arg2: i32) -> (i32, i32) {
    %c0_i32 = arith.constant 0 : i32
    return %arg0, %arg2 : i32, i32
  }
  func.func @transform_1(%arg0: i32, %arg1: i32, %arg2: i32) -> (i32, i32) {
    %c0_i32 = arith.constant 0 : i32
    return %arg2, %arg1 : i32, i32
  }
  func.func @transform_2(%arg0: i32, %arg1: i32, %arg2: i32) -> (i32, i32) {
    %c0_i32 = arith.constant 0 : i32
    %c0_i32_0 = arith.constant 0 : i32
    return %c0_i32, %arg1 : i32, i32
  }
  func.func @transform_3(%arg0: i32, %arg1: i32, %arg2: i32) -> (i32, i32) {
    %c0_i32 = arith.constant 0 : i32
    %c0_i32_0 = arith.constant 0 : i32
    return %c0_i32, %arg1 : i32, i32
  }
  func.func @transform_4(%arg0: i32, %arg1: i32, %arg2: i32) -> (i32, i32) {
    %c0_i32 = arith.constant 0 : i32
    return %arg0, %arg1 : i32, i32
  }
}

module attributes {stable_mosaic.version = 11 : i64} {
  func.func @_mm_kernel(%arg0: i32, %arg1: i32, %arg2: i32, %arg3: memref<16x256xbf16, #tpu.memory_space<vmem>>, %arg4: memref<256x256xbf16, #tpu.memory_space<vmem>>, %arg5: memref<1x256xf32, #tpu.memory_space<vmem>>, %arg6: memref<1x256xf32, #tpu.memory_space<vmem>>, %arg7: memref<16x256xf32, #tpu.memory_space<vmem>>, %arg8: memref<16x256xf32, #tpu.memory_space<vmem>>) attributes {dimension_semantics = [#tpu.dimension_semantics<parallel>, #tpu.dimension_semantics<parallel>, #tpu.dimension_semantics<arbitrary>], iteration_bounds = array<i64: 1, 2, 9>, scalar_prefetch = 0 : i64, scratch_operands = 1 : i64, tpu.core_type = #tpu.core_type<tc>, window_params = [{transform_indices = @transform_0, window_bounds = array<i64: 16, 256>}, {transform_indices = @transform_1, window_bounds = array<i64: 256, 256>}, {transform_indices = @transform_2, window_bounds = array<i64: 1, 256>}, {transform_indices = @transform_3, window_bounds = array<i64: 1, 256>}, {transform_indices = @transform_4, window_bounds = array<i64: 16, 256>}]} {
    %c0_i32 = arith.constant 0 : i32
    %0 = arith.cmpi eq, %arg2, %c0_i32 : i32
    %1 = arith.extui %0 : i1 to i32
    %c0_i32_0 = arith.constant 0 : i32
    %2 = arith.cmpi ne, %1, %c0_i32_0 : i32
    scf.if %2 {
      %cst_9 = arith.constant 0.000000e+00 : f32
      %12 = vector.broadcast %cst_9 : f32 to vector<16x256xf32>
      %c0_10 = arith.constant 0 : index
      %c0_11 = arith.constant 0 : index
      %13 = vector.load %arg8[%c0_10, %c0_11] : memref<16x256xf32, #tpu.memory_space<vmem>>, vector<16x256xf32>
      tpu.vector_store %arg8[%c0_10, %c0_11], %12 {strides = array<i32>} : memref<16x256xf32, #tpu.memory_space<vmem>>, vector<16x256xf32>,
    } else {
    }
    %c0 = arith.constant 0 : index
    %c0_1 = arith.constant 0 : index
    %3 = vector.load %arg8[%c0, %c0_1] : memref<16x256xf32, #tpu.memory_space<vmem>>, vector<16x256xf32>
    %c0_2 = arith.constant 0 : index
    %c0_3 = arith.constant 0 : index
    %4 = vector.load %arg3[%c0_2, %c0_3] : memref<16x256xbf16, #tpu.memory_space<vmem>>, vector<16x256xbf16>
    %c0_4 = arith.constant 0 : index
    %c0_5 = arith.constant 0 : index
    %5 = vector.load %arg4[%c0_4, %c0_5] : memref<256x256xbf16, #tpu.memory_space<vmem>>, vector<256x256xbf16>
    %cst = arith.constant dense<0.000000e+00> : vector<16x256xf32>
    %6 = tpu.matmul %4, %5, %cst {dimension_numbers = #tpu.dot_dimension_numbers<[1], [0], [0], [1], [0, 0, 1, 1], [], []>} : vector<16x256xbf16>, vector<256x256xbf16>, vector<16x256xf32> -> vector<16x256xf32>
    %7 = arith.addf %3, %6 : vector<16x256xf32>
    %c0_6 = arith.constant 0 : index
    %c0_7 = arith.constant 0 : index
    %8 = vector.load %arg8[%c0_6, %c0_7] : memref<16x256xf32, #tpu.memory_space<vmem>>, vector<16x256xf32>
    tpu.vector_store %arg8[%c0_6, %c0_7], %7 {strides = array<i32>} : memref<16x256xf32, #tpu.memory_space<vmem>>, vector<16x256xf32>,
    %c8_i32 = arith.constant 8 : i32
    %9 = arith.cmpi eq, %arg2, %c8_i32 : i32
    %10 = arith.extui %9 : i1 to i32
    %c0_i32_8 = arith.constant 0 : i32
    %11 = arith.cmpi ne, %10, %c0_i32_8 : i32
    scf.if %11 {
      %c0_9 = arith.constant 0 : index
      %c0_10 = arith.constant 0 : index
      %12 = vector.load %arg8[%c0_9, %c0_10] : memref<16x256xf32, #tpu.memory_space<vmem>>, vector<16x256xf32>
      %c0_11 = arith.constant 0 : index
      %c0_12 = arith.constant 0 : index
      %13 = vector.load %arg5[%c0_11, %c0_12] : memref<1x256xf32, #tpu.memory_space<vmem>>, vector<1x256xf32>
      %14 = vector.broadcast %13 : vector<1x256xf32> to vector<16x256xf32>
      %15 = arith.mulf %12, %14 : vector<16x256xf32>
      %c0_13 = arith.constant 0 : index
      %c0_14 = arith.constant 0 : index
      %16 = vector.load %arg6[%c0_13, %c0_14] : memref<1x256xf32, #tpu.memory_space<vmem>>, vector<1x256xf32>
      %17 = vector.broadcast %16 : vector<1x256xf32> to vector<16x256xf32>
      %18 = arith.addf %15, %17 : vector<16x256xf32>
      %cst_15 = arith.constant 0.000000e+00 : f32
      %19 = vector.broadcast %cst_15 : f32 to vector<16x256xf32>
      %20 = arith.maximumf %18, %19 : vector<16x256xf32>
      %c0_16 = arith.constant 0 : index
      %c0_17 = arith.constant 0 : index
      %21 = vector.load %arg7[%c0_16, %c0_17] : memref<16x256xf32, #tpu.memory_space<vmem>>, vector<16x256xf32>
      tpu.vector_store %arg7[%c0_16, %c0_17], %20 {strides = array<i32>} : memref<16x256xf32, #tpu.memory_space<vmem>>, vector<16x256xf32>,
    } else {
    }
    return
  }
  func.func @transform_0(%arg0: i32, %arg1: i32, %arg2: i32) -> (i32, i32) {
    %c0_i32 = arith.constant 0 : i32
    return %arg0, %arg2 : i32, i32
  }
  func.func @transform_1(%arg0: i32, %arg1: i32, %arg2: i32) -> (i32, i32) {
    %c0_i32 = arith.constant 0 : i32
    return %arg2, %arg1 : i32, i32
  }
  func.func @transform_2(%arg0: i32, %arg1: i32, %arg2: i32) -> (i32, i32) {
    %c0_i32 = arith.constant 0 : i32
    %c0_i32_0 = arith.constant 0 : i32
    return %c0_i32, %arg1 : i32, i32
  }
  func.func @transform_3(%arg0: i32, %arg1: i32, %arg2: i32) -> (i32, i32) {
    %c0_i32 = arith.constant 0 : i32
    %c0_i32_0 = arith.constant 0 : i32
    return %c0_i32, %arg1 : i32, i32
  }
  func.func @transform_4(%arg0: i32, %arg1: i32, %arg2: i32) -> (i32, i32) {
    %c0_i32 = arith.constant 0 : i32
    return %arg0, %arg1 : i32, i32
  }
}

module attributes {stable_mosaic.version = 11 : i64} {
  func.func @_mm_kernel(%arg0: i32, %arg1: i32, %arg2: i32, %arg3: memref<16x256xbf16, #tpu.memory_space<vmem>>, %arg4: memref<256x256xbf16, #tpu.memory_space<vmem>>, %arg5: memref<1x256xf32, #tpu.memory_space<vmem>>, %arg6: memref<1x256xf32, #tpu.memory_space<vmem>>, %arg7: memref<16x256xf32, #tpu.memory_space<vmem>>, %arg8: memref<16x256xf32, #tpu.memory_space<vmem>>, %arg9: memref<16x256xf32, #tpu.memory_space<vmem>>) attributes {dimension_semantics = [#tpu.dimension_semantics<parallel>, #tpu.dimension_semantics<parallel>, #tpu.dimension_semantics<arbitrary>], iteration_bounds = array<i64: 1, 2, 18>, scalar_prefetch = 0 : i64, scratch_operands = 1 : i64, tpu.core_type = #tpu.core_type<tc>, window_params = [{transform_indices = @transform_0, window_bounds = array<i64: 16, 256>}, {transform_indices = @transform_1, window_bounds = array<i64: 256, 256>}, {transform_indices = @transform_2, window_bounds = array<i64: 1, 256>}, {transform_indices = @transform_3, window_bounds = array<i64: 1, 256>}, {transform_indices = @transform_4, window_bounds = array<i64: 16, 256>}, {transform_indices = @transform_5, window_bounds = array<i64: 16, 256>}]} {
    %c0_i32 = arith.constant 0 : i32
    %0 = arith.cmpi eq, %arg2, %c0_i32 : i32
    %1 = arith.extui %0 : i1 to i32
    %c0_i32_0 = arith.constant 0 : i32
    %2 = arith.cmpi ne, %1, %c0_i32_0 : i32
    scf.if %2 {
      %cst_9 = arith.constant 0.000000e+00 : f32
      %12 = vector.broadcast %cst_9 : f32 to vector<16x256xf32>
      %c0_10 = arith.constant 0 : index
      %c0_11 = arith.constant 0 : index
      %13 = vector.load %arg9[%c0_10, %c0_11] : memref<16x256xf32, #tpu.memory_space<vmem>>, vector<16x256xf32>
      tpu.vector_store %arg9[%c0_10, %c0_11], %12 {strides = array<i32>} : memref<16x256xf32, #tpu.memory_space<vmem>>, vector<16x256xf32>,
    } else {
    }
    %c0 = arith.constant 0 : index
    %c0_1 = arith.constant 0 : index
    %3 = vector.load %arg9[%c0, %c0_1] : memref<16x256xf32, #tpu.memory_space<vmem>>, vector<16x256xf32>
    %c0_2 = arith.constant 0 : index
    %c0_3 = arith.constant 0 : index
    %4 = vector.load %arg3[%c0_2, %c0_3] : memref<16x256xbf16, #tpu.memory_space<vmem>>, vector<16x256xbf16>
    %c0_4 = arith.constant 0 : index
    %c0_5 = arith.constant 0 : index
    %5 = vector.load %arg4[%c0_4, %c0_5] : memref<256x256xbf16, #tpu.memory_space<vmem>>, vector<256x256xbf16>
    %cst = arith.constant dense<0.000000e+00> : vector<16x256xf32>
    %6 = tpu.matmul %4, %5, %cst {dimension_numbers = #tpu.dot_dimension_numbers<[1], [0], [0], [1], [0, 0, 1, 1], [], []>} : vector<16x256xbf16>, vector<256x256xbf16>, vector<16x256xf32> -> vector<16x256xf32>
    %7 = arith.addf %3, %6 : vector<16x256xf32>
    %c0_6 = arith.constant 0 : index
    %c0_7 = arith.constant 0 : index
    %8 = vector.load %arg9[%c0_6, %c0_7] : memref<16x256xf32, #tpu.memory_space<vmem>>, vector<16x256xf32>
    tpu.vector_store %arg9[%c0_6, %c0_7], %7 {strides = array<i32>} : memref<16x256xf32, #tpu.memory_space<vmem>>, vector<16x256xf32>,
    %c17_i32 = arith.constant 17 : i32
    %9 = arith.cmpi eq, %arg2, %c17_i32 : i32
    %10 = arith.extui %9 : i1 to i32
    %c0_i32_8 = arith.constant 0 : i32
    %11 = arith.cmpi ne, %10, %c0_i32_8 : i32
    scf.if %11 {
      %c0_9 = arith.constant 0 : index
      %c0_10 = arith.constant 0 : index
      %12 = vector.load %arg9[%c0_9, %c0_10] : memref<16x256xf32, #tpu.memory_space<vmem>>, vector<16x256xf32>
      %c0_11 = arith.constant 0 : index
      %c0_12 = arith.constant 0 : index
      %13 = vector.load %arg5[%c0_11, %c0_12] : memref<1x256xf32, #tpu.memory_space<vmem>>, vector<1x256xf32>
      %14 = vector.broadcast %13 : vector<1x256xf32> to vector<16x256xf32>
      %15 = arith.mulf %12, %14 : vector<16x256xf32>
      %c0_13 = arith.constant 0 : index
      %c0_14 = arith.constant 0 : index
      %16 = vector.load %arg6[%c0_13, %c0_14] : memref<1x256xf32, #tpu.memory_space<vmem>>, vector<1x256xf32>
      %17 = vector.broadcast %16 : vector<1x256xf32> to vector<16x256xf32>
      %18 = arith.addf %15, %17 : vector<16x256xf32>
      %c0_15 = arith.constant 0 : index
      %c0_16 = arith.constant 0 : index
      %19 = vector.load %arg7[%c0_15, %c0_16] : memref<16x256xf32, #tpu.memory_space<vmem>>, vector<16x256xf32>
      %20 = arith.addf %18, %19 : vector<16x256xf32>
      %cst_17 = arith.constant 0.000000e+00 : f32
      %21 = vector.broadcast %cst_17 : f32 to vector<16x256xf32>
      %22 = arith.maximumf %20, %21 : vector<16x256xf32>
      %c0_18 = arith.constant 0 : index
      %c0_19 = arith.constant 0 : index
      %23 = vector.load %arg8[%c0_18, %c0_19] : memref<16x256xf32, #tpu.memory_space<vmem>>, vector<16x256xf32>
      tpu.vector_store %arg8[%c0_18, %c0_19], %22 {strides = array<i32>} : memref<16x256xf32, #tpu.memory_space<vmem>>, vector<16x256xf32>,
    } else {
    }
    return
  }
  func.func @transform_0(%arg0: i32, %arg1: i32, %arg2: i32) -> (i32, i32) {
    %c0_i32 = arith.constant 0 : i32
    return %arg0, %arg2 : i32, i32
  }
  func.func @transform_1(%arg0: i32, %arg1: i32, %arg2: i32) -> (i32, i32) {
    %c0_i32 = arith.constant 0 : i32
    return %arg2, %arg1 : i32, i32
  }
  func.func @transform_2(%arg0: i32, %arg1: i32, %arg2: i32) -> (i32, i32) {
    %c0_i32 = arith.constant 0 : i32
    %c0_i32_0 = arith.constant 0 : i32
    return %c0_i32, %arg1 : i32, i32
  }
  func.func @transform_3(%arg0: i32, %arg1: i32, %arg2: i32) -> (i32, i32) {
    %c0_i32 = arith.constant 0 : i32
    %c0_i32_0 = arith.constant 0 : i32
    return %c0_i32, %arg1 : i32, i32
  }
  func.func @transform_4(%arg0: i32, %arg1: i32, %arg2: i32) -> (i32, i32) {
    %c0_i32 = arith.constant 0 : i32
    return %arg0, %arg1 : i32, i32
  }
  func.func @transform_5(%arg0: i32, %arg1: i32, %arg2: i32) -> (i32, i32) {
    %c0_i32 = arith.constant 0 : i32
    return %arg0, %arg1 : i32, i32
  }
}

module attributes {stable_mosaic.version = 11 : i64} {
  func.func @_mm_kernel(%arg0: i32, %arg1: i32, %arg2: i32, %arg3: memref<16x256xbf16, #tpu.memory_space<vmem>>, %arg4: memref<256x256xbf16, #tpu.memory_space<vmem>>, %arg5: memref<1x256xf32, #tpu.memory_space<vmem>>, %arg6: memref<1x256xf32, #tpu.memory_space<vmem>>, %arg7: memref<16x256xf32, #tpu.memory_space<vmem>>, %arg8: memref<16x256xf32, #tpu.memory_space<vmem>>) attributes {dimension_semantics = [#tpu.dimension_semantics<parallel>, #tpu.dimension_semantics<parallel>, #tpu.dimension_semantics<arbitrary>], iteration_bounds = array<i64: 1, 2, 18>, scalar_prefetch = 0 : i64, scratch_operands = 1 : i64, tpu.core_type = #tpu.core_type<tc>, window_params = [{transform_indices = @transform_0, window_bounds = array<i64: 16, 256>}, {transform_indices = @transform_1, window_bounds = array<i64: 256, 256>}, {transform_indices = @transform_2, window_bounds = array<i64: 1, 256>}, {transform_indices = @transform_3, window_bounds = array<i64: 1, 256>}, {transform_indices = @transform_4, window_bounds = array<i64: 16, 256>}]} {
    %c0_i32 = arith.constant 0 : i32
    %0 = arith.cmpi eq, %arg2, %c0_i32 : i32
    %1 = arith.extui %0 : i1 to i32
    %c0_i32_0 = arith.constant 0 : i32
    %2 = arith.cmpi ne, %1, %c0_i32_0 : i32
    scf.if %2 {
      %cst_9 = arith.constant 0.000000e+00 : f32
      %12 = vector.broadcast %cst_9 : f32 to vector<16x256xf32>
      %c0_10 = arith.constant 0 : index
      %c0_11 = arith.constant 0 : index
      %13 = vector.load %arg8[%c0_10, %c0_11] : memref<16x256xf32, #tpu.memory_space<vmem>>, vector<16x256xf32>
      tpu.vector_store %arg8[%c0_10, %c0_11], %12 {strides = array<i32>} : memref<16x256xf32, #tpu.memory_space<vmem>>, vector<16x256xf32>,
    } else {
    }
    %c0 = arith.constant 0 : index
    %c0_1 = arith.constant 0 : index
    %3 = vector.load %arg8[%c0, %c0_1] : memref<16x256xf32, #tpu.memory_space<vmem>>, vector<16x256xf32>
    %c0_2 = arith.constant 0 : index
    %c0_3 = arith.constant 0 : index
    %4 = vector.load %arg3[%c0_2, %c0_3] : memref<16x256xbf16, #tpu.memory_space<vmem>>, vector<16x256xbf16>
    %c0_4 = arith.constant 0 : index
    %c0_5 = arith.constant 0 : index
    %5 = vector.load %arg4[%c0_4, %c0_5] : memref<256x256xbf16, #tpu.memory_space<vmem>>, vector<256x256xbf16>
    %cst = arith.constant dense<0.000000e+00> : vector<16x256xf32>
    %6 = tpu.matmul %4, %5, %cst {dimension_numbers = #tpu.dot_dimension_numbers<[1], [0], [0], [1], [0, 0, 1, 1], [], []>} : vector<16x256xbf16>, vector<256x256xbf16>, vector<16x256xf32> -> vector<16x256xf32>
    %7 = arith.addf %3, %6 : vector<16x256xf32>
    %c0_6 = arith.constant 0 : index
    %c0_7 = arith.constant 0 : index
    %8 = vector.load %arg8[%c0_6, %c0_7] : memref<16x256xf32, #tpu.memory_space<vmem>>, vector<16x256xf32>
    tpu.vector_store %arg8[%c0_6, %c0_7], %7 {strides = array<i32>} : memref<16x256xf32, #tpu.memory_space<vmem>>, vector<16x256xf32>,
    %c17_i32 = arith.constant 17 : i32
    %9 = arith.cmpi eq, %arg2, %c17_i32 : i32
    %10 = arith.extui %9 : i1 to i32
    %c0_i32_8 = arith.constant 0 : i32
    %11 = arith.cmpi ne, %10, %c0_i32_8 : i32
    scf.if %11 {
      %c0_9 = arith.constant 0 : index
      %c0_10 = arith.constant 0 : index
      %12 = vector.load %arg8[%c0_9, %c0_10] : memref<16x256xf32, #tpu.memory_space<vmem>>, vector<16x256xf32>
      %c0_11 = arith.constant 0 : index
      %c0_12 = arith.constant 0 : index
      %13 = vector.load %arg5[%c0_11, %c0_12] : memref<1x256xf32, #tpu.memory_space<vmem>>, vector<1x256xf32>
      %14 = vector.broadcast %13 : vector<1x256xf32> to vector<16x256xf32>
      %15 = arith.mulf %12, %14 : vector<16x256xf32>
      %c0_13 = arith.constant 0 : index
      %c0_14 = arith.constant 0 : index
      %16 = vector.load %arg6[%c0_13, %c0_14] : memref<1x256xf32, #tpu.memory_space<vmem>>, vector<1x256xf32>
      %17 = vector.broadcast %16 : vector<1x256xf32> to vector<16x256xf32>
      %18 = arith.addf %15, %17 : vector<16x256xf32>
      %cst_15 = arith.constant 0.000000e+00 : f32
      %19 = vector.broadcast %cst_15 : f32 to vector<16x256xf32>
      %20 = arith.maximumf %18, %19 : vector<16x256xf32>
      %c0_16 = arith.constant 0 : index
      %c0_17 = arith.constant 0 : index
      %21 = vector.load %arg7[%c0_16, %c0_17] : memref<16x256xf32, #tpu.memory_space<vmem>>, vector<16x256xf32>
      tpu.vector_store %arg7[%c0_16, %c0_17], %20 {strides = array<i32>} : memref<16x256xf32, #tpu.memory_space<vmem>>, vector<16x256xf32>,
    } else {
    }
    return
  }
  func.func @transform_0(%arg0: i32, %arg1: i32, %arg2: i32) -> (i32, i32) {
    %c0_i32 = arith.constant 0 : i32
    return %arg0, %arg2 : i32, i32
  }
  func.func @transform_1(%arg0: i32, %arg1: i32, %arg2: i32) -> (i32, i32) {
    %c0_i32 = arith.constant 0 : i32
    return %arg2, %arg1 : i32, i32
  }
  func.func @transform_2(%arg0: i32, %arg1: i32, %arg2: i32) -> (i32, i32) {
    %c0_i32 = arith.constant 0 : i32
    %c0_i32_0 = arith.constant 0 : i32
    return %c0_i32, %arg1 : i32, i32
  }
  func.func @transform_3(%arg0: i32, %arg1: i32, %arg2: i32) -> (i32, i32) {
    %c0_i32 = arith.constant 0 : i32
    %c0_i32_0 = arith.constant 0 : i32
    return %c0_i32, %arg1 : i32, i32
  }
  func.func @transform_4(%arg0: i32, %arg1: i32, %arg2: i32) -> (i32, i32) {
    %c0_i32 = arith.constant 0 : i32
    return %arg0, %arg1 : i32, i32
  }
}

module attributes {stable_mosaic.version = 11 : i64} {
  func.func @_lstm_layer_kernel(%arg0: i32, %arg1: memref<2x8x32xf32, #tpu.memory_space<vmem>>, %arg2: memref<8x32xf32, #tpu.memory_space<vmem>>, %arg3: memref<8x32xf32, #tpu.memory_space<vmem>>, %arg4: memref<32x128xf32, #tpu.memory_space<vmem>>, %arg5: memref<32x128xf32, #tpu.memory_space<vmem>>, %arg6: memref<1x128xf32, #tpu.memory_space<vmem>>, %arg7: memref<2x8x32xf32, #tpu.memory_space<vmem>>, %arg8: memref<8x32xf32, #tpu.memory_space<vmem>>, %arg9: memref<8x32xf32, #tpu.memory_space<vmem>>, %arg10: memref<8x32xf32, #tpu.memory_space<vmem>>, %arg11: memref<8x32xf32, #tpu.memory_space<vmem>>) attributes {dimension_semantics = [#tpu.dimension_semantics<arbitrary>], iteration_bounds = array<i64: 1>, scalar_prefetch = 0 : i64, scratch_operands = 2 : i64, tpu.core_type = #tpu.core_type<tc>, window_params = [{pipeline_mode = #tpu.pipeline_mode<synchronous>, transform_indices = @transform_0, window_bounds = array<i64: 2, 8, 32>}, {pipeline_mode = #tpu.pipeline_mode<synchronous>, transform_indices = @transform_1, window_bounds = array<i64: 8, 32>}, {pipeline_mode = #tpu.pipeline_mode<synchronous>, transform_indices = @transform_2, window_bounds = array<i64: 8, 32>}, {pipeline_mode = #tpu.pipeline_mode<synchronous>, transform_indices = @transform_3, window_bounds = array<i64: 32, 128>}, {pipeline_mode = #tpu.pipeline_mode<synchronous>, transform_indices = @transform_4, window_bounds = array<i64: 32, 128>}, {pipeline_mode = #tpu.pipeline_mode<synchronous>, transform_indices = @transform_5, window_bounds = array<i64: 1, 128>}, {pipeline_mode = #tpu.pipeline_mode<synchronous>, transform_indices = @transform_6, window_bounds = array<i64: 2, 8, 32>}, {pipeline_mode = #tpu.pipeline_mode<synchronous>, transform_indices = @transform_7, window_bounds = array<i64: 8, 32>}, {pipeline_mode = #tpu.pipeline_mode<synchronous>, transform_indices = @transform_8, window_bounds = array<i64: 8, 32>}]} {
    %c0 = arith.constant 0 : index
    %c0_0 = arith.constant 0 : index
    %0 = vector.load %arg2[%c0, %c0_0] : memref<8x32xf32, #tpu.memory_space<vmem>>, vector<8x32xf32>
    %c0_1 = arith.constant 0 : index
    %c0_2 = arith.constant 0 : index
    %1 = vector.load %arg10[%c0_1, %c0_2] : memref<8x32xf32, #tpu.memory_space<vmem>>, vector<8x32xf32>
    tpu.vector_store %arg10[%c0_1, %c0_2], %0 {strides = array<i32>} : memref<8x32xf32, #tpu.memory_space<vmem>>, vector<8x32xf32>,
    %c0_3 = arith.constant 0 : index
    %c0_4 = arith.constant 0 : index
    %2 = vector.load %arg3[%c0_3, %c0_4] : memref<8x32xf32, #tpu.memory_space<vmem>>, vector<8x32xf32>
    %c0_5 = arith.constant 0 : index
    %c0_6 = arith.constant 0 : index
    %3 = vector.load %arg11[%c0_5, %c0_6] : memref<8x32xf32, #tpu.memory_space<vmem>>, vector<8x32xf32>
    tpu.vector_store %arg11[%c0_5, %c0_6], %2 {strides = array<i32>} : memref<8x32xf32, #tpu.memory_space<vmem>>, vector<8x32xf32>,
    %c0_i32 = arith.constant 0 : i32
    %c2_i32 = arith.constant 2 : i32
    %4 = arith.addi %c0_i32, %c2_i32 : i32
    %c1_i32 = arith.constant 1 : i32
    scf.for %arg12 = %c0_i32 to %4 step %c1_i32  : i32 {
      %9 = arith.index_cast %arg12 : i32 to index
      %c0_16 = arith.constant 0 : index
      %c0_17 = arith.constant 0 : index
      %10 = vector.load %arg1[%9, %c0_16, %c0_17] : memref<2x8x32xf32, #tpu.memory_space<vmem>>, vector<1x8x32xf32>
      %11 = vector.shape_cast %10 : vector<1x8x32xf32> to vector<8x32xf32>
      %c0_18 = arith.constant 0 : index
      %c0_19 = arith.constant 0 : index
      %12 = vector.load %arg10[%c0_18, %c0_19] : memref<8x32xf32, #tpu.memory_space<vmem>>, vector<8x32xf32>
      %c0_20 = arith.constant 0 : index
      %c0_21 = arith.constant 0 : index
      %13 = vector.load %arg4[%c0_20, %c0_21] : memref<32x128xf32, #tpu.memory_space<vmem>>, vector<32x128xf32>
      %cst = arith.constant dense<0.000000e+00> : vector<8x128xf32>
      %14 = tpu.matmul %11, %13, %cst {dimension_numbers = #tpu.dot_dimension_numbers<[1], [0], [0], [1], [0, 0, 1, 1], [], []>} : vector<8x32xf32>, vector<32x128xf32>, vector<8x128xf32> -> vector<8x128xf32>
      %c0_22 = arith.constant 0 : index
      %c0_23 = arith.constant 0 : index
      %15 = vector.load %arg5[%c0_22, %c0_23] : memref<32x128xf32, #tpu.memory_space<vmem>>, vector<32x128xf32>
      %cst_24 = arith.constant dense<0.000000e+00> : vector<8x128xf32>
      %16 = tpu.matmul %12, %15, %cst_24 {dimension_numbers = #tpu.dot_dimension_numbers<[1], [0], [0], [1], [0, 0, 1, 1], [], []>} : vector<8x32xf32>, vector<32x128xf32>, vector<8x128xf32> -> vector<8x128xf32>
      %17 = arith.addf %14, %16 : vector<8x128xf32>
      %c0_25 = arith.constant 0 : index
      %c0_26 = arith.constant 0 : index
      %18 = vector.load %arg6[%c0_25, %c0_26] : memref<1x128xf32, #tpu.memory_space<vmem>>, vector<1x128xf32>
      %19 = vector.broadcast %18 : vector<1x128xf32> to vector<8x128xf32>
      %20 = arith.addf %17, %19 : vector<8x128xf32>
      %21 = vector.extract_strided_slice %20 {offsets = [0, 0], sizes = [8, 32], strides = [1, 1]} : vector<8x128xf32> to vector<8x32xf32>
      %22 = arith.negf %21 : vector<8x32xf32>
      %23 = math.exp %22 : vector<8x32xf32>
      %cst_27 = arith.constant 1.000000e+00 : f32
      %24 = vector.broadcast %cst_27 : f32 to vector<8x32xf32>
      %25 = arith.addf %24, %23 : vector<8x32xf32>
      %26 = arith.divf %24, %25 : vector<8x32xf32>
      %27 = vector.extract_strided_slice %20 {offsets = [0, 32], sizes = [8, 32], strides = [1, 1]} : vector<8x128xf32> to vector<8x32xf32>
      %28 = arith.negf %27 : vector<8x32xf32>
      %29 = math.exp %28 : vector<8x32xf32>
      %cst_28 = arith.constant 1.000000e+00 : f32
      %30 = vector.broadcast %cst_28 : f32 to vector<8x32xf32>
      %31 = arith.addf %30, %29 : vector<8x32xf32>
      %32 = arith.divf %30, %31 : vector<8x32xf32>
      %33 = vector.extract_strided_slice %20 {offsets = [0, 64], sizes = [8, 32], strides = [1, 1]} : vector<8x128xf32> to vector<8x32xf32>
      %34 = math.tanh %33 : vector<8x32xf32>
      %35 = vector.extract_strided_slice %20 {offsets = [0, 96], sizes = [8, 32], strides = [1, 1]} : vector<8x128xf32> to vector<8x32xf32>
      %36 = arith.negf %35 : vector<8x32xf32>
      %37 = math.exp %36 : vector<8x32xf32>
      %cst_29 = arith.constant 1.000000e+00 : f32
      %38 = vector.broadcast %cst_29 : f32 to vector<8x32xf32>
      %39 = arith.addf %38, %37 : vector<8x32xf32>
      %40 = arith.divf %38, %39 : vector<8x32xf32>
      %c0_30 = arith.constant 0 : index
      %c0_31 = arith.constant 0 : index
      %41 = vector.load %arg11[%c0_30, %c0_31] : memref<8x32xf32, #tpu.memory_space<vmem>>, vector<8x32xf32>
      %42 = arith.mulf %32, %41 : vector<8x32xf32>
      %43 = arith.mulf %26, %34 : vector<8x32xf32>
      %44 = arith.addf %42, %43 : vector<8x32xf32>
      %45 = math.tanh %44 : vector<8x32xf32>
      %46 = arith.mulf %40, %45 : vector<8x32xf32>
      %c0_32 = arith.constant 0 : index
      %c0_33 = arith.constant 0 : index
      %47 = vector.load %arg10[%c0_32, %c0_33] : memref<8x32xf32, #tpu.memory_space<vmem>>, vector<8x32xf32>
      tpu.vector_store %arg10[%c0_32, %c0_33], %46 {strides = array<i32>} : memref<8x32xf32, #tpu.memory_space<vmem>>, vector<8x32xf32>,
      %c0_34 = arith.constant 0 : index
      %c0_35 = arith.constant 0 : index
      %48 = vector.load %arg11[%c0_34, %c0_35] : memref<8x32xf32, #tpu.memory_space<vmem>>, vector<8x32xf32>
      tpu.vector_store %arg11[%c0_34, %c0_35], %44 {strides = array<i32>} : memref<8x32xf32, #tpu.memory_space<vmem>>, vector<8x32xf32>,
      %49 = arith.index_cast %arg12 : i32 to index
      %c0_36 = arith.constant 0 : index
      %c0_37 = arith.constant 0 : index
      %50 = vector.load %arg7[%49, %c0_36, %c0_37] : memref<2x8x32xf32, #tpu.memory_space<vmem>>, vector<1x8x32xf32>
      %51 = vector.shape_cast %50 : vector<1x8x32xf32> to vector<8x32xf32>
      %52 = vector.shape_cast %46 : vector<8x32xf32> to vector<1x8x32xf32>
      tpu.vector_store %arg7[%49, %c0_36, %c0_37], %52 {strides = array<i32>} : memref<2x8x32xf32, #tpu.memory_space<vmem>>, vector<1x8x32xf32>,
    }
    %c2_i32_7 = arith.constant 2 : i32
    %c0_8 = arith.constant 0 : index
    %c0_9 = arith.constant 0 : index
    %5 = vector.load %arg10[%c0_8, %c0_9] : memref<8x32xf32, #tpu.memory_space<vmem>>, vector<8x32xf32>
    %c0_10 = arith.constant 0 : index
    %c0_11 = arith.constant 0 : index
    %6 = vector.load %arg8[%c0_10, %c0_11] : memref<8x32xf32, #tpu.memory_space<vmem>>, vector<8x32xf32>
    tpu.vector_store %arg8[%c0_10, %c0_11], %5 {strides = array<i32>} : memref<8x32xf32, #tpu.memory_space<vmem>>, vector<8x32xf32>,
    %c0_12 = arith.constant 0 : index
    %c0_13 = arith.constant 0 : index
    %7 = vector.load %arg11[%c0_12, %c0_13] : memref<8x32xf32, #tpu.memory_space<vmem>>, vector<8x32xf32>
    %c0_14 = arith.constant 0 : index
    %c0_15 = arith.constant 0 : index
    %8 = vector.load %arg9[%c0_14, %c0_15] : memref<8x32xf32, #tpu.memory_space<vmem>>, vector<8x32xf32>
    tpu.vector_store %arg9[%c0_14, %c0_15], %7 {strides = array<i32>} : memref<8x32xf32, #tpu.memory_space<vmem>>, vector<8x32xf32>,
    return
  }
  func.func @transform_0(%arg0: i32) -> (i32, i32, i32) {
    %c0_i32 = arith.constant 0 : i32
    %c0_i32_0 = arith.constant 0 : i32
    %c0_i32_1 = arith.constant 0 : i32
    %c0_i32_2 = arith.constant 0 : i32
    return %c0_i32, %c0_i32_0, %c0_i32_1 : i32, i32, i32
  }
  func.func @transform_1(%arg0: i32) -> (i32, i32) {
    %c0_i32 = arith.constant 0 : i32
    %c0_i32_0 = arith.constant 0 : i32
    %c0_i32_1 = arith.constant 0 : i32
    return %c0_i32, %c0_i32_0 : i32, i32
  }
  func.func @transform_2(%arg0: i32) -> (i32, i32) {
    %c0_i32 = arith.constant 0 : i32
    %c0_i32_0 = arith.constant 0 : i32
    %c0_i32_1 = arith.constant 0 : i32
    return %c0_i32, %c0_i32_0 : i32, i32
  }
  func.func @transform_3(%arg0: i32) -> (i32, i32) {
    %c0_i32 = arith.constant 0 : i32
    %c0_i32_0 = arith.constant 0 : i32
    %c0_i32_1 = arith.constant 0 : i32
    return %c0_i32, %c0_i32_0 : i32, i32
  }
  func.func @transform_4(%arg0: i32) -> (i32, i32) {
    %c0_i32 = arith.constant 0 : i32
    %c0_i32_0 = arith.constant 0 : i32
    %c0_i32_1 = arith.constant 0 : i32
    return %c0_i32, %c0_i32_0 : i32, i32
  }
  func.func @transform_5(%arg0: i32) -> (i32, i32) {
    %c0_i32 = arith.constant 0 : i32
    %c0_i32_0 = arith.constant 0 : i32
    %c0_i32_1 = arith.constant 0 : i32
    return %c0_i32, %c0_i32_0 : i32, i32
  }
  func.func @transform_6(%arg0: i32) -> (i32, i32, i32) {
    %c0_i32 = arith.constant 0 : i32
    %c0_i32_0 = arith.constant 0 : i32
    %c0_i32_1 = arith.constant 0 : i32
    %c0_i32_2 = arith.constant 0 : i32
    return %c0_i32, %c0_i32_0, %c0_i32_1 : i32, i32, i32
  }
  func.func @transform_7(%arg0: i32) -> (i32, i32) {
    %c0_i32 = arith.constant 0 : i32
    %c0_i32_0 = arith.constant 0 : i32
    %c0_i32_1 = arith.constant 0 : i32
    return %c0_i32, %c0_i32_0 : i32, i32
  }
  func.func @transform_8(%arg0: i32) -> (i32, i32) {
    %c0_i32 = arith.constant 0 : i32
    %c0_i32_0 = arith.constant 0 : i32
    %c0_i32_1 = arith.constant 0 : i32
    return %c0_i32, %c0_i32_0 : i32, i32
  }
}

module attributes {stable_mosaic.version = 11 : i64} {
  func.func @_lstm_layer_kernel(%arg0: i32, %arg1: memref<2x8x512xf32, #tpu.memory_space<vmem>>, %arg2: memref<8x32xf32, #tpu.memory_space<vmem>>, %arg3: memref<8x32xf32, #tpu.memory_space<vmem>>, %arg4: memref<512x128xf32, #tpu.memory_space<vmem>>, %arg5: memref<32x128xf32, #tpu.memory_space<vmem>>, %arg6: memref<1x128xf32, #tpu.memory_space<vmem>>, %arg7: memref<2x8x32xf32, #tpu.memory_space<vmem>>, %arg8: memref<8x32xf32, #tpu.memory_space<vmem>>, %arg9: memref<8x32xf32, #tpu.memory_space<vmem>>, %arg10: memref<8x32xf32, #tpu.memory_space<vmem>>, %arg11: memref<8x32xf32, #tpu.memory_space<vmem>>) attributes {dimension_semantics = [#tpu.dimension_semantics<arbitrary>], iteration_bounds = array<i64: 1>, scalar_prefetch = 0 : i64, scratch_operands = 2 : i64, tpu.core_type = #tpu.core_type<tc>, window_params = [{pipeline_mode = #tpu.pipeline_mode<synchronous>, transform_indices = @transform_0, window_bounds = array<i64: 2, 8, 512>}, {pipeline_mode = #tpu.pipeline_mode<synchronous>, transform_indices = @transform_1, window_bounds = array<i64: 8, 32>}, {pipeline_mode = #tpu.pipeline_mode<synchronous>, transform_indices = @transform_2, window_bounds = array<i64: 8, 32>}, {pipeline_mode = #tpu.pipeline_mode<synchronous>, transform_indices = @transform_3, window_bounds = array<i64: 512, 128>}, {pipeline_mode = #tpu.pipeline_mode<synchronous>, transform_indices = @transform_4, window_bounds = array<i64: 32, 128>}, {pipeline_mode = #tpu.pipeline_mode<synchronous>, transform_indices = @transform_5, window_bounds = array<i64: 1, 128>}, {pipeline_mode = #tpu.pipeline_mode<synchronous>, transform_indices = @transform_6, window_bounds = array<i64: 2, 8, 32>}, {pipeline_mode = #tpu.pipeline_mode<synchronous>, transform_indices = @transform_7, window_bounds = array<i64: 8, 32>}, {pipeline_mode = #tpu.pipeline_mode<synchronous>, transform_indices = @transform_8, window_bounds = array<i64: 8, 32>}]} {
    %c0 = arith.constant 0 : index
    %c0_0 = arith.constant 0 : index
    %0 = vector.load %arg2[%c0, %c0_0] : memref<8x32xf32, #tpu.memory_space<vmem>>, vector<8x32xf32>
    %c0_1 = arith.constant 0 : index
    %c0_2 = arith.constant 0 : index
    %1 = vector.load %arg10[%c0_1, %c0_2] : memref<8x32xf32, #tpu.memory_space<vmem>>, vector<8x32xf32>
    tpu.vector_store %arg10[%c0_1, %c0_2], %0 {strides = array<i32>} : memref<8x32xf32, #tpu.memory_space<vmem>>, vector<8x32xf32>,
    %c0_3 = arith.constant 0 : index
    %c0_4 = arith.constant 0 : index
    %2 = vector.load %arg3[%c0_3, %c0_4] : memref<8x32xf32, #tpu.memory_space<vmem>>, vector<8x32xf32>
    %c0_5 = arith.constant 0 : index
    %c0_6 = arith.constant 0 : index
    %3 = vector.load %arg11[%c0_5, %c0_6] : memref<8x32xf32, #tpu.memory_space<vmem>>, vector<8x32xf32>
    tpu.vector_store %arg11[%c0_5, %c0_6], %2 {strides = array<i32>} : memref<8x32xf32, #tpu.memory_space<vmem>>, vector<8x32xf32>,
    %c0_i32 = arith.constant 0 : i32
    %c2_i32 = arith.constant 2 : i32
    %4 = arith.addi %c0_i32, %c2_i32 : i32
    %c1_i32 = arith.constant 1 : i32
    scf.for %arg12 = %c0_i32 to %4 step %c1_i32  : i32 {
      %9 = arith.index_cast %arg12 : i32 to index
      %c0_16 = arith.constant 0 : index
      %c0_17 = arith.constant 0 : index
      %10 = vector.load %arg1[%9, %c0_16, %c0_17] : memref<2x8x512xf32, #tpu.memory_space<vmem>>, vector<1x8x512xf32>
      %11 = vector.shape_cast %10 : vector<1x8x512xf32> to vector<8x512xf32>
      %c0_18 = arith.constant 0 : index
      %c0_19 = arith.constant 0 : index
      %12 = vector.load %arg10[%c0_18, %c0_19] : memref<8x32xf32, #tpu.memory_space<vmem>>, vector<8x32xf32>
      %c0_20 = arith.constant 0 : index
      %c0_21 = arith.constant 0 : index
      %13 = vector.load %arg4[%c0_20, %c0_21] : memref<512x128xf32, #tpu.memory_space<vmem>>, vector<512x128xf32>
      %cst = arith.constant dense<0.000000e+00> : vector<8x128xf32>
      %14 = tpu.matmul %11, %13, %cst {dimension_numbers = #tpu.dot_dimension_numbers<[1], [0], [0], [1], [0, 0, 1, 1], [], []>} : vector<8x512xf32>, vector<512x128xf32>, vector<8x128xf32> -> vector<8x128xf32>
      %c0_22 = arith.constant 0 : index
      %c0_23 = arith.constant 0 : index
      %15 = vector.load %arg5[%c0_22, %c0_23] : memref<32x128xf32, #tpu.memory_space<vmem>>, vector<32x128xf32>
      %cst_24 = arith.constant dense<0.000000e+00> : vector<8x128xf32>
      %16 = tpu.matmul %12, %15, %cst_24 {dimension_numbers = #tpu.dot_dimension_numbers<[1], [0], [0], [1], [0, 0, 1, 1], [], []>} : vector<8x32xf32>, vector<32x128xf32>, vector<8x128xf32> -> vector<8x128xf32>
      %17 = arith.addf %14, %16 : vector<8x128xf32>
      %c0_25 = arith.constant 0 : index
      %c0_26 = arith.constant 0 : index
      %18 = vector.load %arg6[%c0_25, %c0_26] : memref<1x128xf32, #tpu.memory_space<vmem>>, vector<1x128xf32>
      %19 = vector.broadcast %18 : vector<1x128xf32> to vector<8x128xf32>
      %20 = arith.addf %17, %19 : vector<8x128xf32>
      %21 = vector.extract_strided_slice %20 {offsets = [0, 0], sizes = [8, 32], strides = [1, 1]} : vector<8x128xf32> to vector<8x32xf32>
      %22 = arith.negf %21 : vector<8x32xf32>
      %23 = math.exp %22 : vector<8x32xf32>
      %cst_27 = arith.constant 1.000000e+00 : f32
      %24 = vector.broadcast %cst_27 : f32 to vector<8x32xf32>
      %25 = arith.addf %24, %23 : vector<8x32xf32>
      %26 = arith.divf %24, %25 : vector<8x32xf32>
      %27 = vector.extract_strided_slice %20 {offsets = [0, 32], sizes = [8, 32], strides = [1, 1]} : vector<8x128xf32> to vector<8x32xf32>
      %28 = arith.negf %27 : vector<8x32xf32>
      %29 = math.exp %28 : vector<8x32xf32>
      %cst_28 = arith.constant 1.000000e+00 : f32
      %30 = vector.broadcast %cst_28 : f32 to vector<8x32xf32>
      %31 = arith.addf %30, %29 : vector<8x32xf32>
      %32 = arith.divf %30, %31 : vector<8x32xf32>
      %33 = vector.extract_strided_slice %20 {offsets = [0, 64], sizes = [8, 32], strides = [1, 1]} : vector<8x128xf32> to vector<8x32xf32>
      %34 = math.tanh %33 : vector<8x32xf32>
      %35 = vector.extract_strided_slice %20 {offsets = [0, 96], sizes = [8, 32], strides = [1, 1]} : vector<8x128xf32> to vector<8x32xf32>
      %36 = arith.negf %35 : vector<8x32xf32>
      %37 = math.exp %36 : vector<8x32xf32>
      %cst_29 = arith.constant 1.000000e+00 : f32
      %38 = vector.broadcast %cst_29 : f32 to vector<8x32xf32>
      %39 = arith.addf %38, %37 : vector<8x32xf32>
      %40 = arith.divf %38, %39 : vector<8x32xf32>
      %c0_30 = arith.constant 0 : index
      %c0_31 = arith.constant 0 : index
      %41 = vector.load %arg11[%c0_30, %c0_31] : memref<8x32xf32, #tpu.memory_space<vmem>>, vector<8x32xf32>
      %42 = arith.mulf %32, %41 : vector<8x32xf32>
      %43 = arith.mulf %26, %34 : vector<8x32xf32>
      %44 = arith.addf %42, %43 : vector<8x32xf32>
      %45 = math.tanh %44 : vector<8x32xf32>
      %46 = arith.mulf %40, %45 : vector<8x32xf32>
      %c0_32 = arith.constant 0 : index
      %c0_33 = arith.constant 0 : index
      %47 = vector.load %arg10[%c0_32, %c0_33] : memref<8x32xf32, #tpu.memory_space<vmem>>, vector<8x32xf32>
      tpu.vector_store %arg10[%c0_32, %c0_33], %46 {strides = array<i32>} : memref<8x32xf32, #tpu.memory_space<vmem>>, vector<8x32xf32>,
      %c0_34 = arith.constant 0 : index
      %c0_35 = arith.constant 0 : index
      %48 = vector.load %arg11[%c0_34, %c0_35] : memref<8x32xf32, #tpu.memory_space<vmem>>, vector<8x32xf32>
      tpu.vector_store %arg11[%c0_34, %c0_35], %44 {strides = array<i32>} : memref<8x32xf32, #tpu.memory_space<vmem>>, vector<8x32xf32>,
      %49 = arith.index_cast %arg12 : i32 to index
      %c0_36 = arith.constant 0 : index
      %c0_37 = arith.constant 0 : index
      %50 = vector.load %arg7[%49, %c0_36, %c0_37] : memref<2x8x32xf32, #tpu.memory_space<vmem>>, vector<1x8x32xf32>
      %51 = vector.shape_cast %50 : vector<1x8x32xf32> to vector<8x32xf32>
      %52 = vector.shape_cast %46 : vector<8x32xf32> to vector<1x8x32xf32>
      tpu.vector_store %arg7[%49, %c0_36, %c0_37], %52 {strides = array<i32>} : memref<2x8x32xf32, #tpu.memory_space<vmem>>, vector<1x8x32xf32>,
    }
    %c2_i32_7 = arith.constant 2 : i32
    %c0_8 = arith.constant 0 : index
    %c0_9 = arith.constant 0 : index
    %5 = vector.load %arg10[%c0_8, %c0_9] : memref<8x32xf32, #tpu.memory_space<vmem>>, vector<8x32xf32>
    %c0_10 = arith.constant 0 : index
    %c0_11 = arith.constant 0 : index
    %6 = vector.load %arg8[%c0_10, %c0_11] : memref<8x32xf32, #tpu.memory_space<vmem>>, vector<8x32xf32>
    tpu.vector_store %arg8[%c0_10, %c0_11], %5 {strides = array<i32>} : memref<8x32xf32, #tpu.memory_space<vmem>>, vector<8x32xf32>,
    %c0_12 = arith.constant 0 : index
    %c0_13 = arith.constant 0 : index
    %7 = vector.load %arg11[%c0_12, %c0_13] : memref<8x32xf32, #tpu.memory_space<vmem>>, vector<8x32xf32>
    %c0_14 = arith.constant 0 : index
    %c0_15 = arith.constant 0 : index
    %8 = vector.load %arg9[%c0_14, %c0_15] : memref<8x32xf32, #tpu.memory_space<vmem>>, vector<8x32xf32>
    tpu.vector_store %arg9[%c0_14, %c0_15], %7 {strides = array<i32>} : memref<8x32xf32, #tpu.memory_space<vmem>>, vector<8x32xf32>,
    return
  }
  func.func @transform_0(%arg0: i32) -> (i32, i32, i32) {
    %c0_i32 = arith.constant 0 : i32
    %c0_i32_0 = arith.constant 0 : i32
    %c0_i32_1 = arith.constant 0 : i32
    %c0_i32_2 = arith.constant 0 : i32
    return %c0_i32, %c0_i32_0, %c0_i32_1 : i32, i32, i32
  }
  func.func @transform_1(%arg0: i32) -> (i32, i32) {
    %c0_i32 = arith.constant 0 : i32
    %c0_i32_0 = arith.constant 0 : i32
    %c0_i32_1 = arith.constant 0 : i32
    return %c0_i32, %c0_i32_0 : i32, i32
  }
  func.func @transform_2(%arg0: i32) -> (i32, i32) {
    %c0_i32 = arith.constant 0 : i32
    %c0_i32_0 = arith.constant 0 : i32
    %c0_i32_1 = arith.constant 0 : i32
    return %c0_i32, %c0_i32_0 : i32, i32
  }
  func.func @transform_3(%arg0: i32) -> (i32, i32) {
    %c0_i32 = arith.constant 0 : i32
    %c0_i32_0 = arith.constant 0 : i32
    %c0_i32_1 = arith.constant 0 : i32
    return %c0_i32, %c0_i32_0 : i32, i32
  }
  func.func @transform_4(%arg0: i32) -> (i32, i32) {
    %c0_i32 = arith.constant 0 : i32
    %c0_i32_0 = arith.constant 0 : i32
    %c0_i32_1 = arith.constant 0 : i32
    return %c0_i32, %c0_i32_0 : i32, i32
  }
  func.func @transform_5(%arg0: i32) -> (i32, i32) {
    %c0_i32 = arith.constant 0 : i32
    %c0_i32_0 = arith.constant 0 : i32
    %c0_i32_1 = arith.constant 0 : i32
    return %c0_i32, %c0_i32_0 : i32, i32
  }
  func.func @transform_6(%arg0: i32) -> (i32, i32, i32) {
    %c0_i32 = arith.constant 0 : i32
    %c0_i32_0 = arith.constant 0 : i32
    %c0_i32_1 = arith.constant 0 : i32
    %c0_i32_2 = arith.constant 0 : i32
    return %c0_i32, %c0_i32_0, %c0_i32_1 : i32, i32, i32
  }
  func.func @transform_7(%arg0: i32) -> (i32, i32) {
    %c0_i32 = arith.constant 0 : i32
    %c0_i32_0 = arith.constant 0 : i32
    %c0_i32_1 = arith.constant 0 : i32
    return %c0_i32, %c0_i32_0 : i32, i32
  }
  func.func @transform_8(%arg0: i32) -> (i32, i32) {
    %c0_i32 = arith.constant 0 : i32
    %c0_i32_0 = arith.constant 0 : i32
    %c0_i32_1 = arith.constant 0 : i32
    return %c0_i32, %c0_i32_0 : i32, i32
  }
}

module attributes {stable_mosaic.version = 11 : i64} {
  func.func @_lstm_layer_kernel(%arg0: i32, %arg1: memref<2x8x512xf32, #tpu.memory_space<vmem>>, %arg2: memref<8x32xf32, #tpu.memory_space<vmem>>, %arg3: memref<8x32xf32, #tpu.memory_space<vmem>>, %arg4: memref<512x128xf32, #tpu.memory_space<vmem>>, %arg5: memref<32x128xf32, #tpu.memory_space<vmem>>, %arg6: memref<1x128xf32, #tpu.memory_space<vmem>>, %arg7: memref<2x8x32xf32, #tpu.memory_space<vmem>>, %arg8: memref<8x32xf32, #tpu.memory_space<vmem>>, %arg9: memref<8x32xf32, #tpu.memory_space<vmem>>, %arg10: memref<8x32xf32, #tpu.memory_space<vmem>>, %arg11: memref<8x32xf32, #tpu.memory_space<vmem>>) attributes {dimension_semantics = [#tpu.dimension_semantics<arbitrary>], iteration_bounds = array<i64: 1>, scalar_prefetch = 0 : i64, scratch_operands = 2 : i64, tpu.core_type = #tpu.core_type<tc>, window_params = [{pipeline_mode = #tpu.pipeline_mode<synchronous>, transform_indices = @transform_0, window_bounds = array<i64: 2, 8, 512>}, {pipeline_mode = #tpu.pipeline_mode<synchronous>, transform_indices = @transform_1, window_bounds = array<i64: 8, 32>}, {pipeline_mode = #tpu.pipeline_mode<synchronous>, transform_indices = @transform_2, window_bounds = array<i64: 8, 32>}, {pipeline_mode = #tpu.pipeline_mode<synchronous>, transform_indices = @transform_3, window_bounds = array<i64: 512, 128>}, {pipeline_mode = #tpu.pipeline_mode<synchronous>, transform_indices = @transform_4, window_bounds = array<i64: 32, 128>}, {pipeline_mode = #tpu.pipeline_mode<synchronous>, transform_indices = @transform_5, window_bounds = array<i64: 1, 128>}, {pipeline_mode = #tpu.pipeline_mode<synchronous>, transform_indices = @transform_6, window_bounds = array<i64: 2, 8, 32>}, {pipeline_mode = #tpu.pipeline_mode<synchronous>, transform_indices = @transform_7, window_bounds = array<i64: 8, 32>}, {pipeline_mode = #tpu.pipeline_mode<synchronous>, transform_indices = @transform_8, window_bounds = array<i64: 8, 32>}]} {
    %c0 = arith.constant 0 : index
    %c0_0 = arith.constant 0 : index
    %0 = vector.load %arg2[%c0, %c0_0] : memref<8x32xf32, #tpu.memory_space<vmem>>, vector<8x32xf32>
    %c0_1 = arith.constant 0 : index
    %c0_2 = arith.constant 0 : index
    %1 = vector.load %arg10[%c0_1, %c0_2] : memref<8x32xf32, #tpu.memory_space<vmem>>, vector<8x32xf32>
    tpu.vector_store %arg10[%c0_1, %c0_2], %0 {strides = array<i32>} : memref<8x32xf32, #tpu.memory_space<vmem>>, vector<8x32xf32>,
    %c0_3 = arith.constant 0 : index
    %c0_4 = arith.constant 0 : index
    %2 = vector.load %arg3[%c0_3, %c0_4] : memref<8x32xf32, #tpu.memory_space<vmem>>, vector<8x32xf32>
    %c0_5 = arith.constant 0 : index
    %c0_6 = arith.constant 0 : index
    %3 = vector.load %arg11[%c0_5, %c0_6] : memref<8x32xf32, #tpu.memory_space<vmem>>, vector<8x32xf32>
    tpu.vector_store %arg11[%c0_5, %c0_6], %2 {strides = array<i32>} : memref<8x32xf32, #tpu.memory_space<vmem>>, vector<8x32xf32>,
    %c0_i32 = arith.constant 0 : i32
    %c2_i32 = arith.constant 2 : i32
    %4 = arith.addi %c0_i32, %c2_i32 : i32
    %c1_i32 = arith.constant 1 : i32
    scf.for %arg12 = %c0_i32 to %4 step %c1_i32  : i32 {
      %9 = arith.index_cast %arg12 : i32 to index
      %c0_16 = arith.constant 0 : index
      %c0_17 = arith.constant 0 : index
      %10 = vector.load %arg1[%9, %c0_16, %c0_17] : memref<2x8x512xf32, #tpu.memory_space<vmem>>, vector<1x8x512xf32>
      %11 = vector.shape_cast %10 : vector<1x8x512xf32> to vector<8x512xf32>
      %c0_18 = arith.constant 0 : index
      %c0_19 = arith.constant 0 : index
      %12 = vector.load %arg10[%c0_18, %c0_19] : memref<8x32xf32, #tpu.memory_space<vmem>>, vector<8x32xf32>
      %c0_20 = arith.constant 0 : index
      %c0_21 = arith.constant 0 : index
      %13 = vector.load %arg4[%c0_20, %c0_21] : memref<512x128xf32, #tpu.memory_space<vmem>>, vector<512x128xf32>
      %cst = arith.constant dense<0.000000e+00> : vector<8x128xf32>
      %14 = tpu.matmul %11, %13, %cst {dimension_numbers = #tpu.dot_dimension_numbers<[1], [0], [0], [1], [0, 0, 1, 1], [], []>} : vector<8x512xf32>, vector<512x128xf32>, vector<8x128xf32> -> vector<8x128xf32>
      %c0_22 = arith.constant 0 : index
      %c0_23 = arith.constant 0 : index
      %15 = vector.load %arg5[%c0_22, %c0_23] : memref<32x128xf32, #tpu.memory_space<vmem>>, vector<32x128xf32>
      %cst_24 = arith.constant dense<0.000000e+00> : vector<8x128xf32>
      %16 = tpu.matmul %12, %15, %cst_24 {dimension_numbers = #tpu.dot_dimension_numbers<[1], [0], [0], [1], [0, 0, 1, 1], [], []>} : vector<8x32xf32>, vector<32x128xf32>, vector<8x128xf32> -> vector<8x128xf32>
      %17 = arith.addf %14, %16 : vector<8x128xf32>
      %c0_25 = arith.constant 0 : index
      %c0_26 = arith.constant 0 : index
      %18 = vector.load %arg6[%c0_25, %c0_26] : memref<1x128xf32, #tpu.memory_space<vmem>>, vector<1x128xf32>
      %19 = vector.broadcast %18 : vector<1x128xf32> to vector<8x128xf32>
      %20 = arith.addf %17, %19 : vector<8x128xf32>
      %21 = vector.extract_strided_slice %20 {offsets = [0, 0], sizes = [8, 32], strides = [1, 1]} : vector<8x128xf32> to vector<8x32xf32>
      %22 = arith.negf %21 : vector<8x32xf32>
      %23 = math.exp %22 : vector<8x32xf32>
      %cst_27 = arith.constant 1.000000e+00 : f32
      %24 = vector.broadcast %cst_27 : f32 to vector<8x32xf32>
      %25 = arith.addf %24, %23 : vector<8x32xf32>
      %26 = arith.divf %24, %25 : vector<8x32xf32>
      %27 = vector.extract_strided_slice %20 {offsets = [0, 32], sizes = [8, 32], strides = [1, 1]} : vector<8x128xf32> to vector<8x32xf32>
      %28 = arith.negf %27 : vector<8x32xf32>
      %29 = math.exp %28 : vector<8x32xf32>
      %cst_28 = arith.constant 1.000000e+00 : f32
      %30 = vector.broadcast %cst_28 : f32 to vector<8x32xf32>
      %31 = arith.addf %30, %29 : vector<8x32xf32>
      %32 = arith.divf %30, %31 : vector<8x32xf32>
      %33 = vector.extract_strided_slice %20 {offsets = [0, 64], sizes = [8, 32], strides = [1, 1]} : vector<8x128xf32> to vector<8x32xf32>
      %34 = math.tanh %33 : vector<8x32xf32>
      %35 = vector.extract_strided_slice %20 {offsets = [0, 96], sizes = [8, 32], strides = [1, 1]} : vector<8x128xf32> to vector<8x32xf32>
      %36 = arith.negf %35 : vector<8x32xf32>
      %37 = math.exp %36 : vector<8x32xf32>
      %cst_29 = arith.constant 1.000000e+00 : f32
      %38 = vector.broadcast %cst_29 : f32 to vector<8x32xf32>
      %39 = arith.addf %38, %37 : vector<8x32xf32>
      %40 = arith.divf %38, %39 : vector<8x32xf32>
      %c0_30 = arith.constant 0 : index
      %c0_31 = arith.constant 0 : index
      %41 = vector.load %arg11[%c0_30, %c0_31] : memref<8x32xf32, #tpu.memory_space<vmem>>, vector<8x32xf32>
      %42 = arith.mulf %32, %41 : vector<8x32xf32>
      %43 = arith.mulf %26, %34 : vector<8x32xf32>
      %44 = arith.addf %42, %43 : vector<8x32xf32>
      %45 = math.tanh %44 : vector<8x32xf32>
      %46 = arith.mulf %40, %45 : vector<8x32xf32>
      %c0_32 = arith.constant 0 : index
      %c0_33 = arith.constant 0 : index
      %47 = vector.load %arg10[%c0_32, %c0_33] : memref<8x32xf32, #tpu.memory_space<vmem>>, vector<8x32xf32>
      tpu.vector_store %arg10[%c0_32, %c0_33], %46 {strides = array<i32>} : memref<8x32xf32, #tpu.memory_space<vmem>>, vector<8x32xf32>,
      %c0_34 = arith.constant 0 : index
      %c0_35 = arith.constant 0 : index
      %48 = vector.load %arg11[%c0_34, %c0_35] : memref<8x32xf32, #tpu.memory_space<vmem>>, vector<8x32xf32>
      tpu.vector_store %arg11[%c0_34, %c0_35], %44 {strides = array<i32>} : memref<8x32xf32, #tpu.memory_space<vmem>>, vector<8x32xf32>,
      %49 = arith.index_cast %arg12 : i32 to index
      %c0_36 = arith.constant 0 : index
      %c0_37 = arith.constant 0 : index
      %50 = vector.load %arg7[%49, %c0_36, %c0_37] : memref<2x8x32xf32, #tpu.memory_space<vmem>>, vector<1x8x32xf32>
      %51 = vector.shape_cast %50 : vector<1x8x32xf32> to vector<8x32xf32>
      %52 = vector.shape_cast %46 : vector<8x32xf32> to vector<1x8x32xf32>
      tpu.vector_store %arg7[%49, %c0_36, %c0_37], %52 {strides = array<i32>} : memref<2x8x32xf32, #tpu.memory_space<vmem>>, vector<1x8x32xf32>,
    }
    %c2_i32_7 = arith.constant 2 : i32
    %c0_8 = arith.constant 0 : index
    %c0_9 = arith.constant 0 : index
    %5 = vector.load %arg10[%c0_8, %c0_9] : memref<8x32xf32, #tpu.memory_space<vmem>>, vector<8x32xf32>
    %c0_10 = arith.constant 0 : index
    %c0_11 = arith.constant 0 : index
    %6 = vector.load %arg8[%c0_10, %c0_11] : memref<8x32xf32, #tpu.memory_space<vmem>>, vector<8x32xf32>
    tpu.vector_store %arg8[%c0_10, %c0_11], %5 {strides = array<i32>} : memref<8x32xf32, #tpu.memory_space<vmem>>, vector<8x32xf32>,
    %c0_12 = arith.constant 0 : index
    %c0_13 = arith.constant 0 : index
    %7 = vector.load %arg11[%c0_12, %c0_13] : memref<8x32xf32, #tpu.memory_space<vmem>>, vector<8x32xf32>
    %c0_14 = arith.constant 0 : index
    %c0_15 = arith.constant 0 : index
    %8 = vector.load %arg9[%c0_14, %c0_15] : memref<8x32xf32, #tpu.memory_space<vmem>>, vector<8x32xf32>
    tpu.vector_store %arg9[%c0_14, %c0_15], %7 {strides = array<i32>} : memref<8x32xf32, #tpu.memory_space<vmem>>, vector<8x32xf32>,
    return
  }
  func.func @transform_0(%arg0: i32) -> (i32, i32, i32) {
    %c0_i32 = arith.constant 0 : i32
    %c0_i32_0 = arith.constant 0 : i32
    %c0_i32_1 = arith.constant 0 : i32
    %c0_i32_2 = arith.constant 0 : i32
    return %c0_i32, %c0_i32_0, %c0_i32_1 : i32, i32, i32
  }
  func.func @transform_1(%arg0: i32) -> (i32, i32) {
    %c0_i32 = arith.constant 0 : i32
    %c0_i32_0 = arith.constant 0 : i32
    %c0_i32_1 = arith.constant 0 : i32
    return %c0_i32, %c0_i32_0 : i32, i32
  }
  func.func @transform_2(%arg0: i32) -> (i32, i32) {
    %c0_i32 = arith.constant 0 : i32
    %c0_i32_0 = arith.constant 0 : i32
    %c0_i32_1 = arith.constant 0 : i32
    return %c0_i32, %c0_i32_0 : i32, i32
  }
  func.func @transform_3(%arg0: i32) -> (i32, i32) {
    %c0_i32 = arith.constant 0 : i32
    %c0_i32_0 = arith.constant 0 : i32
    %c0_i32_1 = arith.constant 0 : i32
    return %c0_i32, %c0_i32_0 : i32, i32
  }
  func.func @transform_4(%arg0: i32) -> (i32, i32) {
    %c0_i32 = arith.constant 0 : i32
    %c0_i32_0 = arith.constant 0 : i32
    %c0_i32_1 = arith.constant 0 : i32
    return %c0_i32, %c0_i32_0 : i32, i32
  }
  func.func @transform_5(%arg0: i32) -> (i32, i32) {
    %c0_i32 = arith.constant 0 : i32
    %c0_i32_0 = arith.constant 0 : i32
    %c0_i32_1 = arith.constant 0 : i32
    return %c0_i32, %c0_i32_0 : i32, i32
  }
  func.func @transform_6(%arg0: i32) -> (i32, i32, i32) {
    %c0_i32 = arith.constant 0 : i32
    %c0_i32_0 = arith.constant 0 : i32
    %c0_i32_1 = arith.constant 0 : i32
    %c0_i32_2 = arith.constant 0 : i32
    return %c0_i32, %c0_i32_0, %c0_i32_1 : i32, i32, i32
  }
  func.func @transform_7(%arg0: i32) -> (i32, i32) {
    %c0_i32 = arith.constant 0 : i32
    %c0_i32_0 = arith.constant 0 : i32
    %c0_i32_1 = arith.constant 0 : i32
    return %c0_i32, %c0_i32_0 : i32, i32
  }
  func.func @transform_8(%arg0: i32) -> (i32, i32) {
    %c0_i32 = arith.constant 0 : i32
    %c0_i32_0 = arith.constant 0 : i32
    %c0_i32_1 = arith.constant 0 : i32
    return %c0_i32, %c0_i32_0 : i32, i32
  }
}

module attributes {stable_mosaic.version = 11 : i64} {
  func.func @_lstm_layer_kernel(%arg0: i32, %arg1: memref<2x8x32xf32, #tpu.memory_space<vmem>>, %arg2: memref<8x32xf32, #tpu.memory_space<vmem>>, %arg3: memref<8x32xf32, #tpu.memory_space<vmem>>, %arg4: memref<32x128xf32, #tpu.memory_space<vmem>>, %arg5: memref<32x128xf32, #tpu.memory_space<vmem>>, %arg6: memref<1x128xf32, #tpu.memory_space<vmem>>, %arg7: memref<2x8x32xf32, #tpu.memory_space<vmem>>, %arg8: memref<8x32xf32, #tpu.memory_space<vmem>>, %arg9: memref<8x32xf32, #tpu.memory_space<vmem>>, %arg10: memref<8x32xf32, #tpu.memory_space<vmem>>, %arg11: memref<8x32xf32, #tpu.memory_space<vmem>>) attributes {dimension_semantics = [#tpu.dimension_semantics<arbitrary>], iteration_bounds = array<i64: 1>, scalar_prefetch = 0 : i64, scratch_operands = 2 : i64, tpu.core_type = #tpu.core_type<tc>, window_params = [{pipeline_mode = #tpu.pipeline_mode<synchronous>, transform_indices = @transform_0, window_bounds = array<i64: 2, 8, 32>}, {pipeline_mode = #tpu.pipeline_mode<synchronous>, transform_indices = @transform_1, window_bounds = array<i64: 8, 32>}, {pipeline_mode = #tpu.pipeline_mode<synchronous>, transform_indices = @transform_2, window_bounds = array<i64: 8, 32>}, {pipeline_mode = #tpu.pipeline_mode<synchronous>, transform_indices = @transform_3, window_bounds = array<i64: 32, 128>}, {pipeline_mode = #tpu.pipeline_mode<synchronous>, transform_indices = @transform_4, window_bounds = array<i64: 32, 128>}, {pipeline_mode = #tpu.pipeline_mode<synchronous>, transform_indices = @transform_5, window_bounds = array<i64: 1, 128>}, {pipeline_mode = #tpu.pipeline_mode<synchronous>, transform_indices = @transform_6, window_bounds = array<i64: 2, 8, 32>}, {pipeline_mode = #tpu.pipeline_mode<synchronous>, transform_indices = @transform_7, window_bounds = array<i64: 8, 32>}, {pipeline_mode = #tpu.pipeline_mode<synchronous>, transform_indices = @transform_8, window_bounds = array<i64: 8, 32>}]} {
    %c0 = arith.constant 0 : index
    %c0_0 = arith.constant 0 : index
    %0 = vector.load %arg2[%c0, %c0_0] : memref<8x32xf32, #tpu.memory_space<vmem>>, vector<8x32xf32>
    %c0_1 = arith.constant 0 : index
    %c0_2 = arith.constant 0 : index
    %1 = vector.load %arg10[%c0_1, %c0_2] : memref<8x32xf32, #tpu.memory_space<vmem>>, vector<8x32xf32>
    tpu.vector_store %arg10[%c0_1, %c0_2], %0 {strides = array<i32>} : memref<8x32xf32, #tpu.memory_space<vmem>>, vector<8x32xf32>,
    %c0_3 = arith.constant 0 : index
    %c0_4 = arith.constant 0 : index
    %2 = vector.load %arg3[%c0_3, %c0_4] : memref<8x32xf32, #tpu.memory_space<vmem>>, vector<8x32xf32>
    %c0_5 = arith.constant 0 : index
    %c0_6 = arith.constant 0 : index
    %3 = vector.load %arg11[%c0_5, %c0_6] : memref<8x32xf32, #tpu.memory_space<vmem>>, vector<8x32xf32>
    tpu.vector_store %arg11[%c0_5, %c0_6], %2 {strides = array<i32>} : memref<8x32xf32, #tpu.memory_space<vmem>>, vector<8x32xf32>,
    %c0_i32 = arith.constant 0 : i32
    %c2_i32 = arith.constant 2 : i32
    %4 = arith.addi %c0_i32, %c2_i32 : i32
    %c1_i32 = arith.constant 1 : i32
    scf.for %arg12 = %c0_i32 to %4 step %c1_i32  : i32 {
      %9 = arith.index_cast %arg12 : i32 to index
      %c0_16 = arith.constant 0 : index
      %c0_17 = arith.constant 0 : index
      %10 = vector.load %arg1[%9, %c0_16, %c0_17] : memref<2x8x32xf32, #tpu.memory_space<vmem>>, vector<1x8x32xf32>
      %11 = vector.shape_cast %10 : vector<1x8x32xf32> to vector<8x32xf32>
      %c0_18 = arith.constant 0 : index
      %c0_19 = arith.constant 0 : index
      %12 = vector.load %arg10[%c0_18, %c0_19] : memref<8x32xf32, #tpu.memory_space<vmem>>, vector<8x32xf32>
      %c0_20 = arith.constant 0 : index
      %c0_21 = arith.constant 0 : index
      %13 = vector.load %arg4[%c0_20, %c0_21] : memref<32x128xf32, #tpu.memory_space<vmem>>, vector<32x128xf32>
      %cst = arith.constant dense<0.000000e+00> : vector<8x128xf32>
      %14 = tpu.matmul %11, %13, %cst {dimension_numbers = #tpu.dot_dimension_numbers<[1], [0], [0], [1], [0, 0, 1, 1], [], []>} : vector<8x32xf32>, vector<32x128xf32>, vector<8x128xf32> -> vector<8x128xf32>
      %c0_22 = arith.constant 0 : index
      %c0_23 = arith.constant 0 : index
      %15 = vector.load %arg5[%c0_22, %c0_23] : memref<32x128xf32, #tpu.memory_space<vmem>>, vector<32x128xf32>
      %cst_24 = arith.constant dense<0.000000e+00> : vector<8x128xf32>
      %16 = tpu.matmul %12, %15, %cst_24 {dimension_numbers = #tpu.dot_dimension_numbers<[1], [0], [0], [1], [0, 0, 1, 1], [], []>} : vector<8x32xf32>, vector<32x128xf32>, vector<8x128xf32> -> vector<8x128xf32>
      %17 = arith.addf %14, %16 : vector<8x128xf32>
      %c0_25 = arith.constant 0 : index
      %c0_26 = arith.constant 0 : index
      %18 = vector.load %arg6[%c0_25, %c0_26] : memref<1x128xf32, #tpu.memory_space<vmem>>, vector<1x128xf32>
      %19 = vector.broadcast %18 : vector<1x128xf32> to vector<8x128xf32>
      %20 = arith.addf %17, %19 : vector<8x128xf32>
      %21 = vector.extract_strided_slice %20 {offsets = [0, 0], sizes = [8, 32], strides = [1, 1]} : vector<8x128xf32> to vector<8x32xf32>
      %22 = arith.negf %21 : vector<8x32xf32>
      %23 = math.exp %22 : vector<8x32xf32>
      %cst_27 = arith.constant 1.000000e+00 : f32
      %24 = vector.broadcast %cst_27 : f32 to vector<8x32xf32>
      %25 = arith.addf %24, %23 : vector<8x32xf32>
      %26 = arith.divf %24, %25 : vector<8x32xf32>
      %27 = vector.extract_strided_slice %20 {offsets = [0, 32], sizes = [8, 32], strides = [1, 1]} : vector<8x128xf32> to vector<8x32xf32>
      %28 = arith.negf %27 : vector<8x32xf32>
      %29 = math.exp %28 : vector<8x32xf32>
      %cst_28 = arith.constant 1.000000e+00 : f32
      %30 = vector.broadcast %cst_28 : f32 to vector<8x32xf32>
      %31 = arith.addf %30, %29 : vector<8x32xf32>
      %32 = arith.divf %30, %31 : vector<8x32xf32>
      %33 = vector.extract_strided_slice %20 {offsets = [0, 64], sizes = [8, 32], strides = [1, 1]} : vector<8x128xf32> to vector<8x32xf32>
      %34 = math.tanh %33 : vector<8x32xf32>
      %35 = vector.extract_strided_slice %20 {offsets = [0, 96], sizes = [8, 32], strides = [1, 1]} : vector<8x128xf32> to vector<8x32xf32>
      %36 = arith.negf %35 : vector<8x32xf32>
      %37 = math.exp %36 : vector<8x32xf32>
      %cst_29 = arith.constant 1.000000e+00 : f32
      %38 = vector.broadcast %cst_29 : f32 to vector<8x32xf32>
      %39 = arith.addf %38, %37 : vector<8x32xf32>
      %40 = arith.divf %38, %39 : vector<8x32xf32>
      %c0_30 = arith.constant 0 : index
      %c0_31 = arith.constant 0 : index
      %41 = vector.load %arg11[%c0_30, %c0_31] : memref<8x32xf32, #tpu.memory_space<vmem>>, vector<8x32xf32>
      %42 = arith.mulf %32, %41 : vector<8x32xf32>
      %43 = arith.mulf %26, %34 : vector<8x32xf32>
      %44 = arith.addf %42, %43 : vector<8x32xf32>
      %45 = math.tanh %44 : vector<8x32xf32>
      %46 = arith.mulf %40, %45 : vector<8x32xf32>
      %c0_32 = arith.constant 0 : index
      %c0_33 = arith.constant 0 : index
      %47 = vector.load %arg10[%c0_32, %c0_33] : memref<8x32xf32, #tpu.memory_space<vmem>>, vector<8x32xf32>
      tpu.vector_store %arg10[%c0_32, %c0_33], %46 {strides = array<i32>} : memref<8x32xf32, #tpu.memory_space<vmem>>, vector<8x32xf32>,
      %c0_34 = arith.constant 0 : index
      %c0_35 = arith.constant 0 : index
      %48 = vector.load %arg11[%c0_34, %c0_35] : memref<8x32xf32, #tpu.memory_space<vmem>>, vector<8x32xf32>
      tpu.vector_store %arg11[%c0_34, %c0_35], %44 {strides = array<i32>} : memref<8x32xf32, #tpu.memory_space<vmem>>, vector<8x32xf32>,
      %49 = arith.index_cast %arg12 : i32 to index
      %c0_36 = arith.constant 0 : index
      %c0_37 = arith.constant 0 : index
      %50 = vector.load %arg7[%49, %c0_36, %c0_37] : memref<2x8x32xf32, #tpu.memory_space<vmem>>, vector<1x8x32xf32>
      %51 = vector.shape_cast %50 : vector<1x8x32xf32> to vector<8x32xf32>
      %52 = vector.shape_cast %46 : vector<8x32xf32> to vector<1x8x32xf32>
      tpu.vector_store %arg7[%49, %c0_36, %c0_37], %52 {strides = array<i32>} : memref<2x8x32xf32, #tpu.memory_space<vmem>>, vector<1x8x32xf32>,
    }
    %c2_i32_7 = arith.constant 2 : i32
    %c0_8 = arith.constant 0 : index
    %c0_9 = arith.constant 0 : index
    %5 = vector.load %arg10[%c0_8, %c0_9] : memref<8x32xf32, #tpu.memory_space<vmem>>, vector<8x32xf32>
    %c0_10 = arith.constant 0 : index
    %c0_11 = arith.constant 0 : index
    %6 = vector.load %arg8[%c0_10, %c0_11] : memref<8x32xf32, #tpu.memory_space<vmem>>, vector<8x32xf32>
    tpu.vector_store %arg8[%c0_10, %c0_11], %5 {strides = array<i32>} : memref<8x32xf32, #tpu.memory_space<vmem>>, vector<8x32xf32>,
    %c0_12 = arith.constant 0 : index
    %c0_13 = arith.constant 0 : index
    %7 = vector.load %arg11[%c0_12, %c0_13] : memref<8x32xf32, #tpu.memory_space<vmem>>, vector<8x32xf32>
    %c0_14 = arith.constant 0 : index
    %c0_15 = arith.constant 0 : index
    %8 = vector.load %arg9[%c0_14, %c0_15] : memref<8x32xf32, #tpu.memory_space<vmem>>, vector<8x32xf32>
    tpu.vector_store %arg9[%c0_14, %c0_15], %7 {strides = array<i32>} : memref<8x32xf32, #tpu.memory_space<vmem>>, vector<8x32xf32>,
    return
  }
  func.func @transform_0(%arg0: i32) -> (i32, i32, i32) {
    %c0_i32 = arith.constant 0 : i32
    %c0_i32_0 = arith.constant 0 : i32
    %c0_i32_1 = arith.constant 0 : i32
    %c0_i32_2 = arith.constant 0 : i32
    return %c0_i32, %c0_i32_0, %c0_i32_1 : i32, i32, i32
  }
  func.func @transform_1(%arg0: i32) -> (i32, i32) {
    %c0_i32 = arith.constant 0 : i32
    %c0_i32_0 = arith.constant 0 : i32
    %c0_i32_1 = arith.constant 0 : i32
    return %c0_i32, %c0_i32_0 : i32, i32
  }
  func.func @transform_2(%arg0: i32) -> (i32, i32) {
    %c0_i32 = arith.constant 0 : i32
    %c0_i32_0 = arith.constant 0 : i32
    %c0_i32_1 = arith.constant 0 : i32
    return %c0_i32, %c0_i32_0 : i32, i32
  }
  func.func @transform_3(%arg0: i32) -> (i32, i32) {
    %c0_i32 = arith.constant 0 : i32
    %c0_i32_0 = arith.constant 0 : i32
    %c0_i32_1 = arith.constant 0 : i32
    return %c0_i32, %c0_i32_0 : i32, i32
  }
  func.func @transform_4(%arg0: i32) -> (i32, i32) {
    %c0_i32 = arith.constant 0 : i32
    %c0_i32_0 = arith.constant 0 : i32
    %c0_i32_1 = arith.constant 0 : i32
    return %c0_i32, %c0_i32_0 : i32, i32
  }
  func.func @transform_5(%arg0: i32) -> (i32, i32) {
    %c0_i32 = arith.constant 0 : i32
    %c0_i32_0 = arith.constant 0 : i32
    %c0_i32_1 = arith.constant 0 : i32
    return %c0_i32, %c0_i32_0 : i32, i32
  }
  func.func @transform_6(%arg0: i32) -> (i32, i32, i32) {
    %c0_i32 = arith.constant 0 : i32
    %c0_i32_0 = arith.constant 0 : i32
    %c0_i32_1 = arith.constant 0 : i32
    %c0_i32_2 = arith.constant 0 : i32
    return %c0_i32, %c0_i32_0, %c0_i32_1 : i32, i32, i32
  }
  func.func @transform_7(%arg0: i32) -> (i32, i32) {
    %c0_i32 = arith.constant 0 : i32
    %c0_i32_0 = arith.constant 0 : i32
    %c0_i32_1 = arith.constant 0 : i32
    return %c0_i32, %c0_i32_0 : i32, i32
  }
  func.func @transform_8(%arg0: i32) -> (i32, i32) {
    %c0_i32 = arith.constant 0 : i32
    %c0_i32_0 = arith.constant 0 : i32
    %c0_i32_1 = arith.constant 0 : i32
    return %c0_i32, %c0_i32_0 : i32, i32
  }
}

</mosaic_0001>

<bundles_post_ra>
// kernel: resnet18_rnn_forward.111
= control target key start
LH: loop header
LB: loop body
LE: loop exit
PB: predicated region body
PF: predicated region fallthrough
CT: control target
= control target key end

     0   :  { %s873_s1 = inlined_call_operand.vmem [shape: bf16[256,128], index: 1, kind: input, shape index: {}]   ;;  %s874_s0 = inlined_call_operand.vmem [shape: bf16[128,256], index: 0, kind: input, shape index: {}]   ;;  %s875_s2 = inlined_call_operand.vmem [shape: f32[1,128], index: 2, kind: input, shape index: {}]   ;;  %s876_s3 = inlined_call_operand.vmem [shape: f32[1,128], index: 3, kind: input, shape index: {}]   ;;  %s877_s4 = inlined_call_operand.vmem [shape: f32[128,128], index: 4, kind: output, shape index: {}]  }
   0x1   :  { %v622_v0 = vld [vmem:[%s873_s1 + $0x40] sm:$0xff]   ;;  %v624_v2 = vld [vmem:[%s873_s1 + $0x48] sm:$0xff]   ;;  %v626_v4 = vld [vmem:[%s873_s1 + $0x50] sm:$0xff]  }
   0x2   :  { %v623_v1 = vld [vmem:[%s873_s1] sm:$0xff]   ;;  %542 = vmatprep.subr.bf16.mxu0 %v622_v0  ;;  %606 = vmatprep.subr.bf16.mxu1 %v622_v0  ;;  %v625_v3 = vld [vmem:[%s873_s1 + $0x8] sm:$0xff]   ;;  %v627_v5 = vld [vmem:[%s873_s1 + $0x10] sm:$0xff]  }
   0x3   :  { %543 = vmatpush3.bf16.msra.mxu0 %v623_v1  ;;  %614 = vmatpush3.bf16.msra.mxu1 %v623_v1  ;;  %v628_v6 = vld [vmem:[%s873_s1 + $0x58] sm:$0xff]   ;;  %v630_v8 = vld [vmem:[%s873_s1 + $0x60] sm:$0xff]   ;;  %v632_v10 = vld [vmem:[%s873_s1 + $0x68] sm:$0xff]  }
   0x4   :  { %544 = vmatprep.subr.bf16.mxu0 %v624_v2  ;;  %607 = vmatprep.subr.bf16.mxu1 %v624_v2  ;;  %v629_v7 = vld [vmem:[%s873_s1 + $0x18] sm:$0xff]   ;;  %v631_v9 = vld [vmem:[%s873_s1 + $0x20] sm:$0xff]   ;;  %v633_v13 = vld [vmem:[%s873_s1 + $0x28] sm:$0xff]  }
   0x5   :  { %v640_v11 = vld [vmem:[%s874_s0 + $0x4] ss:$8 sps:$4 sm:$0xff]   ;;  %v634_v14 = vld [vmem:[%s873_s1 + $0x70] sm:$0xff]   ;;  %v636_v16 = vld [vmem:[%s873_s1 + $0x78] sm:$0xff]  }
   0x6   :  { %v643_v12 = vld [vmem:[%s874_s0 + $0x44] ss:$8 sps:$4 sm:$0xff]   ;;  %310 = vmatprep.mubr.bf16.mxu0 %v640_v11  ;;  %v635_v15 = vld [vmem:[%s873_s1 + $0x30] sm:$0xff]   ;;  %v637_v17 = vld [vmem:[%s873_s1 + $0x38] sm:$0xff]  }
   0x7   :  { %545 = vmatpush3.bf16.msra.mxu0 %v625_v3  ;;  %615 = vmatpush3.bf16.msra.mxu1 %v625_v3  ;;  %v638_v18 = vld [vmem:[%s874_s0] ss:$8 sps:$4 sm:$0xff]   ;;  %v644_v20 = vld [vmem:[%s874_s0 + $0x14] ss:$8 sps:$4 sm:$0xff]   ;;  %v648_v22 = vld [vmem:[%s874_s0 + $0x10] ss:$8 sps:$4 sm:$0xff]  }
   0x8   :  { %546 = vmatprep.subr.bf16.mxu0 %v626_v4  ;;  %608 = vmatprep.subr.bf16.mxu1 %v626_v4  ;;  %v641_v19 = vld [vmem:[%s874_s0 + $0x40] ss:$8 sps:$4 sm:$0xff]   ;;  %v646_v21 = vld [vmem:[%s874_s0 + $0x54] ss:$8 sps:$4 sm:$0xff]   ;;  %v649_v23 = vld [vmem:[%s874_s0 + $0x50] ss:$8 sps:$4 sm:$0xff]  }
   0x9   :  { %342 = vmatprep.mubr.bf16.mxu1 %v643_v12  ;;  %v650_v24 = vld [vmem:[%s874_s0 + $0x24] ss:$8 sps:$4 sm:$0xff]   ;;  %v654_v26 = vld [vmem:[%s874_s0 + $0x20] ss:$8 sps:$4 sm:$0xff]   ;;  %v656_v28 = vld [vmem:[%s874_s0 + $0x34] ss:$8 sps:$4 sm:$0xff]  }
   0xa   :  { %v652_v25 = vld [vmem:[%s874_s0 + $0x64] ss:$8 sps:$4 sm:$0xff]   ;;  %v655_v27 = vld [vmem:[%s874_s0 + $0x60] ss:$8 sps:$4 sm:$0xff]   ;;  %v658_v29 = vld [vmem:[%s874_s0 + $0x74] ss:$8 sps:$4 sm:$0xff]  }
   0xb   :  { %547 = vmatpush3.bf16.msra.mxu0 %v627_v5  ;;  %616 = vmatpush3.bf16.msra.mxu1 %v627_v5  ;;  %v660_v30 = vld [vmem:[%s874_s0 + $0x30] ss:$8 sps:$4 sm:$0xff]   ;;  %v786_v35 = vld [vmem:[%s875_s2] ss:$0 sm:$0xff] }
   0xc   :  { %548 = vmatprep.subr.bf16.mxu0 %v628_v6  ;;  %609 = vmatprep.subr.bf16.mxu1 %v628_v6  ;;  %v661_v31 = vld [vmem:[%s874_s0 + $0x70] ss:$8 sps:$4 sm:$0xff]   ;;  %v791_v41 = vld [vmem:[%s876_s3] ss:$0 sm:$0xff] }
   0xf   :  { %549 = vmatpush3.bf16.msra.mxu0 %v629_v7  ;;  %617 = vmatpush3.bf16.msra.mxu1 %v629_v7 }
  0x10   :  { %550 = vmatprep.subr.bf16.mxu0 %v630_v8  ;;  %610 = vmatprep.subr.bf16.mxu1 %v630_v8 }
  0x13   :  { %551 = vmatpush3.bf16.msra.mxu0 %v631_v9  ;;  %618 = vmatpush3.bf16.msra.mxu1 %v631_v9 }
  0x14   :  { %552 = vmatprep.subr.bf16.mxu0 %v632_v10  ;;  %611 = vmatprep.subr.bf16.mxu1 %v632_v10 }
  0x17   :  { %553 = vmatpush3.bf16.msra.mxu0 %v633_v13  ;;  %619 = vmatpush3.bf16.msra.mxu1 %v633_v13 }
  0x18   :  { %554 = vmatprep.subr.bf16.mxu0 %v634_v14  ;;  %612 = vmatprep.subr.bf16.mxu1 %v634_v14 }
  0x1b   :  { %555 = vmatpush3.bf16.msra.mxu0 %v635_v15  ;;  %620 = vmatpush3.bf16.msra.mxu1 %v635_v15 }
  0x1c   :  { %556 = vmatprep.subr.bf16.mxu0 %v636_v16  ;;  %613 = vmatprep.subr.bf16.mxu1 %v636_v16 }
  0x1f   :  { %557 = vmatpush3.bf16.msra.mxu0 %v637_v17  ;;  %621 = vmatpush3.bf16.msra.mxu1 %v637_v17 }
  0x22   :  { %311 = vmatmul.mubr.bf16.vlgmr.msra.gmra.mrb[0].mxu0 %v638_v18  ;;  %343 = vmatmul.mubr.bf16.vlgmr.msra.gmra.mrb[0].mxu1 %v641_v19 }
  0x23   :  { %318 = vmatprep.mubr.bf16.mxu0 %v644_v20  ;;  %350 = vmatprep.mubr.bf16.mxu1 %v646_v21 }
  0x2a   :  { %319 = vmatmul.mubr.bf16.gmra.mrb[4].mxu0 %v648_v22  ;;  %351 = vmatmul.mubr.bf16.gmra.mrb[4].mxu1 %v649_v23 }
  0x2b   :  { %326 = vmatprep.mubr.bf16.mxu0 %v650_v24  ;;  %358 = vmatprep.mubr.bf16.mxu1 %v652_v25 }
  0x32   :  { %327 = vmatmul.mubr.bf16.gmra.mrb[8].mxu0 %v654_v26  ;;  %359 = vmatmul.mubr.bf16.gmra.mrb[8].mxu1 %v655_v27 }
  0x33   :  { %334 = vmatprep.mubr.bf16.mxu0 %v656_v28  ;;  %366 = vmatprep.mubr.bf16.mxu1 %v658_v29 }
  0x3a   :  { %335 = vmatmul.mubr.bf16.gmra.mrb[12].mxu0 %v660_v30  ;;  %367 = vmatmul.mubr.bf16.gmra.mrb[12].mxu1 %v661_v31 }
  0xf5   :  { %v558_v32 = vpop.f32.mrb[0].mxu0  ;;  %v582_v33 = vpop.f32.mrb[0].mxu1 }
  0xf6   :  { %v559_v34 = vpop.f32.mrb[1].mxu0  ;;  %v583_v36 = vpop.f32.mrb[1].mxu1 }
  0xf7   :  { %v560_v37 = vadd.f32 %v559_v34, %v558_v32  ;;  %v584_v38 = vadd.f32 %v583_v36, %v582_v33  ;;  %v561_v39 = vpop.f32.mrb[2].mxu0  ;;  %v585_v40 = vpop.f32.mrb[2].mxu1 }
  0xf8   :  { %v562_v42 = vpop.f32.mrb[3].mxu0  ;;  %v586_v43 = vpop.f32.mrb[3].mxu1 }
  0xf9   :  { %v433_v44 = vmul.f32 %v560_v37, %v786_v35  ;;  %v441_v45 = vmul.f32 %v584_v38, %v786_v35  ;;  %v563_v46 = vadd.f32 %v562_v42, %v561_v39  ;;  %v587_v47 = vadd.f32 %v586_v43, %v585_v40 }
  0xfb   :  { %v456_v48 = vadd.f32 %v791_v41, %v433_v44  ;;  %v464_v49 = vadd.f32 %v791_v41, %v441_v45  ;;  %v434_v50 = vmul.f32 %v563_v46, %v786_v35  ;;  %v442_v51 = vmul.f32 %v587_v47, %v786_v35 }
  0xfd   :  { %v472_v52 = vmax.f32 %v456_v48, 0.0  ;;  %v480_v53 = vmax.f32 %v464_v49, 0.0  ;;  %v457_v54 = vadd.f32 %v791_v41, %v434_v50  ;;  %v465_v55 = vadd.f32 %v791_v41, %v442_v51  ;;  %v564_v56 = vpop.f32.mrb[4].mxu0  ;;  %v588_v57 = vpop.f32.mrb[4].mxu1 }
  0xfe   :  { %v565_v58 = vpop.f32.mrb[5].mxu0  ;;  %v589_v59 = vpop.f32.mrb[5].mxu1 }
  0xff   :  { %488 = vst [vmem:[%s877_s4] sm:$0xff] %v472_v52  ;;  %496 = vst [vmem:[%s877_s4 + $0x40] sm:$0xff] %v480_v53  ;;  %v473_v60 = vmax.f32 %v457_v54, 0.0  ;;  %v481_v61 = vmax.f32 %v465_v55, 0.0  ;;  %v566_v62 = vadd.f32 %v565_v58, %v564_v56  ;;  %v590_v63 = vadd.f32 %v589_v59, %v588_v57  ;;  %v567_v0 = vpop.f32.mrb[6].mxu0  ;;  %v591_v1 = vpop.f32.mrb[6].mxu1 }
 0x100   :  { %v568_v2 = vpop.f32.mrb[7].mxu0  ;;  %v592_v3 = vpop.f32.mrb[7].mxu1 }
 0x101   :  { %489 = vst [vmem:[%s877_s4 + $0x8] sm:$0xff] %v473_v60  ;;  %497 = vst [vmem:[%s877_s4 + $0x48] sm:$0xff] %v481_v61  ;;  %v435_v4 = vmul.f32 %v566_v62, %v786_v35  ;;  %v443_v5 = vmul.f32 %v590_v63, %v786_v35  ;;  %v569_v6 = vadd.f32 %v568_v2, %v567_v0 }
 0x102   :  { %v593_v7 = vadd.f32 %v592_v3, %v591_v1 }
 0x103   :  { %v458_v8 = vadd.f32 %v791_v41, %v435_v4  ;;  %v466_v9 = vadd.f32 %v791_v41, %v443_v5  ;;  %v436_v10 = vmul.f32 %v569_v6, %v786_v35 }
 0x104   :  { %v444_v11 = vmul.f32 %v593_v7, %v786_v35 }
 0x105   :  { %v474_v12 = vmax.f32 %v458_v8, 0.0  ;;  %v482_v13 = vmax.f32 %v466_v9, 0.0  ;;  %v459_v14 = vadd.f32 %v791_v41, %v436_v10  ;;  %v570_v16 = vpop.f32.mrb[8].mxu0  ;;  %v594_v17 = vpop.f32.mrb[8].mxu1 }
 0x106   :  { %v467_v15 = vadd.f32 %v791_v41, %v444_v11  ;;  %v571_v18 = vpop.f32.mrb[9].mxu0  ;;  %v595_v19 = vpop.f32.mrb[9].mxu1 }
 0x107   :  { %490 = vst [vmem:[%s877_s4 + $0x10] sm:$0xff] %v474_v12  ;;  %498 = vst [vmem:[%s877_s4 + $0x50] sm:$0xff] %v482_v13  ;;  %v475_v20 = vmax.f32 %v459_v14, 0.0  ;;  %v572_v22 = vadd.f32 %v571_v18, %v570_v16  ;;  %v596_v23 = vadd.f32 %v595_v19, %v594_v17  ;;  %v573_v24 = vpop.f32.mrb[10].mxu0  ;;  %v597_v25 = vpop.f32.mrb[10].mxu1 }
 0x108   :  { %v483_v21 = vmax.f32 %v467_v15, 0.0  ;;  %v574_v26 = vpop.f32.mrb[11].mxu0  ;;  %v598_v27 = vpop.f32.mrb[11].mxu1 }
 0x109   :  { %491 = vst [vmem:[%s877_s4 + $0x18] sm:$0xff] %v475_v20  ;;  %v437_v28 = vmul.f32 %v572_v22, %v786_v35  ;;  %v445_v29 = vmul.f32 %v596_v23, %v786_v35  ;;  %v575_v30 = vadd.f32 %v574_v26, %v573_v24  ;;  %v599_v31 = vadd.f32 %v598_v27, %v597_v25 }
 0x10a   :  { %499 = vst [vmem:[%s877_s4 + $0x58] sm:$0xff] %v483_v21 }
 0x10b   :  { %v460_v32 = vadd.f32 %v791_v41, %v437_v28  ;;  %v468_v33 = vadd.f32 %v791_v41, %v445_v29  ;;  %v438_v34 = vmul.f32 %v575_v30, %v786_v35  ;;  %v446_v36 = vmul.f32 %v599_v31, %v786_v35 }
 0x10d   :  { %v476_v37 = vmax.f32 %v460_v32, 0.0  ;;  %v484_v38 = vmax.f32 %v468_v33, 0.0  ;;  %v461_v39 = vadd.f32 %v791_v41, %v438_v34  ;;  %v469_v40 = vadd.f32 %v791_v41, %v446_v36  ;;  %v576_v42 = vpop.f32.mrb[12].mxu0  ;;  %v600_v43 = vpop.f32.mrb[12].mxu1 }
 0x10e   :  { %v577_v44 = vpop.f32.mrb[13].mxu0  ;;  %v601_v45 = vpop.f32.mrb[13].mxu1 }
 0x10f   :  { %492 = vst [vmem:[%s877_s4 + $0x20] sm:$0xff] %v476_v37  ;;  %500 = vst [vmem:[%s877_s4 + $0x60] sm:$0xff] %v484_v38  ;;  %v477_v46 = vmax.f32 %v461_v39, 0.0  ;;  %v485_v47 = vmax.f32 %v469_v40, 0.0  ;;  %v578_v48 = vadd.f32 %v577_v44, %v576_v42  ;;  %v602_v49 = vadd.f32 %v601_v45, %v600_v43  ;;  %v579_v50 = vpop.f32.mrb[14].mxu0  ;;  %v603_v51 = vpop.f32.mrb[14].mxu1 }
 0x110   :  { %v580_v52 = vpop.f32.mrb[15].mxu0  ;;  %v604_v53 = vpop.f32.mrb[15].mxu1 }
 0x111   :  { %493 = vst [vmem:[%s877_s4 + $0x28] sm:$0xff] %v477_v46  ;;  %501 = vst [vmem:[%s877_s4 + $0x68] sm:$0xff] %v485_v47  ;;  %v439_v54 = vmul.f32 %v578_v48, %v786_v35  ;;  %v447_v55 = vmul.f32 %v602_v49, %v786_v35  ;;  %v581_v56 = vadd.f32 %v580_v52, %v579_v50 }
 0x112   :  { %v605_v57 = vadd.f32 %v604_v53, %v603_v51 }
 0x113   :  { %v462_v58 = vadd.f32 %v791_v41, %v439_v54  ;;  %v470_v59 = vadd.f32 %v791_v41, %v447_v55  ;;  %v440_v60 = vmul.f32 %v581_v56, %v786_v35 }
 0x114   :  { %v448_v61 = vmul.f32 %v605_v57, %v786_v35 }
 0x115   :  { %v478_v62 = vmax.f32 %v462_v58, 0.0  ;;  %v486_v63 = vmax.f32 %v470_v59, 0.0  ;;  %v463_v0 = vadd.f32 %v791_v41, %v440_v60 }
 0x116   :  { %v471_v1 = vadd.f32 %v791_v41, %v448_v61 }
 0x117   :  { %494 = vst [vmem:[%s877_s4 + $0x30] sm:$0xff] %v478_v62  ;;  %502 = vst [vmem:[%s877_s4 + $0x70] sm:$0xff] %v486_v63  ;;  %v479_v2 = vmax.f32 %v463_v0, 0.0 }
 0x118   :  { %v487_v3 = vmax.f32 %v471_v1, 0.0 }
 0x119   :  { %495 = vst [vmem:[%s877_s4 + $0x38] sm:$0xff] %v479_v2 }
 0x11a   :  { %503 = vst [vmem:[%s877_s4 + $0x78] sm:$0xff] %v487_v3 }

// kernel: resnet18_rnn_forward.112
= control target key start
LH: loop header
LB: loop body
LE: loop exit
PB: predicated region body
PF: predicated region fallthrough
CT: control target
= control target key end

     0   :  { %s938_s15 = smov 0   ;;  %s940_s16 = smov 0   ;;  %s1047_s0 = inlined_call_operand.vmem [shape: bf16[32,768], index: 0, kind: input, shape index: {}]   ;;  %s1048_s1 = inlined_call_operand.vmem [shape: bf16[768,128], index: 1, kind: input, shape index: {}]   ;;  %s1049_s2 = inlined_call_operand.vmem [shape: f32[1,128], index: 2, kind: input, shape index: {}]   ;;  %s1050_s3 = inlined_call_operand.vmem [shape: f32[1,128], index: 3, kind: input, shape index: {}]   ;;  %s1051_s4 = inlined_call_operand.vmem [shape: f32[32,128], index: 4, kind: output, shape index: {}]  }
   0x1   :  { %s942_s17 = smov 0   ;;  %s944_s18 = smov 0  }
   0x2   :  { %s946_s19 = smov 0  }
   0x3 LB: > { %s26_s20 = sadd.s32 1, %s906_s18  ;;  %p49_p1 = scmp.ne.s32.totalorder %s898_s16, %s894_s15  ;;  %s910_s19 = sphi %s946_s19, %s14_s19   ;;  %s906_s18 = sphi %s944_s18, %s1055_s18   ;;  %s902_s17 = sphi %s942_s17, %s1054_s17   ;;  %s898_s16 = sphi %s940_s16, %s1053_s16   ;;  %s894_s15 = sphi %s938_s15, %s1052_s15  }
   0x4   : > { %p27_p0 = scmp.ge.s32.totalorder %s26_s20, 3  ;;  %p50_p2 = scmp.eq.s32.totalorder %s910_s19, 0 }
   0x5   : > { %s42_s22 = sadd.s32 1, %s898_s16  ;;  %p728_p5 = scmp.ge.s32.totalorder %s910_s19, 3 }
   0x6   : > { %s1057_s20 = smov (%p27_p0, %s26_s20), 0  ;;  %p51_p3 = por %p50_p2, %p49_p1 }
   0x7   : > { %s38_s21 = ssub.s32 %s906_s18, %s1057_s20  ;;  %195 = sbr.rel (%p728_p5) target bundleno = 21 (0x15), region = 24 }
   0x8   : > { %p40_p4 = scmp.eq.s32.totalorder %s38_s21, 0 }
   0xa   : > { %s973_s23 = scalar_select %p40_p4, %s898_s16, %s42_s22  }
   0xe   : > { %198 = sbr.rel (!%p51_p3) target bundleno = 21 (0x15), region = 28  ;;  %s200_s24 = sand.u32 (%p51_p3), 1, %s898_s16  }
   0xf   : > { %s764_s25 = sshll.u32 (%p51_p3), %s906_s18, 3  ;;  %s729_s26 = sshll.u32 (%p51_p3), %s200_s24, 5 }
  0x10   : > { %s208_s29 = scalar_lea.vmem (%p51_p3), %s1047_s0, %s764_s25  ;;  %s202_s30 = scalar_lea.vmem (%p51_p3), [#allocation3], %s729_s26 }
  0x11   : > { %v242_v0 = vld [vmem:[%s208_s29] sm:$0xff] (%p51_p3)  ;;  %v244_v1 = vld [vmem:[%s208_s29 + $0x18] sm:$0xff] (%p51_p3)  ;;  %v246_v2 = vld [vmem:[%s208_s29 + $0x30] sm:$0xff] (%p51_p3) }
  0x12   : > { %243 = vst [vmem:[%s202_s30] sm:$0xff] (%p51_p3), %v242_v0  ;;  %245 = vst [vmem:[%s202_s30 + $0x8] sm:$0xff] (%p51_p3), %v244_v1  ;;  %v248_v3 = vld [vmem:[%s208_s29 + $0x48] sm:$0xff] (%p51_p3) }
  0x13   : > { %247 = vst [vmem:[%s202_s30 + $0x10] sm:$0xff] (%p51_p3), %v246_v2  ;;  %249 = vst [vmem:[%s202_s30 + $0x18] sm:$0xff] (%p51_p3), %v248_v3 }
  0x15 PF: > { %p732_p6 = scmp.ge.s32.totalorder %s910_s19, 1  ;;  %p266_p7 = scmp.lt.s32.totalorder %s910_s19, 4 }
  0x17   : > { %p267_p8 = pnand %p732_p6, %p266_p7 }
  0x18   : > { %s273_s5 = sand.u32 (!%p267_p8), 1, %s894_s15   ;;  %s734_s6 = sshll.u32 (!%p267_p8), %s902_s17, 5 }
  0x19   : > { %270 = sbr.rel (%p267_p8) target bundleno = 306 (0x132), region = 70  ;;  %s733_s7 = sshll.u32 (!%p267_p8), %s273_s5, 5 }
  0x1a   : > { %p318_p9 = scmp.lt.s32.totalorder (!%p267_p8), %s734_s6, 95  ;;  %s990_s12 = scalar_lea.vmem (!%p267_p8), [#allocation3], %s733_s7 }
  0x1b   : > { %p736_p10 = scmp.ne.s32.totalorder (!%p267_p8), %s902_s17, 0 }
  0x20   : > { %s1059_s6 = smov (!%p318_p9, %s734_s6), 95  ;;  %345 = sbr.rel (%p736_p10) target bundleno = 39 (0x27), region = 78 }
  0x21   : > { %s735_s8 = sshll.u32 %s1059_s6, 2  ;;  %v912_v4 = vmov (!%p736_p10), 0.0  }
  0x22   : > { %s988_s11 = scalar_lea.vmem %s1048_s1, %s735_s8  ;;  %346 = vst [vmem:[#allocation2] sm:$0xff] (!%p736_p10), %v912_v4  ;;  %347 = vst [vmem:[#allocation2 + $0x8] sm:$0xff] (!%p736_p10), %v912_v4 }
  0x23   : > { %348 = vst [vmem:[#allocation2 + $0x10] sm:$0xff] (!%p736_p10), %v912_v4  ;;  %349 = vst [vmem:[#allocation2 + $0x18] sm:$0xff] (!%p736_p10), %v912_v4 }
  0x27 PF: > { %v850_v5 = vld [vmem:[%s988_s11 + $0x40] sm:$0xff]   ;;  %v852_v7 = vld [vmem:[%s988_s11 + $0x48] sm:$0xff]   ;;  %v854_v9 = vld [vmem:[%s988_s11 + $0x50] sm:$0xff]   ;;  %p757_p11 = scmp.ne.s32.totalorder %s902_s17, 2 }
  0x28   : > { %v851_v6 = vld [vmem:[%s988_s11] sm:$0xff]   ;;  %765 = vmatprep.subr.bf16.mxu0 %v850_v5  ;;  %793 = vmatprep.subr.bf16.mxu1 %v850_v5  ;;  %v853_v8 = vld [vmem:[%s988_s11 + $0x8] sm:$0xff]   ;;  %v855_v10 = vld [vmem:[%s988_s11 + $0x10] sm:$0xff]  }
  0x29   : > { %766 = vmatpush3.bf16.msra.mxu0 %v851_v6  ;;  %801 = vmatpush3.bf16.msra.mxu1 %v851_v6  ;;  %v856_v11 = vld [vmem:[%s988_s11 + $0x58] sm:$0xff]   ;;  %v858_v13 = vld [vmem:[%s988_s11 + $0x60] sm:$0xff]   ;;  %v860_v15 = vld [vmem:[%s988_s11 + $0x68] sm:$0xff]  }
  0x2a   : > { %767 = vmatprep.subr.bf16.mxu0 %v852_v7  ;;  %794 = vmatprep.subr.bf16.mxu1 %v852_v7  ;;  %v857_v12 = vld [vmem:[%s988_s11 + $0x18] sm:$0xff]   ;;  %v859_v14 = vld [vmem:[%s988_s11 + $0x20] sm:$0xff]   ;;  %v861_v18 = vld [vmem:[%s988_s11 + $0x28] sm:$0xff]  }
  0x2b   : > { %v868_v16 = vld [vmem:[%s990_s12 + $0x4] ss:$8 sps:$4 sm:$0xff]   ;;  %v871_v17 = vld [vmem:[%s990_s12 + $0x14] ss:$8 sps:$4 sm:$0xff]   ;;  %v866_v23 = vld [vmem:[%s990_s12] ss:$8 sps:$4 sm:$0xff]  }
  0x2c   : > { %v862_v19 = vld [vmem:[%s988_s11 + $0x70] sm:$0xff]   ;;  %538 = vmatprep.mubr.bf16.mxu0 %v868_v16  ;;  %546 = vmatprep.mubr.bf16.mxu1 %v871_v17  ;;  %v864_v21 = vld [vmem:[%s988_s11 + $0x78] sm:$0xff]   ;;  %v350_v27 = vld [vmem:[#allocation2] sm:$0xff] }
  0x2d   : > { %768 = vmatpush3.bf16.msra.mxu0 %v853_v8  ;;  %802 = vmatpush3.bf16.msra.mxu1 %v853_v8  ;;  %v863_v20 = vld [vmem:[%s988_s11 + $0x30] sm:$0xff]   ;;  %v865_v22 = vld [vmem:[%s988_s11 + $0x38] sm:$0xff]   ;;  %v351_v35 = vld [vmem:[#allocation2 + $0x8] sm:$0xff] }
  0x2e   : > { %769 = vmatprep.subr.bf16.mxu0 %v854_v9  ;;  %795 = vmatprep.subr.bf16.mxu1 %v854_v9  ;;  %v869_v24 = vld [vmem:[%s990_s12 + $0x10] ss:$8 sps:$4 sm:$0xff]   ;;  %v758_v46 = vld [vmem:[%s1049_s2] ss:$0 sm:$0xff] (!%p757_p11) }
  0x2f   : > { %v352_v29 = vld [vmem:[#allocation2 + $0x10] sm:$0xff]  ;;  %v353_v37 = vld [vmem:[#allocation2 + $0x18] sm:$0xff]  ;;  %v759_v47 = vld [vmem:[%s1050_s3] ss:$0 sm:$0xff] (!%p757_p11) }
  0x31   : > { %770 = vmatpush3.bf16.msra.mxu0 %v855_v10  ;;  %803 = vmatpush3.bf16.msra.mxu1 %v855_v10 }
  0x32   : > { %771 = vmatprep.subr.bf16.mxu0 %v856_v11  ;;  %796 = vmatprep.subr.bf16.mxu1 %v856_v11 }
  0x35   : > { %772 = vmatpush3.bf16.msra.mxu0 %v857_v12  ;;  %804 = vmatpush3.bf16.msra.mxu1 %v857_v12 }
  0x36   : > { %773 = vmatprep.subr.bf16.mxu0 %v858_v13  ;;  %797 = vmatprep.subr.bf16.mxu1 %v858_v13 }
  0x39   : > { %774 = vmatpush3.bf16.msra.mxu0 %v859_v14  ;;  %805 = vmatpush3.bf16.msra.mxu1 %v859_v14 }
  0x3a   : > { %775 = vmatprep.subr.bf16.mxu0 %v860_v15  ;;  %798 = vmatprep.subr.bf16.mxu1 %v860_v15 }
  0x3d   : > { %776 = vmatpush3.bf16.msra.mxu0 %v861_v18  ;;  %806 = vmatpush3.bf16.msra.mxu1 %v861_v18 }
  0x3e   : > { %777 = vmatprep.subr.bf16.mxu0 %v862_v19  ;;  %799 = vmatprep.subr.bf16.mxu1 %v862_v19 }
  0x41   : > { %778 = vmatpush3.bf16.msra.mxu0 %v863_v20  ;;  %807 = vmatpush3.bf16.msra.mxu1 %v863_v20 }
  0x42   : > { %779 = vmatprep.subr.bf16.mxu0 %v864_v21  ;;  %800 = vmatprep.subr.bf16.mxu1 %v864_v21 }
  0x45   : > { %780 = vmatpush3.bf16.msra.mxu0 %v865_v22  ;;  %808 = vmatpush3.bf16.msra.mxu1 %v865_v22 }
  0x48   : > { %539 = vmatmul.mubr.bf16.vlgmr.msra.gmra.mrb[0].mxu0 %v866_v23  ;;  %547 = vmatmul.mubr.bf16.vlgmr.msra.gmra.mrb[0].mxu1 %v869_v24 }
 0x11b   : > { %v781_v25 = vpop.f32.mrb[0].mxu0  ;;  %v787_v26 = vpop.f32.mrb[0].mxu1 }
 0x11c   : > { %v782_v28 = vpop.f32.mrb[1].mxu0  ;;  %v788_v30 = vpop.f32.mrb[1].mxu1 }
 0x11d   : > { %v783_v31 = vadd.f32 %v782_v28, %v781_v25  ;;  %v789_v32 = vadd.f32 %v788_v30, %v787_v26  ;;  %v784_v33 = vpop.f32.mrb[2].mxu0  ;;  %v790_v34 = vpop.f32.mrb[2].mxu1  ;;  %566 = sbr.rel (%p757_p11) target bundleno = 306 (0x132), region = 82 }
 0x11e   : > { %v785_v36 = vpop.f32.mrb[3].mxu0  ;;  %v791_v38 = vpop.f32.mrb[3].mxu1 }
 0x11f   : > { %v555_v39 = vadd.f32 %v783_v31, %v350_v27  ;;  %v557_v40 = vadd.f32 %v789_v32, %v352_v29  ;;  %v786_v41 = vadd.f32 %v785_v36, %v784_v33  ;;  %v792_v42 = vadd.f32 %v791_v38, %v790_v34 }
 0x121   : > { %559 = vst [vmem:[#allocation2] sm:$0xff] %v555_v39  ;;  %561 = vst [vmem:[#allocation2 + $0x10] sm:$0xff] %v557_v40  ;;  %v556_v43 = vadd.f32 %v786_v41, %v351_v35  ;;  %v558_v44 = vadd.f32 %v792_v42, %v353_v37 }
 0x123   : > { %560 = vst [vmem:[#allocation2 + $0x8] sm:$0xff] %v556_v43  ;;  %562 = vst [vmem:[#allocation2 + $0x18] sm:$0xff] %v558_v44 }
 0x128   : > { %v567_v45 = vld [vmem:[#allocation2] sm:$0xff]  ;;  %v569_v50 = vld [vmem:[#allocation2 + $0x10] sm:$0xff] }
 0x129   : > { %v578_v48 = vmul.f32 %v758_v46, %v567_v45  ;;  %v580_v53 = vmul.f32 %v758_v46, %v569_v50 }
 0x12a   : > { %v568_v49 = vld [vmem:[#allocation2 + $0x8] sm:$0xff]  ;;  %v570_v51 = vld [vmem:[#allocation2 + $0x18] sm:$0xff] }
 0x12b   : > { %v579_v52 = vmul.f32 %v758_v46, %v568_v49  ;;  %v581_v54 = vmul.f32 %v758_v46, %v570_v51  ;;  %v589_v55 = vadd.f32 %v759_v47, %v578_v48  ;;  %v591_v57 = vadd.f32 %v759_v47, %v580_v53 }
 0x12d   : > { %v590_v56 = vadd.f32 %v759_v47, %v579_v52  ;;  %v592_v58 = vadd.f32 %v759_v47, %v581_v54  ;;  %v593_v59 = vmax.f32 %v589_v55, 0.0  ;;  %v595_v61 = vmax.f32 %v591_v57, 0.0 }
 0x12f   : > { %v594_v60 = vmax.f32 %v590_v56, 0.0  ;;  %v596_v62 = vmax.f32 %v592_v58, 0.0  ;;  %597 = vst [vmem:[%s1051_s4] sm:$0xff] %v593_v59  ;;  %599 = vst [vmem:[%s1051_s4 + $0x10] sm:$0xff] %v595_v61 }
 0x131   : > { %598 = vst [vmem:[%s1051_s4 + $0x8] sm:$0xff] %v594_v60  ;;  %600 = vst [vmem:[%s1051_s4 + $0x18] sm:$0xff] %v596_v62 }
 0x132 PF: > { %s14_s19 = sadd.s32 1, %s910_s19   ;;  %s1052_s15 = smov %s898_s16 }
 0x133   : > { %p11_p12 = scmp.ge.s32.totalorder %s14_s19, 5   ;;  %s1053_s16 = smov %s973_s23 }
 0x134   : > { %s1054_s17 = smov %s906_s18  ;;  %s1055_s18 = smov %s1057_s20 }
 0x135   :  { %13 = sbr.rel (!%p11_p12) target bundleno = 3 (0x3), region = 126 }

// kernel: resnet18_rnn_forward.113
= control target key start
LH: loop header
LB: loop body
LE: loop exit
PB: predicated region body
PF: predicated region fallthrough
CT: control target
= control target key end

     0   :  { %s1030_s18 = smov 0   ;;  %s1032_s19 = smov 0   ;;  %s1151_s0 = inlined_call_operand.vmem [shape: bf16[32,768], index: 0, kind: input, shape index: {}]   ;;  %s1152_s1 = inlined_call_operand.vmem [shape: bf16[768,128], index: 1, kind: input, shape index: {}]   ;;  %s1153_s2 = inlined_call_operand.vmem [shape: f32[1,128], index: 2, kind: input, shape index: {}]   ;;  %s1154_s3 = inlined_call_operand.vmem [shape: f32[1,128], index: 3, kind: input, shape index: {}]   ;;  %s1155_s4 = inlined_call_operand.vmem [shape: f32[32,128], index: 4, kind: input, shape index: {}]   ;;  %s1156_s5 = inlined_call_operand.vmem [shape: f32[32,128], index: 5, kind: output, shape index: {}]  }
   0x1   :  { %s1034_s20 = smov 0   ;;  %s1036_s21 = smov 0  }
   0x2   :  { %s1038_s22 = smov 0  }
   0x3 LB: > { %s27_s23 = sadd.s32 1, %s993_s21  ;;  %p50_p1 = scmp.ne.s32.totalorder %s985_s19, %s981_s18  ;;  %s997_s22 = sphi %s1038_s22, %s15_s22   ;;  %s993_s21 = sphi %s1036_s21, %s1160_s21   ;;  %s989_s20 = sphi %s1034_s20, %s1159_s20   ;;  %s985_s19 = sphi %s1032_s19, %s1158_s19   ;;  %s981_s18 = sphi %s1030_s18, %s1157_s18  }
   0x4   : > { %p28_p0 = scmp.ge.s32.totalorder %s27_s23, 3  ;;  %p51_p2 = scmp.eq.s32.totalorder %s997_s22, 0 }
   0x5   : > { %s43_s25 = sadd.s32 1, %s985_s19  ;;  %p815_p5 = scmp.ge.s32.totalorder %s997_s22, 3 }
   0x6   : > { %s1162_s23 = smov (%p28_p0, %s27_s23), 0  ;;  %p52_p3 = por %p51_p2, %p50_p1 }
   0x7   : > { %s39_s24 = ssub.s32 %s993_s21, %s1162_s23  ;;  %236 = sbr.rel (%p815_p5) target bundleno = 21 (0x15), region = 28 }
   0x8   : > { %p41_p4 = scmp.eq.s32.totalorder %s39_s24, 0 }
   0xa   : > { %s1065_s26 = scalar_select %p41_p4, %s985_s19, %s43_s25  }
   0xe   : > { %239 = sbr.rel (!%p52_p3) target bundleno = 21 (0x15), region = 32  ;;  %s241_s27 = sand.u32 (%p52_p3), 1, %s985_s19  }
   0xf   : > { %s851_s28 = sshll.u32 (%p52_p3), %s993_s21, 3  ;;  %s816_s29 = sshll.u32 (%p52_p3), %s241_s27, 5 }
  0x10   : > { %s249_s7 = scalar_lea.vmem (%p52_p3), %s1151_s0, %s851_s28  ;;  %s243_s8 = scalar_lea.vmem (%p52_p3), [#allocation3], %s816_s29 }
  0x11   : > { %v283_v0 = vld [vmem:[%s249_s7] sm:$0xff] (%p52_p3)  ;;  %v285_v1 = vld [vmem:[%s249_s7 + $0x18] sm:$0xff] (%p52_p3)  ;;  %v287_v2 = vld [vmem:[%s249_s7 + $0x30] sm:$0xff] (%p52_p3) }
  0x12   : > { %284 = vst [vmem:[%s243_s8] sm:$0xff] (%p52_p3), %v283_v0  ;;  %286 = vst [vmem:[%s243_s8 + $0x8] sm:$0xff] (%p52_p3), %v285_v1  ;;  %v289_v3 = vld [vmem:[%s249_s7 + $0x48] sm:$0xff] (%p52_p3) }
  0x13   : > { %288 = vst [vmem:[%s243_s8 + $0x10] sm:$0xff] (%p52_p3), %v287_v2  ;;  %290 = vst [vmem:[%s243_s8 + $0x18] sm:$0xff] (%p52_p3), %v289_v3 }
  0x15 PF: > { %p819_p6 = scmp.ge.s32.totalorder %s997_s22, 1  ;;  %p307_p7 = scmp.lt.s32.totalorder %s997_s22, 4 }
  0x17   : > { %p308_p8 = pnand %p819_p6, %p307_p7 }
  0x18   : > { %s314_s9 = sand.u32 (!%p308_p8), 1, %s981_s18   ;;  %s821_s10 = sshll.u32 (!%p308_p8), %s989_s20, 5 }
  0x19   : > { %311 = sbr.rel (%p308_p8) target bundleno = 308 (0x134), region = 74  ;;  %s820_s11 = sshll.u32 (!%p308_p8), %s314_s9, 5 }
  0x1a   : > { %p369_p9 = scmp.lt.s32.totalorder (!%p308_p8), %s821_s10, 95  ;;  %s1082_s16 = scalar_lea.vmem (!%p308_p8), [#allocation3], %s820_s11 }
  0x1b   : > { %p823_p10 = scmp.ne.s32.totalorder (!%p308_p8), %s989_s20, 0 }
  0x20   : > { %s1164_s10 = smov (!%p369_p9, %s821_s10), 95  ;;  %405 = sbr.rel (%p823_p10) target bundleno = 39 (0x27), region = 82 }
  0x21   : > { %s822_s12 = sshll.u32 %s1164_s10, 2  ;;  %v999_v4 = vmov (!%p823_p10), 0.0  }
  0x22   : > { %s1080_s15 = scalar_lea.vmem %s1152_s1, %s822_s12  ;;  %406 = vst [vmem:[#allocation2] sm:$0xff] (!%p823_p10), %v999_v4  ;;  %407 = vst [vmem:[#allocation2 + $0x8] sm:$0xff] (!%p823_p10), %v999_v4 }
  0x23   : > { %408 = vst [vmem:[#allocation2 + $0x10] sm:$0xff] (!%p823_p10), %v999_v4  ;;  %409 = vst [vmem:[#allocation2 + $0x18] sm:$0xff] (!%p823_p10), %v999_v4 }
  0x27 PF: > { %v937_v5 = vld [vmem:[%s1080_s15 + $0x40] sm:$0xff]   ;;  %v939_v7 = vld [vmem:[%s1080_s15 + $0x48] sm:$0xff]   ;;  %v941_v9 = vld [vmem:[%s1080_s15 + $0x50] sm:$0xff]   ;;  %p844_p11 = scmp.ne.s32.totalorder %s989_s20, 2 }
  0x28   : > { %v938_v6 = vld [vmem:[%s1080_s15] sm:$0xff]   ;;  %852 = vmatprep.subr.bf16.mxu0 %v937_v5  ;;  %880 = vmatprep.subr.bf16.mxu1 %v937_v5  ;;  %v940_v8 = vld [vmem:[%s1080_s15 + $0x8] sm:$0xff]   ;;  %v942_v10 = vld [vmem:[%s1080_s15 + $0x10] sm:$0xff]  }
  0x29   : > { %853 = vmatpush3.bf16.msra.mxu0 %v938_v6  ;;  %888 = vmatpush3.bf16.msra.mxu1 %v938_v6  ;;  %v943_v11 = vld [vmem:[%s1080_s15 + $0x58] sm:$0xff]   ;;  %v945_v13 = vld [vmem:[%s1080_s15 + $0x60] sm:$0xff]   ;;  %v947_v15 = vld [vmem:[%s1080_s15 + $0x68] sm:$0xff]  }
  0x2a   : > { %854 = vmatprep.subr.bf16.mxu0 %v939_v7  ;;  %881 = vmatprep.subr.bf16.mxu1 %v939_v7  ;;  %v944_v12 = vld [vmem:[%s1080_s15 + $0x18] sm:$0xff]   ;;  %v946_v14 = vld [vmem:[%s1080_s15 + $0x20] sm:$0xff]   ;;  %v948_v18 = vld [vmem:[%s1080_s15 + $0x28] sm:$0xff]  }
  0x2b   : > { %v955_v16 = vld [vmem:[%s1082_s16 + $0x4] ss:$8 sps:$4 sm:$0xff]   ;;  %v958_v17 = vld [vmem:[%s1082_s16 + $0x14] ss:$8 sps:$4 sm:$0xff]   ;;  %v953_v23 = vld [vmem:[%s1082_s16] ss:$8 sps:$4 sm:$0xff]  }
  0x2c   : > { %v949_v19 = vld [vmem:[%s1080_s15 + $0x70] sm:$0xff]   ;;  %598 = vmatprep.mubr.bf16.mxu0 %v955_v16  ;;  %606 = vmatprep.mubr.bf16.mxu1 %v958_v17  ;;  %v951_v21 = vld [vmem:[%s1080_s15 + $0x78] sm:$0xff]   ;;  %v410_v27 = vld [vmem:[#allocation2] sm:$0xff] }
  0x2d   : > { %855 = vmatpush3.bf16.msra.mxu0 %v940_v8  ;;  %889 = vmatpush3.bf16.msra.mxu1 %v940_v8  ;;  %v950_v20 = vld [vmem:[%s1080_s15 + $0x30] sm:$0xff]   ;;  %v952_v22 = vld [vmem:[%s1080_s15 + $0x38] sm:$0xff]   ;;  %v411_v35 = vld [vmem:[#allocation2 + $0x8] sm:$0xff] }
  0x2e   : > { %856 = vmatprep.subr.bf16.mxu0 %v941_v9  ;;  %882 = vmatprep.subr.bf16.mxu1 %v941_v9  ;;  %v956_v24 = vld [vmem:[%s1082_s16 + $0x10] ss:$8 sps:$4 sm:$0xff]   ;;  %v845_v46 = vld [vmem:[%s1153_s2] ss:$0 sm:$0xff] (!%p844_p11)  ;;  %v654_v55 = vld [vmem:[%s1155_s4 + $0x8] sm:$0xff] (!%p844_p11) }
  0x2f   : > { %v412_v29 = vld [vmem:[#allocation2 + $0x10] sm:$0xff]  ;;  %v413_v37 = vld [vmem:[#allocation2 + $0x18] sm:$0xff]  ;;  %v846_v47 = vld [vmem:[%s1154_s3] ss:$0 sm:$0xff] (!%p844_p11) }
  0x30   : > { %v653_v50 = vld [vmem:[%s1155_s4] sm:$0xff] (!%p844_p11)  ;;  %v655_v59 = vld [vmem:[%s1155_s4 + $0x10] sm:$0xff] (!%p844_p11)  ;;  %v656_v60 = vld [vmem:[%s1155_s4 + $0x18] sm:$0xff] (!%p844_p11) }
  0x31   : > { %857 = vmatpush3.bf16.msra.mxu0 %v942_v10  ;;  %890 = vmatpush3.bf16.msra.mxu1 %v942_v10 }
  0x32   : > { %858 = vmatprep.subr.bf16.mxu0 %v943_v11  ;;  %883 = vmatprep.subr.bf16.mxu1 %v943_v11 }
  0x35   : > { %859 = vmatpush3.bf16.msra.mxu0 %v944_v12  ;;  %891 = vmatpush3.bf16.msra.mxu1 %v944_v12 }
  0x36   : > { %860 = vmatprep.subr.bf16.mxu0 %v945_v13  ;;  %884 = vmatprep.subr.bf16.mxu1 %v945_v13 }
  0x39   : > { %861 = vmatpush3.bf16.msra.mxu0 %v946_v14  ;;  %892 = vmatpush3.bf16.msra.mxu1 %v946_v14 }
  0x3a   : > { %862 = vmatprep.subr.bf16.mxu0 %v947_v15  ;;  %885 = vmatprep.subr.bf16.mxu1 %v947_v15 }
  0x3d   : > { %863 = vmatpush3.bf16.msra.mxu0 %v948_v18  ;;  %893 = vmatpush3.bf16.msra.mxu1 %v948_v18 }
  0x3e   : > { %864 = vmatprep.subr.bf16.mxu0 %v949_v19  ;;  %886 = vmatprep.subr.bf16.mxu1 %v949_v19 }
  0x41   : > { %865 = vmatpush3.bf16.msra.mxu0 %v950_v20  ;;  %894 = vmatpush3.bf16.msra.mxu1 %v950_v20 }
  0x42   : > { %866 = vmatprep.subr.bf16.mxu0 %v951_v21  ;;  %887 = vmatprep.subr.bf16.mxu1 %v951_v21 }
  0x45   : > { %867 = vmatpush3.bf16.msra.mxu0 %v952_v22  ;;  %895 = vmatpush3.bf16.msra.mxu1 %v952_v22 }
  0x48   : > { %599 = vmatmul.mubr.bf16.vlgmr.msra.gmra.mrb[0].mxu0 %v953_v23  ;;  %607 = vmatmul.mubr.bf16.vlgmr.msra.gmra.mrb[0].mxu1 %v956_v24 }
 0x11b   : > { %v868_v25 = vpop.f32.mrb[0].mxu0  ;;  %v874_v26 = vpop.f32.mrb[0].mxu1 }
 0x11c   : > { %v869_v28 = vpop.f32.mrb[1].mxu0  ;;  %v875_v30 = vpop.f32.mrb[1].mxu1 }
 0x11d   : > { %v870_v31 = vadd.f32 %v869_v28, %v868_v25  ;;  %v876_v32 = vadd.f32 %v875_v30, %v874_v26  ;;  %v871_v33 = vpop.f32.mrb[2].mxu0  ;;  %v877_v34 = vpop.f32.mrb[2].mxu1  ;;  %626 = sbr.rel (%p844_p11) target bundleno = 308 (0x134), region = 86 }
 0x11e   : > { %v872_v36 = vpop.f32.mrb[3].mxu0  ;;  %v878_v38 = vpop.f32.mrb[3].mxu1 }
 0x11f   : > { %v615_v39 = vadd.f32 %v870_v31, %v410_v27  ;;  %v617_v40 = vadd.f32 %v876_v32, %v412_v29  ;;  %v873_v41 = vadd.f32 %v872_v36, %v871_v33  ;;  %v879_v42 = vadd.f32 %v878_v38, %v877_v34 }
 0x121   : > { %619 = vst [vmem:[#allocation2] sm:$0xff] %v615_v39  ;;  %621 = vst [vmem:[#allocation2 + $0x10] sm:$0xff] %v617_v40  ;;  %v616_v43 = vadd.f32 %v873_v41, %v411_v35  ;;  %v618_v44 = vadd.f32 %v879_v42, %v413_v37 }
 0x123   : > { %620 = vst [vmem:[#allocation2 + $0x8] sm:$0xff] %v616_v43  ;;  %622 = vst [vmem:[#allocation2 + $0x18] sm:$0xff] %v618_v44 }
 0x128   : > { %v627_v45 = vld [vmem:[#allocation2] sm:$0xff]  ;;  %v629_v52 = vld [vmem:[#allocation2 + $0x10] sm:$0xff] }
 0x129   : > { %v638_v48 = vmul.f32 %v845_v46, %v627_v45  ;;  %v640_v56 = vmul.f32 %v845_v46, %v629_v52 }
 0x12a   : > { %v628_v49 = vld [vmem:[#allocation2 + $0x8] sm:$0xff]  ;;  %v630_v53 = vld [vmem:[#allocation2 + $0x18] sm:$0xff] }
 0x12b   : > { %v639_v51 = vmul.f32 %v845_v46, %v628_v49  ;;  %v649_v54 = vadd.f32 %v846_v47, %v638_v48  ;;  %v641_v57 = vmul.f32 %v845_v46, %v630_v53  ;;  %v651_v62 = vadd.f32 %v846_v47, %v640_v56 }
 0x12d   : > { %v650_v58 = vadd.f32 %v846_v47, %v639_v51  ;;  %v657_v61 = vadd.f32 %v653_v50, %v649_v54  ;;  %v652_v63 = vadd.f32 %v846_v47, %v641_v57  ;;  %v659_v2 = vadd.f32 %v655_v59, %v651_v62 }
 0x12f   : > { %v658_v0 = vadd.f32 %v654_v55, %v650_v58  ;;  %v661_v1 = vmax.f32 %v657_v61, 0.0  ;;  %v660_v3 = vadd.f32 %v656_v60, %v652_v63  ;;  %v663_v5 = vmax.f32 %v659_v2, 0.0 }
 0x131   : > { %v662_v4 = vmax.f32 %v658_v0, 0.0  ;;  %665 = vst [vmem:[%s1156_s5] sm:$0xff] %v661_v1  ;;  %v664_v6 = vmax.f32 %v660_v3, 0.0  ;;  %667 = vst [vmem:[%s1156_s5 + $0x10] sm:$0xff] %v663_v5 }
 0x133   : > { %666 = vst [vmem:[%s1156_s5 + $0x8] sm:$0xff] %v662_v4  ;;  %668 = vst [vmem:[%s1156_s5 + $0x18] sm:$0xff] %v664_v6 }
 0x134 PF: > { %s15_s22 = sadd.s32 1, %s997_s22   ;;  %s1157_s18 = smov %s985_s19 }
 0x135   : > { %p12_p12 = scmp.ge.s32.totalorder %s15_s22, 5   ;;  %s1158_s19 = smov %s1065_s26 }
 0x136   : > { %s1159_s20 = smov %s993_s21  ;;  %s1160_s21 = smov %s1162_s23 }
 0x137   :  { %14 = sbr.rel (!%p12_p12) target bundleno = 3 (0x3), region = 133 }

// kernel: resnet18_rnn_forward.117
= control target key start
LH: loop header
LB: loop body
LE: loop exit
PB: predicated region body
PF: predicated region fallthrough
CT: control target
= control target key end

     0   :  { %v223_v0 = vmov 0.0   ;;  %vm224_vm0 = vmmov 0   ;;  %s289_s1 = inlined_call_operand.vmem [shape: bf16[128,128], index: 1, kind: input, shape index: {}]   ;;  %s290_s0 = inlined_call_operand.vmem [shape: bf16[16,128], index: 0, kind: input, shape index: {}]   ;;  %s291_s2 = inlined_call_operand.vmem [shape: f32[1,128], index: 2, kind: input, shape index: {}]   ;;  %s292_s3 = inlined_call_operand.vmem [shape: f32[1,128], index: 3, kind: input, shape index: {}]   ;;  %s293_s4 = inlined_call_operand.vmem [shape: f32[16,128], index: 4, kind: output, shape index: {}]  }
   0x1   :  { %192 = vmatprep.subr.bf16.mxu0 %v223_v0  ;;  %v214_v1 = vld [vmem:[%s289_s1] sm:$0xff]   ;;  %208 = vmatprep.mubr.msk.bf16.mxu0 %vm224_vm0, %v223_v0  ;;  %v215_v2 = vld [vmem:[%s289_s1 + $0x8] sm:$0xff]   ;;  %v216_v3 = vld [vmem:[%s289_s1 + $0x10] sm:$0xff]  }
   0x2   :  { %193 = vmatpush3.bf16.msra.mxu0 %v214_v1  ;;  %v217_v4 = vld [vmem:[%s289_s1 + $0x18] sm:$0xff]   ;;  %v218_v5 = vld [vmem:[%s289_s1 + $0x20] sm:$0xff]   ;;  %v219_v6 = vld [vmem:[%s289_s1 + $0x28] sm:$0xff]  }
   0x3   :  { %194 = vmatprep.subr.bf16.mxu0 %v223_v0  ;;  %v220_v7 = vld [vmem:[%s289_s1 + $0x30] sm:$0xff]   ;;  %v221_v8 = vld [vmem:[%s289_s1 + $0x38] sm:$0xff]   ;;  %v222_v9 = vld [vmem:[%s290_s0] sm:$0xff]  }
   0x4   :  { %v181_v10 = vld [vmem:[%s291_s2] ss:$0 sm:$0xff] }
   0x5   :  { %v182_v12 = vld [vmem:[%s292_s3] ss:$0 sm:$0xff] }
   0x6   :  { %195 = vmatpush3.bf16.msra.mxu0 %v215_v2 }
   0x7   :  { %196 = vmatprep.subr.bf16.mxu0 %v223_v0 }
   0xa   :  { %197 = vmatpush3.bf16.msra.mxu0 %v216_v3 }
   0xb   :  { %198 = vmatprep.subr.bf16.mxu0 %v223_v0 }
   0xe   :  { %199 = vmatpush3.bf16.msra.mxu0 %v217_v4 }
   0xf   :  { %200 = vmatprep.subr.bf16.mxu0 %v223_v0 }
  0x12   :  { %201 = vmatpush3.bf16.msra.mxu0 %v218_v5 }
  0x13   :  { %202 = vmatprep.subr.bf16.mxu0 %v223_v0 }
  0x16   :  { %203 = vmatpush3.bf16.msra.mxu0 %v219_v6 }
  0x17   :  { %204 = vmatprep.subr.bf16.mxu0 %v223_v0 }
  0x1a   :  { %205 = vmatpush3.bf16.msra.mxu0 %v220_v7 }
  0x1b   :  { %206 = vmatprep.subr.bf16.mxu0 %v223_v0 }
  0x1e   :  { %207 = vmatpush3.bf16.msra.mxu0 %v221_v8 }
  0x21   :  { %209 = vmatmul.mubr.bf16.vlgmr.msra.gmra.mrb[0].mxu0 %v222_v9 }
  0xf4   :  { %v132_v11 = vpop.f32.mrb[0].mxu0 }
  0xf5   :  { %v155_v13 = vmul.f32 %v181_v10, %v132_v11  ;;  %v210_v14 = vpop.f32.mrb[1].mxu0 }
  0xf6   :  { %v135_v15 = vpop.f32.mrb[2].mxu0 }
  0xf7   :  { %v164_v16 = vadd.f32 %v182_v12, %v155_v13  ;;  %v156_v17 = vmul.f32 %v181_v10, %v135_v15  ;;  %v211_v18 = vpop.f32.mrb[3].mxu0 }
  0xf9   :  { %166 = vst [vmem:[%s293_s4] sm:$0xff] %v164_v16  ;;  %v165_v19 = vadd.f32 %v182_v12, %v156_v17 }
  0xfb   :  { %167 = vst [vmem:[%s293_s4 + $0x8] sm:$0xff] %v165_v19 }

// kernel: resnet18_rnn_forward.116
= control target key start
LH: loop header
LB: loop body
LE: loop exit
PB: predicated region body
PF: predicated region fallthrough
CT: control target
= control target key end

     0   :  { %s865_s15 = smov 0   ;;  %s867_s16 = smov 0   ;;  %s969_s0 = inlined_call_operand.vmem [shape: bf16[16,768], index: 0, kind: input, shape index: {}]   ;;  %s970_s1 = inlined_call_operand.vmem [shape: bf16[768,128], index: 1, kind: input, shape index: {}]   ;;  %s971_s2 = inlined_call_operand.vmem [shape: f32[1,128], index: 2, kind: input, shape index: {}]   ;;  %s972_s3 = inlined_call_operand.vmem [shape: f32[1,128], index: 3, kind: input, shape index: {}]   ;;  %s973_s4 = inlined_call_operand.vmem [shape: f32[16,128], index: 4, kind: output, shape index: {}]  }
   0x1   :  { %s869_s17 = smov 0   ;;  %s871_s18 = smov 0  }
   0x2   :  { %s873_s19 = smov 0  }
   0x3 LB: > { %s26_s20 = sadd.s32 1, %s833_s18  ;;  %p49_p1 = scmp.ne.s32.totalorder %s825_s16, %s821_s15  ;;  %s837_s19 = sphi %s873_s19, %s14_s19   ;;  %s833_s18 = sphi %s871_s18, %s977_s18   ;;  %s829_s17 = sphi %s869_s17, %s976_s17   ;;  %s825_s16 = sphi %s867_s16, %s975_s16   ;;  %s821_s15 = sphi %s865_s15, %s974_s15  }
   0x4   : > { %p27_p0 = scmp.ge.s32.totalorder %s26_s20, 3  ;;  %p50_p2 = scmp.eq.s32.totalorder %s837_s19, 0 }
   0x5   : > { %s42_s22 = sadd.s32 1, %s825_s16  ;;  %p682_p5 = scmp.ge.s32.totalorder %s837_s19, 3 }
   0x6   : > { %s979_s20 = smov (%p27_p0, %s26_s20), 0  ;;  %p51_p3 = por %p50_p2, %p49_p1 }
   0x7   : > { %s38_s21 = ssub.s32 %s833_s18, %s979_s20  ;;  %195 = sbr.rel (%p682_p5) target bundleno = 21 (0x15), region = 24 }
   0x8   : > { %p40_p4 = scmp.eq.s32.totalorder %s38_s21, 0 }
   0xa   : > { %s900_s23 = scalar_select %p40_p4, %s825_s16, %s42_s22  }
   0xe   : > { %198 = sbr.rel (!%p51_p3) target bundleno = 21 (0x15), region = 28  ;;  %s200_s24 = sand.u32 (%p51_p3), 1, %s825_s16  }
   0xf   : > { %s716_s25 = sshll.u32 (%p51_p3), %s833_s18, 3  ;;  %s683_s26 = sshll.u32 (%p51_p3), %s200_s24, 4 }
  0x10   : > { %s208_s29 = scalar_lea.vmem (%p51_p3), %s969_s0, %s716_s25  ;;  %s202_s30 = scalar_lea.vmem (%p51_p3), [#allocation3], %s683_s26 }
  0x11   : > { %v238_v0 = vld [vmem:[%s208_s29] sm:$0xff] (%p51_p3)  ;;  %v240_v1 = vld [vmem:[%s208_s29 + $0x18] sm:$0xff] (%p51_p3) }
  0x12   : > { %239 = vst [vmem:[%s202_s30] sm:$0xff] (%p51_p3), %v238_v0  ;;  %241 = vst [vmem:[%s202_s30 + $0x8] sm:$0xff] (%p51_p3), %v240_v1 }
  0x15 PF: > { %p686_p6 = scmp.ge.s32.totalorder %s837_s19, 1  ;;  %p258_p7 = scmp.lt.s32.totalorder %s837_s19, 4 }
  0x17   : > { %p259_p8 = pnand %p686_p6, %p258_p7 }
  0x18   : > { %s265_s5 = sand.u32 (!%p259_p8), 1, %s821_s15   ;;  %s688_s6 = sshll.u32 (!%p259_p8), %s829_s17, 5 }
  0x19   : > { %262 = sbr.rel (%p259_p8) target bundleno = 306 (0x132), region = 70  ;;  %s912_s7 = sshll.u32 (!%p259_p8), %s265_s5, 4 }
  0x1a   : > { %p310_p9 = scmp.lt.s32.totalorder (!%p259_p8), %s688_s6, 95  ;;  %s267_s12 = scalar_lea.vmem (!%p259_p8), [#allocation3], %s912_s7 }
  0x1b   : > { %p690_p10 = scmp.ne.s32.totalorder (!%p259_p8), %s829_s17, 0 }
  0x20   : > { %s981_s6 = smov (!%p310_p9, %s688_s6), 95  ;;  %337 = sbr.rel (%p690_p10) target bundleno = 39 (0x27), region = 78 }
  0x21   : > { %s689_s8 = sshll.u32 %s981_s6, 2  ;;  %v839_v2 = vmov (!%p690_p10), 0.0  }
  0x22   : > { %s917_s11 = scalar_lea.vmem %s970_s1, %s689_s8  ;;  %338 = vst [vmem:[#allocation2] sm:$0xff] (!%p690_p10), %v839_v2  ;;  %339 = vst [vmem:[#allocation2 + $0x8] sm:$0xff] (!%p690_p10), %v839_v2 }
  0x27 PF: > { %v780_v3 = vld [vmem:[%s917_s11 + $0x40] sm:$0xff]   ;;  %v782_v5 = vld [vmem:[%s917_s11 + $0x48] sm:$0xff]   ;;  %v784_v7 = vld [vmem:[%s917_s11 + $0x50] sm:$0xff]   ;;  %p709_p11 = scmp.ne.s32.totalorder %s829_s17, 2 }
  0x28   : > { %v781_v4 = vld [vmem:[%s917_s11] sm:$0xff]   ;;  %717 = vmatprep.subr.bf16.mxu0 %v780_v3  ;;  %v783_v6 = vld [vmem:[%s917_s11 + $0x8] sm:$0xff]   ;;  %v785_v8 = vld [vmem:[%s917_s11 + $0x10] sm:$0xff]  }
  0x29   : > { %718 = vmatpush3.bf16.msra.mxu0 %v781_v4  ;;  %v786_v9 = vld [vmem:[%s917_s11 + $0x58] sm:$0xff]   ;;  %v788_v11 = vld [vmem:[%s917_s11 + $0x60] sm:$0xff]   ;;  %v790_v13 = vld [vmem:[%s917_s11 + $0x68] sm:$0xff]  }
  0x2a   : > { %719 = vmatprep.subr.bf16.mxu0 %v782_v5  ;;  %v787_v10 = vld [vmem:[%s917_s11 + $0x18] sm:$0xff]   ;;  %v789_v12 = vld [vmem:[%s917_s11 + $0x20] sm:$0xff]   ;;  %v791_v15 = vld [vmem:[%s917_s11 + $0x28] sm:$0xff]  }
  0x2b   : > { %v798_v14 = vld [vmem:[%s267_s12 + $0x4] ss:$8 sps:$4 sm:$0xff]   ;;  %v796_v20 = vld [vmem:[%s267_s12] ss:$8 sps:$4 sm:$0xff]  }
  0x2c   : > { %514 = vmatprep.mubr.bf16.mxu0 %v798_v14  ;;  %v792_v16 = vld [vmem:[%s917_s11 + $0x70] sm:$0xff]   ;;  %v794_v18 = vld [vmem:[%s917_s11 + $0x78] sm:$0xff]   ;;  %v340_v22 = vld [vmem:[#allocation2] sm:$0xff] }
  0x2d   : > { %720 = vmatpush3.bf16.msra.mxu0 %v783_v6  ;;  %v793_v17 = vld [vmem:[%s917_s11 + $0x30] sm:$0xff]   ;;  %v795_v19 = vld [vmem:[%s917_s11 + $0x38] sm:$0xff]   ;;  %v341_v26 = vld [vmem:[#allocation2 + $0x8] sm:$0xff] }
  0x2e   : > { %721 = vmatprep.subr.bf16.mxu0 %v784_v7  ;;  %v710_v32 = vld [vmem:[%s971_s2] ss:$0 sm:$0xff] (!%p709_p11) }
  0x2f   : > { %v711_v33 = vld [vmem:[%s972_s3] ss:$0 sm:$0xff] (!%p709_p11) }
  0x31   : > { %722 = vmatpush3.bf16.msra.mxu0 %v785_v8 }
  0x32   : > { %723 = vmatprep.subr.bf16.mxu0 %v786_v9 }
  0x35   : > { %724 = vmatpush3.bf16.msra.mxu0 %v787_v10 }
  0x36   : > { %725 = vmatprep.subr.bf16.mxu0 %v788_v11 }
  0x39   : > { %726 = vmatpush3.bf16.msra.mxu0 %v789_v12 }
  0x3a   : > { %727 = vmatprep.subr.bf16.mxu0 %v790_v13 }
  0x3d   : > { %728 = vmatpush3.bf16.msra.mxu0 %v791_v15 }
  0x3e   : > { %729 = vmatprep.subr.bf16.mxu0 %v792_v16 }
  0x41   : > { %730 = vmatpush3.bf16.msra.mxu0 %v793_v17 }
  0x42   : > { %731 = vmatprep.subr.bf16.mxu0 %v794_v18 }
  0x45   : > { %732 = vmatpush3.bf16.msra.mxu0 %v795_v19 }
  0x48   : > { %515 = vmatmul.mubr.bf16.vlgmr.msra.gmra.mrb[0].mxu0 %v796_v20 }
 0x11b   : > { %v733_v21 = vpop.f32.mrb[0].mxu0 }
 0x11c   : > { %v734_v23 = vpop.f32.mrb[1].mxu0 }
 0x11d   : > { %v735_v24 = vadd.f32 %v734_v23, %v733_v21  ;;  %v736_v25 = vpop.f32.mrb[2].mxu0  ;;  %530 = sbr.rel (%p709_p11) target bundleno = 306 (0x132), region = 82 }
 0x11e   : > { %v737_v27 = vpop.f32.mrb[3].mxu0 }
 0x11f   : > { %v523_v28 = vadd.f32 %v735_v24, %v340_v22  ;;  %v738_v29 = vadd.f32 %v737_v27, %v736_v25 }
 0x121   : > { %525 = vst [vmem:[#allocation2] sm:$0xff] %v523_v28  ;;  %v524_v30 = vadd.f32 %v738_v29, %v341_v26 }
 0x123   : > { %526 = vst [vmem:[#allocation2 + $0x8] sm:$0xff] %v524_v30 }
 0x128   : > { %v531_v31 = vld [vmem:[#allocation2] sm:$0xff] }
 0x129   : > { %v540_v34 = vmul.f32 %v710_v32, %v531_v31 }
 0x12a   : > { %v532_v35 = vld [vmem:[#allocation2 + $0x8] sm:$0xff] }
 0x12b   : > { %v541_v36 = vmul.f32 %v710_v32, %v532_v35  ;;  %v549_v37 = vadd.f32 %v711_v33, %v540_v34 }
 0x12d   : > { %v550_v38 = vadd.f32 %v711_v33, %v541_v36  ;;  %v551_v39 = vmax.f32 %v549_v37, 0.0 }
 0x12f   : > { %v552_v40 = vmax.f32 %v550_v38, 0.0  ;;  %553 = vst [vmem:[%s973_s4] sm:$0xff] %v551_v39 }
 0x131   : > { %554 = vst [vmem:[%s973_s4 + $0x8] sm:$0xff] %v552_v40 }
 0x132 PF: > { %s14_s19 = sadd.s32 1, %s837_s19   ;;  %s974_s15 = smov %s825_s16 }
 0x133   : > { %p11_p12 = scmp.ge.s32.totalorder %s14_s19, 5   ;;  %s975_s16 = smov %s900_s23 }
 0x134   : > { %s976_s17 = smov %s833_s18  ;;  %s977_s18 = smov %s979_s20 }
 0x135   :  { %13 = sbr.rel (!%p11_p12) target bundleno = 3 (0x3), region = 126 }

// kernel: resnet18_rnn_forward.118
= control target key start
LH: loop header
LB: loop body
LE: loop exit
PB: predicated region body
PF: predicated region fallthrough
CT: control target
= control target key end

     0   :  { %s953_s18 = smov 0   ;;  %s955_s19 = smov 0   ;;  %s1063_s0 = inlined_call_operand.vmem [shape: bf16[16,1280], index: 0, kind: input, shape index: {}]   ;;  %s1064_s1 = inlined_call_operand.vmem [shape: bf16[1280,128], index: 1, kind: input, shape index: {}]   ;;  %s1065_s2 = inlined_call_operand.vmem [shape: f32[1,128], index: 2, kind: input, shape index: {}]   ;;  %s1066_s3 = inlined_call_operand.vmem [shape: f32[1,128], index: 3, kind: input, shape index: {}]   ;;  %s1067_s4 = inlined_call_operand.vmem [shape: f32[16,128], index: 4, kind: input, shape index: {}]   ;;  %s1068_s5 = inlined_call_operand.vmem [shape: f32[16,128], index: 5, kind: output, shape index: {}]  }
   0x1   :  { %s957_s20 = smov 0   ;;  %s959_s21 = smov 0  }
   0x2   :  { %s961_s22 = smov 0  }
   0x3 LB: > { %s27_s23 = sadd.s32 1, %s916_s21  ;;  %p50_p1 = scmp.ne.s32.totalorder %s908_s19, %s904_s18  ;;  %s920_s22 = sphi %s961_s22, %s15_s22   ;;  %s916_s21 = sphi %s959_s21, %s1072_s21   ;;  %s912_s20 = sphi %s957_s20, %s1071_s20   ;;  %s908_s19 = sphi %s955_s19, %s1070_s19   ;;  %s904_s18 = sphi %s953_s18, %s1069_s18  }
   0x4   : > { %p28_p0 = scmp.ge.s32.totalorder %s27_s23, 5  ;;  %p51_p2 = scmp.eq.s32.totalorder %s920_s22, 0 }
   0x5   : > { %s43_s25 = sadd.s32 1, %s908_s19  ;;  %p765_p5 = scmp.ge.s32.totalorder %s920_s22, 5 }
   0x6   : > { %s1074_s23 = smov (%p28_p0, %s27_s23), 0  ;;  %p52_p3 = por %p51_p2, %p50_p1 }
   0x7   : > { %s39_s24 = ssub.s32 %s916_s21, %s1074_s23  ;;  %236 = sbr.rel (%p765_p5) target bundleno = 21 (0x15), region = 28 }
   0x8   : > { %p41_p4 = scmp.eq.s32.totalorder %s39_s24, 0 }
   0xa   : > { %s988_s26 = scalar_select %p41_p4, %s908_s19, %s43_s25  }
   0xe   : > { %239 = sbr.rel (!%p52_p3) target bundleno = 21 (0x15), region = 32  ;;  %s241_s27 = sand.u32 (%p52_p3), 1, %s908_s19  }
   0xf   : > { %s799_s28 = sshll.u32 (%p52_p3), %s916_s21, 3  ;;  %s766_s29 = sshll.u32 (%p52_p3), %s241_s27, 4 }
  0x10   : > { %s249_s7 = scalar_lea.vmem (%p52_p3), %s1063_s0, %s799_s28  ;;  %s243_s8 = scalar_lea.vmem (%p52_p3), [#allocation3], %s766_s29 }
  0x11   : > { %v279_v0 = vld [vmem:[%s249_s7] sm:$0xff] (%p52_p3)  ;;  %v281_v1 = vld [vmem:[%s249_s7 + $0x28] sm:$0xff] (%p52_p3) }
  0x12   : > { %280 = vst [vmem:[%s243_s8] sm:$0xff] (%p52_p3), %v279_v0  ;;  %282 = vst [vmem:[%s243_s8 + $0x8] sm:$0xff] (%p52_p3), %v281_v1 }
  0x15 PF: > { %p769_p6 = scmp.ge.s32.totalorder %s920_s22, 1  ;;  %p299_p7 = scmp.lt.s32.totalorder %s920_s22, 6 }
  0x17   : > { %p300_p8 = pnand %p769_p6, %p299_p7 }
  0x18   : > { %s306_s9 = sand.u32 (!%p300_p8), 1, %s904_s18   ;;  %s771_s10 = sshll.u32 (!%p300_p8), %s912_s20, 5 }
  0x19   : > { %303 = sbr.rel (%p300_p8) target bundleno = 308 (0x134), region = 74  ;;  %s1000_s11 = sshll.u32 (!%p300_p8), %s306_s9, 4 }
  0x1a   : > { %p361_p9 = scmp.lt.s32.totalorder (!%p300_p8), %s771_s10, 159  ;;  %s308_s16 = scalar_lea.vmem (!%p300_p8), [#allocation3], %s1000_s11 }
  0x1b   : > { %p773_p10 = scmp.ne.s32.totalorder (!%p300_p8), %s912_s20, 0 }
  0x20   : > { %s1076_s10 = smov (!%p361_p9, %s771_s10), 159  ;;  %397 = sbr.rel (%p773_p10) target bundleno = 39 (0x27), region = 82 }
  0x21   : > { %s772_s12 = sshll.u32 %s1076_s10, 2  ;;  %v922_v2 = vmov (!%p773_p10), 0.0  }
  0x22   : > { %s1005_s15 = scalar_lea.vmem %s1064_s1, %s772_s12  ;;  %398 = vst [vmem:[#allocation2] sm:$0xff] (!%p773_p10), %v922_v2  ;;  %399 = vst [vmem:[#allocation2 + $0x8] sm:$0xff] (!%p773_p10), %v922_v2 }
  0x27 PF: > { %v863_v3 = vld [vmem:[%s1005_s15 + $0x40] sm:$0xff]   ;;  %v865_v5 = vld [vmem:[%s1005_s15 + $0x48] sm:$0xff]   ;;  %v867_v7 = vld [vmem:[%s1005_s15 + $0x50] sm:$0xff]   ;;  %p792_p11 = scmp.ne.s32.totalorder %s912_s20, 4 }
  0x28   : > { %v864_v4 = vld [vmem:[%s1005_s15] sm:$0xff]   ;;  %800 = vmatprep.subr.bf16.mxu0 %v863_v3  ;;  %v866_v6 = vld [vmem:[%s1005_s15 + $0x8] sm:$0xff]   ;;  %v868_v8 = vld [vmem:[%s1005_s15 + $0x10] sm:$0xff]  }
  0x29   : > { %801 = vmatpush3.bf16.msra.mxu0 %v864_v4  ;;  %v869_v9 = vld [vmem:[%s1005_s15 + $0x58] sm:$0xff]   ;;  %v871_v11 = vld [vmem:[%s1005_s15 + $0x60] sm:$0xff]   ;;  %v873_v13 = vld [vmem:[%s1005_s15 + $0x68] sm:$0xff]  }
  0x2a   : > { %802 = vmatprep.subr.bf16.mxu0 %v865_v5  ;;  %v870_v10 = vld [vmem:[%s1005_s15 + $0x18] sm:$0xff]   ;;  %v872_v12 = vld [vmem:[%s1005_s15 + $0x20] sm:$0xff]   ;;  %v874_v15 = vld [vmem:[%s1005_s15 + $0x28] sm:$0xff]  }
  0x2b   : > { %v881_v14 = vld [vmem:[%s308_s16 + $0x4] ss:$8 sps:$4 sm:$0xff]   ;;  %v879_v20 = vld [vmem:[%s308_s16] ss:$8 sps:$4 sm:$0xff]  }
  0x2c   : > { %574 = vmatprep.mubr.bf16.mxu0 %v881_v14  ;;  %v875_v16 = vld [vmem:[%s1005_s15 + $0x70] sm:$0xff]   ;;  %v877_v18 = vld [vmem:[%s1005_s15 + $0x78] sm:$0xff]   ;;  %v400_v22 = vld [vmem:[#allocation2] sm:$0xff] }
  0x2d   : > { %803 = vmatpush3.bf16.msra.mxu0 %v866_v6  ;;  %v876_v17 = vld [vmem:[%s1005_s15 + $0x30] sm:$0xff]   ;;  %v878_v19 = vld [vmem:[%s1005_s15 + $0x38] sm:$0xff]   ;;  %v401_v26 = vld [vmem:[#allocation2 + $0x8] sm:$0xff] }
  0x2e   : > { %804 = vmatprep.subr.bf16.mxu0 %v867_v7  ;;  %v793_v32 = vld [vmem:[%s1065_s2] ss:$0 sm:$0xff] (!%p792_p11)  ;;  %v612_v39 = vld [vmem:[%s1067_s4 + $0x8] sm:$0xff] (!%p792_p11) }
  0x2f   : > { %v794_v33 = vld [vmem:[%s1066_s3] ss:$0 sm:$0xff] (!%p792_p11) }
  0x30   : > { %v611_v36 = vld [vmem:[%s1067_s4] sm:$0xff] (!%p792_p11) }
  0x31   : > { %805 = vmatpush3.bf16.msra.mxu0 %v868_v8 }
  0x32   : > { %806 = vmatprep.subr.bf16.mxu0 %v869_v9 }
  0x35   : > { %807 = vmatpush3.bf16.msra.mxu0 %v870_v10 }
  0x36   : > { %808 = vmatprep.subr.bf16.mxu0 %v871_v11 }
  0x39   : > { %809 = vmatpush3.bf16.msra.mxu0 %v872_v12 }
  0x3a   : > { %810 = vmatprep.subr.bf16.mxu0 %v873_v13 }
  0x3d   : > { %811 = vmatpush3.bf16.msra.mxu0 %v874_v15 }
  0x3e   : > { %812 = vmatprep.subr.bf16.mxu0 %v875_v16 }
  0x41   : > { %813 = vmatpush3.bf16.msra.mxu0 %v876_v17 }
  0x42   : > { %814 = vmatprep.subr.bf16.mxu0 %v877_v18 }
  0x45   : > { %815 = vmatpush3.bf16.msra.mxu0 %v878_v19 }
  0x48   : > { %575 = vmatmul.mubr.bf16.vlgmr.msra.gmra.mrb[0].mxu0 %v879_v20 }
 0x11b   : > { %v816_v21 = vpop.f32.mrb[0].mxu0 }
 0x11c   : > { %v817_v23 = vpop.f32.mrb[1].mxu0 }
 0x11d   : > { %v818_v24 = vadd.f32 %v817_v23, %v816_v21  ;;  %v819_v25 = vpop.f32.mrb[2].mxu0  ;;  %590 = sbr.rel (%p792_p11) target bundleno = 308 (0x134), region = 86 }
 0x11e   : > { %v820_v27 = vpop.f32.mrb[3].mxu0 }
 0x11f   : > { %v583_v28 = vadd.f32 %v818_v24, %v400_v22  ;;  %v821_v29 = vadd.f32 %v820_v27, %v819_v25 }
 0x121   : > { %585 = vst [vmem:[#allocation2] sm:$0xff] %v583_v28  ;;  %v584_v30 = vadd.f32 %v821_v29, %v401_v26 }
 0x123   : > { %586 = vst [vmem:[#allocation2 + $0x8] sm:$0xff] %v584_v30 }
 0x128   : > { %v591_v31 = vld [vmem:[#allocation2] sm:$0xff] }
 0x129   : > { %v600_v34 = vmul.f32 %v793_v32, %v591_v31 }
 0x12a   : > { %v592_v35 = vld [vmem:[#allocation2 + $0x8] sm:$0xff] }
 0x12b   : > { %v601_v37 = vmul.f32 %v793_v32, %v592_v35  ;;  %v609_v38 = vadd.f32 %v794_v33, %v600_v34 }
 0x12d   : > { %v610_v40 = vadd.f32 %v794_v33, %v601_v37  ;;  %v613_v41 = vadd.f32 %v611_v36, %v609_v38 }
 0x12f   : > { %v614_v42 = vadd.f32 %v612_v39, %v610_v40  ;;  %v615_v43 = vmax.f32 %v613_v41, 0.0 }
 0x131   : > { %v616_v44 = vmax.f32 %v614_v42, 0.0  ;;  %617 = vst [vmem:[%s1068_s5] sm:$0xff] %v615_v43 }
 0x133   : > { %618 = vst [vmem:[%s1068_s5 + $0x8] sm:$0xff] %v616_v44 }
 0x134 PF: > { %s15_s22 = sadd.s32 1, %s920_s22   ;;  %s1069_s18 = smov %s908_s19 }
 0x135   : > { %p12_p12 = scmp.ge.s32.totalorder %s15_s22, 7   ;;  %s1070_s19 = smov %s988_s26 }
 0x136   : > { %s1071_s20 = smov %s916_s21  ;;  %s1072_s21 = smov %s1074_s23 }
 0x137   :  { %14 = sbr.rel (!%p12_p12) target bundleno = 3 (0x3), region = 133 }

// kernel: resnet18_rnn_forward.119
= control target key start
LH: loop header
LB: loop body
LE: loop exit
PB: predicated region body
PF: predicated region fallthrough
CT: control target
= control target key end

     0   :  { %s865_s15 = smov 0   ;;  %s867_s16 = smov 0   ;;  %s969_s0 = inlined_call_operand.vmem [shape: bf16[16,1280], index: 0, kind: input, shape index: {}]   ;;  %s970_s1 = inlined_call_operand.vmem [shape: bf16[1280,128], index: 1, kind: input, shape index: {}]   ;;  %s971_s2 = inlined_call_operand.vmem [shape: f32[1,128], index: 2, kind: input, shape index: {}]   ;;  %s972_s3 = inlined_call_operand.vmem [shape: f32[1,128], index: 3, kind: input, shape index: {}]   ;;  %s973_s4 = inlined_call_operand.vmem [shape: f32[16,128], index: 4, kind: output, shape index: {}]  }
   0x1   :  { %s869_s17 = smov 0   ;;  %s871_s18 = smov 0  }
   0x2   :  { %s873_s19 = smov 0  }
   0x3 LB: > { %s26_s20 = sadd.s32 1, %s833_s18  ;;  %p49_p1 = scmp.ne.s32.totalorder %s825_s16, %s821_s15  ;;  %s837_s19 = sphi %s873_s19, %s14_s19   ;;  %s833_s18 = sphi %s871_s18, %s977_s18   ;;  %s829_s17 = sphi %s869_s17, %s976_s17   ;;  %s825_s16 = sphi %s867_s16, %s975_s16   ;;  %s821_s15 = sphi %s865_s15, %s974_s15  }
   0x4   : > { %p27_p0 = scmp.ge.s32.totalorder %s26_s20, 5  ;;  %p50_p2 = scmp.eq.s32.totalorder %s837_s19, 0 }
   0x5   : > { %s42_s22 = sadd.s32 1, %s825_s16  ;;  %p682_p5 = scmp.ge.s32.totalorder %s837_s19, 5 }
   0x6   : > { %s979_s20 = smov (%p27_p0, %s26_s20), 0  ;;  %p51_p3 = por %p50_p2, %p49_p1 }
   0x7   : > { %s38_s21 = ssub.s32 %s833_s18, %s979_s20  ;;  %195 = sbr.rel (%p682_p5) target bundleno = 21 (0x15), region = 24 }
   0x8   : > { %p40_p4 = scmp.eq.s32.totalorder %s38_s21, 0 }
   0xa   : > { %s900_s23 = scalar_select %p40_p4, %s825_s16, %s42_s22  }
   0xe   : > { %198 = sbr.rel (!%p51_p3) target bundleno = 21 (0x15), region = 28  ;;  %s200_s24 = sand.u32 (%p51_p3), 1, %s825_s16  }
   0xf   : > { %s716_s25 = sshll.u32 (%p51_p3), %s833_s18, 3  ;;  %s683_s26 = sshll.u32 (%p51_p3), %s200_s24, 4 }
  0x10   : > { %s208_s29 = scalar_lea.vmem (%p51_p3), %s969_s0, %s716_s25  ;;  %s202_s30 = scalar_lea.vmem (%p51_p3), [#allocation3], %s683_s26 }
  0x11   : > { %v238_v0 = vld [vmem:[%s208_s29] sm:$0xff] (%p51_p3)  ;;  %v240_v1 = vld [vmem:[%s208_s29 + $0x28] sm:$0xff] (%p51_p3) }
  0x12   : > { %239 = vst [vmem:[%s202_s30] sm:$0xff] (%p51_p3), %v238_v0  ;;  %241 = vst [vmem:[%s202_s30 + $0x8] sm:$0xff] (%p51_p3), %v240_v1 }
  0x15 PF: > { %p686_p6 = scmp.ge.s32.totalorder %s837_s19, 1  ;;  %p258_p7 = scmp.lt.s32.totalorder %s837_s19, 6 }
  0x17   : > { %p259_p8 = pnand %p686_p6, %p258_p7 }
  0x18   : > { %s265_s5 = sand.u32 (!%p259_p8), 1, %s821_s15   ;;  %s688_s6 = sshll.u32 (!%p259_p8), %s829_s17, 5 }
  0x19   : > { %262 = sbr.rel (%p259_p8) target bundleno = 306 (0x132), region = 70  ;;  %s912_s7 = sshll.u32 (!%p259_p8), %s265_s5, 4 }
  0x1a   : > { %p310_p9 = scmp.lt.s32.totalorder (!%p259_p8), %s688_s6, 159  ;;  %s267_s12 = scalar_lea.vmem (!%p259_p8), [#allocation3], %s912_s7 }
  0x1b   : > { %p690_p10 = scmp.ne.s32.totalorder (!%p259_p8), %s829_s17, 0 }
  0x20   : > { %s981_s6 = smov (!%p310_p9, %s688_s6), 159  ;;  %337 = sbr.rel (%p690_p10) target bundleno = 39 (0x27), region = 78 }
  0x21   : > { %s689_s8 = sshll.u32 %s981_s6, 2  ;;  %v839_v2 = vmov (!%p690_p10), 0.0  }
  0x22   : > { %s917_s11 = scalar_lea.vmem %s970_s1, %s689_s8  ;;  %338 = vst [vmem:[#allocation2] sm:$0xff] (!%p690_p10), %v839_v2  ;;  %339 = vst [vmem:[#allocation2 + $0x8] sm:$0xff] (!%p690_p10), %v839_v2 }
  0x27 PF: > { %v780_v3 = vld [vmem:[%s917_s11 + $0x40] sm:$0xff]   ;;  %v782_v5 = vld [vmem:[%s917_s11 + $0x48] sm:$0xff]   ;;  %v784_v7 = vld [vmem:[%s917_s11 + $0x50] sm:$0xff]   ;;  %p709_p11 = scmp.ne.s32.totalorder %s829_s17, 4 }
  0x28   : > { %v781_v4 = vld [vmem:[%s917_s11] sm:$0xff]   ;;  %717 = vmatprep.subr.bf16.mxu0 %v780_v3  ;;  %v783_v6 = vld [vmem:[%s917_s11 + $0x8] sm:$0xff]   ;;  %v785_v8 = vld [vmem:[%s917_s11 + $0x10] sm:$0xff]  }
  0x29   : > { %718 = vmatpush3.bf16.msra.mxu0 %v781_v4  ;;  %v786_v9 = vld [vmem:[%s917_s11 + $0x58] sm:$0xff]   ;;  %v788_v11 = vld [vmem:[%s917_s11 + $0x60] sm:$0xff]   ;;  %v790_v13 = vld [vmem:[%s917_s11 + $0x68] sm:$0xff]  }
  0x2a   : > { %719 = vmatprep.subr.bf16.mxu0 %v782_v5  ;;  %v787_v10 = vld [vmem:[%s917_s11 + $0x18] sm:$0xff]   ;;  %v789_v12 = vld [vmem:[%s917_s11 + $0x20] sm:$0xff]   ;;  %v791_v15 = vld [vmem:[%s917_s11 + $0x28] sm:$0xff]  }
  0x2b   : > { %v798_v14 = vld [vmem:[%s267_s12 + $0x4] ss:$8 sps:$4 sm:$0xff]   ;;  %v796_v20 = vld [vmem:[%s267_s12] ss:$8 sps:$4 sm:$0xff]  }
  0x2c   : > { %514 = vmatprep.mubr.bf16.mxu0 %v798_v14  ;;  %v792_v16 = vld [vmem:[%s917_s11 + $0x70] sm:$0xff]   ;;  %v794_v18 = vld [vmem:[%s917_s11 + $0x78] sm:$0xff]   ;;  %v340_v22 = vld [vmem:[#allocation2] sm:$0xff] }
  0x2d   : > { %720 = vmatpush3.bf16.msra.mxu0 %v783_v6  ;;  %v793_v17 = vld [vmem:[%s917_s11 + $0x30] sm:$0xff]   ;;  %v795_v19 = vld [vmem:[%s917_s11 + $0x38] sm:$0xff]   ;;  %v341_v26 = vld [vmem:[#allocation2 + $0x8] sm:$0xff] }
  0x2e   : > { %721 = vmatprep.subr.bf16.mxu0 %v784_v7  ;;  %v710_v32 = vld [vmem:[%s971_s2] ss:$0 sm:$0xff] (!%p709_p11) }
  0x2f   : > { %v711_v33 = vld [vmem:[%s972_s3] ss:$0 sm:$0xff] (!%p709_p11) }
  0x31   : > { %722 = vmatpush3.bf16.msra.mxu0 %v785_v8 }
  0x32   : > { %723 = vmatprep.subr.bf16.mxu0 %v786_v9 }
  0x35   : > { %724 = vmatpush3.bf16.msra.mxu0 %v787_v10 }
  0x36   : > { %725 = vmatprep.subr.bf16.mxu0 %v788_v11 }
  0x39   : > { %726 = vmatpush3.bf16.msra.mxu0 %v789_v12 }
  0x3a   : > { %727 = vmatprep.subr.bf16.mxu0 %v790_v13 }
  0x3d   : > { %728 = vmatpush3.bf16.msra.mxu0 %v791_v15 }
  0x3e   : > { %729 = vmatprep.subr.bf16.mxu0 %v792_v16 }
  0x41   : > { %730 = vmatpush3.bf16.msra.mxu0 %v793_v17 }
  0x42   : > { %731 = vmatprep.subr.bf16.mxu0 %v794_v18 }
  0x45   : > { %732 = vmatpush3.bf16.msra.mxu0 %v795_v19 }
  0x48   : > { %515 = vmatmul.mubr.bf16.vlgmr.msra.gmra.mrb[0].mxu0 %v796_v20 }
 0x11b   : > { %v733_v21 = vpop.f32.mrb[0].mxu0 }
 0x11c   : > { %v734_v23 = vpop.f32.mrb[1].mxu0 }
 0x11d   : > { %v735_v24 = vadd.f32 %v734_v23, %v733_v21  ;;  %v736_v25 = vpop.f32.mrb[2].mxu0  ;;  %530 = sbr.rel (%p709_p11) target bundleno = 306 (0x132), region = 82 }
 0x11e   : > { %v737_v27 = vpop.f32.mrb[3].mxu0 }
 0x11f   : > { %v523_v28 = vadd.f32 %v735_v24, %v340_v22  ;;  %v738_v29 = vadd.f32 %v737_v27, %v736_v25 }
 0x121   : > { %525 = vst [vmem:[#allocation2] sm:$0xff] %v523_v28  ;;  %v524_v30 = vadd.f32 %v738_v29, %v341_v26 }
 0x123   : > { %526 = vst [vmem:[#allocation2 + $0x8] sm:$0xff] %v524_v30 }
 0x128   : > { %v531_v31 = vld [vmem:[#allocation2] sm:$0xff] }
 0x129   : > { %v540_v34 = vmul.f32 %v710_v32, %v531_v31 }
 0x12a   : > { %v532_v35 = vld [vmem:[#allocation2 + $0x8] sm:$0xff] }
 0x12b   : > { %v541_v36 = vmul.f32 %v710_v32, %v532_v35  ;;  %v549_v37 = vadd.f32 %v711_v33, %v540_v34 }
 0x12d   : > { %v550_v38 = vadd.f32 %v711_v33, %v541_v36  ;;  %v551_v39 = vmax.f32 %v549_v37, 0.0 }
 0x12f   : > { %v552_v40 = vmax.f32 %v550_v38, 0.0  ;;  %553 = vst [vmem:[%s973_s4] sm:$0xff] %v551_v39 }
 0x131   : > { %554 = vst [vmem:[%s973_s4 + $0x8] sm:$0xff] %v552_v40 }
 0x132 PF: > { %s14_s19 = sadd.s32 1, %s837_s19   ;;  %s974_s15 = smov %s825_s16 }
 0x133   : > { %p11_p12 = scmp.ge.s32.totalorder %s14_s19, 7   ;;  %s975_s16 = smov %s900_s23 }
 0x134   : > { %s976_s17 = smov %s833_s18  ;;  %s977_s18 = smov %s979_s20 }
 0x135   :  { %13 = sbr.rel (!%p11_p12) target bundleno = 3 (0x3), region = 126 }

// kernel: resnet18_rnn_forward.122
= control target key start
LH: loop header
LB: loop body
LE: loop exit
PB: predicated region body
PF: predicated region fallthrough
CT: control target
= control target key end

     0   :  { %v275_v1 = vmov 0   ;;  %v194_v18 = vlaneseq  ;;  %s370_s1 = inlined_call_operand.vmem [shape: bf16[128,256], index: 1, kind: input, shape index: {}]   ;;  %s371_s0 = inlined_call_operand.vmem [shape: bf16[16,128], index: 0, kind: input, shape index: {}]   ;;  %s372_s2 = inlined_call_operand.vmem [shape: f32[1,256], index: 2, kind: input, shape index: {}]   ;;  %s373_s3 = inlined_call_operand.vmem [shape: f32[1,256], index: 3, kind: input, shape index: {}]   ;;  %s374_s4 = inlined_call_operand.vmem [shape: f32[16,256], index: 4, kind: output, shape index: {}]  }
   0x1   :  { %v250_v0 = vld [vmem:[%s370_s1 + $0x4] ss:$8 sps:$4 sm:$0xff]   ;;  %166 = vmatprep.mubr.bf16.mxu0 %v275_v1  ;;  %v252_v2 = vld [vmem:[%s370_s1] ss:$8 sps:$4 sm:$0xff]   ;;  %v253_v3 = vld [vmem:[%s370_s1 + $0x14] ss:$8 sps:$4 sm:$0xff]  }
   0x2   :  { %134 = vmatprep.subr.bf16.mxu0 %v250_v0  ;;  %v255_v4 = vld [vmem:[%s370_s1 + $0x10] ss:$8 sps:$4 sm:$0xff]   ;;  %v256_v5 = vld [vmem:[%s370_s1 + $0x24] ss:$8 sps:$4 sm:$0xff]   ;;  %v258_v6 = vld [vmem:[%s370_s1 + $0x20] ss:$8 sps:$4 sm:$0xff]  }
   0x3   :  { %135 = vmatpush1.bf16.msra.mxu0 %v252_v2  ;;  %v259_v7 = vld [vmem:[%s370_s1 + $0x34] ss:$8 sps:$4 sm:$0xff]   ;;  %v261_v8 = vld [vmem:[%s370_s1 + $0x30] ss:$8 sps:$4 sm:$0xff]   ;;  %v262_v9 = vld [vmem:[%s370_s1 + $0x44] ss:$8 sps:$4 sm:$0xff]  }
   0x4   :  { %136 = vmatprep.subr.bf16.mxu0 %v253_v3  ;;  %v264_v10 = vld [vmem:[%s370_s1 + $0x40] ss:$8 sps:$4 sm:$0xff]   ;;  %v265_v11 = vld [vmem:[%s370_s1 + $0x54] ss:$8 sps:$4 sm:$0xff]   ;;  %v267_v12 = vld [vmem:[%s370_s1 + $0x50] ss:$8 sps:$4 sm:$0xff]  }
   0x5   :  { %v268_v13 = vld [vmem:[%s370_s1 + $0x64] ss:$8 sps:$4 sm:$0xff]   ;;  %v270_v14 = vld [vmem:[%s370_s1 + $0x60] ss:$8 sps:$4 sm:$0xff]   ;;  %v271_v15 = vld [vmem:[%s370_s1 + $0x74] ss:$8 sps:$4 sm:$0xff]  }
   0x6   :  { %v273_v16 = vld [vmem:[%s370_s1 + $0x70] ss:$8 sps:$4 sm:$0xff]   ;;  %v274_v17 = vld [vmem:[%s371_s0] sm:$0xff]   ;;  %v195_v19 = vshrl.u32 %v194_v18, 7 }
   0x7   :  { %137 = vmatpush1.bf16.msra.mxu0 %v255_v4  ;;  %v192_v21 = vld [vmem:[%s372_s2] sm:$0x3] }
   0x8   :  { %138 = vmatprep.subr.bf16.mxu0 %v256_v5  ;;  %v196_v20 = vsub.s32 0, %v195_v19  ;;  %v200_v22 = vsub.s32 1, %v195_v19  ;;  %v208_v23 = vld [vmem:[%s373_s3] sm:$0x3] }
   0xa   :  { %v197_v24 = vrot.slane %v192_v21, %v196_v20  ;;  %v201_v25 = vrot.slane %v192_v21, %v200_v22  ;;  %v213_v26 = vrot.slane %v208_v23, %v196_v20  ;;  %v217_v28 = vrot.slane %v208_v23, %v200_v22 }
   0xb   :  { %139 = vmatpush1.bf16.msra.mxu0 %v258_v6 }
   0xc   :  { %140 = vmatprep.subr.bf16.mxu0 %v259_v7 }
   0xf   :  { %141 = vmatpush1.bf16.msra.mxu0 %v261_v8 }
  0x10   :  { %142 = vmatprep.subr.bf16.mxu0 %v262_v9 }
  0x13   :  { %143 = vmatpush1.bf16.msra.mxu0 %v264_v10 }
  0x14   :  { %144 = vmatprep.subr.bf16.mxu0 %v265_v11 }
  0x17   :  { %145 = vmatpush1.bf16.msra.mxu0 %v267_v12 }
  0x18   :  { %146 = vmatprep.subr.bf16.mxu0 %v268_v13 }
  0x1b   :  { %147 = vmatpush1.bf16.msra.mxu0 %v270_v14 }
  0x1c   :  { %148 = vmatprep.subr.bf16.mxu0 %v271_v15 }
  0x1f   :  { %149 = vmatpush1.bf16.msra.mxu0 %v273_v16 }
  0x22   :  { %167 = vmatmul.mubr.bf16.vlgmr.msra.gmra.mrb[0].mxu0 %v274_v17 }
  0xf5   :  { %v168_v27 = vpop.f32.mrb[0].mxu0 }
  0xf6   :  { %v204_v29 = vmul.f32 %v197_v24, %v168_v27  ;;  %v170_v30 = vpop.f32.mrb[1].mxu0 }
  0xf7   :  { %v205_v31 = vmul.f32 %v201_v25, %v170_v30  ;;  %v172_v32 = vpop.f32.mrb[2].mxu0 }
  0xf8   :  { %v220_v33 = vadd.f32 %v213_v26, %v204_v29  ;;  %v206_v34 = vmul.f32 %v197_v24, %v172_v32  ;;  %v174_v35 = vpop.f32.mrb[3].mxu0 }
  0xf9   :  { %v221_v36 = vadd.f32 %v217_v28, %v205_v31  ;;  %v207_v37 = vmul.f32 %v201_v25, %v174_v35 }
  0xfa   :  { %224 = vst [vmem:[%s374_s4] sm:$0xff] %v220_v33  ;;  %v222_v38 = vadd.f32 %v213_v26, %v206_v34 }
  0xfb   :  { %225 = vst [vmem:[%s374_s4 + $0x8] sm:$0xff] %v221_v36  ;;  %v223_v39 = vadd.f32 %v217_v28, %v207_v37 }
  0xfc   :  { %226 = vst [vmem:[%s374_s4 + $0x10] sm:$0xff] %v222_v38 }
  0xfd   :  { %227 = vst [vmem:[%s374_s4 + $0x18] sm:$0xff] %v223_v39 }

// kernel: resnet18_rnn_forward.99
= control target key start
LH: loop header
LB: loop body
LE: loop exit
PB: predicated region body
PF: predicated region fallthrough
CT: control target
= control target key end

     0   :  { %s1019_s15 = smov 0   ;;  %s1021_s16 = smov 0   ;;  %s1145_s0 = inlined_call_operand.vmem [shape: bf16[16,1280], index: 0, kind: input, shape index: {}]   ;;  %s1146_s1 = inlined_call_operand.vmem [shape: bf16[1280,256], index: 1, kind: input, shape index: {}]   ;;  %s1147_s2 = inlined_call_operand.vmem [shape: f32[1,256], index: 2, kind: input, shape index: {}]   ;;  %s1148_s3 = inlined_call_operand.vmem [shape: f32[1,256], index: 3, kind: input, shape index: {}]   ;;  %s1149_s4 = inlined_call_operand.vmem [shape: f32[16,256], index: 4, kind: output, shape index: {}]  }
   0x1   :  { %s1023_s17 = smov 0   ;;  %s1025_s18 = smov 0  }
   0x2   :  { %s1027_s19 = smov 0  }
   0x3 LB: > { %s26_s20 = sadd.s32 1, %s987_s18  ;;  %p49_p1 = scmp.ne.s32.totalorder %s979_s16, %s975_s15  ;;  %s991_s19 = sphi %s1027_s19, %s14_s19   ;;  %s987_s18 = sphi %s1025_s18, %s1153_s18   ;;  %s983_s17 = sphi %s1023_s17, %s1152_s17   ;;  %s979_s16 = sphi %s1021_s16, %s1151_s16   ;;  %s975_s15 = sphi %s1019_s15, %s1150_s15  }
   0x4   : > { %p27_p0 = scmp.ge.s32.totalorder %s26_s20, 5  ;;  %p50_p2 = scmp.eq.s32.totalorder %s991_s19, 0 }
   0x5   : > { %s42_s22 = sadd.s32 1, %s979_s16  ;;  %p810_p5 = scmp.ge.s32.totalorder %s991_s19, 5 }
   0x6   : > { %s1155_s20 = smov (%p27_p0, %s26_s20), 0  ;;  %p51_p3 = por %p50_p2, %p49_p1 }
   0x7   : > { %s38_s21 = ssub.s32 %s987_s18, %s1155_s20  ;;  %199 = sbr.rel (%p810_p5) target bundleno = 21 (0x15), region = 24 }
   0x8   : > { %p40_p4 = scmp.eq.s32.totalorder %s38_s21, 0 }
   0xa   : > { %s1054_s23 = scalar_select %p40_p4, %s979_s16, %s42_s22  }
   0xe   : > { %202 = sbr.rel (!%p51_p3) target bundleno = 21 (0x15), region = 28  ;;  %s204_s24 = sand.u32 (%p51_p3), 1, %s979_s16  }
   0xf   : > { %s859_s25 = sshll.u32 (%p51_p3), %s987_s18, 3  ;;  %s811_s26 = sshll.u32 (%p51_p3), %s204_s24, 4 }
  0x10   : > { %s212_s29 = scalar_lea.vmem (%p51_p3), %s1145_s0, %s859_s25  ;;  %s206_s30 = scalar_lea.vmem (%p51_p3), [#allocation3], %s811_s26 }
  0x11   : > { %v242_v0 = vld [vmem:[%s212_s29] sm:$0xff] (%p51_p3)  ;;  %v244_v1 = vld [vmem:[%s212_s29 + $0x28] sm:$0xff] (%p51_p3) }
  0x12   : > { %243 = vst [vmem:[%s206_s30] sm:$0xff] (%p51_p3), %v242_v0  ;;  %245 = vst [vmem:[%s206_s30 + $0x8] sm:$0xff] (%p51_p3), %v244_v1 }
  0x15 PF: > { %p814_p6 = scmp.ge.s32.totalorder %s991_s19, 1  ;;  %p265_p7 = scmp.lt.s32.totalorder %s991_s19, 6 }
  0x17   : > { %p266_p8 = pnand %p814_p6, %p265_p7 }
  0x18   : > { %s272_s5 = sand.u32 (!%p266_p8), 1, %s975_s15   ;;  %s816_s6 = sshll.u32 (!%p266_p8), %s983_s17, 5 }
  0x19   : > { %269 = sbr.rel (%p266_p8) target bundleno = 336 (0x150), region = 70  ;;  %s1066_s7 = sshll.u32 (!%p266_p8), %s272_s5, 4 }
  0x1a   : > { %p324_p9 = scmp.lt.s32.totalorder (!%p266_p8), %s816_s6, 159  ;;  %s274_s12 = scalar_lea.vmem (!%p266_p8), [#allocation3], %s1066_s7 }
  0x1b   : > { %p819_p10 = scmp.ne.s32.totalorder (!%p266_p8), %s983_s17, 0 }
  0x20   : > { %s1157_s6 = smov (!%p324_p9, %s816_s6), 159  ;;  %359 = sbr.rel (%p819_p10) target bundleno = 39 (0x27), region = 78 }
  0x21   : > { %s860_s8 = sshll.u32 %s1157_s6, 3  ;;  %v993_v2 = vmov (!%p819_p10), 0.0  }
  0x22   : > { %s1071_s11 = scalar_lea.vmem %s1146_s1, %s860_s8  ;;  %360 = vst [vmem:[#allocation2] sm:$0xff] (!%p819_p10), %v993_v2  ;;  %361 = vst [vmem:[#allocation2 + $0x8] sm:$0xff] (!%p819_p10), %v993_v2 }
  0x23   : > { %362 = vst [vmem:[#allocation2 + $0x10] sm:$0xff] (!%p819_p10), %v993_v2  ;;  %363 = vst [vmem:[#allocation2 + $0x18] sm:$0xff] (!%p819_p10), %v993_v2 }
  0x27 PF: > { %v902_v3 = vld [vmem:[%s1071_s11 + $0x4] ss:$8 sps:$4 sm:$0xff]   ;;  %v904_v4 = vld [vmem:[%s1071_s11] ss:$8 sps:$4 sm:$0xff]   ;;  %v905_v5 = vld [vmem:[%s1071_s11 + $0x14] ss:$8 sps:$4 sm:$0xff]  }
  0x28   : > { %572 = vmatprep.subr.bf16.mxu0 %v902_v3  ;;  %v907_v6 = vld [vmem:[%s1071_s11 + $0x10] ss:$8 sps:$4 sm:$0xff]   ;;  %v908_v7 = vld [vmem:[%s1071_s11 + $0x24] ss:$8 sps:$4 sm:$0xff]   ;;  %v910_v8 = vld [vmem:[%s1071_s11 + $0x20] ss:$8 sps:$4 sm:$0xff]  }
  0x29   : > { %573 = vmatpush1.bf16.msra.mxu0 %v904_v4  ;;  %v911_v9 = vld [vmem:[%s1071_s11 + $0x34] ss:$8 sps:$4 sm:$0xff]   ;;  %v913_v10 = vld [vmem:[%s1071_s11 + $0x30] ss:$8 sps:$4 sm:$0xff]   ;;  %v914_v11 = vld [vmem:[%s1071_s11 + $0x44] ss:$8 sps:$4 sm:$0xff]  }
  0x2a   : > { %574 = vmatprep.subr.bf16.mxu0 %v905_v5  ;;  %v916_v12 = vld [vmem:[%s1071_s11 + $0x40] ss:$8 sps:$4 sm:$0xff]   ;;  %v917_v13 = vld [vmem:[%s1071_s11 + $0x54] ss:$8 sps:$4 sm:$0xff]   ;;  %v919_v14 = vld [vmem:[%s1071_s11 + $0x50] ss:$8 sps:$4 sm:$0xff]  }
  0x2b   : > { %v920_v15 = vld [vmem:[%s1071_s11 + $0x64] ss:$8 sps:$4 sm:$0xff]   ;;  %v922_v17 = vld [vmem:[%s1071_s11 + $0x60] ss:$8 sps:$4 sm:$0xff]   ;;  %v923_v18 = vld [vmem:[%s1071_s11 + $0x74] ss:$8 sps:$4 sm:$0xff]  }
  0x2c   : > { %v952_v16 = vld [vmem:[%s274_s12 + $0x4] ss:$8 sps:$4 sm:$0xff]   ;;  %v925_v19 = vld [vmem:[%s1071_s11 + $0x70] ss:$8 sps:$4 sm:$0xff]   ;;  %v928_v21 = vld [vmem:[%s1071_s11 + $0x80] ss:$8 sps:$4 sm:$0xff]  }
  0x2d   : > { %575 = vmatpush1.bf16.msra.mxu0 %v907_v6  ;;  %604 = vmatprep.mubr.bf16.mxu0 %v952_v16  ;;  %v926_v20 = vld [vmem:[%s1071_s11 + $0x84] ss:$8 sps:$4 sm:$0xff]   ;;  %v929_v22 = vld [vmem:[%s1071_s11 + $0x94] ss:$8 sps:$4 sm:$0xff]   ;;  %v931_v23 = vld [vmem:[%s1071_s11 + $0x90] ss:$8 sps:$4 sm:$0xff]  }
  0x2e   : > { %576 = vmatprep.subr.bf16.mxu0 %v908_v7  ;;  %v932_v24 = vld [vmem:[%s1071_s11 + $0xa4] ss:$8 sps:$4 sm:$0xff]   ;;  %v934_v25 = vld [vmem:[%s1071_s11 + $0xa0] ss:$8 sps:$4 sm:$0xff]   ;;  %v935_v26 = vld [vmem:[%s1071_s11 + $0xb4] ss:$8 sps:$4 sm:$0xff]  }
  0x2f   : > { %v937_v27 = vld [vmem:[%s1071_s11 + $0xb0] ss:$8 sps:$4 sm:$0xff]   ;;  %v938_v28 = vld [vmem:[%s1071_s11 + $0xc4] ss:$8 sps:$4 sm:$0xff]   ;;  %v940_v29 = vld [vmem:[%s1071_s11 + $0xc0] ss:$8 sps:$4 sm:$0xff]  }
  0x30   : > { %v941_v30 = vld [vmem:[%s1071_s11 + $0xd4] ss:$8 sps:$4 sm:$0xff]   ;;  %v943_v31 = vld [vmem:[%s1071_s11 + $0xd0] ss:$8 sps:$4 sm:$0xff]   ;;  %v944_v32 = vld [vmem:[%s1071_s11 + $0xe4] ss:$8 sps:$4 sm:$0xff]  }
  0x31   : > { %577 = vmatpush1.bf16.msra.mxu0 %v910_v8  ;;  %v946_v33 = vld [vmem:[%s1071_s11 + $0xe0] ss:$8 sps:$4 sm:$0xff]   ;;  %v947_v34 = vld [vmem:[%s1071_s11 + $0xf4] ss:$8 sps:$4 sm:$0xff]   ;;  %v949_v35 = vld [vmem:[%s1071_s11 + $0xf0] ss:$8 sps:$4 sm:$0xff]  }
  0x32   : > { %578 = vmatprep.subr.bf16.mxu0 %v911_v9  ;;  %v950_v36 = vld [vmem:[%s274_s12] ss:$8 sps:$4 sm:$0xff]   ;;  %p854_p11 = scmp.ne.s32.totalorder %s983_s17, 4 }
  0x33   : > { %v364_v37 = vld [vmem:[#allocation2] sm:$0xff]  ;;  %v365_v38 = vld [vmem:[#allocation2 + $0x8] sm:$0xff]  ;;  %v366_v40 = vld [vmem:[#allocation2 + $0x10] sm:$0xff]  ;;  %v633_v49 = vlaneseq (!%p854_p11) }
  0x34   : > { %v367_v43 = vld [vmem:[#allocation2 + $0x18] sm:$0xff]  ;;  %v631_v51 = vld [vmem:[%s1147_s2] sm:$0x3] (!%p854_p11) }
  0x35   : > { %579 = vmatpush1.bf16.msra.mxu0 %v913_v10  ;;  %v634_v50 = vshrl.u32 (!%p854_p11), %v633_v49, 7  ;;  %v647_v52 = vld [vmem:[%s1148_s3] sm:$0x3] (!%p854_p11) }
  0x36   : > { %580 = vmatprep.subr.bf16.mxu0 %v914_v11 }
  0x37   : > { %v635_v54 = vsub.s32 (!%p854_p11), 0, %v634_v50  ;;  %v639_v55 = vsub.s32 (!%p854_p11), 1, %v634_v50 }
  0x39   : > { %581 = vmatpush1.bf16.msra.mxu0 %v916_v12  ;;  %v636_v59 = vrot.slane (!%p854_p11), %v631_v51, %v635_v54  ;;  %v652_v60 = vrot.slane (!%p854_p11), %v647_v52, %v635_v54  ;;  %v640_v61 = vrot.slane (!%p854_p11), %v631_v51, %v639_v55  ;;  %v656_v62 = vrot.slane (!%p854_p11), %v647_v52, %v639_v55 }
  0x3a   : > { %582 = vmatprep.subr.bf16.mxu0 %v917_v13 }
  0x3d   : > { %583 = vmatpush1.bf16.msra.mxu0 %v919_v14 }
  0x3e   : > { %584 = vmatprep.subr.bf16.mxu0 %v920_v15 }
  0x41   : > { %585 = vmatpush1.bf16.msra.mxu0 %v922_v17 }
  0x42   : > { %586 = vmatprep.subr.bf16.mxu0 %v923_v18 }
  0x45   : > { %587 = vmatpush1.bf16.msra.mxu0 %v925_v19 }
  0x46   : > { %588 = vmatprep.subr.bf16.mxu0 %v926_v20 }
  0x49   : > { %589 = vmatpush1.bf16.msra.mxu0 %v928_v21 }
  0x4a   : > { %590 = vmatprep.subr.bf16.mxu0 %v929_v22 }
  0x4d   : > { %591 = vmatpush1.bf16.msra.mxu0 %v931_v23 }
  0x4e   : > { %592 = vmatprep.subr.bf16.mxu0 %v932_v24 }
  0x51   : > { %593 = vmatpush1.bf16.msra.mxu0 %v934_v25 }
  0x52   : > { %594 = vmatprep.subr.bf16.mxu0 %v935_v26 }
  0x55   : > { %595 = vmatpush1.bf16.msra.mxu0 %v937_v27 }
  0x56   : > { %596 = vmatprep.subr.bf16.mxu0 %v938_v28 }
  0x59   : > { %597 = vmatpush1.bf16.msra.mxu0 %v940_v29 }
  0x5a   : > { %598 = vmatprep.subr.bf16.mxu0 %v941_v30 }
  0x5d   : > { %599 = vmatpush1.bf16.msra.mxu0 %v943_v31 }
  0x5e   : > { %600 = vmatprep.subr.bf16.mxu0 %v944_v32 }
  0x61   : > { %601 = vmatpush1.bf16.msra.mxu0 %v946_v33 }
  0x62   : > { %602 = vmatprep.subr.bf16.mxu0 %v947_v34 }
  0x65   : > { %603 = vmatpush1.bf16.msra.mxu0 %v949_v35 }
  0x68   : > { %605 = vmatmul.mubr.bf16.vlgmr.msra.gmra.mrb[0].mxu0 %v950_v36 }
 0x13b   : > { %v606_v39 = vpop.f32.mrb[0].mxu0  ;;  %626 = sbr.rel (%p854_p11) target bundleno = 336 (0x150), region = 82 }
 0x13c   : > { %v615_v41 = vadd.f32 %v606_v39, %v364_v37  ;;  %v608_v42 = vpop.f32.mrb[1].mxu0 }
 0x13d   : > { %v616_v44 = vadd.f32 %v608_v42, %v365_v38  ;;  %v610_v45 = vpop.f32.mrb[2].mxu0 }
 0x13e   : > { %619 = vst [vmem:[#allocation2] sm:$0xff] %v615_v41  ;;  %v617_v46 = vadd.f32 %v610_v45, %v366_v40  ;;  %v612_v47 = vpop.f32.mrb[3].mxu0 }
 0x13f   : > { %620 = vst [vmem:[#allocation2 + $0x8] sm:$0xff] %v616_v44  ;;  %v618_v48 = vadd.f32 %v612_v47, %v367_v43 }
 0x140   : > { %621 = vst [vmem:[#allocation2 + $0x10] sm:$0xff] %v617_v46 }
 0x141   : > { %622 = vst [vmem:[#allocation2 + $0x18] sm:$0xff] %v618_v48 }
 0x145   : > { %v627_v53 = vld [vmem:[#allocation2] sm:$0xff] }
 0x146   : > { %v628_v56 = vld [vmem:[#allocation2 + $0x8] sm:$0xff]  ;;  %v643_v63 = vmul.f32 %v636_v59, %v627_v53 }
 0x147   : > { %v629_v57 = vld [vmem:[#allocation2 + $0x10] sm:$0xff]  ;;  %v644_v0 = vmul.f32 %v640_v61, %v628_v56 }
 0x148   : > { %v630_v58 = vld [vmem:[#allocation2 + $0x18] sm:$0xff]  ;;  %v645_v1 = vmul.f32 %v636_v59, %v629_v57  ;;  %v659_v3 = vadd.f32 %v652_v60, %v643_v63 }
 0x149   : > { %v646_v2 = vmul.f32 %v640_v61, %v630_v58  ;;  %v660_v4 = vadd.f32 %v656_v62, %v644_v0 }
 0x14a   : > { %v661_v5 = vadd.f32 %v652_v60, %v645_v1  ;;  %v663_v7 = vmax.f32 %v659_v3, 0.0 }
 0x14b   : > { %v662_v6 = vadd.f32 %v656_v62, %v646_v2  ;;  %v664_v8 = vmax.f32 %v660_v4, 0.0 }
 0x14c   : > { %v665_v9 = vmax.f32 %v661_v5, 0.0  ;;  %667 = vst [vmem:[%s1149_s4] sm:$0xff] %v663_v7 }
 0x14d   : > { %v666_v10 = vmax.f32 %v662_v6, 0.0  ;;  %668 = vst [vmem:[%s1149_s4 + $0x8] sm:$0xff] %v664_v8 }
 0x14e   : > { %669 = vst [vmem:[%s1149_s4 + $0x10] sm:$0xff] %v665_v9 }
 0x14f   : > { %670 = vst [vmem:[%s1149_s4 + $0x18] sm:$0xff] %v666_v10 }
 0x150 PF: > { %s14_s19 = sadd.s32 1, %s991_s19   ;;  %s1150_s15 = smov %s979_s16 }
 0x151   : > { %p11_p12 = scmp.ge.s32.totalorder %s14_s19, 7   ;;  %s1151_s16 = smov %s1054_s23 }
 0x152   : > { %s1152_s17 = smov %s987_s18  ;;  %s1153_s18 = smov %s1155_s20 }
 0x153   :  { %13 = sbr.rel (!%p11_p12) target bundleno = 3 (0x3), region = 126 }

// kernel: resnet18_rnn_forward.123
= control target key start
LH: loop header
LB: loop body
LE: loop exit
PB: predicated region body
PF: predicated region fallthrough
CT: control target
= control target key end

     0   :  { %s1122_s18 = smov 0   ;;  %s1124_s19 = smov 0   ;;  %s1260_s0 = inlined_call_operand.vmem [shape: bf16[16,2304], index: 0, kind: input, shape index: {}]   ;;  %s1261_s1 = inlined_call_operand.vmem [shape: bf16[2304,256], index: 1, kind: input, shape index: {}]   ;;  %s1262_s2 = inlined_call_operand.vmem [shape: f32[1,256], index: 2, kind: input, shape index: {}]   ;;  %s1263_s3 = inlined_call_operand.vmem [shape: f32[1,256], index: 3, kind: input, shape index: {}]   ;;  %s1264_s4 = inlined_call_operand.vmem [shape: f32[16,256], index: 4, kind: input, shape index: {}]   ;;  %s1265_s5 = inlined_call_operand.vmem [shape: f32[16,256], index: 5, kind: output, shape index: {}]  }
   0x1   :  { %s1126_s20 = smov 0   ;;  %s1128_s21 = smov 0  }
   0x2   :  { %s1130_s22 = smov 0  }
   0x3 LB: > { %s27_s23 = sadd.s32 1, %s1085_s21  ;;  %p50_p1 = scmp.ne.s32.totalorder %s1077_s19, %s1073_s18  ;;  %s1089_s22 = sphi %s1130_s22, %s15_s22   ;;  %s1085_s21 = sphi %s1128_s21, %s1269_s21   ;;  %s1081_s20 = sphi %s1126_s20, %s1268_s20   ;;  %s1077_s19 = sphi %s1124_s19, %s1267_s19   ;;  %s1073_s18 = sphi %s1122_s18, %s1266_s18  }
   0x4   : > { %p28_p0 = scmp.ge.s32.totalorder %s27_s23, 9  ;;  %p51_p2 = scmp.eq.s32.totalorder %s1089_s22, 0 }
   0x5   : > { %s43_s25 = sadd.s32 1, %s1077_s19  ;;  %p908_p5 = scmp.ge.s32.totalorder %s1089_s22, 9 }
   0x6   : > { %s1271_s23 = smov (%p28_p0, %s27_s23), 0  ;;  %p52_p3 = por %p51_p2, %p50_p1 }
   0x7   : > { %s39_s24 = ssub.s32 %s1085_s21, %s1271_s23  ;;  %243 = sbr.rel (%p908_p5) target bundleno = 21 (0x15), region = 28 }
   0x8   : > { %p41_p4 = scmp.eq.s32.totalorder %s39_s24, 0 }
   0xa   : > { %s1157_s26 = scalar_select %p41_p4, %s1077_s19, %s43_s25  }
   0xe   : > { %246 = sbr.rel (!%p52_p3) target bundleno = 21 (0x15), region = 32  ;;  %s248_s27 = sand.u32 (%p52_p3), 1, %s1077_s19  }
   0xf   : > { %s957_s28 = sshll.u32 (%p52_p3), %s1085_s21, 3  ;;  %s909_s29 = sshll.u32 (%p52_p3), %s248_s27, 4 }
  0x10   : > { %s256_s7 = scalar_lea.vmem (%p52_p3), %s1260_s0, %s957_s28  ;;  %s250_s8 = scalar_lea.vmem (%p52_p3), [#allocation3], %s909_s29 }
  0x11   : > { %v286_v0 = vld [vmem:[%s256_s7] sm:$0xff] (%p52_p3)  ;;  %v288_v1 = vld [vmem:[%s256_s7 + $0x48] sm:$0xff] (%p52_p3) }
  0x12   : > { %287 = vst [vmem:[%s250_s8] sm:$0xff] (%p52_p3), %v286_v0  ;;  %289 = vst [vmem:[%s250_s8 + $0x8] sm:$0xff] (%p52_p3), %v288_v1 }
  0x15 PF: > { %p912_p6 = scmp.ge.s32.totalorder %s1089_s22, 1  ;;  %p309_p7 = scmp.lt.s32.totalorder %s1089_s22, 10 }
  0x17   : > { %p310_p8 = pnand %p912_p6, %p309_p7 }
  0x18   : > { %s316_s9 = sand.u32 (!%p310_p8), 1, %s1073_s18   ;;  %s914_s10 = sshll.u32 (!%p310_p8), %s1081_s20, 5 }
  0x19   : > { %313 = sbr.rel (%p310_p8) target bundleno = 338 (0x152), region = 74  ;;  %s1169_s11 = sshll.u32 (!%p310_p8), %s316_s9, 4 }
  0x1a   : > { %p380_p9 = scmp.lt.s32.totalorder (!%p310_p8), %s914_s10, 287  ;;  %s318_s16 = scalar_lea.vmem (!%p310_p8), [#allocation3], %s1169_s11 }
  0x1b   : > { %p917_p10 = scmp.ne.s32.totalorder (!%p310_p8), %s1081_s20, 0 }
  0x20   : > { %s1273_s10 = smov (!%p380_p9, %s914_s10), 287  ;;  %427 = sbr.rel (%p917_p10) target bundleno = 39 (0x27), region = 82 }
  0x21   : > { %s958_s12 = sshll.u32 %s1273_s10, 3  ;;  %v1091_v2 = vmov (!%p917_p10), 0.0  }
  0x22   : > { %s1174_s15 = scalar_lea.vmem %s1261_s1, %s958_s12  ;;  %428 = vst [vmem:[#allocation2] sm:$0xff] (!%p917_p10), %v1091_v2  ;;  %429 = vst [vmem:[#allocation2 + $0x8] sm:$0xff] (!%p917_p10), %v1091_v2 }
  0x23   : > { %430 = vst [vmem:[#allocation2 + $0x10] sm:$0xff] (!%p917_p10), %v1091_v2  ;;  %431 = vst [vmem:[#allocation2 + $0x18] sm:$0xff] (!%p917_p10), %v1091_v2 }
  0x27 PF: > { %v1000_v3 = vld [vmem:[%s1174_s15 + $0x4] ss:$8 sps:$4 sm:$0xff]   ;;  %v1002_v4 = vld [vmem:[%s1174_s15] ss:$8 sps:$4 sm:$0xff]   ;;  %v1003_v5 = vld [vmem:[%s1174_s15 + $0x14] ss:$8 sps:$4 sm:$0xff]  }
  0x28   : > { %640 = vmatprep.subr.bf16.mxu0 %v1000_v3  ;;  %v1005_v6 = vld [vmem:[%s1174_s15 + $0x10] ss:$8 sps:$4 sm:$0xff]   ;;  %v1006_v7 = vld [vmem:[%s1174_s15 + $0x24] ss:$8 sps:$4 sm:$0xff]   ;;  %v1008_v8 = vld [vmem:[%s1174_s15 + $0x20] ss:$8 sps:$4 sm:$0xff]  }
  0x29   : > { %641 = vmatpush1.bf16.msra.mxu0 %v1002_v4  ;;  %v1009_v9 = vld [vmem:[%s1174_s15 + $0x34] ss:$8 sps:$4 sm:$0xff]   ;;  %v1011_v10 = vld [vmem:[%s1174_s15 + $0x30] ss:$8 sps:$4 sm:$0xff]   ;;  %v1012_v11 = vld [vmem:[%s1174_s15 + $0x44] ss:$8 sps:$4 sm:$0xff]  }
  0x2a   : > { %642 = vmatprep.subr.bf16.mxu0 %v1003_v5  ;;  %v1014_v12 = vld [vmem:[%s1174_s15 + $0x40] ss:$8 sps:$4 sm:$0xff]   ;;  %v1015_v13 = vld [vmem:[%s1174_s15 + $0x54] ss:$8 sps:$4 sm:$0xff]   ;;  %v1017_v14 = vld [vmem:[%s1174_s15 + $0x50] ss:$8 sps:$4 sm:$0xff]  }
  0x2b   : > { %v1018_v15 = vld [vmem:[%s1174_s15 + $0x64] ss:$8 sps:$4 sm:$0xff]   ;;  %v1020_v17 = vld [vmem:[%s1174_s15 + $0x60] ss:$8 sps:$4 sm:$0xff]   ;;  %v1021_v18 = vld [vmem:[%s1174_s15 + $0x74] ss:$8 sps:$4 sm:$0xff]  }
  0x2c   : > { %v1050_v16 = vld [vmem:[%s318_s16 + $0x4] ss:$8 sps:$4 sm:$0xff]   ;;  %v1023_v19 = vld [vmem:[%s1174_s15 + $0x70] ss:$8 sps:$4 sm:$0xff]   ;;  %v1026_v21 = vld [vmem:[%s1174_s15 + $0x80] ss:$8 sps:$4 sm:$0xff]  }
  0x2d   : > { %643 = vmatpush1.bf16.msra.mxu0 %v1005_v6  ;;  %672 = vmatprep.mubr.bf16.mxu0 %v1050_v16  ;;  %v1024_v20 = vld [vmem:[%s1174_s15 + $0x84] ss:$8 sps:$4 sm:$0xff]   ;;  %v1027_v22 = vld [vmem:[%s1174_s15 + $0x94] ss:$8 sps:$4 sm:$0xff]   ;;  %v1029_v23 = vld [vmem:[%s1174_s15 + $0x90] ss:$8 sps:$4 sm:$0xff]  }
  0x2e   : > { %644 = vmatprep.subr.bf16.mxu0 %v1006_v7  ;;  %v1030_v24 = vld [vmem:[%s1174_s15 + $0xa4] ss:$8 sps:$4 sm:$0xff]   ;;  %v1032_v25 = vld [vmem:[%s1174_s15 + $0xa0] ss:$8 sps:$4 sm:$0xff]   ;;  %v1033_v26 = vld [vmem:[%s1174_s15 + $0xb4] ss:$8 sps:$4 sm:$0xff]  }
  0x2f   : > { %v1035_v27 = vld [vmem:[%s1174_s15 + $0xb0] ss:$8 sps:$4 sm:$0xff]   ;;  %v1036_v28 = vld [vmem:[%s1174_s15 + $0xc4] ss:$8 sps:$4 sm:$0xff]   ;;  %v1038_v29 = vld [vmem:[%s1174_s15 + $0xc0] ss:$8 sps:$4 sm:$0xff]  }
  0x30   : > { %v1039_v30 = vld [vmem:[%s1174_s15 + $0xd4] ss:$8 sps:$4 sm:$0xff]   ;;  %v1041_v31 = vld [vmem:[%s1174_s15 + $0xd0] ss:$8 sps:$4 sm:$0xff]   ;;  %v1042_v32 = vld [vmem:[%s1174_s15 + $0xe4] ss:$8 sps:$4 sm:$0xff]  }
  0x31   : > { %645 = vmatpush1.bf16.msra.mxu0 %v1008_v8  ;;  %v1044_v33 = vld [vmem:[%s1174_s15 + $0xe0] ss:$8 sps:$4 sm:$0xff]   ;;  %v1045_v34 = vld [vmem:[%s1174_s15 + $0xf4] ss:$8 sps:$4 sm:$0xff]   ;;  %v1047_v35 = vld [vmem:[%s1174_s15 + $0xf0] ss:$8 sps:$4 sm:$0xff]  }
  0x32   : > { %646 = vmatprep.subr.bf16.mxu0 %v1009_v9  ;;  %v1048_v36 = vld [vmem:[%s318_s16] ss:$8 sps:$4 sm:$0xff]   ;;  %p952_p11 = scmp.ne.s32.totalorder %s1081_s20, 8 }
  0x33   : > { %v432_v37 = vld [vmem:[#allocation2] sm:$0xff]  ;;  %v433_v38 = vld [vmem:[#allocation2 + $0x8] sm:$0xff]  ;;  %v434_v40 = vld [vmem:[#allocation2 + $0x10] sm:$0xff]  ;;  %v701_v49 = vlaneseq (!%p952_p11) }
  0x34   : > { %v435_v43 = vld [vmem:[#allocation2 + $0x18] sm:$0xff]  ;;  %v699_v51 = vld [vmem:[%s1262_s2] sm:$0x3] (!%p952_p11)  ;;  %v732_v4 = vld [vmem:[%s1264_s4 + $0x8] sm:$0xff] (!%p952_p11) }
  0x35   : > { %647 = vmatpush1.bf16.msra.mxu0 %v1011_v10  ;;  %v702_v50 = vshrl.u32 (!%p952_p11), %v701_v49, 7  ;;  %v715_v52 = vld [vmem:[%s1263_s3] sm:$0x3] (!%p952_p11)  ;;  %v733_v5 = vld [vmem:[%s1264_s4 + $0x10] sm:$0xff] (!%p952_p11)  ;;  %v734_v6 = vld [vmem:[%s1264_s4 + $0x18] sm:$0xff] (!%p952_p11) }
  0x36   : > { %648 = vmatprep.subr.bf16.mxu0 %v1012_v11  ;;  %v731_v0 = vld [vmem:[%s1264_s4] sm:$0xff] (!%p952_p11) }
  0x37   : > { %v703_v54 = vsub.s32 (!%p952_p11), 0, %v702_v50  ;;  %v707_v55 = vsub.s32 (!%p952_p11), 1, %v702_v50 }
  0x39   : > { %649 = vmatpush1.bf16.msra.mxu0 %v1014_v12  ;;  %v704_v59 = vrot.slane (!%p952_p11), %v699_v51, %v703_v54  ;;  %v720_v60 = vrot.slane (!%p952_p11), %v715_v52, %v703_v54  ;;  %v708_v61 = vrot.slane (!%p952_p11), %v699_v51, %v707_v55  ;;  %v724_v62 = vrot.slane (!%p952_p11), %v715_v52, %v707_v55 }
  0x3a   : > { %650 = vmatprep.subr.bf16.mxu0 %v1015_v13 }
  0x3d   : > { %651 = vmatpush1.bf16.msra.mxu0 %v1017_v14 }
  0x3e   : > { %652 = vmatprep.subr.bf16.mxu0 %v1018_v15 }
  0x41   : > { %653 = vmatpush1.bf16.msra.mxu0 %v1020_v17 }
  0x42   : > { %654 = vmatprep.subr.bf16.mxu0 %v1021_v18 }
  0x45   : > { %655 = vmatpush1.bf16.msra.mxu0 %v1023_v19 }
  0x46   : > { %656 = vmatprep.subr.bf16.mxu0 %v1024_v20 }
  0x49   : > { %657 = vmatpush1.bf16.msra.mxu0 %v1026_v21 }
  0x4a   : > { %658 = vmatprep.subr.bf16.mxu0 %v1027_v22 }
  0x4d   : > { %659 = vmatpush1.bf16.msra.mxu0 %v1029_v23 }
  0x4e   : > { %660 = vmatprep.subr.bf16.mxu0 %v1030_v24 }
  0x51   : > { %661 = vmatpush1.bf16.msra.mxu0 %v1032_v25 }
  0x52   : > { %662 = vmatprep.subr.bf16.mxu0 %v1033_v26 }
  0x55   : > { %663 = vmatpush1.bf16.msra.mxu0 %v1035_v27 }
  0x56   : > { %664 = vmatprep.subr.bf16.mxu0 %v1036_v28 }
  0x59   : > { %665 = vmatpush1.bf16.msra.mxu0 %v1038_v29 }
  0x5a   : > { %666 = vmatprep.subr.bf16.mxu0 %v1039_v30 }
  0x5d   : > { %667 = vmatpush1.bf16.msra.mxu0 %v1041_v31 }
  0x5e   : > { %668 = vmatprep.subr.bf16.mxu0 %v1042_v32 }
  0x61   : > { %669 = vmatpush1.bf16.msra.mxu0 %v1044_v33 }
  0x62   : > { %670 = vmatprep.subr.bf16.mxu0 %v1045_v34 }
  0x65   : > { %671 = vmatpush1.bf16.msra.mxu0 %v1047_v35 }
  0x68   : > { %673 = vmatmul.mubr.bf16.vlgmr.msra.gmra.mrb[0].mxu0 %v1048_v36 }
 0x13b   : > { %v674_v39 = vpop.f32.mrb[0].mxu0  ;;  %694 = sbr.rel (%p952_p11) target bundleno = 338 (0x152), region = 86 }
 0x13c   : > { %v683_v41 = vadd.f32 %v674_v39, %v432_v37  ;;  %v676_v42 = vpop.f32.mrb[1].mxu0 }
 0x13d   : > { %v684_v44 = vadd.f32 %v676_v42, %v433_v38  ;;  %v678_v45 = vpop.f32.mrb[2].mxu0 }
 0x13e   : > { %687 = vst [vmem:[#allocation2] sm:$0xff] %v683_v41  ;;  %v685_v46 = vadd.f32 %v678_v45, %v434_v40  ;;  %v680_v47 = vpop.f32.mrb[3].mxu0 }
 0x13f   : > { %688 = vst [vmem:[#allocation2 + $0x8] sm:$0xff] %v684_v44  ;;  %v686_v48 = vadd.f32 %v680_v47, %v435_v43 }
 0x140   : > { %689 = vst [vmem:[#allocation2 + $0x10] sm:$0xff] %v685_v46 }
 0x141   : > { %690 = vst [vmem:[#allocation2 + $0x18] sm:$0xff] %v686_v48 }
 0x145   : > { %v695_v53 = vld [vmem:[#allocation2] sm:$0xff] }
 0x146   : > { %v696_v56 = vld [vmem:[#allocation2 + $0x8] sm:$0xff]  ;;  %v711_v63 = vmul.f32 %v704_v59, %v695_v53 }
 0x147   : > { %v697_v57 = vld [vmem:[#allocation2 + $0x10] sm:$0xff]  ;;  %v712_v1 = vmul.f32 %v708_v61, %v696_v56 }
 0x148   : > { %v698_v58 = vld [vmem:[#allocation2 + $0x18] sm:$0xff]  ;;  %v713_v2 = vmul.f32 %v704_v59, %v697_v57  ;;  %v727_v7 = vadd.f32 %v720_v60, %v711_v63 }
 0x149   : > { %v714_v3 = vmul.f32 %v708_v61, %v698_v58  ;;  %v728_v8 = vadd.f32 %v724_v62, %v712_v1 }
 0x14a   : > { %v729_v9 = vadd.f32 %v720_v60, %v713_v2  ;;  %v735_v11 = vadd.f32 %v731_v0, %v727_v7 }
 0x14b   : > { %v730_v10 = vadd.f32 %v724_v62, %v714_v3  ;;  %v736_v12 = vadd.f32 %v732_v4, %v728_v8 }
 0x14c   : > { %v737_v13 = vadd.f32 %v733_v5, %v729_v9  ;;  %v739_v15 = vmax.f32 %v735_v11, 0.0 }
 0x14d   : > { %v738_v14 = vadd.f32 %v734_v6, %v730_v10  ;;  %v740_v16 = vmax.f32 %v736_v12, 0.0 }
 0x14e   : > { %v741_v17 = vmax.f32 %v737_v13, 0.0  ;;  %743 = vst [vmem:[%s1265_s5] sm:$0xff] %v739_v15 }
 0x14f   : > { %v742_v18 = vmax.f32 %v738_v14, 0.0  ;;  %744 = vst [vmem:[%s1265_s5 + $0x8] sm:$0xff] %v740_v16 }
 0x150   : > { %745 = vst [vmem:[%s1265_s5 + $0x10] sm:$0xff] %v741_v17 }
 0x151   : > { %746 = vst [vmem:[%s1265_s5 + $0x18] sm:$0xff] %v742_v18 }
 0x152 PF: > { %s15_s22 = sadd.s32 1, %s1089_s22   ;;  %s1266_s18 = smov %s1077_s19 }
 0x153   : > { %p12_p12 = scmp.ge.s32.totalorder %s15_s22, 11   ;;  %s1267_s19 = smov %s1157_s26 }
 0x154   : > { %s1268_s20 = smov %s1085_s21  ;;  %s1269_s21 = smov %s1271_s23 }
 0x155   :  { %14 = sbr.rel (!%p12_p12) target bundleno = 3 (0x3), region = 133 }

// kernel: resnet18_rnn_forward.102
= control target key start
LH: loop header
LB: loop body
LE: loop exit
PB: predicated region body
PF: predicated region fallthrough
CT: control target
= control target key end

     0   :  { %s1019_s15 = smov 0   ;;  %s1021_s16 = smov 0   ;;  %s1145_s0 = inlined_call_operand.vmem [shape: bf16[16,2304], index: 0, kind: input, shape index: {}]   ;;  %s1146_s1 = inlined_call_operand.vmem [shape: bf16[2304,256], index: 1, kind: input, shape index: {}]   ;;  %s1147_s2 = inlined_call_operand.vmem [shape: f32[1,256], index: 2, kind: input, shape index: {}]   ;;  %s1148_s3 = inlined_call_operand.vmem [shape: f32[1,256], index: 3, kind: input, shape index: {}]   ;;  %s1149_s4 = inlined_call_operand.vmem [shape: f32[16,256], index: 4, kind: output, shape index: {}]  }
   0x1   :  { %s1023_s17 = smov 0   ;;  %s1025_s18 = smov 0  }
   0x2   :  { %s1027_s19 = smov 0  }
   0x3 LB: > { %s26_s20 = sadd.s32 1, %s987_s18  ;;  %p49_p1 = scmp.ne.s32.totalorder %s979_s16, %s975_s15  ;;  %s991_s19 = sphi %s1027_s19, %s14_s19   ;;  %s987_s18 = sphi %s1025_s18, %s1153_s18   ;;  %s983_s17 = sphi %s1023_s17, %s1152_s17   ;;  %s979_s16 = sphi %s1021_s16, %s1151_s16   ;;  %s975_s15 = sphi %s1019_s15, %s1150_s15  }
   0x4   : > { %p27_p0 = scmp.ge.s32.totalorder %s26_s20, 9  ;;  %p50_p2 = scmp.eq.s32.totalorder %s991_s19, 0 }
   0x5   : > { %s42_s22 = sadd.s32 1, %s979_s16  ;;  %p810_p5 = scmp.ge.s32.totalorder %s991_s19, 9 }
   0x6   : > { %s1155_s20 = smov (%p27_p0, %s26_s20), 0  ;;  %p51_p3 = por %p50_p2, %p49_p1 }
   0x7   : > { %s38_s21 = ssub.s32 %s987_s18, %s1155_s20  ;;  %199 = sbr.rel (%p810_p5) target bundleno = 21 (0x15), region = 24 }
   0x8   : > { %p40_p4 = scmp.eq.s32.totalorder %s38_s21, 0 }
   0xa   : > { %s1054_s23 = scalar_select %p40_p4, %s979_s16, %s42_s22  }
   0xe   : > { %202 = sbr.rel (!%p51_p3) target bundleno = 21 (0x15), region = 28  ;;  %s204_s24 = sand.u32 (%p51_p3), 1, %s979_s16  }
   0xf   : > { %s859_s25 = sshll.u32 (%p51_p3), %s987_s18, 3  ;;  %s811_s26 = sshll.u32 (%p51_p3), %s204_s24, 4 }
  0x10   : > { %s212_s29 = scalar_lea.vmem (%p51_p3), %s1145_s0, %s859_s25  ;;  %s206_s30 = scalar_lea.vmem (%p51_p3), [#allocation3], %s811_s26 }
  0x11   : > { %v242_v0 = vld [vmem:[%s212_s29] sm:$0xff] (%p51_p3)  ;;  %v244_v1 = vld [vmem:[%s212_s29 + $0x48] sm:$0xff] (%p51_p3) }
  0x12   : > { %243 = vst [vmem:[%s206_s30] sm:$0xff] (%p51_p3), %v242_v0  ;;  %245 = vst [vmem:[%s206_s30 + $0x8] sm:$0xff] (%p51_p3), %v244_v1 }
  0x15 PF: > { %p814_p6 = scmp.ge.s32.totalorder %s991_s19, 1  ;;  %p265_p7 = scmp.lt.s32.totalorder %s991_s19, 10 }
  0x17   : > { %p266_p8 = pnand %p814_p6, %p265_p7 }
  0x18   : > { %s272_s5 = sand.u32 (!%p266_p8), 1, %s975_s15   ;;  %s816_s6 = sshll.u32 (!%p266_p8), %s983_s17, 5 }
  0x19   : > { %269 = sbr.rel (%p266_p8) target bundleno = 336 (0x150), region = 70  ;;  %s1066_s7 = sshll.u32 (!%p266_p8), %s272_s5, 4 }
  0x1a   : > { %p324_p9 = scmp.lt.s32.totalorder (!%p266_p8), %s816_s6, 287  ;;  %s274_s12 = scalar_lea.vmem (!%p266_p8), [#allocation3], %s1066_s7 }
  0x1b   : > { %p819_p10 = scmp.ne.s32.totalorder (!%p266_p8), %s983_s17, 0 }
  0x20   : > { %s1157_s6 = smov (!%p324_p9, %s816_s6), 287  ;;  %359 = sbr.rel (%p819_p10) target bundleno = 39 (0x27), region = 78 }
  0x21   : > { %s860_s8 = sshll.u32 %s1157_s6, 3  ;;  %v993_v2 = vmov (!%p819_p10), 0.0  }
  0x22   : > { %s1071_s11 = scalar_lea.vmem %s1146_s1, %s860_s8  ;;  %360 = vst [vmem:[#allocation2] sm:$0xff] (!%p819_p10), %v993_v2  ;;  %361 = vst [vmem:[#allocation2 + $0x8] sm:$0xff] (!%p819_p10), %v993_v2 }
  0x23   : > { %362 = vst [vmem:[#allocation2 + $0x10] sm:$0xff] (!%p819_p10), %v993_v2  ;;  %363 = vst [vmem:[#allocation2 + $0x18] sm:$0xff] (!%p819_p10), %v993_v2 }
  0x27 PF: > { %v902_v3 = vld [vmem:[%s1071_s11 + $0x4] ss:$8 sps:$4 sm:$0xff]   ;;  %v904_v4 = vld [vmem:[%s1071_s11] ss:$8 sps:$4 sm:$0xff]   ;;  %v905_v5 = vld [vmem:[%s1071_s11 + $0x14] ss:$8 sps:$4 sm:$0xff]  }
  0x28   : > { %572 = vmatprep.subr.bf16.mxu0 %v902_v3  ;;  %v907_v6 = vld [vmem:[%s1071_s11 + $0x10] ss:$8 sps:$4 sm:$0xff]   ;;  %v908_v7 = vld [vmem:[%s1071_s11 + $0x24] ss:$8 sps:$4 sm:$0xff]   ;;  %v910_v8 = vld [vmem:[%s1071_s11 + $0x20] ss:$8 sps:$4 sm:$0xff]  }
  0x29   : > { %573 = vmatpush1.bf16.msra.mxu0 %v904_v4  ;;  %v911_v9 = vld [vmem:[%s1071_s11 + $0x34] ss:$8 sps:$4 sm:$0xff]   ;;  %v913_v10 = vld [vmem:[%s1071_s11 + $0x30] ss:$8 sps:$4 sm:$0xff]   ;;  %v914_v11 = vld [vmem:[%s1071_s11 + $0x44] ss:$8 sps:$4 sm:$0xff]  }
  0x2a   : > { %574 = vmatprep.subr.bf16.mxu0 %v905_v5  ;;  %v916_v12 = vld [vmem:[%s1071_s11 + $0x40] ss:$8 sps:$4 sm:$0xff]   ;;  %v917_v13 = vld [vmem:[%s1071_s11 + $0x54] ss:$8 sps:$4 sm:$0xff]   ;;  %v919_v14 = vld [vmem:[%s1071_s11 + $0x50] ss:$8 sps:$4 sm:$0xff]  }
  0x2b   : > { %v920_v15 = vld [vmem:[%s1071_s11 + $0x64] ss:$8 sps:$4 sm:$0xff]   ;;  %v922_v17 = vld [vmem:[%s1071_s11 + $0x60] ss:$8 sps:$4 sm:$0xff]   ;;  %v923_v18 = vld [vmem:[%s1071_s11 + $0x74] ss:$8 sps:$4 sm:$0xff]  }
  0x2c   : > { %v952_v16 = vld [vmem:[%s274_s12 + $0x4] ss:$8 sps:$4 sm:$0xff]   ;;  %v925_v19 = vld [vmem:[%s1071_s11 + $0x70] ss:$8 sps:$4 sm:$0xff]   ;;  %v928_v21 = vld [vmem:[%s1071_s11 + $0x80] ss:$8 sps:$4 sm:$0xff]  }
  0x2d   : > { %575 = vmatpush1.bf16.msra.mxu0 %v907_v6  ;;  %604 = vmatprep.mubr.bf16.mxu0 %v952_v16  ;;  %v926_v20 = vld [vmem:[%s1071_s11 + $0x84] ss:$8 sps:$4 sm:$0xff]   ;;  %v929_v22 = vld [vmem:[%s1071_s11 + $0x94] ss:$8 sps:$4 sm:$0xff]   ;;  %v931_v23 = vld [vmem:[%s1071_s11 + $0x90] ss:$8 sps:$4 sm:$0xff]  }
  0x2e   : > { %576 = vmatprep.subr.bf16.mxu0 %v908_v7  ;;  %v932_v24 = vld [vmem:[%s1071_s11 + $0xa4] ss:$8 sps:$4 sm:$0xff]   ;;  %v934_v25 = vld [vmem:[%s1071_s11 + $0xa0] ss:$8 sps:$4 sm:$0xff]   ;;  %v935_v26 = vld [vmem:[%s1071_s11 + $0xb4] ss:$8 sps:$4 sm:$0xff]  }
  0x2f   : > { %v937_v27 = vld [vmem:[%s1071_s11 + $0xb0] ss:$8 sps:$4 sm:$0xff]   ;;  %v938_v28 = vld [vmem:[%s1071_s11 + $0xc4] ss:$8 sps:$4 sm:$0xff]   ;;  %v940_v29 = vld [vmem:[%s1071_s11 + $0xc0] ss:$8 sps:$4 sm:$0xff]  }
  0x30   : > { %v941_v30 = vld [vmem:[%s1071_s11 + $0xd4] ss:$8 sps:$4 sm:$0xff]   ;;  %v943_v31 = vld [vmem:[%s1071_s11 + $0xd0] ss:$8 sps:$4 sm:$0xff]   ;;  %v944_v32 = vld [vmem:[%s1071_s11 + $0xe4] ss:$8 sps:$4 sm:$0xff]  }
  0x31   : > { %577 = vmatpush1.bf16.msra.mxu0 %v910_v8  ;;  %v946_v33 = vld [vmem:[%s1071_s11 + $0xe0] ss:$8 sps:$4 sm:$0xff]   ;;  %v947_v34 = vld [vmem:[%s1071_s11 + $0xf4] ss:$8 sps:$4 sm:$0xff]   ;;  %v949_v35 = vld [vmem:[%s1071_s11 + $0xf0] ss:$8 sps:$4 sm:$0xff]  }
  0x32   : > { %578 = vmatprep.subr.bf16.mxu0 %v911_v9  ;;  %v950_v36 = vld [vmem:[%s274_s12] ss:$8 sps:$4 sm:$0xff]   ;;  %p854_p11 = scmp.ne.s32.totalorder %s983_s17, 8 }
  0x33   : > { %v364_v37 = vld [vmem:[#allocation2] sm:$0xff]  ;;  %v365_v38 = vld [vmem:[#allocation2 + $0x8] sm:$0xff]  ;;  %v366_v40 = vld [vmem:[#allocation2 + $0x10] sm:$0xff]  ;;  %v633_v49 = vlaneseq (!%p854_p11) }
  0x34   : > { %v367_v43 = vld [vmem:[#allocation2 + $0x18] sm:$0xff]  ;;  %v631_v51 = vld [vmem:[%s1147_s2] sm:$0x3] (!%p854_p11) }
  0x35   : > { %579 = vmatpush1.bf16.msra.mxu0 %v913_v10  ;;  %v634_v50 = vshrl.u32 (!%p854_p11), %v633_v49, 7  ;;  %v647_v52 = vld [vmem:[%s1148_s3] sm:$0x3] (!%p854_p11) }
  0x36   : > { %580 = vmatprep.subr.bf16.mxu0 %v914_v11 }
  0x37   : > { %v635_v54 = vsub.s32 (!%p854_p11), 0, %v634_v50  ;;  %v639_v55 = vsub.s32 (!%p854_p11), 1, %v634_v50 }
  0x39   : > { %581 = vmatpush1.bf16.msra.mxu0 %v916_v12  ;;  %v636_v59 = vrot.slane (!%p854_p11), %v631_v51, %v635_v54  ;;  %v652_v60 = vrot.slane (!%p854_p11), %v647_v52, %v635_v54  ;;  %v640_v61 = vrot.slane (!%p854_p11), %v631_v51, %v639_v55  ;;  %v656_v62 = vrot.slane (!%p854_p11), %v647_v52, %v639_v55 }
  0x3a   : > { %582 = vmatprep.subr.bf16.mxu0 %v917_v13 }
  0x3d   : > { %583 = vmatpush1.bf16.msra.mxu0 %v919_v14 }
  0x3e   : > { %584 = vmatprep.subr.bf16.mxu0 %v920_v15 }
  0x41   : > { %585 = vmatpush1.bf16.msra.mxu0 %v922_v17 }
  0x42   : > { %586 = vmatprep.subr.bf16.mxu0 %v923_v18 }
  0x45   : > { %587 = vmatpush1.bf16.msra.mxu0 %v925_v19 }
  0x46   : > { %588 = vmatprep.subr.bf16.mxu0 %v926_v20 }
  0x49   : > { %589 = vmatpush1.bf16.msra.mxu0 %v928_v21 }
  0x4a   : > { %590 = vmatprep.subr.bf16.mxu0 %v929_v22 }
  0x4d   : > { %591 = vmatpush1.bf16.msra.mxu0 %v931_v23 }
  0x4e   : > { %592 = vmatprep.subr.bf16.mxu0 %v932_v24 }
  0x51   : > { %593 = vmatpush1.bf16.msra.mxu0 %v934_v25 }
  0x52   : > { %594 = vmatprep.subr.bf16.mxu0 %v935_v26 }
  0x55   : > { %595 = vmatpush1.bf16.msra.mxu0 %v937_v27 }
  0x56   : > { %596 = vmatprep.subr.bf16.mxu0 %v938_v28 }
  0x59   : > { %597 = vmatpush1.bf16.msra.mxu0 %v940_v29 }
  0x5a   : > { %598 = vmatprep.subr.bf16.mxu0 %v941_v30 }
  0x5d   : > { %599 = vmatpush1.bf16.msra.mxu0 %v943_v31 }
  0x5e   : > { %600 = vmatprep.subr.bf16.mxu0 %v944_v32 }
  0x61   : > { %601 = vmatpush1.bf16.msra.mxu0 %v946_v33 }
  0x62   : > { %602 = vmatprep.subr.bf16.mxu0 %v947_v34 }
  0x65   : > { %603 = vmatpush1.bf16.msra.mxu0 %v949_v35 }
  0x68   : > { %605 = vmatmul.mubr.bf16.vlgmr.msra.gmra.mrb[0].mxu0 %v950_v36 }
 0x13b   : > { %v606_v39 = vpop.f32.mrb[0].mxu0  ;;  %626 = sbr.rel (%p854_p11) target bundleno = 336 (0x150), region = 82 }
 0x13c   : > { %v615_v41 = vadd.f32 %v606_v39, %v364_v37  ;;  %v608_v42 = vpop.f32.mrb[1].mxu0 }
 0x13d   : > { %v616_v44 = vadd.f32 %v608_v42, %v365_v38  ;;  %v610_v45 = vpop.f32.mrb[2].mxu0 }
 0x13e   : > { %619 = vst [vmem:[#allocation2] sm:$0xff] %v615_v41  ;;  %v617_v46 = vadd.f32 %v610_v45, %v366_v40  ;;  %v612_v47 = vpop.f32.mrb[3].mxu0 }
 0x13f   : > { %620 = vst [vmem:[#allocation2 + $0x8] sm:$0xff] %v616_v44  ;;  %v618_v48 = vadd.f32 %v612_v47, %v367_v43 }
 0x140   : > { %621 = vst [vmem:[#allocation2 + $0x10] sm:$0xff] %v617_v46 }
 0x141   : > { %622 = vst [vmem:[#allocation2 + $0x18] sm:$0xff] %v618_v48 }
 0x145   : > { %v627_v53 = vld [vmem:[#allocation2] sm:$0xff] }
 0x146   : > { %v628_v56 = vld [vmem:[#allocation2 + $0x8] sm:$0xff]  ;;  %v643_v63 = vmul.f32 %v636_v59, %v627_v53 }
 0x147   : > { %v629_v57 = vld [vmem:[#allocation2 + $0x10] sm:$0xff]  ;;  %v644_v0 = vmul.f32 %v640_v61, %v628_v56 }
 0x148   : > { %v630_v58 = vld [vmem:[#allocation2 + $0x18] sm:$0xff]  ;;  %v645_v1 = vmul.f32 %v636_v59, %v629_v57  ;;  %v659_v3 = vadd.f32 %v652_v60, %v643_v63 }
 0x149   : > { %v646_v2 = vmul.f32 %v640_v61, %v630_v58  ;;  %v660_v4 = vadd.f32 %v656_v62, %v644_v0 }
 0x14a   : > { %v661_v5 = vadd.f32 %v652_v60, %v645_v1  ;;  %v663_v7 = vmax.f32 %v659_v3, 0.0 }
 0x14b   : > { %v662_v6 = vadd.f32 %v656_v62, %v646_v2  ;;  %v664_v8 = vmax.f32 %v660_v4, 0.0 }
 0x14c   : > { %v665_v9 = vmax.f32 %v661_v5, 0.0  ;;  %667 = vst [vmem:[%s1149_s4] sm:$0xff] %v663_v7 }
 0x14d   : > { %v666_v10 = vmax.f32 %v662_v6, 0.0  ;;  %668 = vst [vmem:[%s1149_s4 + $0x8] sm:$0xff] %v664_v8 }
 0x14e   : > { %669 = vst [vmem:[%s1149_s4 + $0x10] sm:$0xff] %v665_v9 }
 0x14f   : > { %670 = vst [vmem:[%s1149_s4 + $0x18] sm:$0xff] %v666_v10 }
 0x150 PF: > { %s14_s19 = sadd.s32 1, %s991_s19   ;;  %s1150_s15 = smov %s979_s16 }
 0x151   : > { %p11_p12 = scmp.ge.s32.totalorder %s14_s19, 11   ;;  %s1151_s16 = smov %s1054_s23 }
 0x152   : > { %s1152_s17 = smov %s987_s18  ;;  %s1153_s18 = smov %s1155_s20 }
 0x153   :  { %13 = sbr.rel (!%p11_p12) target bundleno = 3 (0x3), region = 126 }

// kernel: resnet18_rnn_forward.83
= control target key start
LH: loop header
LB: loop body
LE: loop exit
PB: predicated region body
PF: predicated region fallthrough
CT: control target
= control target key end

     0   :  { %s1129_s15 = smov 0   ;;  %s1131_s16 = smov 0   ;;  %s1320_s0 = inlined_call_operand.vmem [shape: bf16[16,256], index: 0, kind: input, shape index: {}]   ;;  %s1321_s1 = inlined_call_operand.vmem [shape: bf16[256,512], index: 1, kind: input, shape index: {}]   ;;  %s1322_s2 = inlined_call_operand.vmem [shape: f32[1,512], index: 2, kind: input, shape index: {}]   ;;  %s1323_s3 = inlined_call_operand.vmem [shape: f32[1,512], index: 3, kind: input, shape index: {}]   ;;  %s1324_s4 = inlined_call_operand.vmem [shape: f32[16,512], index: 4, kind: output, shape index: {}]  }
   0x1   :  { %s1133_s17 = smov 0   ;;  %s1135_s18 = smov 0  }
   0x2   :  { %s1137_s19 = smov 0  }
   0x3 LB: > { %s29_s20 = sadd.s32 1, %s1098_s18  ;;  %s919_s21 = sadd.s32 4294967295, %s1102_s19   ;;  %s1102_s19 = sphi %s1137_s19, %s14_s19   ;;  %s1098_s18 = sphi %s1135_s18, %s1329_s18   ;;  %s1094_s17 = sphi %s1133_s17, %s1328_s17   ;;  %s1090_s16 = sphi %s1131_s16, %s1327_s16   ;;  %s1086_s15 = sphi %s1129_s15, %s1326_s15  }
   0x4   : > { %p31_p0 = scmp.ge.s32.totalorder %s29_s20, 2  ;;  %p77_p1 = scmp.ne.s32.totalorder %s1090_s16, %s1086_s15 }
   0x5   : > { %p78_p2 = scmp.eq.s32.totalorder %s1102_s19, 0  ;;  %p161_p4 = scmp.eq.s32.totalorder %s919_s21, 1 }
   0x6   : > { %s1331_s20 = smov (%p31_p0, %s29_s20), 0  ;;  %s70_s23 = sadd.s32 1, %s1090_s16 }
   0x7   : > { %p79_p3 = por %p78_p2, %p77_p1  ;;  %s66_s22 = ssub.s32 %s1098_s18, %s1331_s20 }
   0x8   : > { %p68_p5 = scmp.eq.s32.totalorder %s66_s22, 0  ;;  %p1164_p6 = por %p161_p4, %p77_p1 }
   0x9   : > { %p923_p7 = scmp.ge.s32.totalorder %s1102_s19, 2 }
   0xa   : > { %s1169_s25 = scalar_select %p68_p5, %s1090_s16, %s70_s23  }
   0xb   : > { %198 = sbr.rel (%p923_p7) target bundleno = 38 (0x26), region = 20 }
  0x12   : > { %201 = sbr.rel (!%p79_p3) target bundleno = 38 (0x26), region = 24  ;;  %s203_s26 = sand.u32 (%p79_p3), 1, %s1090_s16  }
  0x13   : > { %s971_s27 = sshll.u32 (%p79_p3), %s1098_s18, 3  ;;  %s924_s28 = sshll.u32 (%p79_p3), %s203_s26, 8 }
  0x14   : > { %s1177_s5 = scalar_lea.vmem (%p79_p3), %s1321_s1, %s971_s27  ;;  %s1182_s6 = scalar_lea.vmem (%p79_p3), [#allocation3], %s924_s28 }
  0x15   : > { %v301_v0 = vld [vmem:[%s1177_s5] sm:$0xff] (%p79_p3)  ;;  %v303_v1 = vld [vmem:[%s1177_s5 + $0x10] sm:$0xff] (%p79_p3) }
  0x16   : > { %v305_v2 = vld [vmem:[%s1177_s5 + $0x20] sm:$0xff] (%p79_p3)  ;;  %302 = vst [vmem:[%s1182_s6] sm:$0xff] (%p79_p3), %v301_v0  ;;  %304 = vst [vmem:[%s1182_s6 + $0x8] sm:$0xff] (%p79_p3), %v303_v1  ;;  %v307_v3 = vld [vmem:[%s1177_s5 + $0x30] sm:$0xff] (%p79_p3) }
  0x17   : > { %306 = vst [vmem:[%s1182_s6 + $0x10] sm:$0xff] (%p79_p3), %v305_v2  ;;  %v309_v4 = vld [vmem:[%s1177_s5 + $0x40] sm:$0xff] (%p79_p3)  ;;  %v311_v5 = vld [vmem:[%s1177_s5 + $0x50] sm:$0xff] (%p79_p3)  ;;  %308 = vst [vmem:[%s1182_s6 + $0x18] sm:$0xff] (%p79_p3), %v307_v3 }
  0x18   : > { %310 = vst [vmem:[%s1182_s6 + $0x20] sm:$0xff] (%p79_p3), %v309_v4  ;;  %312 = vst [vmem:[%s1182_s6 + $0x28] sm:$0xff] (%p79_p3), %v311_v5  ;;  %v313_v6 = vld [vmem:[%s1177_s5 + $0x60] sm:$0xff] (%p79_p3)  ;;  %v315_v7 = vld [vmem:[%s1177_s5 + $0x70] sm:$0xff] (%p79_p3) }
  0x19   : > { %v317_v8 = vld [vmem:[%s1177_s5 + $0x80] sm:$0xff]  ;;  %314 = vst [vmem:[%s1182_s6 + $0x30] sm:$0xff] %v313_v6  ;;  %316 = vst [vmem:[%s1182_s6 + $0x38] sm:$0xff] %v315_v7  ;;  %v319_v9 = vld [vmem:[%s1177_s5 + $0x90] sm:$0xff] }
  0x1a   : > { %318 = vst [vmem:[%s1182_s6 + $0x40] sm:$0xff] %v317_v8  ;;  %v321_v10 = vld [vmem:[%s1177_s5 + $0xa0] sm:$0xff]  ;;  %v323_v11 = vld [vmem:[%s1177_s5 + $0xb0] sm:$0xff]  ;;  %320 = vst [vmem:[%s1182_s6 + $0x48] sm:$0xff] %v319_v9 }
  0x1b   : > { %322 = vst [vmem:[%s1182_s6 + $0x50] sm:$0xff] %v321_v10  ;;  %324 = vst [vmem:[%s1182_s6 + $0x58] sm:$0xff] %v323_v11  ;;  %v325_v12 = vld [vmem:[%s1177_s5 + $0xc0] sm:$0xff]  ;;  %v327_v13 = vld [vmem:[%s1177_s5 + $0xd0] sm:$0xff] }
  0x1c   : > { %v329_v14 = vld [vmem:[%s1177_s5 + $0xe0] sm:$0xff]  ;;  %326 = vst [vmem:[%s1182_s6 + $0x60] sm:$0xff] %v325_v12  ;;  %328 = vst [vmem:[%s1182_s6 + $0x68] sm:$0xff] %v327_v13  ;;  %v331_v15 = vld [vmem:[%s1177_s5 + $0xf0] sm:$0xff] }
  0x1d   : > { %330 = vst [vmem:[%s1182_s6 + $0x70] sm:$0xff] %v329_v14  ;;  %v333_v16 = vld [vmem:[%s1177_s5 + $0x100] sm:$0xff]  ;;  %v335_v17 = vld [vmem:[%s1177_s5 + $0x110] sm:$0xff]  ;;  %332 = vst [vmem:[%s1182_s6 + $0x78] sm:$0xff] %v331_v15 }
  0x1e   : > { %334 = vst [vmem:[%s1182_s6 + $0x80] sm:$0xff] %v333_v16  ;;  %336 = vst [vmem:[%s1182_s6 + $0x88] sm:$0xff] %v335_v17  ;;  %v337_v18 = vld [vmem:[%s1177_s5 + $0x120] sm:$0xff]  ;;  %v339_v19 = vld [vmem:[%s1177_s5 + $0x130] sm:$0xff] }
  0x1f   : > { %v341_v20 = vld [vmem:[%s1177_s5 + $0x140] sm:$0xff]  ;;  %338 = vst [vmem:[%s1182_s6 + $0x90] sm:$0xff] %v337_v18  ;;  %340 = vst [vmem:[%s1182_s6 + $0x98] sm:$0xff] %v339_v19  ;;  %v343_v21 = vld [vmem:[%s1177_s5 + $0x150] sm:$0xff] }
  0x20   : > { %342 = vst [vmem:[%s1182_s6 + $0xa0] sm:$0xff] %v341_v20  ;;  %v345_v22 = vld [vmem:[%s1177_s5 + $0x160] sm:$0xff]  ;;  %v347_v23 = vld [vmem:[%s1177_s5 + $0x170] sm:$0xff]  ;;  %344 = vst [vmem:[%s1182_s6 + $0xa8] sm:$0xff] %v343_v21 }
  0x21   : > { %346 = vst [vmem:[%s1182_s6 + $0xb0] sm:$0xff] %v345_v22  ;;  %348 = vst [vmem:[%s1182_s6 + $0xb8] sm:$0xff] %v347_v23  ;;  %v349_v24 = vld [vmem:[%s1177_s5 + $0x180] sm:$0xff]  ;;  %v351_v25 = vld [vmem:[%s1177_s5 + $0x190] sm:$0xff] }
  0x22   : > { %v353_v26 = vld [vmem:[%s1177_s5 + $0x1a0] sm:$0xff]  ;;  %350 = vst [vmem:[%s1182_s6 + $0xc0] sm:$0xff] %v349_v24  ;;  %352 = vst [vmem:[%s1182_s6 + $0xc8] sm:$0xff] %v351_v25  ;;  %v355_v27 = vld [vmem:[%s1177_s5 + $0x1b0] sm:$0xff] }
  0x23   : > { %354 = vst [vmem:[%s1182_s6 + $0xd0] sm:$0xff] %v353_v26  ;;  %v357_v28 = vld [vmem:[%s1177_s5 + $0x1c0] sm:$0xff]  ;;  %v359_v29 = vld [vmem:[%s1177_s5 + $0x1d0] sm:$0xff]  ;;  %356 = vst [vmem:[%s1182_s6 + $0xd8] sm:$0xff] %v355_v27 }
  0x24   : > { %358 = vst [vmem:[%s1182_s6 + $0xe0] sm:$0xff] %v357_v28  ;;  %360 = vst [vmem:[%s1182_s6 + $0xe8] sm:$0xff] %v359_v29  ;;  %v361_v30 = vld [vmem:[%s1177_s5 + $0x1e0] sm:$0xff]  ;;  %v363_v31 = vld [vmem:[%s1177_s5 + $0x1f0] sm:$0xff] }
  0x25   : > { %362 = vst [vmem:[%s1182_s6 + $0xf0] sm:$0xff] %v361_v30  ;;  %364 = vst [vmem:[%s1182_s6 + $0xf8] sm:$0xff] %v363_v31 }
  0x26 PF: > { %p927_p8 = scmp.ge.s32.totalorder %s1102_s19, 1  ;;  %p385_p9 = scmp.lt.s32.totalorder %s1102_s19, 3 }
  0x28   : > { %p386_p10 = pnand %p927_p8, %p385_p9 }
  0x29   : > { %s392_s7 = sand.u32 (!%p386_p10), 1, %s1086_s15   ;;  %v1063_v32 = vld [vmem:[%s1320_s0 + $0x4] ss:$8 sps:$4 sm:$0xff] (!%p386_p10)   ;;  %v1061_v1 = vld [vmem:[%s1320_s0] ss:$8 sps:$4 sm:$0xff] (!%p386_p10)   ;;  %s930_s14 = sshll.u32 (!%p386_p10), %s1094_s17, 1  ;;  %v736_v2 = vlaneseq (!%p386_p10) }
  0x2a   : > { %389 = sbr.rel (%p386_p10) target bundleno = 337 (0x151), region = 70  ;;  %s928_s8 = sshll.u32 (!%p386_p10), %s392_s7, 8  ;;  %708 = vmatprep.mubr.bf16.mxu0 (!%p386_p10), %v1063_v32 }
  0x2b   : > { %s1253_s11 = scalar_lea.vmem (!%p386_p10), [#allocation3], %s928_s8  ;;  %p449_p11 = scmp.lt.s32.totalorder (!%p386_p10), %s930_s14, 3  ;;  %v737_v3 = vshrl.u32 (!%p386_p10), %v736_v2, 7 }
  0x2c   : > { %v1013_v33 = vld [vmem:[%s1253_s11 + $0x4] ss:$8 sps:$4 sm:$0xff] (!%p386_p10)   ;;  %v1015_v34 = vld [vmem:[%s1253_s11] ss:$8 sps:$4 sm:$0xff] (!%p386_p10)   ;;  %v1016_v35 = vld [vmem:[%s1253_s11 + $0x14] ss:$8 sps:$4 sm:$0xff] (!%p386_p10)  }
  0x2d   : > { %676 = vmatprep.subr.bf16.mxu0 (!%p386_p10), %v1013_v33  ;;  %v1018_v36 = vld [vmem:[%s1253_s11 + $0x10] ss:$8 sps:$4 sm:$0xff] (!%p386_p10)   ;;  %v1019_v37 = vld [vmem:[%s1253_s11 + $0x24] ss:$8 sps:$4 sm:$0xff] (!%p386_p10)   ;;  %v1021_v38 = vld [vmem:[%s1253_s11 + $0x20] ss:$8 sps:$4 sm:$0xff] (!%p386_p10)  }
  0x2e   : > { %677 = vmatpush1.bf16.msra.mxu0 (!%p386_p10), %v1015_v34  ;;  %v1022_v39 = vld [vmem:[%s1253_s11 + $0x34] ss:$8 sps:$4 sm:$0xff] (!%p386_p10)   ;;  %v1024_v40 = vld [vmem:[%s1253_s11 + $0x30] ss:$8 sps:$4 sm:$0xff] (!%p386_p10)   ;;  %v1025_v41 = vld [vmem:[%s1253_s11 + $0x44] ss:$8 sps:$4 sm:$0xff] (!%p386_p10)  }
  0x2f   : > { %678 = vmatprep.subr.bf16.mxu0 (!%p386_p10), %v1016_v35  ;;  %v1027_v42 = vld [vmem:[%s1253_s11 + $0x40] ss:$8 sps:$4 sm:$0xff] (!%p386_p10)   ;;  %v1028_v43 = vld [vmem:[%s1253_s11 + $0x54] ss:$8 sps:$4 sm:$0xff] (!%p386_p10)   ;;  %v1030_v44 = vld [vmem:[%s1253_s11 + $0x50] ss:$8 sps:$4 sm:$0xff] (!%p386_p10)  }
  0x30   : > { %v1031_v45 = vld [vmem:[%s1253_s11 + $0x64] ss:$8 sps:$4 sm:$0xff] (!%p386_p10)   ;;  %v1033_v46 = vld [vmem:[%s1253_s11 + $0x60] ss:$8 sps:$4 sm:$0xff] (!%p386_p10)   ;;  %v1034_v47 = vld [vmem:[%s1253_s11 + $0x74] ss:$8 sps:$4 sm:$0xff] (!%p386_p10)  }
  0x31   : > { %v1036_v48 = vld [vmem:[%s1253_s11 + $0x70] ss:$8 sps:$4 sm:$0xff]   ;;  %v1037_v49 = vld [vmem:[%s1253_s11 + $0x84] ss:$8 sps:$4 sm:$0xff]   ;;  %v1039_v50 = vld [vmem:[%s1253_s11 + $0x80] ss:$8 sps:$4 sm:$0xff]  }
  0x32   : > { %679 = vmatpush1.bf16.msra.mxu0 %v1018_v36  ;;  %v1040_v51 = vld [vmem:[%s1253_s11 + $0x94] ss:$8 sps:$4 sm:$0xff]   ;;  %v1042_v52 = vld [vmem:[%s1253_s11 + $0x90] ss:$8 sps:$4 sm:$0xff]   ;;  %v1043_v53 = vld [vmem:[%s1253_s11 + $0xa4] ss:$8 sps:$4 sm:$0xff]  }
  0x33   : > { %680 = vmatprep.subr.bf16.mxu0 %v1019_v37  ;;  %v1045_v54 = vld [vmem:[%s1253_s11 + $0xa0] ss:$8 sps:$4 sm:$0xff]   ;;  %v1046_v55 = vld [vmem:[%s1253_s11 + $0xb4] ss:$8 sps:$4 sm:$0xff]   ;;  %v1048_v56 = vld [vmem:[%s1253_s11 + $0xb0] ss:$8 sps:$4 sm:$0xff]  }
  0x34   : > { %v1049_v57 = vld [vmem:[%s1253_s11 + $0xc4] ss:$8 sps:$4 sm:$0xff]   ;;  %v1051_v58 = vld [vmem:[%s1253_s11 + $0xc0] ss:$8 sps:$4 sm:$0xff]   ;;  %v1052_v59 = vld [vmem:[%s1253_s11 + $0xd4] ss:$8 sps:$4 sm:$0xff]  }
  0x35   : > { %v1054_v60 = vld [vmem:[%s1253_s11 + $0xd0] ss:$8 sps:$4 sm:$0xff]   ;;  %v1055_v61 = vld [vmem:[%s1253_s11 + $0xe4] ss:$8 sps:$4 sm:$0xff]   ;;  %v1057_v62 = vld [vmem:[%s1253_s11 + $0xe0] ss:$8 sps:$4 sm:$0xff]  }
  0x36   : > { %681 = vmatpush1.bf16.msra.mxu0 %v1021_v38  ;;  %v1058_v63 = vld [vmem:[%s1253_s11 + $0xf4] ss:$8 sps:$4 sm:$0xff]   ;;  %v1060_v0 = vld [vmem:[%s1253_s11 + $0xf0] ss:$8 sps:$4 sm:$0xff]   ;;  %s1333_s14 = smov (!%p449_p11, %s930_s14), 3  ;;  %v738_v4 = vsub.s32 0, %v737_v3 }
  0x37   : > { %682 = vmatprep.subr.bf16.mxu0 %v1022_v39  ;;  %s451_s23 = scalar_lea.vmem %s1322_s2, %s1333_s14  ;;  %s456_s28 = scalar_lea.vmem %s1323_s3, %s1333_s14  ;;  %v742_v6 = vsub.s32 1, %v737_v3 }
  0x38   : > { %v734_v5 = vld [vmem:[%s451_s23] sm:$0x3]  ;;  %s929_s29 = sshll.u32 %s392_s7, 5  ;;  %s972_s15 = sshll.u32 (%p1164_p6), %s1094_s17, 4 }
  0x39   : > { %v750_v7 = vld [vmem:[%s456_s28] sm:$0x3]  ;;  %v739_v8 = vrot.slane %v734_v5, %v738_v4  ;;  %v743_v9 = vrot.slane %v734_v5, %v742_v6  ;;  %s433_s30 = scalar_lea.vmem [#allocation4], %s929_s29  ;;  %s782_s7 = scalar_lea.vmem (%p1164_p6), %s1324_s4, %s972_s15 }
  0x3a   : > { %683 = vmatpush1.bf16.msra.mxu0 %v1024_v40  ;;  %v755_v10 = vrot.slane %v750_v7, %v738_v4  ;;  %v759_v12 = vrot.slane %v750_v7, %v742_v6 }
  0x3b   : > { %684 = vmatprep.subr.bf16.mxu0 %v1025_v41 }
  0x3e   : > { %685 = vmatpush1.bf16.msra.mxu0 %v1027_v42 }
  0x3f   : > { %686 = vmatprep.subr.bf16.mxu0 %v1028_v43 }
  0x42   : > { %687 = vmatpush1.bf16.msra.mxu0 %v1030_v44 }
  0x43   : > { %688 = vmatprep.subr.bf16.mxu0 %v1031_v45 }
  0x46   : > { %689 = vmatpush1.bf16.msra.mxu0 %v1033_v46 }
  0x47   : > { %690 = vmatprep.subr.bf16.mxu0 %v1034_v47 }
  0x4a   : > { %691 = vmatpush1.bf16.msra.mxu0 %v1036_v48 }
  0x4b   : > { %692 = vmatprep.subr.bf16.mxu0 %v1037_v49 }
  0x4e   : > { %693 = vmatpush1.bf16.msra.mxu0 %v1039_v50 }
  0x4f   : > { %694 = vmatprep.subr.bf16.mxu0 %v1040_v51 }
  0x52   : > { %695 = vmatpush1.bf16.msra.mxu0 %v1042_v52 }
  0x53   : > { %696 = vmatprep.subr.bf16.mxu0 %v1043_v53 }
  0x56   : > { %697 = vmatpush1.bf16.msra.mxu0 %v1045_v54 }
  0x57   : > { %698 = vmatprep.subr.bf16.mxu0 %v1046_v55 }
  0x5a   : > { %699 = vmatpush1.bf16.msra.mxu0 %v1048_v56 }
  0x5b   : > { %700 = vmatprep.subr.bf16.mxu0 %v1049_v57 }
  0x5e   : > { %701 = vmatpush1.bf16.msra.mxu0 %v1051_v58 }
  0x5f   : > { %702 = vmatprep.subr.bf16.mxu0 %v1052_v59 }
  0x62   : > { %703 = vmatpush1.bf16.msra.mxu0 %v1054_v60 }
  0x63   : > { %704 = vmatprep.subr.bf16.mxu0 %v1055_v61 }
  0x66   : > { %705 = vmatpush1.bf16.msra.mxu0 %v1057_v62 }
  0x67   : > { %706 = vmatprep.subr.bf16.mxu0 %v1058_v63 }
  0x6a   : > { %707 = vmatpush1.bf16.msra.mxu0 %v1060_v0 }
  0x6d   : > { %709 = vmatmul.mubr.bf16.vlgmr.msra.gmra.mrb[0].mxu0 %v1061_v1 }
 0x140   : > { %v710_v11 = vpop.f32.mrb[0].mxu0 }
 0x141   : > { %v746_v13 = vmul.f32 %v739_v8, %v710_v11  ;;  %v712_v14 = vpop.f32.mrb[1].mxu0 }
 0x142   : > { %v747_v15 = vmul.f32 %v743_v9, %v712_v14  ;;  %v714_v16 = vpop.f32.mrb[2].mxu0  ;;  %776 = sbr.rel (!%p1164_p6) target bundleno = 337 (0x151), region = 86 }
 0x143   : > { %v762_v17 = vadd.f32 %v755_v10, %v746_v13  ;;  %v748_v18 = vmul.f32 %v739_v8, %v714_v16  ;;  %v716_v19 = vpop.f32.mrb[3].mxu0 }
 0x144   : > { %v763_v20 = vadd.f32 %v759_v12, %v747_v15  ;;  %v749_v21 = vmul.f32 %v743_v9, %v716_v19 }
 0x145   : > { %766 = vst [vmem:[%s433_s30] sm:$0xff] %v762_v17  ;;  %v764_v22 = vadd.f32 %v755_v10, %v748_v18 }
 0x146   : > { %767 = vst [vmem:[%s433_s30 + $0x8] sm:$0xff] %v763_v20  ;;  %v765_v23 = vadd.f32 %v759_v12, %v749_v21 }
 0x147   : > { %768 = vst [vmem:[%s433_s30 + $0x10] sm:$0xff] %v764_v22 }
 0x148   : > { %769 = vst [vmem:[%s433_s30 + $0x18] sm:$0xff] %v765_v23 }
 0x14c   : > { %v795_v24 = vld [vmem:[%s433_s30] sm:$0xff] }
 0x14d   : > { %v797_v25 = vld [vmem:[%s433_s30 + $0x8] sm:$0xff]  ;;  %796 = vst [vmem:[%s782_s7] sm:$0xff] %v795_v24 }
 0x14e   : > { %v799_v26 = vld [vmem:[%s433_s30 + $0x10] sm:$0xff]  ;;  %798 = vst [vmem:[%s782_s7 + $0x8] sm:$0xff] %v797_v25 }
 0x14f   : > { %v801_v27 = vld [vmem:[%s433_s30 + $0x18] sm:$0xff]  ;;  %800 = vst [vmem:[%s782_s7 + $0x20] sm:$0xff] %v799_v26 }
 0x150   : > { %802 = vst [vmem:[%s782_s7 + $0x28] sm:$0xff] %v801_v27 }
 0x151 PF: > { %s14_s19 = sadd.s32 1, %s1102_s19   ;;  %s1326_s15 = smov %s1090_s16 }
 0x152   : > { %p11_p12 = scmp.ge.s32.totalorder %s14_s19, 4   ;;  %s1327_s16 = smov %s1169_s25 }
 0x153   : > { %s1328_s17 = smov %s1098_s18  ;;  %s1329_s18 = smov %s1331_s20 }
 0x154   :  { %13 = sbr.rel (!%p11_p12) target bundleno = 3 (0x3), region = 149 }

// kernel: resnet18_rnn_forward.104
= control target key start
LH: loop header
LB: loop body
LE: loop exit
PB: predicated region body
PF: predicated region fallthrough
CT: control target
= control target key end

     0   :  { %s1268_s15 = smov 0   ;;  %s1270_s16 = smov 0   ;;  %s1568_s0 = inlined_call_operand.vmem [shape: bf16[16,2304], index: 0, kind: input, shape index: {}]   ;;  %s1569_s1 = inlined_call_operand.vmem [shape: bf16[2304,512], index: 1, kind: input, shape index: {}]   ;;  %s1570_s2 = inlined_call_operand.vmem [shape: f32[1,512], index: 2, kind: input, shape index: {}]   ;;  %s1571_s3 = inlined_call_operand.vmem [shape: f32[1,512], index: 3, kind: input, shape index: {}]   ;;  %s1572_s4 = inlined_call_operand.vmem [shape: f32[16,512], index: 4, kind: output, shape index: {}]  }
   0x1   :  { %s1272_s17 = smov 0   ;;  %s1274_s18 = smov 0  }
   0x2   :  { %s1276_s19 = smov 0   ;;  %s1278_s20 = smov 0  }
   0x3   :  { %s1280_s21 = smov 0   ;;  %s1282_s22 = smov 0  }
   0x4   :  { %s1284_s23 = smov 0   ;;  %s1286_s24 = smov 0  }
   0x5   :  { %s1288_s25 = smov 0  }
   0x6 LB: > { %1576 = sst [smem:[#allocation6_spill]] %s1220_s20  ;;  %s952_s26 = sadd.s32 4294967295, %s1240_s25   ;;  %s1240_s25 = sphi %s1288_s25, %s14_s25   ;;  %s1236_s24 = sphi %s1286_s24, %s1594_s24   ;;  %s1232_s23 = sphi %s1284_s23, %s1593_s23   ;;  %s1228_s22 = sphi %s1282_s22, %s1592_s22   ;;  %s1224_s21 = sphi %s1280_s21, %s1591_s21   ;;  %s1220_s20 = sphi %s1278_s20, %s1584_s20   ;;  %s1216_s19 = sphi %s1276_s19, %s1583_s19   ;;  %s1212_s18 = sphi %s1274_s18, %s1590_s18   ;;  %s1208_s17 = sphi %s1272_s17, %s1589_s17   ;;  %s1204_s16 = sphi %s1270_s16, %s1588_s16   ;;  %s1200_s15 = sphi %s1268_s15, %s1587_s15  }
   0x7   : > { %s26_s27 = sadd.s32 1, %s1232_s23  ;;  %s29_s28 = sadd.s32 1, %s1236_s24 }
   0x8   : > { %p27_p0 = scmp.ge.s32.totalorder %s26_s27, 9  ;;  %s42_s29 = sadd.s32 1, %s1220_s20 }
   0x9   : > { %p49_p1 = scmp.ne.s32.totalorder %s1220_s20, %s1216_s19  ;;  %p50_p2 = scmp.eq.s32.totalorder %s1240_s25, 0 }
   0xa   : > { %s1596_s27 = smov (%p27_p0, %s26_s27), 0  ;;  %s1598_s28 = smov (!%p27_p0, %s29_s28), %s1236_s24 }
   0xb   : > { %1577 = sst [smem:[#allocation7_spill]] %s1596_s27  ;;  %s38_s30 = ssub.s32 %s1232_s23, %s1596_s27 }
   0xc   : > { %p31_p3 = scmp.ge.s32.totalorder %s1598_s28, 2  ;;  %p40_p4 = scmp.eq.s32.totalorder %s38_s30, 0 }
   0xd   : > { %p1335_p5 = por %p50_p2, %p49_p1  ;;  %s70_s6 = sadd.s32 1, %s1212_s18 }
   0xe   : > { %s1600_s28 = smov (%p31_p3, %s1598_s28), 0  ;;  %p77_p6 = scmp.ne.s32.totalorder %s1212_s18, %s1208_s17 }
   0xf   : > { %1579 = sst [smem:[#allocation8_spill]] %s1600_s28  ;;  %s66_s8 = ssub.s32 %s1236_s24, %s1600_s28 }
  0x10   : > { %s1343_s7 = scalar_select %p40_p4, %s1220_s20, %s42_s29  }
  0x11   : > { %s67_s9 = sor.u32 %s66_s8, %s38_s30  ;;  %p148_p7 = scmp.eq.s32.totalorder %s66_s8, 0 }
  0x12   : > { %1580 = sst [smem:[#allocation9_spill]] %s1343_s7  ;;  %p68_p8 = scmp.eq.s32.totalorder %s67_s9, 0 }
  0x13   : > { %p1349_p9 = por %p77_p6, %p50_p2  ;;  %s150_s11 = sadd.s32 1, %s1204_s16 }
  0x14   : > { %p160_p10 = scmp.ne.s32.totalorder %s1204_s16, %s1200_s15  ;;  %p161_p11 = scmp.eq.s32.totalorder %s952_s26, 17 }
  0x15   : > { %s1357_s12 = scalar_select %p68_p8, %s1212_s18, %s70_s6  }
  0x16   : > { %s1360_s13 = scalar_select %p148_p7, %s1204_s16, %s150_s11  }
  0x17   : > { %p1362_p12 = por %p161_p11, %p160_p10  ;;  %p955_p13 = scmp.ge.s32.totalorder %s1240_s25, 18 }
  0x19   : > { %183 = sbr.rel (%p955_p13) target bundleno = 62 (0x3e), region = 16 }
  0x20   : > { %186 = sbr.rel (!%p1335_p5) target bundleno = 39 (0x27), region = 20  ;;  %s188_s29 = sand.u32 (%p1335_p5), 1, %s1220_s20  }
  0x21   : > { %s1011_s30 = sshll.u32 (%p1335_p5), %s1232_s23, 3  ;;  %s956_s8 = sshll.u32 (%p1335_p5), %s188_s29, 4 }
  0x22   : > { %s196_s11 = scalar_lea.vmem (%p1335_p5), %s1568_s0, %s1011_s30  ;;  %s190_s26 = scalar_lea.vmem (%p1335_p5), [#allocation3], %s956_s8 }
  0x23   : > { %v226_v0 = vld [vmem:[%s196_s11] sm:$0xff] (%p1335_p5)  ;;  %v228_v1 = vld [vmem:[%s196_s11 + $0x48] sm:$0xff] (%p1335_p5) }
  0x24   : > { %227 = vst [vmem:[%s190_s26] sm:$0xff] (%p1335_p5), %v226_v0  ;;  %229 = vst [vmem:[%s190_s26 + $0x8] sm:$0xff] (%p1335_p5), %v228_v1 }
  0x27 PF: > { %235 = sbr.rel (!%p1349_p9) target bundleno = 62 (0x3e), region = 58  ;;  %s237_s5 = sand.u32 (%p1349_p9), 1, %s1212_s18  }
  0x28   : > { %s961_s28 = sshll.u32 (%p1349_p9), %s1236_s24, 1  ;;  %s959_s27 = sshll.u32 (%p1349_p9), %s237_s5, 8 }
  0x29   : > { %s1012_s29 = sshll.u32 (%p1349_p9), %s1232_s23, 7  ;;  %s1387_s10 = scalar_lea.vmem (%p1349_p9), [#allocation4], %s959_s27 }
  0x2a   : > { %s243_s7 = sadd.s32 (%p1349_p9), %s1012_s29, %s961_s28 }
  0x2b   : > { %s963_s20 = sshll.u32 (%p1349_p9), %s243_s7, 2 }
  0x2c   : > { %s1382_s9 = scalar_lea.vmem (%p1349_p9), %s1569_s1, %s963_s20 }
  0x2d   : > { %v335_v2 = vld [vmem:[%s1382_s9] sm:$0xff] (%p1349_p9)  ;;  %v337_v3 = vld [vmem:[%s1382_s9 + $0x10] sm:$0xff] (%p1349_p9) }
  0x2e   : > { %v339_v4 = vld [vmem:[%s1382_s9 + $0x20] sm:$0xff]  ;;  %336 = vst [vmem:[%s1387_s10] sm:$0xff] %v335_v2  ;;  %338 = vst [vmem:[%s1387_s10 + $0x8] sm:$0xff] %v337_v3  ;;  %v341_v5 = vld [vmem:[%s1382_s9 + $0x30] sm:$0xff] }
  0x2f   : > { %340 = vst [vmem:[%s1387_s10 + $0x10] sm:$0xff] %v339_v4  ;;  %v343_v6 = vld [vmem:[%s1382_s9 + $0x40] sm:$0xff]  ;;  %v345_v7 = vld [vmem:[%s1382_s9 + $0x50] sm:$0xff]  ;;  %342 = vst [vmem:[%s1387_s10 + $0x18] sm:$0xff] %v341_v5 }
  0x30   : > { %344 = vst [vmem:[%s1387_s10 + $0x20] sm:$0xff] %v343_v6  ;;  %346 = vst [vmem:[%s1387_s10 + $0x28] sm:$0xff] %v345_v7  ;;  %v347_v8 = vld [vmem:[%s1382_s9 + $0x60] sm:$0xff]  ;;  %v349_v9 = vld [vmem:[%s1382_s9 + $0x70] sm:$0xff] }
  0x31   : > { %v351_v10 = vld [vmem:[%s1382_s9 + $0x80] sm:$0xff]  ;;  %348 = vst [vmem:[%s1387_s10 + $0x30] sm:$0xff] %v347_v8  ;;  %350 = vst [vmem:[%s1387_s10 + $0x38] sm:$0xff] %v349_v9  ;;  %v353_v11 = vld [vmem:[%s1382_s9 + $0x90] sm:$0xff] }
  0x32   : > { %352 = vst [vmem:[%s1387_s10 + $0x40] sm:$0xff] %v351_v10  ;;  %v355_v12 = vld [vmem:[%s1382_s9 + $0xa0] sm:$0xff]  ;;  %v357_v13 = vld [vmem:[%s1382_s9 + $0xb0] sm:$0xff]  ;;  %354 = vst [vmem:[%s1387_s10 + $0x48] sm:$0xff] %v353_v11 }
  0x33   : > { %356 = vst [vmem:[%s1387_s10 + $0x50] sm:$0xff] %v355_v12  ;;  %358 = vst [vmem:[%s1387_s10 + $0x58] sm:$0xff] %v357_v13  ;;  %v359_v14 = vld [vmem:[%s1382_s9 + $0xc0] sm:$0xff]  ;;  %v361_v15 = vld [vmem:[%s1382_s9 + $0xd0] sm:$0xff] }
  0x34   : > { %v363_v16 = vld [vmem:[%s1382_s9 + $0xe0] sm:$0xff]  ;;  %360 = vst [vmem:[%s1387_s10 + $0x60] sm:$0xff] %v359_v14  ;;  %362 = vst [vmem:[%s1387_s10 + $0x68] sm:$0xff] %v361_v15  ;;  %v365_v17 = vld [vmem:[%s1382_s9 + $0xf0] sm:$0xff] }
  0x35   : > { %364 = vst [vmem:[%s1387_s10 + $0x70] sm:$0xff] %v363_v16  ;;  %v367_v18 = vld [vmem:[%s1382_s9 + $0x100] sm:$0xff]  ;;  %v369_v19 = vld [vmem:[%s1382_s9 + $0x110] sm:$0xff]  ;;  %366 = vst [vmem:[%s1387_s10 + $0x78] sm:$0xff] %v365_v17 }
  0x36   : > { %368 = vst [vmem:[%s1387_s10 + $0x80] sm:$0xff] %v367_v18  ;;  %370 = vst [vmem:[%s1387_s10 + $0x88] sm:$0xff] %v369_v19  ;;  %v371_v20 = vld [vmem:[%s1382_s9 + $0x120] sm:$0xff]  ;;  %v373_v21 = vld [vmem:[%s1382_s9 + $0x130] sm:$0xff] }
  0x37   : > { %v375_v22 = vld [vmem:[%s1382_s9 + $0x140] sm:$0xff]  ;;  %372 = vst [vmem:[%s1387_s10 + $0x90] sm:$0xff] %v371_v20  ;;  %374 = vst [vmem:[%s1387_s10 + $0x98] sm:$0xff] %v373_v21  ;;  %v377_v23 = vld [vmem:[%s1382_s9 + $0x150] sm:$0xff] }
  0x38   : > { %376 = vst [vmem:[%s1387_s10 + $0xa0] sm:$0xff] %v375_v22  ;;  %v379_v24 = vld [vmem:[%s1382_s9 + $0x160] sm:$0xff]  ;;  %v381_v25 = vld [vmem:[%s1382_s9 + $0x170] sm:$0xff]  ;;  %378 = vst [vmem:[%s1387_s10 + $0xa8] sm:$0xff] %v377_v23 }
  0x39   : > { %380 = vst [vmem:[%s1387_s10 + $0xb0] sm:$0xff] %v379_v24  ;;  %382 = vst [vmem:[%s1387_s10 + $0xb8] sm:$0xff] %v381_v25  ;;  %v383_v26 = vld [vmem:[%s1382_s9 + $0x180] sm:$0xff]  ;;  %v385_v27 = vld [vmem:[%s1382_s9 + $0x190] sm:$0xff] }
  0x3a   : > { %v387_v28 = vld [vmem:[%s1382_s9 + $0x1a0] sm:$0xff]  ;;  %384 = vst [vmem:[%s1387_s10 + $0xc0] sm:$0xff] %v383_v26  ;;  %386 = vst [vmem:[%s1387_s10 + $0xc8] sm:$0xff] %v385_v27  ;;  %v389_v29 = vld [vmem:[%s1382_s9 + $0x1b0] sm:$0xff] }
  0x3b   : > { %388 = vst [vmem:[%s1387_s10 + $0xd0] sm:$0xff] %v387_v28  ;;  %v391_v30 = vld [vmem:[%s1382_s9 + $0x1c0] sm:$0xff]  ;;  %v393_v31 = vld [vmem:[%s1382_s9 + $0x1d0] sm:$0xff]  ;;  %390 = vst [vmem:[%s1387_s10 + $0xd8] sm:$0xff] %v389_v29 }
  0x3c   : > { %392 = vst [vmem:[%s1387_s10 + $0xe0] sm:$0xff] %v391_v30  ;;  %394 = vst [vmem:[%s1387_s10 + $0xe8] sm:$0xff] %v393_v31  ;;  %v395_v32 = vld [vmem:[%s1382_s9 + $0x1e0] sm:$0xff]  ;;  %v397_v33 = vld [vmem:[%s1382_s9 + $0x1f0] sm:$0xff] }
  0x3d   : > { %396 = vst [vmem:[%s1387_s10 + $0xf0] sm:$0xff] %v395_v32  ;;  %398 = vst [vmem:[%s1387_s10 + $0xf8] sm:$0xff] %v397_v33 }
  0x3e PF: > { %p964_p0 = scmp.ge.s32.totalorder %s1240_s25, 1  ;;  %p419_p1 = scmp.lt.s32.totalorder %s1240_s25, 19 }
  0x40   : > { %p420_p2 = pnand %p964_p0, %p419_p1 }
  0x41   : > { %s426_s20 = sand.u32 (!%p420_p2), 1, %s1216_s19   ;;  %s433_s27 = sand.u32 (!%p420_p2), 1, %s1208_s17  }
  0x42   : > { %423 = sbr.rel (%p420_p2) target bundleno = 385 (0x181), region = 104  ;;  %s1454_s28 = sshll.u32 (!%p420_p2), %s426_s20, 4 }
  0x43   : > { %s966_s7 = sshll.u32 (!%p420_p2), %s433_s27, 8  ;;  %s466_s8 = sand.u32 (!%p420_p2), 1, %s1200_s15  }
  0x44   : > { %s968_s11 = sshll.u32 (!%p420_p2), %s1228_s22, 1  ;;  %s967_s26 = sshll.u32 (!%p420_p2), %s466_s8, 5 }
  0x45   : > { %p474_p3 = scmp.lt.s32.totalorder (!%p420_p2), %s968_s11, 3  ;;  %s428_s19 = scalar_lea.vmem (!%p420_p2), [#allocation3], %s1454_s28 }
  0x46   : > { %s1469_s10 = scalar_lea.vmem (!%p420_p2), [#allocation4], %s966_s7  ;;  %s1471_s20 = scalar_lea.vmem (!%p420_p2), [#allocation5], %s967_s26 }
  0x47   : > { %p970_p4 = scmp.ne.s32.totalorder (!%p420_p2), %s1224_s21, 0 }
  0x49   : > { %s1602_s11 = smov (!%p474_p3, %s968_s11), 3  ;;  %488 = sbr.rel (%p970_p4) target bundleno = 80 (0x50), region = 116 }
  0x4a   : > { %s476_s6 = scalar_lea.vmem %s1570_s2, %s1602_s11  ;;  %s481_s17 = scalar_lea.vmem %s1571_s3, %s1602_s11  ;;  %v1242_v34 = vmov (!%p970_p4), 0.0  }
  0x4b   : > { %489 = vst [vmem:[#allocation2] sm:$0xff] (!%p970_p4), %v1242_v34  ;;  %490 = vst [vmem:[#allocation2 + $0x8] sm:$0xff] (!%p970_p4), %v1242_v34 }
  0x4c   : > { %491 = vst [vmem:[#allocation2 + $0x10] sm:$0xff] (!%p970_p4), %v1242_v34  ;;  %492 = vst [vmem:[#allocation2 + $0x18] sm:$0xff] (!%p970_p4), %v1242_v34 }
  0x50 PF: > { %v1103_v35 = vld [vmem:[%s1469_s10 + $0x4] ss:$8 sps:$4 sm:$0xff]   ;;  %v1105_v36 = vld [vmem:[%s1469_s10] ss:$8 sps:$4 sm:$0xff]   ;;  %v1106_v37 = vld [vmem:[%s1469_s10 + $0x14] ss:$8 sps:$4 sm:$0xff]  }
  0x51   : > { %701 = vmatprep.subr.bf16.mxu0 %v1103_v35  ;;  %v1108_v38 = vld [vmem:[%s1469_s10 + $0x10] ss:$8 sps:$4 sm:$0xff]   ;;  %v1109_v39 = vld [vmem:[%s1469_s10 + $0x24] ss:$8 sps:$4 sm:$0xff]   ;;  %v1111_v40 = vld [vmem:[%s1469_s10 + $0x20] ss:$8 sps:$4 sm:$0xff]  }
  0x52   : > { %702 = vmatpush1.bf16.msra.mxu0 %v1105_v36  ;;  %v1112_v41 = vld [vmem:[%s1469_s10 + $0x34] ss:$8 sps:$4 sm:$0xff]   ;;  %v1114_v42 = vld [vmem:[%s1469_s10 + $0x30] ss:$8 sps:$4 sm:$0xff]   ;;  %v1115_v43 = vld [vmem:[%s1469_s10 + $0x44] ss:$8 sps:$4 sm:$0xff]  }
  0x53   : > { %703 = vmatprep.subr.bf16.mxu0 %v1106_v37  ;;  %v1117_v44 = vld [vmem:[%s1469_s10 + $0x40] ss:$8 sps:$4 sm:$0xff]   ;;  %v1118_v45 = vld [vmem:[%s1469_s10 + $0x54] ss:$8 sps:$4 sm:$0xff]   ;;  %v1120_v46 = vld [vmem:[%s1469_s10 + $0x50] ss:$8 sps:$4 sm:$0xff]  }
  0x54   : > { %v1121_v47 = vld [vmem:[%s1469_s10 + $0x64] ss:$8 sps:$4 sm:$0xff]   ;;  %v1123_v49 = vld [vmem:[%s1469_s10 + $0x60] ss:$8 sps:$4 sm:$0xff]   ;;  %v1124_v50 = vld [vmem:[%s1469_s10 + $0x74] ss:$8 sps:$4 sm:$0xff]  }
  0x55   : > { %v1153_v48 = vld [vmem:[%s428_s19 + $0x4] ss:$8 sps:$4 sm:$0xff]   ;;  %v1126_v51 = vld [vmem:[%s1469_s10 + $0x70] ss:$8 sps:$4 sm:$0xff]   ;;  %v1129_v53 = vld [vmem:[%s1469_s10 + $0x80] ss:$8 sps:$4 sm:$0xff]  }
  0x56   : > { %704 = vmatpush1.bf16.msra.mxu0 %v1108_v38  ;;  %733 = vmatprep.mubr.bf16.mxu0 %v1153_v48  ;;  %v1127_v52 = vld [vmem:[%s1469_s10 + $0x84] ss:$8 sps:$4 sm:$0xff]   ;;  %v1130_v54 = vld [vmem:[%s1469_s10 + $0x94] ss:$8 sps:$4 sm:$0xff]   ;;  %v1132_v55 = vld [vmem:[%s1469_s10 + $0x90] ss:$8 sps:$4 sm:$0xff]  }
  0x57   : > { %705 = vmatprep.subr.bf16.mxu0 %v1109_v39  ;;  %v1133_v56 = vld [vmem:[%s1469_s10 + $0xa4] ss:$8 sps:$4 sm:$0xff]   ;;  %v1135_v57 = vld [vmem:[%s1469_s10 + $0xa0] ss:$8 sps:$4 sm:$0xff]   ;;  %v1136_v58 = vld [vmem:[%s1469_s10 + $0xb4] ss:$8 sps:$4 sm:$0xff]  }
  0x58   : > { %v1138_v59 = vld [vmem:[%s1469_s10 + $0xb0] ss:$8 sps:$4 sm:$0xff]   ;;  %v1139_v60 = vld [vmem:[%s1469_s10 + $0xc4] ss:$8 sps:$4 sm:$0xff]   ;;  %v1141_v61 = vld [vmem:[%s1469_s10 + $0xc0] ss:$8 sps:$4 sm:$0xff]  }
  0x59   : > { %v1142_v62 = vld [vmem:[%s1469_s10 + $0xd4] ss:$8 sps:$4 sm:$0xff]   ;;  %v1144_v63 = vld [vmem:[%s1469_s10 + $0xd0] ss:$8 sps:$4 sm:$0xff]   ;;  %v1145_v0 = vld [vmem:[%s1469_s10 + $0xe4] ss:$8 sps:$4 sm:$0xff]  }
  0x5a   : > { %706 = vmatpush1.bf16.msra.mxu0 %v1111_v40  ;;  %v1147_v1 = vld [vmem:[%s1469_s10 + $0xe0] ss:$8 sps:$4 sm:$0xff]   ;;  %v1148_v2 = vld [vmem:[%s1469_s10 + $0xf4] ss:$8 sps:$4 sm:$0xff]   ;;  %v1150_v3 = vld [vmem:[%s1469_s10 + $0xf0] ss:$8 sps:$4 sm:$0xff]  }
  0x5b   : > { %707 = vmatprep.subr.bf16.mxu0 %v1112_v41  ;;  %v1151_v4 = vld [vmem:[%s428_s19] ss:$8 sps:$4 sm:$0xff]   ;;  %p1005_p5 = scmp.ne.s32.totalorder %s1224_s21, 8 }
  0x5c   : > { %v493_v5 = vld [vmem:[#allocation2] sm:$0xff]  ;;  %v494_v6 = vld [vmem:[#allocation2 + $0x8] sm:$0xff]  ;;  %v495_v8 = vld [vmem:[#allocation2 + $0x10] sm:$0xff]  ;;  %v762_v17 = vlaneseq (!%p1005_p5) }
  0x5d   : > { %v496_v11 = vld [vmem:[#allocation2 + $0x18] sm:$0xff]  ;;  %v760_v19 = vld [vmem:[%s476_s6] sm:$0x3] (!%p1005_p5) }
  0x5e   : > { %708 = vmatpush1.bf16.msra.mxu0 %v1114_v42  ;;  %v763_v18 = vshrl.u32 (!%p1005_p5), %v762_v17, 7  ;;  %v776_v20 = vld [vmem:[%s481_s17] sm:$0x3] (!%p1005_p5) }
  0x5f   : > { %709 = vmatprep.subr.bf16.mxu0 %v1115_v43 }
  0x60   : > { %v764_v22 = vsub.s32 (!%p1005_p5), 0, %v763_v18  ;;  %v768_v23 = vsub.s32 (!%p1005_p5), 1, %v763_v18 }
  0x62   : > { %710 = vmatpush1.bf16.msra.mxu0 %v1117_v44  ;;  %v765_v27 = vrot.slane (!%p1005_p5), %v760_v19, %v764_v22  ;;  %v781_v28 = vrot.slane (!%p1005_p5), %v776_v20, %v764_v22  ;;  %v769_v29 = vrot.slane (!%p1005_p5), %v760_v19, %v768_v23  ;;  %v785_v30 = vrot.slane (!%p1005_p5), %v776_v20, %v768_v23 }
  0x63   : > { %711 = vmatprep.subr.bf16.mxu0 %v1118_v45 }
  0x66   : > { %712 = vmatpush1.bf16.msra.mxu0 %v1120_v46 }
  0x67   : > { %713 = vmatprep.subr.bf16.mxu0 %v1121_v47 }
  0x6a   : > { %714 = vmatpush1.bf16.msra.mxu0 %v1123_v49 }
  0x6b   : > { %715 = vmatprep.subr.bf16.mxu0 %v1124_v50 }
  0x6e   : > { %716 = vmatpush1.bf16.msra.mxu0 %v1126_v51 }
  0x6f   : > { %717 = vmatprep.subr.bf16.mxu0 %v1127_v52 }
  0x72   : > { %718 = vmatpush1.bf16.msra.mxu0 %v1129_v53 }
  0x73   : > { %719 = vmatprep.subr.bf16.mxu0 %v1130_v54 }
  0x76   : > { %720 = vmatpush1.bf16.msra.mxu0 %v1132_v55 }
  0x77   : > { %721 = vmatprep.subr.bf16.mxu0 %v1133_v56 }
  0x7a   : > { %722 = vmatpush1.bf16.msra.mxu0 %v1135_v57 }
  0x7b   : > { %723 = vmatprep.subr.bf16.mxu0 %v1136_v58 }
  0x7e   : > { %724 = vmatpush1.bf16.msra.mxu0 %v1138_v59 }
  0x7f   : > { %725 = vmatprep.subr.bf16.mxu0 %v1139_v60 }
  0x82   : > { %726 = vmatpush1.bf16.msra.mxu0 %v1141_v61 }
  0x83   : > { %727 = vmatprep.subr.bf16.mxu0 %v1142_v62 }
  0x86   : > { %728 = vmatpush1.bf16.msra.mxu0 %v1144_v63 }
  0x87   : > { %729 = vmatprep.subr.bf16.mxu0 %v1145_v0 }
  0x8a   : > { %730 = vmatpush1.bf16.msra.mxu0 %v1147_v1 }
  0x8b   : > { %731 = vmatprep.subr.bf16.mxu0 %v1148_v2 }
  0x8e   : > { %732 = vmatpush1.bf16.msra.mxu0 %v1150_v3 }
  0x91   : > { %734 = vmatmul.mubr.bf16.vlgmr.msra.gmra.mrb[0].mxu0 %v1151_v4 }
 0x164   : > { %v735_v7 = vpop.f32.mrb[0].mxu0  ;;  %755 = sbr.rel (%p1005_p5) target bundleno = 377 (0x179), region = 120 }
 0x165   : > { %v744_v9 = vadd.f32 %v735_v7, %v493_v5  ;;  %v737_v10 = vpop.f32.mrb[1].mxu0 }
 0x166   : > { %v745_v12 = vadd.f32 %v737_v10, %v494_v6  ;;  %v739_v13 = vpop.f32.mrb[2].mxu0 }
 0x167   : > { %748 = vst [vmem:[#allocation2] sm:$0xff] %v744_v9  ;;  %v746_v14 = vadd.f32 %v739_v13, %v495_v8  ;;  %v741_v15 = vpop.f32.mrb[3].mxu0 }
 0x168   : > { %749 = vst [vmem:[#allocation2 + $0x8] sm:$0xff] %v745_v12  ;;  %v747_v16 = vadd.f32 %v741_v15, %v496_v11 }
 0x169   : > { %750 = vst [vmem:[#allocation2 + $0x10] sm:$0xff] %v746_v14 }
 0x16a   : > { %751 = vst [vmem:[#allocation2 + $0x18] sm:$0xff] %v747_v16 }
 0x16e   : > { %v756_v21 = vld [vmem:[#allocation2] sm:$0xff] }
 0x16f   : > { %v757_v24 = vld [vmem:[#allocation2 + $0x8] sm:$0xff]  ;;  %v772_v31 = vmul.f32 %v765_v27, %v756_v21 }
 0x170   : > { %v758_v25 = vld [vmem:[#allocation2 + $0x10] sm:$0xff]  ;;  %v773_v32 = vmul.f32 %v769_v29, %v757_v24 }
 0x171   : > { %v759_v26 = vld [vmem:[#allocation2 + $0x18] sm:$0xff]  ;;  %v774_v33 = vmul.f32 %v765_v27, %v758_v25  ;;  %v788_v35 = vadd.f32 %v781_v28, %v772_v31 }
 0x172   : > { %v775_v34 = vmul.f32 %v769_v29, %v759_v26  ;;  %v789_v36 = vadd.f32 %v785_v30, %v773_v32 }
 0x173   : > { %v790_v37 = vadd.f32 %v781_v28, %v774_v33  ;;  %v792_v39 = vmax.f32 %v788_v35, 0.0 }
 0x174   : > { %v791_v38 = vadd.f32 %v785_v30, %v775_v34  ;;  %v793_v40 = vmax.f32 %v789_v36, 0.0 }
 0x175   : > { %v794_v41 = vmax.f32 %v790_v37, 0.0  ;;  %796 = vst [vmem:[%s1471_s20] sm:$0xff] %v792_v39 }
 0x176   : > { %v795_v42 = vmax.f32 %v791_v38, 0.0  ;;  %797 = vst [vmem:[%s1471_s20 + $0x8] sm:$0xff] %v793_v40 }
 0x177   : > { %798 = vst [vmem:[%s1471_s20 + $0x10] sm:$0xff] %v794_v41 }
 0x178   : > { %799 = vst [vmem:[%s1471_s20 + $0x18] sm:$0xff] %v795_v42 }
 0x179 PF: > { %806 = sbr.rel (!%p1362_p12) target bundleno = 385 (0x181), region = 124  ;;  %s1013_s21 = sshll.u32 (%p1362_p12), %s1228_s22, 4 }
 0x17a   : > { %s812_s26 = scalar_lea.vmem (%p1362_p12), %s1572_s4, %s1013_s21 }
 0x17c   : > { %v825_v43 = vld [vmem:[%s1471_s20] sm:$0xff] (%p1362_p12) }
 0x17d   : > { %v827_v44 = vld [vmem:[%s1471_s20 + $0x8] sm:$0xff] (%p1362_p12)  ;;  %826 = vst [vmem:[%s812_s26] sm:$0xff] (%p1362_p12), %v825_v43 }
 0x17e   : > { %v829_v45 = vld [vmem:[%s1471_s20 + $0x10] sm:$0xff] (%p1362_p12)  ;;  %828 = vst [vmem:[%s812_s26 + $0x8] sm:$0xff] (%p1362_p12), %v827_v44 }
 0x17f   : > { %v831_v46 = vld [vmem:[%s1471_s20 + $0x18] sm:$0xff] (%p1362_p12)  ;;  %830 = vst [vmem:[%s812_s26 + $0x20] sm:$0xff] (%p1362_p12), %v829_v45 }
 0x180   : > { %832 = vst [vmem:[%s812_s26 + $0x28] sm:$0xff] %v831_v46 }
 0x181 PF: > { %s14_s25 = sadd.s32 1, %s1240_s25   ;;  %s1583_s19 = sld [smem:[#allocation6_spill]] }
 0x182   : > { %p11_p6 = scmp.ge.s32.totalorder %s14_s25, 20   ;;  %s1584_s20 = sld [smem:[#allocation9_spill]] }
 0x183   : > { %s1585_s14 = sld [smem:[#allocation7_spill]]  ;;  %s1586_s5 = sld [smem:[#allocation8_spill]] }
 0x184   : > { %s1587_s15 = smov %s1204_s16  ;;  %s1588_s16 = smov %s1360_s13 }
 0x185   : > { %s1589_s17 = smov %s1212_s18  ;;  %s1590_s18 = smov %s1357_s12 }
 0x186   : > { %s1591_s21 = smov %s1232_s23  ;;  %s1592_s22 = smov %s1236_s24 }
 0x187   :  { %13 = sbr.rel (!%p11_p6) target bundleno = 6 (0x6), region = 192 }
 0x189   : > { %s1593_s23 = smov %s1585_s14  ;;  %s1594_s24 = smov %s1586_s5 }

// kernel: resnet18_rnn_forward.84
= control target key start
LH: loop header
LB: loop body
LE: loop exit
PB: predicated region body
PF: predicated region fallthrough
CT: control target
= control target key end

     0   :  { %s1387_s18 = smov 0   ;;  %s1389_s19 = smov 0   ;;  %s1710_s0 = inlined_call_operand.vmem [shape: bf16[16,4608], index: 0, kind: input, shape index: {}]   ;;  %s1711_s1 = inlined_call_operand.vmem [shape: bf16[4608,512], index: 1, kind: input, shape index: {}]   ;;  %s1712_s2 = inlined_call_operand.vmem [shape: f32[1,512], index: 2, kind: input, shape index: {}]   ;;  %s1713_s3 = inlined_call_operand.vmem [shape: f32[1,512], index: 3, kind: input, shape index: {}]   ;;  %s1714_s4 = inlined_call_operand.vmem [shape: f32[16,512], index: 4, kind: input, shape index: {}]   ;;  %s1715_s5 = inlined_call_operand.vmem [shape: f32[16,512], index: 5, kind: output, shape index: {}]  }
   0x1   :  { %s1391_s20 = smov 0   ;;  %s1393_s21 = smov 0  }
   0x2   :  { %s1395_s22 = smov 0   ;;  %s1397_s23 = smov 0  }
   0x3   :  { %s1399_s24 = smov 0   ;;  %s1401_s25 = smov 0  }
   0x4   :  { %s1403_s26 = smov 0   ;;  %s1405_s27 = smov 0  }
   0x5   :  { %s1407_s28 = smov 0  }
   0x6 LB: > { %1719 = sst [smem:[#allocation7_spill]] %s1334_s23  ;;  %s1061_s29 = sadd.s32 4294967295, %s1354_s28   ;;  %s1354_s28 = sphi %s1407_s28, %s15_s28   ;;  %s1350_s27 = sphi %s1405_s27, %s1742_s27   ;;  %s1346_s26 = sphi %s1403_s26, %s1741_s26   ;;  %s1342_s25 = sphi %s1401_s25, %s1740_s25   ;;  %s1338_s24 = sphi %s1399_s24, %s1739_s24   ;;  %s1334_s23 = sphi %s1397_s23, %s1732_s23   ;;  %s1330_s22 = sphi %s1395_s22, %s1731_s22   ;;  %s1326_s21 = sphi %s1393_s21, %s1738_s21   ;;  %s1322_s20 = sphi %s1391_s20, %s1737_s20   ;;  %s1318_s19 = sphi %s1389_s19, %s1736_s19   ;;  %s1314_s18 = sphi %s1387_s18, %s1735_s18  }
   0x7   : > { %s27_s30 = sadd.s32 1, %s1346_s26  ;;  %s30_s6 = sadd.s32 1, %s1350_s27 }
   0x8   : > { %p28_p0 = scmp.ge.s32.totalorder %s27_s30, 18  ;;  %s43_s7 = sadd.s32 1, %s1334_s23 }
   0x9   : > { %p50_p1 = scmp.ne.s32.totalorder %s1334_s23, %s1330_s22  ;;  %p51_p2 = scmp.eq.s32.totalorder %s1354_s28, 0 }
   0xa   : > { %s1744_s30 = smov (%p28_p0, %s27_s30), 0  ;;  %s1746_s6 = smov (!%p28_p0, %s30_s6), %s1350_s27 }
   0xb   : > { %1720 = sst [smem:[#allocation8_spill]] %s1744_s30  ;;  %s39_s8 = ssub.s32 %s1346_s26, %s1744_s30 }
   0xc   : > { %p32_p3 = scmp.ge.s32.totalorder %s1746_s6, 2  ;;  %p41_p4 = scmp.eq.s32.totalorder %s39_s8, 0 }
   0xd   : > { %p1456_p5 = por %p51_p2, %p50_p1  ;;  %s71_s10 = sadd.s32 1, %s1326_s21 }
   0xe   : > { %s1748_s6 = smov (%p32_p3, %s1746_s6), 0  ;;  %p78_p6 = scmp.ne.s32.totalorder %s1326_s21, %s1322_s20 }
   0xf   : > { %1722 = sst [smem:[#allocation9_spill]] %s1748_s6  ;;  %s67_s12 = ssub.s32 %s1350_s27, %s1748_s6 }
  0x10   : > { %s1464_s11 = scalar_select %p41_p4, %s1334_s23, %s43_s7  }
  0x11   : > { %s68_s13 = sor.u32 %s67_s12, %s39_s8  ;;  %p149_p7 = scmp.eq.s32.totalorder %s67_s12, 0 }
  0x12   : > { %1723 = sst [smem:[#allocation10_spill]] %s1464_s11  ;;  %p69_p8 = scmp.eq.s32.totalorder %s68_s13, 0 }
  0x13   : > { %p1472_p9 = por %p78_p6, %p51_p2  ;;  %s151_s15 = sadd.s32 1, %s1318_s19 }
  0x14   : > { %p158_p10 = scmp.ne.s32.totalorder %s1318_s19, %s1314_s18  ;;  %p190_p12 = scmp.eq.s32.totalorder %s1061_s29, 35 }
  0x15   : > { %s1480_s16 = scalar_select %p69_p8, %s1326_s21, %s71_s10  }
  0x16   : > { %s1483_s17 = scalar_select %p149_p7, %s1318_s19, %s151_s15  }
  0x17   : > { %1725 = sst [smem:[#allocation11_spill]] %s1480_s16  ;;  %p1487_p11 = por %p158_p10, %p51_p2 }
  0x18   : > { %1726 = sst [smem:[#allocation12_spill]] %s1483_s17  ;;  %p1491_p13 = por %p190_p12, %p158_p10 }
  0x19   : > { %p1064_p0 = scmp.ge.s32.totalorder %s1354_s28, 36 }
  0x1b   : > { %212 = sbr.rel (%p1064_p0) target bundleno = 71 (0x47), region = 16 }
  0x22   : > { %215 = sbr.rel (!%p1456_p5) target bundleno = 41 (0x29), region = 20  ;;  %s217_s10 = sand.u32 (%p1456_p5), 1, %s1334_s23  }
  0x23   : > { %s1124_s12 = sshll.u32 (%p1456_p5), %s1346_s26, 3  ;;  %s1065_s13 = sshll.u32 (%p1456_p5), %s217_s10, 4 }
  0x24   : > { %s225_s30 = scalar_lea.vmem (%p1456_p5), %s1710_s0, %s1124_s12  ;;  %s219_s29 = scalar_lea.vmem (%p1456_p5), [#allocation3], %s1065_s13 }
  0x25   : > { %v255_v0 = vld [vmem:[%s225_s30] sm:$0xff] (%p1456_p5)  ;;  %v257_v1 = vld [vmem:[%s225_s30 + $0x90] sm:$0xff] (%p1456_p5) }
  0x26   : > { %256 = vst [vmem:[%s219_s29] sm:$0xff] (%p1456_p5), %v255_v0  ;;  %258 = vst [vmem:[%s219_s29 + $0x8] sm:$0xff] (%p1456_p5), %v257_v1 }
  0x29 PF: > { %264 = sbr.rel (!%p1472_p9) target bundleno = 64 (0x40), region = 58  ;;  %s266_s9 = sand.u32 (%p1472_p9), 1, %s1326_s21  }
  0x2a   : > { %s1070_s11 = sshll.u32 (%p1472_p9), %s1350_s27, 1  ;;  %s1068_s23 = sshll.u32 (%p1472_p9), %s266_s9, 8 }
  0x2b   : > { %s1125_s10 = sshll.u32 (%p1472_p9), %s1346_s26, 7  ;;  %s1516_s14 = scalar_lea.vmem (%p1472_p9), [#allocation4], %s1068_s23 }
  0x2c   : > { %s272_s16 = sadd.s32 (%p1472_p9), %s1125_s10, %s1070_s11 }
  0x2d   : > { %s1072_s17 = sshll.u32 (%p1472_p9), %s272_s16, 2 }
  0x2e   : > { %s1511_s30 = scalar_lea.vmem (%p1472_p9), %s1711_s1, %s1072_s17 }
  0x2f   : > { %v364_v2 = vld [vmem:[%s1511_s30] sm:$0xff] (%p1472_p9)  ;;  %v366_v3 = vld [vmem:[%s1511_s30 + $0x10] sm:$0xff] (%p1472_p9) }
  0x30   : > { %v368_v4 = vld [vmem:[%s1511_s30 + $0x20] sm:$0xff]  ;;  %365 = vst [vmem:[%s1516_s14] sm:$0xff] %v364_v2  ;;  %367 = vst [vmem:[%s1516_s14 + $0x8] sm:$0xff] %v366_v3  ;;  %v370_v5 = vld [vmem:[%s1511_s30 + $0x30] sm:$0xff] }
  0x31   : > { %369 = vst [vmem:[%s1516_s14 + $0x10] sm:$0xff] %v368_v4  ;;  %v372_v6 = vld [vmem:[%s1511_s30 + $0x40] sm:$0xff]  ;;  %v374_v7 = vld [vmem:[%s1511_s30 + $0x50] sm:$0xff]  ;;  %371 = vst [vmem:[%s1516_s14 + $0x18] sm:$0xff] %v370_v5 }
  0x32   : > { %373 = vst [vmem:[%s1516_s14 + $0x20] sm:$0xff] %v372_v6  ;;  %375 = vst [vmem:[%s1516_s14 + $0x28] sm:$0xff] %v374_v7  ;;  %v376_v8 = vld [vmem:[%s1511_s30 + $0x60] sm:$0xff]  ;;  %v378_v9 = vld [vmem:[%s1511_s30 + $0x70] sm:$0xff] }
  0x33   : > { %v380_v10 = vld [vmem:[%s1511_s30 + $0x80] sm:$0xff]  ;;  %377 = vst [vmem:[%s1516_s14 + $0x30] sm:$0xff] %v376_v8  ;;  %379 = vst [vmem:[%s1516_s14 + $0x38] sm:$0xff] %v378_v9  ;;  %v382_v11 = vld [vmem:[%s1511_s30 + $0x90] sm:$0xff] }
  0x34   : > { %381 = vst [vmem:[%s1516_s14 + $0x40] sm:$0xff] %v380_v10  ;;  %v384_v12 = vld [vmem:[%s1511_s30 + $0xa0] sm:$0xff]  ;;  %v386_v13 = vld [vmem:[%s1511_s30 + $0xb0] sm:$0xff]  ;;  %383 = vst [vmem:[%s1516_s14 + $0x48] sm:$0xff] %v382_v11 }
  0x35   : > { %385 = vst [vmem:[%s1516_s14 + $0x50] sm:$0xff] %v384_v12  ;;  %387 = vst [vmem:[%s1516_s14 + $0x58] sm:$0xff] %v386_v13  ;;  %v388_v14 = vld [vmem:[%s1511_s30 + $0xc0] sm:$0xff]  ;;  %v390_v15 = vld [vmem:[%s1511_s30 + $0xd0] sm:$0xff] }
  0x36   : > { %v392_v16 = vld [vmem:[%s1511_s30 + $0xe0] sm:$0xff]  ;;  %389 = vst [vmem:[%s1516_s14 + $0x60] sm:$0xff] %v388_v14  ;;  %391 = vst [vmem:[%s1516_s14 + $0x68] sm:$0xff] %v390_v15  ;;  %v394_v17 = vld [vmem:[%s1511_s30 + $0xf0] sm:$0xff] }
  0x37   : > { %393 = vst [vmem:[%s1516_s14 + $0x70] sm:$0xff] %v392_v16  ;;  %v396_v18 = vld [vmem:[%s1511_s30 + $0x100] sm:$0xff]  ;;  %v398_v19 = vld [vmem:[%s1511_s30 + $0x110] sm:$0xff]  ;;  %395 = vst [vmem:[%s1516_s14 + $0x78] sm:$0xff] %v394_v17 }
  0x38   : > { %397 = vst [vmem:[%s1516_s14 + $0x80] sm:$0xff] %v396_v18  ;;  %399 = vst [vmem:[%s1516_s14 + $0x88] sm:$0xff] %v398_v19  ;;  %v400_v20 = vld [vmem:[%s1511_s30 + $0x120] sm:$0xff]  ;;  %v402_v21 = vld [vmem:[%s1511_s30 + $0x130] sm:$0xff] }
  0x39   : > { %v404_v22 = vld [vmem:[%s1511_s30 + $0x140] sm:$0xff]  ;;  %401 = vst [vmem:[%s1516_s14 + $0x90] sm:$0xff] %v400_v20  ;;  %403 = vst [vmem:[%s1516_s14 + $0x98] sm:$0xff] %v402_v21  ;;  %v406_v23 = vld [vmem:[%s1511_s30 + $0x150] sm:$0xff] }
  0x3a   : > { %405 = vst [vmem:[%s1516_s14 + $0xa0] sm:$0xff] %v404_v22  ;;  %v408_v24 = vld [vmem:[%s1511_s30 + $0x160] sm:$0xff]  ;;  %v410_v25 = vld [vmem:[%s1511_s30 + $0x170] sm:$0xff]  ;;  %407 = vst [vmem:[%s1516_s14 + $0xa8] sm:$0xff] %v406_v23 }
  0x3b   : > { %409 = vst [vmem:[%s1516_s14 + $0xb0] sm:$0xff] %v408_v24  ;;  %411 = vst [vmem:[%s1516_s14 + $0xb8] sm:$0xff] %v410_v25  ;;  %v412_v26 = vld [vmem:[%s1511_s30 + $0x180] sm:$0xff]  ;;  %v414_v27 = vld [vmem:[%s1511_s30 + $0x190] sm:$0xff] }
  0x3c   : > { %v416_v28 = vld [vmem:[%s1511_s30 + $0x1a0] sm:$0xff]  ;;  %413 = vst [vmem:[%s1516_s14 + $0xc0] sm:$0xff] %v412_v26  ;;  %415 = vst [vmem:[%s1516_s14 + $0xc8] sm:$0xff] %v414_v27  ;;  %v418_v29 = vld [vmem:[%s1511_s30 + $0x1b0] sm:$0xff] }
  0x3d   : > { %417 = vst [vmem:[%s1516_s14 + $0xd0] sm:$0xff] %v416_v28  ;;  %v420_v30 = vld [vmem:[%s1511_s30 + $0x1c0] sm:$0xff]  ;;  %v422_v31 = vld [vmem:[%s1511_s30 + $0x1d0] sm:$0xff]  ;;  %419 = vst [vmem:[%s1516_s14 + $0xd8] sm:$0xff] %v418_v29 }
  0x3e   : > { %421 = vst [vmem:[%s1516_s14 + $0xe0] sm:$0xff] %v420_v30  ;;  %423 = vst [vmem:[%s1516_s14 + $0xe8] sm:$0xff] %v422_v31  ;;  %v424_v32 = vld [vmem:[%s1511_s30 + $0x1e0] sm:$0xff]  ;;  %v426_v33 = vld [vmem:[%s1511_s30 + $0x1f0] sm:$0xff] }
  0x3f   : > { %425 = vst [vmem:[%s1516_s14 + $0xf0] sm:$0xff] %v424_v32  ;;  %427 = vst [vmem:[%s1516_s14 + $0xf8] sm:$0xff] %v426_v33 }
  0x40 PF: > { %449 = sbr.rel (!%p1487_p11) target bundleno = 71 (0x47), region = 104  ;;  %s451_s23 = sand.u32 (%p1487_p11), 1, %s1318_s19  }
  0x41   : > { %s1126_s11 = sshll.u32 (%p1487_p11), %s1350_s27, 4  ;;  %s1073_s16 = sshll.u32 (%p1487_p11), %s451_s23, 5 }
  0x42   : > { %s459_s15 = scalar_lea.vmem (%p1487_p11), %s1714_s4, %s1126_s11  ;;  %s453_s29 = scalar_lea.vmem (%p1487_p11), [#allocation5], %s1073_s16 }
  0x43   : > { %v472_v34 = vld [vmem:[%s459_s15] sm:$0xff] (%p1487_p11)  ;;  %v474_v35 = vld [vmem:[%s459_s15 + $0x8] sm:$0xff] (%p1487_p11) }
  0x44   : > { %v476_v36 = vld [vmem:[%s459_s15 + $0x20] sm:$0xff] (%p1487_p11)  ;;  %473 = vst [vmem:[%s453_s29] sm:$0xff] (%p1487_p11), %v472_v34  ;;  %475 = vst [vmem:[%s453_s29 + $0x8] sm:$0xff] (%p1487_p11), %v474_v35  ;;  %v478_v37 = vld [vmem:[%s459_s15 + $0x28] sm:$0xff] (%p1487_p11) }
  0x45   : > { %477 = vst [vmem:[%s453_s29 + $0x10] sm:$0xff] (%p1487_p11), %v476_v36  ;;  %479 = vst [vmem:[%s453_s29 + $0x18] sm:$0xff] (%p1487_p11), %v478_v37 }
  0x47 PF: > { %p1076_p1 = scmp.ge.s32.totalorder %s1354_s28, 1  ;;  %p484_p2 = scmp.lt.s32.totalorder %s1354_s28, 37 }
  0x49   : > { %p485_p3 = pnand %p1076_p1, %p484_p2 }
  0x4a   : > { %s491_s7 = sand.u32 (!%p485_p3), 1, %s1330_s22   ;;  %s498_s9 = sand.u32 (!%p485_p3), 1, %s1322_s20  }
  0x4b   : > { %488 = sbr.rel (%p485_p3) target bundleno = 396 (0x18c), region = 127  ;;  %s1590_s10 = sshll.u32 (!%p485_p3), %s491_s7, 4 }
  0x4c   : > { %s1078_s6 = sshll.u32 (!%p485_p3), %s498_s9, 8  ;;  %s505_s12 = sand.u32 (!%p485_p3), 1, %s1314_s18  }
  0x4d   : > { %s1081_s30 = sshll.u32 (!%p485_p3), %s1342_s25, 1  ;;  %s1079_s14 = sshll.u32 (!%p485_p3), %s505_s12, 5 }
  0x4e   : > { %p552_p4 = scmp.lt.s32.totalorder (!%p485_p3), %s1081_s30, 3  ;;  %s493_s22 = scalar_lea.vmem (!%p485_p3), [#allocation3], %s1590_s10 }
  0x4f   : > { %s1605_s15 = scalar_lea.vmem (!%p485_p3), [#allocation4], %s1078_s6  ;;  %s1607_s29 = scalar_lea.vmem (!%p485_p3), [#allocation5], %s1079_s14 }
  0x50   : > { %s1609_s18 = scalar_lea.vmem (!%p485_p3), [#allocation6], %s1079_s14  ;;  %p1083_p5 = scmp.ne.s32.totalorder (!%p485_p3), %s1338_s24, 0 }
  0x52   : > { %s1750_s30 = smov (!%p552_p4, %s1081_s30), 3  ;;  %568 = sbr.rel (%p1083_p5) target bundleno = 89 (0x59), region = 143 }
  0x53   : > { %s554_s16 = scalar_lea.vmem %s1712_s2, %s1750_s30  ;;  %s559_s20 = scalar_lea.vmem %s1713_s3, %s1750_s30  ;;  %v1356_v38 = vmov (!%p1083_p5), 0.0  }
  0x54   : > { %569 = vst [vmem:[#allocation2] sm:$0xff] (!%p1083_p5), %v1356_v38  ;;  %570 = vst [vmem:[#allocation2 + $0x8] sm:$0xff] (!%p1083_p5), %v1356_v38 }
  0x55   : > { %571 = vst [vmem:[#allocation2 + $0x10] sm:$0xff] (!%p1083_p5), %v1356_v38  ;;  %572 = vst [vmem:[#allocation2 + $0x18] sm:$0xff] (!%p1083_p5), %v1356_v38 }
  0x59 PF: > { %v1217_v39 = vld [vmem:[%s1605_s15 + $0x4] ss:$8 sps:$4 sm:$0xff]   ;;  %v1219_v40 = vld [vmem:[%s1605_s15] ss:$8 sps:$4 sm:$0xff]   ;;  %v1220_v41 = vld [vmem:[%s1605_s15 + $0x14] ss:$8 sps:$4 sm:$0xff]  }
  0x5a   : > { %781 = vmatprep.subr.bf16.mxu0 %v1217_v39  ;;  %v1222_v42 = vld [vmem:[%s1605_s15 + $0x10] ss:$8 sps:$4 sm:$0xff]   ;;  %v1223_v43 = vld [vmem:[%s1605_s15 + $0x24] ss:$8 sps:$4 sm:$0xff]   ;;  %v1225_v44 = vld [vmem:[%s1605_s15 + $0x20] ss:$8 sps:$4 sm:$0xff]  }
  0x5b   : > { %782 = vmatpush1.bf16.msra.mxu0 %v1219_v40  ;;  %v1226_v45 = vld [vmem:[%s1605_s15 + $0x34] ss:$8 sps:$4 sm:$0xff]   ;;  %v1228_v46 = vld [vmem:[%s1605_s15 + $0x30] ss:$8 sps:$4 sm:$0xff]   ;;  %v1229_v47 = vld [vmem:[%s1605_s15 + $0x44] ss:$8 sps:$4 sm:$0xff]  }
  0x5c   : > { %783 = vmatprep.subr.bf16.mxu0 %v1220_v41  ;;  %v1231_v48 = vld [vmem:[%s1605_s15 + $0x40] ss:$8 sps:$4 sm:$0xff]   ;;  %v1232_v49 = vld [vmem:[%s1605_s15 + $0x54] ss:$8 sps:$4 sm:$0xff]   ;;  %v1234_v50 = vld [vmem:[%s1605_s15 + $0x50] ss:$8 sps:$4 sm:$0xff]  }
  0x5d   : > { %v1235_v51 = vld [vmem:[%s1605_s15 + $0x64] ss:$8 sps:$4 sm:$0xff]   ;;  %v1237_v53 = vld [vmem:[%s1605_s15 + $0x60] ss:$8 sps:$4 sm:$0xff]   ;;  %v1238_v54 = vld [vmem:[%s1605_s15 + $0x74] ss:$8 sps:$4 sm:$0xff]  }
  0x5e   : > { %v1267_v52 = vld [vmem:[%s493_s22 + $0x4] ss:$8 sps:$4 sm:$0xff]   ;;  %v1240_v55 = vld [vmem:[%s1605_s15 + $0x70] ss:$8 sps:$4 sm:$0xff]   ;;  %v1243_v57 = vld [vmem:[%s1605_s15 + $0x80] ss:$8 sps:$4 sm:$0xff]  }
  0x5f   : > { %784 = vmatpush1.bf16.msra.mxu0 %v1222_v42  ;;  %813 = vmatprep.mubr.bf16.mxu0 %v1267_v52  ;;  %v1241_v56 = vld [vmem:[%s1605_s15 + $0x84] ss:$8 sps:$4 sm:$0xff]   ;;  %v1244_v58 = vld [vmem:[%s1605_s15 + $0x94] ss:$8 sps:$4 sm:$0xff]   ;;  %v1246_v59 = vld [vmem:[%s1605_s15 + $0x90] ss:$8 sps:$4 sm:$0xff]  }
  0x60   : > { %785 = vmatprep.subr.bf16.mxu0 %v1223_v43  ;;  %v1247_v60 = vld [vmem:[%s1605_s15 + $0xa4] ss:$8 sps:$4 sm:$0xff]   ;;  %v1249_v61 = vld [vmem:[%s1605_s15 + $0xa0] ss:$8 sps:$4 sm:$0xff]   ;;  %v1250_v62 = vld [vmem:[%s1605_s15 + $0xb4] ss:$8 sps:$4 sm:$0xff]  }
  0x61   : > { %v1252_v63 = vld [vmem:[%s1605_s15 + $0xb0] ss:$8 sps:$4 sm:$0xff]   ;;  %v1253_v0 = vld [vmem:[%s1605_s15 + $0xc4] ss:$8 sps:$4 sm:$0xff]   ;;  %v1255_v1 = vld [vmem:[%s1605_s15 + $0xc0] ss:$8 sps:$4 sm:$0xff]  }
  0x62   : > { %v1256_v2 = vld [vmem:[%s1605_s15 + $0xd4] ss:$8 sps:$4 sm:$0xff]   ;;  %v1258_v3 = vld [vmem:[%s1605_s15 + $0xd0] ss:$8 sps:$4 sm:$0xff]   ;;  %v1259_v4 = vld [vmem:[%s1605_s15 + $0xe4] ss:$8 sps:$4 sm:$0xff]  }
  0x63   : > { %786 = vmatpush1.bf16.msra.mxu0 %v1225_v44  ;;  %v1261_v5 = vld [vmem:[%s1605_s15 + $0xe0] ss:$8 sps:$4 sm:$0xff]   ;;  %v1262_v6 = vld [vmem:[%s1605_s15 + $0xf4] ss:$8 sps:$4 sm:$0xff]   ;;  %v1264_v7 = vld [vmem:[%s1605_s15 + $0xf0] ss:$8 sps:$4 sm:$0xff]  }
  0x64   : > { %787 = vmatprep.subr.bf16.mxu0 %v1226_v45  ;;  %v1265_v8 = vld [vmem:[%s493_s22] ss:$8 sps:$4 sm:$0xff]   ;;  %p1118_p6 = scmp.ne.s32.totalorder %s1338_s24, 17 }
  0x65   : > { %v573_v9 = vld [vmem:[#allocation2] sm:$0xff]  ;;  %v574_v10 = vld [vmem:[#allocation2 + $0x8] sm:$0xff]  ;;  %v575_v12 = vld [vmem:[#allocation2 + $0x10] sm:$0xff]  ;;  %v842_v21 = vlaneseq (!%p1118_p6) }
  0x66   : > { %v576_v15 = vld [vmem:[#allocation2 + $0x18] sm:$0xff]  ;;  %v840_v23 = vld [vmem:[%s554_s16] sm:$0x3] (!%p1118_p6)  ;;  %v873_v40 = vld [vmem:[%s1607_s29 + $0x8] sm:$0xff] (!%p1118_p6) }
  0x67   : > { %788 = vmatpush1.bf16.msra.mxu0 %v1228_v46  ;;  %v843_v22 = vshrl.u32 (!%p1118_p6), %v842_v21, 7  ;;  %v856_v24 = vld [vmem:[%s559_s20] sm:$0x3] (!%p1118_p6)  ;;  %v874_v41 = vld [vmem:[%s1607_s29 + $0x10] sm:$0xff] (!%p1118_p6)  ;;  %v875_v42 = vld [vmem:[%s1607_s29 + $0x18] sm:$0xff] (!%p1118_p6) }
  0x68   : > { %789 = vmatprep.subr.bf16.mxu0 %v1229_v47  ;;  %v872_v36 = vld [vmem:[%s1607_s29] sm:$0xff] (!%p1118_p6) }
  0x69   : > { %v844_v26 = vsub.s32 (!%p1118_p6), 0, %v843_v22  ;;  %v848_v27 = vsub.s32 (!%p1118_p6), 1, %v843_v22 }
  0x6b   : > { %790 = vmatpush1.bf16.msra.mxu0 %v1231_v48  ;;  %v845_v31 = vrot.slane (!%p1118_p6), %v840_v23, %v844_v26  ;;  %v861_v32 = vrot.slane (!%p1118_p6), %v856_v24, %v844_v26  ;;  %v849_v33 = vrot.slane (!%p1118_p6), %v840_v23, %v848_v27  ;;  %v865_v34 = vrot.slane (!%p1118_p6), %v856_v24, %v848_v27 }
  0x6c   : > { %791 = vmatprep.subr.bf16.mxu0 %v1232_v49 }
  0x6f   : > { %792 = vmatpush1.bf16.msra.mxu0 %v1234_v50 }
  0x70   : > { %793 = vmatprep.subr.bf16.mxu0 %v1235_v51 }
  0x73   : > { %794 = vmatpush1.bf16.msra.mxu0 %v1237_v53 }
  0x74   : > { %795 = vmatprep.subr.bf16.mxu0 %v1238_v54 }
  0x77   : > { %796 = vmatpush1.bf16.msra.mxu0 %v1240_v55 }
  0x78   : > { %797 = vmatprep.subr.bf16.mxu0 %v1241_v56 }
  0x7b   : > { %798 = vmatpush1.bf16.msra.mxu0 %v1243_v57 }
  0x7c   : > { %799 = vmatprep.subr.bf16.mxu0 %v1244_v58 }
  0x7f   : > { %800 = vmatpush1.bf16.msra.mxu0 %v1246_v59 }
  0x80   : > { %801 = vmatprep.subr.bf16.mxu0 %v1247_v60 }
  0x83   : > { %802 = vmatpush1.bf16.msra.mxu0 %v1249_v61 }
  0x84   : > { %803 = vmatprep.subr.bf16.mxu0 %v1250_v62 }
  0x87   : > { %804 = vmatpush1.bf16.msra.mxu0 %v1252_v63 }
  0x88   : > { %805 = vmatprep.subr.bf16.mxu0 %v1253_v0 }
  0x8b   : > { %806 = vmatpush1.bf16.msra.mxu0 %v1255_v1 }
  0x8c   : > { %807 = vmatprep.subr.bf16.mxu0 %v1256_v2 }
  0x8f   : > { %808 = vmatpush1.bf16.msra.mxu0 %v1258_v3 }
  0x90   : > { %809 = vmatprep.subr.bf16.mxu0 %v1259_v4 }
  0x93   : > { %810 = vmatpush1.bf16.msra.mxu0 %v1261_v5 }
  0x94   : > { %811 = vmatprep.subr.bf16.mxu0 %v1262_v6 }
  0x97   : > { %812 = vmatpush1.bf16.msra.mxu0 %v1264_v7 }
  0x9a   : > { %814 = vmatmul.mubr.bf16.vlgmr.msra.gmra.mrb[0].mxu0 %v1265_v8 }
 0x16d   : > { %v815_v11 = vpop.f32.mrb[0].mxu0  ;;  %835 = sbr.rel (%p1118_p6) target bundleno = 388 (0x184), region = 147 }
 0x16e   : > { %v824_v13 = vadd.f32 %v815_v11, %v573_v9  ;;  %v817_v14 = vpop.f32.mrb[1].mxu0 }
 0x16f   : > { %v825_v16 = vadd.f32 %v817_v14, %v574_v10  ;;  %v819_v17 = vpop.f32.mrb[2].mxu0 }
 0x170   : > { %828 = vst [vmem:[#allocation2] sm:$0xff] %v824_v13  ;;  %v826_v18 = vadd.f32 %v819_v17, %v575_v12  ;;  %v821_v19 = vpop.f32.mrb[3].mxu0 }
 0x171   : > { %829 = vst [vmem:[#allocation2 + $0x8] sm:$0xff] %v825_v16  ;;  %v827_v20 = vadd.f32 %v821_v19, %v576_v15 }
 0x172   : > { %830 = vst [vmem:[#allocation2 + $0x10] sm:$0xff] %v826_v18 }
 0x173   : > { %831 = vst [vmem:[#allocation2 + $0x18] sm:$0xff] %v827_v20 }
 0x177   : > { %v836_v25 = vld [vmem:[#allocation2] sm:$0xff] }
 0x178   : > { %v837_v28 = vld [vmem:[#allocation2 + $0x8] sm:$0xff]  ;;  %v852_v35 = vmul.f32 %v845_v31, %v836_v25 }
 0x179   : > { %v838_v29 = vld [vmem:[#allocation2 + $0x10] sm:$0xff]  ;;  %v853_v37 = vmul.f32 %v849_v33, %v837_v28 }
 0x17a   : > { %v839_v30 = vld [vmem:[#allocation2 + $0x18] sm:$0xff]  ;;  %v854_v38 = vmul.f32 %v845_v31, %v838_v29  ;;  %v868_v43 = vadd.f32 %v861_v32, %v852_v35 }
 0x17b   : > { %v855_v39 = vmul.f32 %v849_v33, %v839_v30  ;;  %v869_v44 = vadd.f32 %v865_v34, %v853_v37 }
 0x17c   : > { %v870_v45 = vadd.f32 %v861_v32, %v854_v38  ;;  %v876_v47 = vadd.f32 %v872_v36, %v868_v43 }
 0x17d   : > { %v871_v46 = vadd.f32 %v865_v34, %v855_v39  ;;  %v877_v48 = vadd.f32 %v873_v40, %v869_v44 }
 0x17e   : > { %v878_v49 = vadd.f32 %v874_v41, %v870_v45  ;;  %v880_v51 = vmax.f32 %v876_v47, 0.0 }
 0x17f   : > { %v879_v50 = vadd.f32 %v875_v42, %v871_v46  ;;  %v881_v52 = vmax.f32 %v877_v48, 0.0 }
 0x180   : > { %v882_v53 = vmax.f32 %v878_v49, 0.0  ;;  %884 = vst [vmem:[%s1609_s18] sm:$0xff] %v880_v51 }
 0x181   : > { %v883_v54 = vmax.f32 %v879_v50, 0.0  ;;  %885 = vst [vmem:[%s1609_s18 + $0x8] sm:$0xff] %v881_v52 }
 0x182   : > { %886 = vst [vmem:[%s1609_s18 + $0x10] sm:$0xff] %v882_v53 }
 0x183   : > { %887 = vst [vmem:[%s1609_s18 + $0x18] sm:$0xff] %v883_v54 }
 0x184 PF: > { %894 = sbr.rel (!%p1491_p13) target bundleno = 396 (0x18c), region = 151  ;;  %s1127_s24 = sshll.u32 (%p1491_p13), %s1342_s25, 4 }
 0x185   : > { %s900_s14 = scalar_lea.vmem (%p1491_p13), %s1715_s5, %s1127_s24 }
 0x187   : > { %v913_v55 = vld [vmem:[%s1609_s18] sm:$0xff] (%p1491_p13) }
 0x188   : > { %v915_v56 = vld [vmem:[%s1609_s18 + $0x8] sm:$0xff] (%p1491_p13)  ;;  %914 = vst [vmem:[%s900_s14] sm:$0xff] (%p1491_p13), %v913_v55 }
 0x189   : > { %v917_v57 = vld [vmem:[%s1609_s18 + $0x10] sm:$0xff] (%p1491_p13)  ;;  %916 = vst [vmem:[%s900_s14 + $0x8] sm:$0xff] (%p1491_p13), %v915_v56 }
 0x18a   : > { %v919_v58 = vld [vmem:[%s1609_s18 + $0x18] sm:$0xff] (%p1491_p13)  ;;  %918 = vst [vmem:[%s900_s14 + $0x20] sm:$0xff] (%p1491_p13), %v917_v57 }
 0x18b   : > { %920 = vst [vmem:[%s900_s14 + $0x28] sm:$0xff] %v919_v58 }
 0x18c PF: > { %s15_s28 = sadd.s32 1, %s1354_s28   ;;  %s1729_s8 = sld [smem:[#allocation12_spill]] }
 0x18d   : > { %p12_p7 = scmp.ge.s32.totalorder %s15_s28, 38   ;;  %s1730_s25 = sld [smem:[#allocation11_spill]] }
 0x18e   : > { %s1731_s22 = sld [smem:[#allocation7_spill]]  ;;  %s1732_s23 = sld [smem:[#allocation10_spill]] }
 0x18f   : > { %s1733_s11 = sld [smem:[#allocation8_spill]]  ;;  %s1734_s16 = sld [smem:[#allocation9_spill]] }
 0x190   : > { %s1735_s18 = smov %s1318_s19  ;;  %s1737_s20 = smov %s1326_s21 }
 0x191   : > { %s1739_s24 = smov %s1346_s26  ;;  %14 = sbr.rel (!%p12_p7) target bundleno = 6 (0x6), region = 227 }
 0x192   : > { %s1736_s19 = smov %s1729_s8 }
 0x193   : > { %s1738_s21 = smov %s1730_s25  ;;  %s1740_s25 = smov %s1350_s27 }
 0x195   : > { %s1741_s26 = smov %s1733_s11  ;;  %s1742_s27 = smov %s1734_s16 }

// kernel: resnet18_rnn_forward.85
= control target key start
LH: loop header
LB: loop body
LE: loop exit
PB: predicated region body
PF: predicated region fallthrough
CT: control target
= control target key end

     0   :  { %s1268_s15 = smov 0   ;;  %s1270_s16 = smov 0   ;;  %s1568_s0 = inlined_call_operand.vmem [shape: bf16[16,4608], index: 0, kind: input, shape index: {}]   ;;  %s1569_s1 = inlined_call_operand.vmem [shape: bf16[4608,512], index: 1, kind: input, shape index: {}]   ;;  %s1570_s2 = inlined_call_operand.vmem [shape: f32[1,512], index: 2, kind: input, shape index: {}]   ;;  %s1571_s3 = inlined_call_operand.vmem [shape: f32[1,512], index: 3, kind: input, shape index: {}]   ;;  %s1572_s4 = inlined_call_operand.vmem [shape: f32[16,512], index: 4, kind: output, shape index: {}]  }
   0x1   :  { %s1272_s17 = smov 0   ;;  %s1274_s18 = smov 0  }
   0x2   :  { %s1276_s19 = smov 0   ;;  %s1278_s20 = smov 0  }
   0x3   :  { %s1280_s21 = smov 0   ;;  %s1282_s22 = smov 0  }
   0x4   :  { %s1284_s23 = smov 0   ;;  %s1286_s24 = smov 0  }
   0x5   :  { %s1288_s25 = smov 0  }
   0x6 LB: > { %1576 = sst [smem:[#allocation6_spill]] %s1220_s20  ;;  %s952_s26 = sadd.s32 4294967295, %s1240_s25   ;;  %s1240_s25 = sphi %s1288_s25, %s14_s25   ;;  %s1236_s24 = sphi %s1286_s24, %s1594_s24   ;;  %s1232_s23 = sphi %s1284_s23, %s1593_s23   ;;  %s1228_s22 = sphi %s1282_s22, %s1592_s22   ;;  %s1224_s21 = sphi %s1280_s21, %s1591_s21   ;;  %s1220_s20 = sphi %s1278_s20, %s1584_s20   ;;  %s1216_s19 = sphi %s1276_s19, %s1583_s19   ;;  %s1212_s18 = sphi %s1274_s18, %s1590_s18   ;;  %s1208_s17 = sphi %s1272_s17, %s1589_s17   ;;  %s1204_s16 = sphi %s1270_s16, %s1588_s16   ;;  %s1200_s15 = sphi %s1268_s15, %s1587_s15  }
   0x7   : > { %s26_s27 = sadd.s32 1, %s1232_s23  ;;  %s29_s28 = sadd.s32 1, %s1236_s24 }
   0x8   : > { %p27_p0 = scmp.ge.s32.totalorder %s26_s27, 18  ;;  %s42_s29 = sadd.s32 1, %s1220_s20 }
   0x9   : > { %p49_p1 = scmp.ne.s32.totalorder %s1220_s20, %s1216_s19  ;;  %p50_p2 = scmp.eq.s32.totalorder %s1240_s25, 0 }
   0xa   : > { %s1596_s27 = smov (%p27_p0, %s26_s27), 0  ;;  %s1598_s28 = smov (!%p27_p0, %s29_s28), %s1236_s24 }
   0xb   : > { %1577 = sst [smem:[#allocation7_spill]] %s1596_s27  ;;  %s38_s30 = ssub.s32 %s1232_s23, %s1596_s27 }
   0xc   : > { %p31_p3 = scmp.ge.s32.totalorder %s1598_s28, 2  ;;  %p40_p4 = scmp.eq.s32.totalorder %s38_s30, 0 }
   0xd   : > { %p1335_p5 = por %p50_p2, %p49_p1  ;;  %s70_s6 = sadd.s32 1, %s1212_s18 }
   0xe   : > { %s1600_s28 = smov (%p31_p3, %s1598_s28), 0  ;;  %p77_p6 = scmp.ne.s32.totalorder %s1212_s18, %s1208_s17 }
   0xf   : > { %1579 = sst [smem:[#allocation8_spill]] %s1600_s28  ;;  %s66_s8 = ssub.s32 %s1236_s24, %s1600_s28 }
  0x10   : > { %s1343_s7 = scalar_select %p40_p4, %s1220_s20, %s42_s29  }
  0x11   : > { %s67_s9 = sor.u32 %s66_s8, %s38_s30  ;;  %p148_p7 = scmp.eq.s32.totalorder %s66_s8, 0 }
  0x12   : > { %1580 = sst [smem:[#allocation9_spill]] %s1343_s7  ;;  %p68_p8 = scmp.eq.s32.totalorder %s67_s9, 0 }
  0x13   : > { %p1349_p9 = por %p77_p6, %p50_p2  ;;  %s150_s11 = sadd.s32 1, %s1204_s16 }
  0x14   : > { %p160_p10 = scmp.ne.s32.totalorder %s1204_s16, %s1200_s15  ;;  %p161_p11 = scmp.eq.s32.totalorder %s952_s26, 35 }
  0x15   : > { %s1357_s12 = scalar_select %p68_p8, %s1212_s18, %s70_s6  }
  0x16   : > { %s1360_s13 = scalar_select %p148_p7, %s1204_s16, %s150_s11  }
  0x17   : > { %p1362_p12 = por %p161_p11, %p160_p10  ;;  %p955_p13 = scmp.ge.s32.totalorder %s1240_s25, 36 }
  0x19   : > { %183 = sbr.rel (%p955_p13) target bundleno = 62 (0x3e), region = 16 }
  0x20   : > { %186 = sbr.rel (!%p1335_p5) target bundleno = 39 (0x27), region = 20  ;;  %s188_s29 = sand.u32 (%p1335_p5), 1, %s1220_s20  }
  0x21   : > { %s1011_s30 = sshll.u32 (%p1335_p5), %s1232_s23, 3  ;;  %s956_s8 = sshll.u32 (%p1335_p5), %s188_s29, 4 }
  0x22   : > { %s196_s11 = scalar_lea.vmem (%p1335_p5), %s1568_s0, %s1011_s30  ;;  %s190_s26 = scalar_lea.vmem (%p1335_p5), [#allocation3], %s956_s8 }
  0x23   : > { %v226_v0 = vld [vmem:[%s196_s11] sm:$0xff] (%p1335_p5)  ;;  %v228_v1 = vld [vmem:[%s196_s11 + $0x90] sm:$0xff] (%p1335_p5) }
  0x24   : > { %227 = vst [vmem:[%s190_s26] sm:$0xff] (%p1335_p5), %v226_v0  ;;  %229 = vst [vmem:[%s190_s26 + $0x8] sm:$0xff] (%p1335_p5), %v228_v1 }
  0x27 PF: > { %235 = sbr.rel (!%p1349_p9) target bundleno = 62 (0x3e), region = 58  ;;  %s237_s5 = sand.u32 (%p1349_p9), 1, %s1212_s18  }
  0x28   : > { %s961_s28 = sshll.u32 (%p1349_p9), %s1236_s24, 1  ;;  %s959_s27 = sshll.u32 (%p1349_p9), %s237_s5, 8 }
  0x29   : > { %s1012_s29 = sshll.u32 (%p1349_p9), %s1232_s23, 7  ;;  %s1387_s10 = scalar_lea.vmem (%p1349_p9), [#allocation4], %s959_s27 }
  0x2a   : > { %s243_s7 = sadd.s32 (%p1349_p9), %s1012_s29, %s961_s28 }
  0x2b   : > { %s963_s20 = sshll.u32 (%p1349_p9), %s243_s7, 2 }
  0x2c   : > { %s1382_s9 = scalar_lea.vmem (%p1349_p9), %s1569_s1, %s963_s20 }
  0x2d   : > { %v335_v2 = vld [vmem:[%s1382_s9] sm:$0xff] (%p1349_p9)  ;;  %v337_v3 = vld [vmem:[%s1382_s9 + $0x10] sm:$0xff] (%p1349_p9) }
  0x2e   : > { %v339_v4 = vld [vmem:[%s1382_s9 + $0x20] sm:$0xff]  ;;  %336 = vst [vmem:[%s1387_s10] sm:$0xff] %v335_v2  ;;  %338 = vst [vmem:[%s1387_s10 + $0x8] sm:$0xff] %v337_v3  ;;  %v341_v5 = vld [vmem:[%s1382_s9 + $0x30] sm:$0xff] }
  0x2f   : > { %340 = vst [vmem:[%s1387_s10 + $0x10] sm:$0xff] %v339_v4  ;;  %v343_v6 = vld [vmem:[%s1382_s9 + $0x40] sm:$0xff]  ;;  %v345_v7 = vld [vmem:[%s1382_s9 + $0x50] sm:$0xff]  ;;  %342 = vst [vmem:[%s1387_s10 + $0x18] sm:$0xff] %v341_v5 }
  0x30   : > { %344 = vst [vmem:[%s1387_s10 + $0x20] sm:$0xff] %v343_v6  ;;  %346 = vst [vmem:[%s1387_s10 + $0x28] sm:$0xff] %v345_v7  ;;  %v347_v8 = vld [vmem:[%s1382_s9 + $0x60] sm:$0xff]  ;;  %v349_v9 = vld [vmem:[%s1382_s9 + $0x70] sm:$0xff] }
  0x31   : > { %v351_v10 = vld [vmem:[%s1382_s9 + $0x80] sm:$0xff]  ;;  %348 = vst [vmem:[%s1387_s10 + $0x30] sm:$0xff] %v347_v8  ;;  %350 = vst [vmem:[%s1387_s10 + $0x38] sm:$0xff] %v349_v9  ;;  %v353_v11 = vld [vmem:[%s1382_s9 + $0x90] sm:$0xff] }
  0x32   : > { %352 = vst [vmem:[%s1387_s10 + $0x40] sm:$0xff] %v351_v10  ;;  %v355_v12 = vld [vmem:[%s1382_s9 + $0xa0] sm:$0xff]  ;;  %v357_v13 = vld [vmem:[%s1382_s9 + $0xb0] sm:$0xff]  ;;  %354 = vst [vmem:[%s1387_s10 + $0x48] sm:$0xff] %v353_v11 }
  0x33   : > { %356 = vst [vmem:[%s1387_s10 + $0x50] sm:$0xff] %v355_v12  ;;  %358 = vst [vmem:[%s1387_s10 + $0x58] sm:$0xff] %v357_v13  ;;  %v359_v14 = vld [vmem:[%s1382_s9 + $0xc0] sm:$0xff]  ;;  %v361_v15 = vld [vmem:[%s1382_s9 + $0xd0] sm:$0xff] }
  0x34   : > { %v363_v16 = vld [vmem:[%s1382_s9 + $0xe0] sm:$0xff]  ;;  %360 = vst [vmem:[%s1387_s10 + $0x60] sm:$0xff] %v359_v14  ;;  %362 = vst [vmem:[%s1387_s10 + $0x68] sm:$0xff] %v361_v15  ;;  %v365_v17 = vld [vmem:[%s1382_s9 + $0xf0] sm:$0xff] }
  0x35   : > { %364 = vst [vmem:[%s1387_s10 + $0x70] sm:$0xff] %v363_v16  ;;  %v367_v18 = vld [vmem:[%s1382_s9 + $0x100] sm:$0xff]  ;;  %v369_v19 = vld [vmem:[%s1382_s9 + $0x110] sm:$0xff]  ;;  %366 = vst [vmem:[%s1387_s10 + $0x78] sm:$0xff] %v365_v17 }
  0x36   : > { %368 = vst [vmem:[%s1387_s10 + $0x80] sm:$0xff] %v367_v18  ;;  %370 = vst [vmem:[%s1387_s10 + $0x88] sm:$0xff] %v369_v19  ;;  %v371_v20 = vld [vmem:[%s1382_s9 + $0x120] sm:$0xff]  ;;  %v373_v21 = vld [vmem:[%s1382_s9 + $0x130] sm:$0xff] }
  0x37   : > { %v375_v22 = vld [vmem:[%s1382_s9 + $0x140] sm:$0xff]  ;;  %372 = vst [vmem:[%s1387_s10 + $0x90] sm:$0xff] %v371_v20  ;;  %374 = vst [vmem:[%s1387_s10 + $0x98] sm:$0xff] %v373_v21  ;;  %v377_v23 = vld [vmem:[%s1382_s9 + $0x150] sm:$0xff] }
  0x38   : > { %376 = vst [vmem:[%s1387_s10 + $0xa0] sm:$0xff] %v375_v22  ;;  %v379_v24 = vld [vmem:[%s1382_s9 + $0x160] sm:$0xff]  ;;  %v381_v25 = vld [vmem:[%s1382_s9 + $0x170] sm:$0xff]  ;;  %378 = vst [vmem:[%s1387_s10 + $0xa8] sm:$0xff] %v377_v23 }
  0x39   : > { %380 = vst [vmem:[%s1387_s10 + $0xb0] sm:$0xff] %v379_v24  ;;  %382 = vst [vmem:[%s1387_s10 + $0xb8] sm:$0xff] %v381_v25  ;;  %v383_v26 = vld [vmem:[%s1382_s9 + $0x180] sm:$0xff]  ;;  %v385_v27 = vld [vmem:[%s1382_s9 + $0x190] sm:$0xff] }
  0x3a   : > { %v387_v28 = vld [vmem:[%s1382_s9 + $0x1a0] sm:$0xff]  ;;  %384 = vst [vmem:[%s1387_s10 + $0xc0] sm:$0xff] %v383_v26  ;;  %386 = vst [vmem:[%s1387_s10 + $0xc8] sm:$0xff] %v385_v27  ;;  %v389_v29 = vld [vmem:[%s1382_s9 + $0x1b0] sm:$0xff] }
  0x3b   : > { %388 = vst [vmem:[%s1387_s10 + $0xd0] sm:$0xff] %v387_v28  ;;  %v391_v30 = vld [vmem:[%s1382_s9 + $0x1c0] sm:$0xff]  ;;  %v393_v31 = vld [vmem:[%s1382_s9 + $0x1d0] sm:$0xff]  ;;  %390 = vst [vmem:[%s1387_s10 + $0xd8] sm:$0xff] %v389_v29 }
  0x3c   : > { %392 = vst [vmem:[%s1387_s10 + $0xe0] sm:$0xff] %v391_v30  ;;  %394 = vst [vmem:[%s1387_s10 + $0xe8] sm:$0xff] %v393_v31  ;;  %v395_v32 = vld [vmem:[%s1382_s9 + $0x1e0] sm:$0xff]  ;;  %v397_v33 = vld [vmem:[%s1382_s9 + $0x1f0] sm:$0xff] }
  0x3d   : > { %396 = vst [vmem:[%s1387_s10 + $0xf0] sm:$0xff] %v395_v32  ;;  %398 = vst [vmem:[%s1387_s10 + $0xf8] sm:$0xff] %v397_v33 }
  0x3e PF: > { %p964_p0 = scmp.ge.s32.totalorder %s1240_s25, 1  ;;  %p419_p1 = scmp.lt.s32.totalorder %s1240_s25, 37 }
  0x40   : > { %p420_p2 = pnand %p964_p0, %p419_p1 }
  0x41   : > { %s426_s20 = sand.u32 (!%p420_p2), 1, %s1216_s19   ;;  %s433_s27 = sand.u32 (!%p420_p2), 1, %s1208_s17  }
  0x42   : > { %423 = sbr.rel (%p420_p2) target bundleno = 385 (0x181), region = 104  ;;  %s1454_s28 = sshll.u32 (!%p420_p2), %s426_s20, 4 }
  0x43   : > { %s966_s7 = sshll.u32 (!%p420_p2), %s433_s27, 8  ;;  %s466_s8 = sand.u32 (!%p420_p2), 1, %s1200_s15  }
  0x44   : > { %s968_s11 = sshll.u32 (!%p420_p2), %s1228_s22, 1  ;;  %s967_s26 = sshll.u32 (!%p420_p2), %s466_s8, 5 }
  0x45   : > { %p474_p3 = scmp.lt.s32.totalorder (!%p420_p2), %s968_s11, 3  ;;  %s428_s19 = scalar_lea.vmem (!%p420_p2), [#allocation3], %s1454_s28 }
  0x46   : > { %s1469_s10 = scalar_lea.vmem (!%p420_p2), [#allocation4], %s966_s7  ;;  %s1471_s20 = scalar_lea.vmem (!%p420_p2), [#allocation5], %s967_s26 }
  0x47   : > { %p970_p4 = scmp.ne.s32.totalorder (!%p420_p2), %s1224_s21, 0 }
  0x49   : > { %s1602_s11 = smov (!%p474_p3, %s968_s11), 3  ;;  %488 = sbr.rel (%p970_p4) target bundleno = 80 (0x50), region = 116 }
  0x4a   : > { %s476_s6 = scalar_lea.vmem %s1570_s2, %s1602_s11  ;;  %s481_s17 = scalar_lea.vmem %s1571_s3, %s1602_s11  ;;  %v1242_v34 = vmov (!%p970_p4), 0.0  }
  0x4b   : > { %489 = vst [vmem:[#allocation2] sm:$0xff] (!%p970_p4), %v1242_v34  ;;  %490 = vst [vmem:[#allocation2 + $0x8] sm:$0xff] (!%p970_p4), %v1242_v34 }
  0x4c   : > { %491 = vst [vmem:[#allocation2 + $0x10] sm:$0xff] (!%p970_p4), %v1242_v34  ;;  %492 = vst [vmem:[#allocation2 + $0x18] sm:$0xff] (!%p970_p4), %v1242_v34 }
  0x50 PF: > { %v1103_v35 = vld [vmem:[%s1469_s10 + $0x4] ss:$8 sps:$4 sm:$0xff]   ;;  %v1105_v36 = vld [vmem:[%s1469_s10] ss:$8 sps:$4 sm:$0xff]   ;;  %v1106_v37 = vld [vmem:[%s1469_s10 + $0x14] ss:$8 sps:$4 sm:$0xff]  }
  0x51   : > { %701 = vmatprep.subr.bf16.mxu0 %v1103_v35  ;;  %v1108_v38 = vld [vmem:[%s1469_s10 + $0x10] ss:$8 sps:$4 sm:$0xff]   ;;  %v1109_v39 = vld [vmem:[%s1469_s10 + $0x24] ss:$8 sps:$4 sm:$0xff]   ;;  %v1111_v40 = vld [vmem:[%s1469_s10 + $0x20] ss:$8 sps:$4 sm:$0xff]  }
  0x52   : > { %702 = vmatpush1.bf16.msra.mxu0 %v1105_v36  ;;  %v1112_v41 = vld [vmem:[%s1469_s10 + $0x34] ss:$8 sps:$4 sm:$0xff]   ;;  %v1114_v42 = vld [vmem:[%s1469_s10 + $0x30] ss:$8 sps:$4 sm:$0xff]   ;;  %v1115_v43 = vld [vmem:[%s1469_s10 + $0x44] ss:$8 sps:$4 sm:$0xff]  }
  0x53   : > { %703 = vmatprep.subr.bf16.mxu0 %v1106_v37  ;;  %v1117_v44 = vld [vmem:[%s1469_s10 + $0x40] ss:$8 sps:$4 sm:$0xff]   ;;  %v1118_v45 = vld [vmem:[%s1469_s10 + $0x54] ss:$8 sps:$4 sm:$0xff]   ;;  %v1120_v46 = vld [vmem:[%s1469_s10 + $0x50] ss:$8 sps:$4 sm:$0xff]  }
  0x54   : > { %v1121_v47 = vld [vmem:[%s1469_s10 + $0x64] ss:$8 sps:$4 sm:$0xff]   ;;  %v1123_v49 = vld [vmem:[%s1469_s10 + $0x60] ss:$8 sps:$4 sm:$0xff]   ;;  %v1124_v50 = vld [vmem:[%s1469_s10 + $0x74] ss:$8 sps:$4 sm:$0xff]  }
  0x55   : > { %v1153_v48 = vld [vmem:[%s428_s19 + $0x4] ss:$8 sps:$4 sm:$0xff]   ;;  %v1126_v51 = vld [vmem:[%s1469_s10 + $0x70] ss:$8 sps:$4 sm:$0xff]   ;;  %v1129_v53 = vld [vmem:[%s1469_s10 + $0x80] ss:$8 sps:$4 sm:$0xff]  }
  0x56   : > { %704 = vmatpush1.bf16.msra.mxu0 %v1108_v38  ;;  %733 = vmatprep.mubr.bf16.mxu0 %v1153_v48  ;;  %v1127_v52 = vld [vmem:[%s1469_s10 + $0x84] ss:$8 sps:$4 sm:$0xff]   ;;  %v1130_v54 = vld [vmem:[%s1469_s10 + $0x94] ss:$8 sps:$4 sm:$0xff]   ;;  %v1132_v55 = vld [vmem:[%s1469_s10 + $0x90] ss:$8 sps:$4 sm:$0xff]  }
  0x57   : > { %705 = vmatprep.subr.bf16.mxu0 %v1109_v39  ;;  %v1133_v56 = vld [vmem:[%s1469_s10 + $0xa4] ss:$8 sps:$4 sm:$0xff]   ;;  %v1135_v57 = vld [vmem:[%s1469_s10 + $0xa0] ss:$8 sps:$4 sm:$0xff]   ;;  %v1136_v58 = vld [vmem:[%s1469_s10 + $0xb4] ss:$8 sps:$4 sm:$0xff]  }
  0x58   : > { %v1138_v59 = vld [vmem:[%s1469_s10 + $0xb0] ss:$8 sps:$4 sm:$0xff]   ;;  %v1139_v60 = vld [vmem:[%s1469_s10 + $0xc4] ss:$8 sps:$4 sm:$0xff]   ;;  %v1141_v61 = vld [vmem:[%s1469_s10 + $0xc0] ss:$8 sps:$4 sm:$0xff]  }
  0x59   : > { %v1142_v62 = vld [vmem:[%s1469_s10 + $0xd4] ss:$8 sps:$4 sm:$0xff]   ;;  %v1144_v63 = vld [vmem:[%s1469_s10 + $0xd0] ss:$8 sps:$4 sm:$0xff]   ;;  %v1145_v0 = vld [vmem:[%s1469_s10 + $0xe4] ss:$8 sps:$4 sm:$0xff]  }
  0x5a   : > { %706 = vmatpush1.bf16.msra.mxu0 %v1111_v40  ;;  %v1147_v1 = vld [vmem:[%s1469_s10 + $0xe0] ss:$8 sps:$4 sm:$0xff]   ;;  %v1148_v2 = vld [vmem:[%s1469_s10 + $0xf4] ss:$8 sps:$4 sm:$0xff]   ;;  %v1150_v3 = vld [vmem:[%s1469_s10 + $0xf0] ss:$8 sps:$4 sm:$0xff]  }
  0x5b   : > { %707 = vmatprep.subr.bf16.mxu0 %v1112_v41  ;;  %v1151_v4 = vld [vmem:[%s428_s19] ss:$8 sps:$4 sm:$0xff]   ;;  %p1005_p5 = scmp.ne.s32.totalorder %s1224_s21, 17 }
  0x5c   : > { %v493_v5 = vld [vmem:[#allocation2] sm:$0xff]  ;;  %v494_v6 = vld [vmem:[#allocation2 + $0x8] sm:$0xff]  ;;  %v495_v8 = vld [vmem:[#allocation2 + $0x10] sm:$0xff]  ;;  %v762_v17 = vlaneseq (!%p1005_p5) }
  0x5d   : > { %v496_v11 = vld [vmem:[#allocation2 + $0x18] sm:$0xff]  ;;  %v760_v19 = vld [vmem:[%s476_s6] sm:$0x3] (!%p1005_p5) }
  0x5e   : > { %708 = vmatpush1.bf16.msra.mxu0 %v1114_v42  ;;  %v763_v18 = vshrl.u32 (!%p1005_p5), %v762_v17, 7  ;;  %v776_v20 = vld [vmem:[%s481_s17] sm:$0x3] (!%p1005_p5) }
  0x5f   : > { %709 = vmatprep.subr.bf16.mxu0 %v1115_v43 }
  0x60   : > { %v764_v22 = vsub.s32 (!%p1005_p5), 0, %v763_v18  ;;  %v768_v23 = vsub.s32 (!%p1005_p5), 1, %v763_v18 }
  0x62   : > { %710 = vmatpush1.bf16.msra.mxu0 %v1117_v44  ;;  %v765_v27 = vrot.slane (!%p1005_p5), %v760_v19, %v764_v22  ;;  %v781_v28 = vrot.slane (!%p1005_p5), %v776_v20, %v764_v22  ;;  %v769_v29 = vrot.slane (!%p1005_p5), %v760_v19, %v768_v23  ;;  %v785_v30 = vrot.slane (!%p1005_p5), %v776_v20, %v768_v23 }
  0x63   : > { %711 = vmatprep.subr.bf16.mxu0 %v1118_v45 }
  0x66   : > { %712 = vmatpush1.bf16.msra.mxu0 %v1120_v46 }
  0x67   : > { %713 = vmatprep.subr.bf16.mxu0 %v1121_v47 }
  0x6a   : > { %714 = vmatpush1.bf16.msra.mxu0 %v1123_v49 }
  0x6b   : > { %715 = vmatprep.subr.bf16.mxu0 %v1124_v50 }
  0x6e   : > { %716 = vmatpush1.bf16.msra.mxu0 %v1126_v51 }
  0x6f   : > { %717 = vmatprep.subr.bf16.mxu0 %v1127_v52 }
  0x72   : > { %718 = vmatpush1.bf16.msra.mxu0 %v1129_v53 }
  0x73   : > { %719 = vmatprep.subr.bf16.mxu0 %v1130_v54 }
  0x76   : > { %720 = vmatpush1.bf16.msra.mxu0 %v1132_v55 }
  0x77   : > { %721 = vmatprep.subr.bf16.mxu0 %v1133_v56 }
  0x7a   : > { %722 = vmatpush1.bf16.msra.mxu0 %v1135_v57 }
  0x7b   : > { %723 = vmatprep.subr.bf16.mxu0 %v1136_v58 }
  0x7e   : > { %724 = vmatpush1.bf16.msra.mxu0 %v1138_v59 }
  0x7f   : > { %725 = vmatprep.subr.bf16.mxu0 %v1139_v60 }
  0x82   : > { %726 = vmatpush1.bf16.msra.mxu0 %v1141_v61 }
  0x83   : > { %727 = vmatprep.subr.bf16.mxu0 %v1142_v62 }
  0x86   : > { %728 = vmatpush1.bf16.msra.mxu0 %v1144_v63 }
  0x87   : > { %729 = vmatprep.subr.bf16.mxu0 %v1145_v0 }
  0x8a   : > { %730 = vmatpush1.bf16.msra.mxu0 %v1147_v1 }
  0x8b   : > { %731 = vmatprep.subr.bf16.mxu0 %v1148_v2 }
  0x8e   : > { %732 = vmatpush1.bf16.msra.mxu0 %v1150_v3 }
  0x91   : > { %734 = vmatmul.mubr.bf16.vlgmr.msra.gmra.mrb[0].mxu0 %v1151_v4 }
 0x164   : > { %v735_v7 = vpop.f32.mrb[0].mxu0  ;;  %755 = sbr.rel (%p1005_p5) target bundleno = 377 (0x179), region = 120 }
 0x165   : > { %v744_v9 = vadd.f32 %v735_v7, %v493_v5  ;;  %v737_v10 = vpop.f32.mrb[1].mxu0 }
 0x166   : > { %v745_v12 = vadd.f32 %v737_v10, %v494_v6  ;;  %v739_v13 = vpop.f32.mrb[2].mxu0 }
 0x167   : > { %748 = vst [vmem:[#allocation2] sm:$0xff] %v744_v9  ;;  %v746_v14 = vadd.f32 %v739_v13, %v495_v8  ;;  %v741_v15 = vpop.f32.mrb[3].mxu0 }
 0x168   : > { %749 = vst [vmem:[#allocation2 + $0x8] sm:$0xff] %v745_v12  ;;  %v747_v16 = vadd.f32 %v741_v15, %v496_v11 }
 0x169   : > { %750 = vst [vmem:[#allocation2 + $0x10] sm:$0xff] %v746_v14 }
 0x16a   : > { %751 = vst [vmem:[#allocation2 + $0x18] sm:$0xff] %v747_v16 }
 0x16e   : > { %v756_v21 = vld [vmem:[#allocation2] sm:$0xff] }
 0x16f   : > { %v757_v24 = vld [vmem:[#allocation2 + $0x8] sm:$0xff]  ;;  %v772_v31 = vmul.f32 %v765_v27, %v756_v21 }
 0x170   : > { %v758_v25 = vld [vmem:[#allocation2 + $0x10] sm:$0xff]  ;;  %v773_v32 = vmul.f32 %v769_v29, %v757_v24 }
 0x171   : > { %v759_v26 = vld [vmem:[#allocation2 + $0x18] sm:$0xff]  ;;  %v774_v33 = vmul.f32 %v765_v27, %v758_v25  ;;  %v788_v35 = vadd.f32 %v781_v28, %v772_v31 }
 0x172   : > { %v775_v34 = vmul.f32 %v769_v29, %v759_v26  ;;  %v789_v36 = vadd.f32 %v785_v30, %v773_v32 }
 0x173   : > { %v790_v37 = vadd.f32 %v781_v28, %v774_v33  ;;  %v792_v39 = vmax.f32 %v788_v35, 0.0 }
 0x174   : > { %v791_v38 = vadd.f32 %v785_v30, %v775_v34  ;;  %v793_v40 = vmax.f32 %v789_v36, 0.0 }
 0x175   : > { %v794_v41 = vmax.f32 %v790_v37, 0.0  ;;  %796 = vst [vmem:[%s1471_s20] sm:$0xff] %v792_v39 }
 0x176   : > { %v795_v42 = vmax.f32 %v791_v38, 0.0  ;;  %797 = vst [vmem:[%s1471_s20 + $0x8] sm:$0xff] %v793_v40 }
 0x177   : > { %798 = vst [vmem:[%s1471_s20 + $0x10] sm:$0xff] %v794_v41 }
 0x178   : > { %799 = vst [vmem:[%s1471_s20 + $0x18] sm:$0xff] %v795_v42 }
 0x179 PF: > { %806 = sbr.rel (!%p1362_p12) target bundleno = 385 (0x181), region = 124  ;;  %s1013_s21 = sshll.u32 (%p1362_p12), %s1228_s22, 4 }
 0x17a   : > { %s812_s26 = scalar_lea.vmem (%p1362_p12), %s1572_s4, %s1013_s21 }
 0x17c   : > { %v825_v43 = vld [vmem:[%s1471_s20] sm:$0xff] (%p1362_p12) }
 0x17d   : > { %v827_v44 = vld [vmem:[%s1471_s20 + $0x8] sm:$0xff] (%p1362_p12)  ;;  %826 = vst [vmem:[%s812_s26] sm:$0xff] (%p1362_p12), %v825_v43 }
 0x17e   : > { %v829_v45 = vld [vmem:[%s1471_s20 + $0x10] sm:$0xff] (%p1362_p12)  ;;  %828 = vst [vmem:[%s812_s26 + $0x8] sm:$0xff] (%p1362_p12), %v827_v44 }
 0x17f   : > { %v831_v46 = vld [vmem:[%s1471_s20 + $0x18] sm:$0xff] (%p1362_p12)  ;;  %830 = vst [vmem:[%s812_s26 + $0x20] sm:$0xff] (%p1362_p12), %v829_v45 }
 0x180   : > { %832 = vst [vmem:[%s812_s26 + $0x28] sm:$0xff] %v831_v46 }
 0x181 PF: > { %s14_s25 = sadd.s32 1, %s1240_s25   ;;  %s1583_s19 = sld [smem:[#allocation6_spill]] }
 0x182   : > { %p11_p6 = scmp.ge.s32.totalorder %s14_s25, 38   ;;  %s1584_s20 = sld [smem:[#allocation9_spill]] }
 0x183   : > { %s1585_s14 = sld [smem:[#allocation7_spill]]  ;;  %s1586_s5 = sld [smem:[#allocation8_spill]] }
 0x184   : > { %s1587_s15 = smov %s1204_s16  ;;  %s1588_s16 = smov %s1360_s13 }
 0x185   : > { %s1589_s17 = smov %s1212_s18  ;;  %s1590_s18 = smov %s1357_s12 }
 0x186   : > { %s1591_s21 = smov %s1232_s23  ;;  %s1592_s22 = smov %s1236_s24 }
 0x187   :  { %13 = sbr.rel (!%p11_p6) target bundleno = 6 (0x6), region = 192 }
 0x189   : > { %s1593_s23 = smov %s1585_s14  ;;  %s1594_s24 = smov %s1586_s5 }

// kernel: resnet18_rnn_forward.88
= control target key start
LH: loop header
LB: loop body
LE: loop exit
PB: predicated region body
PF: predicated region fallthrough
CT: control target
= control target key end

     0   :  { %14 = vsyncpa [#allocation5], 0  ;;  %vm28_vm0 = vcmask 261120   ;;  %s450_s9 = smov 0   ;;  %s518_s0 = inlined_call_operand.vmem [shape: f32[2,8,32], index: 0, kind: input, shape index: {}]   ;;  %s519_s1 = inlined_call_operand.vmem [shape: f32[8,32], index: 1, kind: input, shape index: {}, may-alias: {1,2}]   ;;  %s520_s2 = inlined_call_operand.vmem [shape: f32[8,32], index: 2, kind: input, shape index: {}, may-alias: {1,2}]   ;;  %s521_s3 = inlined_call_operand.vmem [shape: f32[32,128], index: 3, kind: input, shape index: {}]   ;;  %s522_s4 = inlined_call_operand.vmem [shape: f32[32,128], index: 4, kind: input, shape index: {}]   ;;  %s523_s5 = inlined_call_operand.vmem [shape: f32[1,128], index: 5, kind: input, shape index: {}]   ;;  %s524_s6 = inlined_call_operand.hbm [shape: f32[2,8,32], index: 6, kind: output, shape index: {0}]   ;;  %s525_s7 = inlined_call_operand.vmem [shape: f32[8,32], index: 7, kind: output, shape index: {1}]   ;;  %s526_s8 = inlined_call_operand.vmem [shape: f32[8,32], index: 8, kind: output, shape index: {2}]  }
   0x1   :  { %v27_v0 = vld [vmem:[%s519_s1] sm:$0xff] }
   0x2   :  { %v30_v1 = vld [vmem:[%s520_s2] sm:$0xff]  ;;  %29 = vst.msk [vmem:[#allocation2] sm:$0xff] %vm28_vm0, %v27_v0 }
   0x3   :  { %31 = vst.msk [vmem:[#allocation3] sm:$0xff] %vm28_vm0, %v30_v1 }
   0x4 LB: > { %v46_v2 = vld [vmem:[%s522_s4] sm:$0xff]  ;;  %v47_v3 = vld [vmem:[%s522_s4 + $0x8] sm:$0xff]  ;;  %v388_v5 = vmov 0.0|0.0   ;;  %v48_v8 = vld [vmem:[%s522_s4 + $0x10] sm:$0xff]  ;;  %vm389_vm1 = vmmov 0   ;;  %v390_v13 = vmov 0.0   ;;  %s386_s9 = sphi %s450_s9, %s37_s9  }
   0x5   : > { %v42_v4 = vld [vmem:[%s521_s3] sm:$0xff]  ;;  %319 = vmatprep.subr.bf16.mxu0 %v388_v5  ;;  %325 = vmatprep.subr.bf16.mxu1 %v388_v5  ;;  %v320_v6 = vpack.c.bf16 %v47_v3, %v46_v2  ;;  %v43_v7 = vld [vmem:[%s521_s3 + $0x8] sm:$0xff]  ;;  %v49_v9 = vld [vmem:[%s522_s4 + $0x18] sm:$0xff]  ;;  %s282_s24 = sshll.u32 %s386_s9, 3  ;;  %s391_s30 = smov 64  }
   0x6   : > { %v326_v10 = vpack.c.bf16 %v43_v7, %v42_v4  ;;  %v44_v11 = vld [vmem:[%s521_s3 + $0x10] sm:$0xff]  ;;  %v45_v12 = vld [vmem:[%s521_s3 + $0x18] sm:$0xff]  ;;  %305 = vmatprep.mubr.msk.f32.mxu0 %vm389_vm1, %v390_v13  ;;  %316 = vmatprep.mubr.msk.f32.mxu1 %vm389_vm1, %v390_v13  ;;  %v323_v14 = vpack.c.bf16 %v49_v9, %v48_v8  ;;  %s39_s27 = scalar_lea.vmem %s518_s0, %s282_s24  ;;  %v285_v20 = vld [vmem:[%s523_s5] ss:$0 sm:$0xff]  ;;  %s392_s10 = smov 32  }
   0x7   : > { %321 = vmatpush3.bf16.msra.mxu0 %v320_v6  ;;  %v329_v15 = vpack.c.bf16 %v45_v12, %v44_v11  ;;  %v40_v17 = vld [vmem:[%s39_s27] sm:$0xff]  ;;  %s393_s11 = smov 96   ;;  %s243_s1 = scalar_lea.vmem [#allocation4], %s282_s24 }
   0x8   : > { %327 = vmatpush3.bf16.msra.mxu1 %v326_v10  ;;  %322 = vmatprep.subr.bf16.mxu0 %v388_v5  ;;  %s37_s9 = sadd.s32 1, %s386_s9  }
   0x9   : > { %328 = vmatprep.subr.bf16.mxu1 %v388_v5  ;;  %v41_v16 = vld [vmem:[#allocation2] sm:$0xff]  ;;  %p34_p0 = scmp.ge.s32.totalorder %s37_s9, 2  }
   0xa   : > { %v211_v26 = vld [vmem:[#allocation3] sm:$0xff]  ;;  %s394_s15 = smov (%p34_p0), [#allocation4]  }
   0xb   : > { %324 = vmatpush3.bf16.msra.mxu0 %v323_v14  ;;  %s254_s16 = sshll.u32 (%p34_p0), %s394_s15, 4  ;;  %s255_s16 = int_to_ptr.vmem [resolvable:$true] %s254_s16 }
   0xc   : > { %330 = vmatpush3.bf16.msra.mxu1 %v329_v15  ;;  %s356_s17 = scalar_lea.vmem (%p34_p0), %s255_s16, 256  ;;  %p361_p2 = scmp.lt.s32.totalorder (%p34_p0), %s255_s16, %s255_s16 }
   0xd   :  { %p357_p1 = scmp.ne.s32.totalorder (%p34_p0), %s255_s16, %s356_s17  ;;  %p362_p3 = scmp.lt.s32.totalorder (%p34_p0), %s356_s17, %s356_s17 }
   0xe   : > { %306 = vmatmul.mubr.msk.f32.vlgmr.msra.gmra.mrb[0].mxu0 %vm28_vm0, %v41_v16 }
   0xf   : > { %317 = vmatmul.mubr.msk.f32.vlgmr.msra.gmra.mrb[0].mxu1 %vm28_vm0, %v40_v17  ;;  %p363_p4 = por (%p34_p0), %p362_p3, %p361_p2 }
  0x11   :  { %p364_p5 = pnand (%p34_p0), %p363_p4, %p357_p1 }
  0xe1   : > { %v119_v18 = vpop.f32.mrb[0].mxu0 }
  0xe2   : > { %v192_v19 = vpop.f32.mrb[0].mxu1  ;;  %v307_v21 = vpop.f32.mrb[1].mxu0 }
  0xe3   : > { %v193_v22 = vadd.f32 %v192_v19, %v119_v18  ;;  %v318_v23 = vpop.f32.mrb[1].mxu1 }
  0xe5   : > { %v203_v24 = vadd.f32 %v285_v20, %v193_v22 }
  0xe7   : > { %348 = vtanh.f32 %v203_v24  ;;  %v286_v27 = vmul.f32 -1.442695, %v203_v24 }
  0xe9   : > { %350 = vpow2.f32 %v286_v27 }
  0xf1   : > { %v349_v25 = vpop.eup %348 }
  0xf2   : > { %218 = vrot.lane.b32.xlu0 %v349_v25, %s391_s30 }
  0xf3   : > { %v351_v28 = vpop.eup %350 }
  0xf4   : > { %v207_v29 = vadd.f32 1.0, %v351_v28 }
  0xf6   : > { %213 = vrot.lane.b32.xlu0 %v211_v26, %s392_s10  ;;  %352 = vrcp.f32 %v207_v29 }
 0x100   : > { %v353_v30 = vpop.eup %352 }
 0x164   : > { %v219_v31 = vpop.permute.xlu0 %218 }
 0x165   : > { %v221_v32 = vmul.f32 %v353_v30, %v219_v31 }
 0x167   : > { %223 = vrot.lane.b32.xlu1 %v221_v32, %s392_s10 }
 0x168   : > { %v214_v33 = vpop.permute.xlu0 %213 }
 0x169   : > { %v216_v34 = vmul.f32 %v353_v30, %v214_v33 }
 0x1d9   : > { %v224_v35 = vpop.permute.xlu1 %223 }
 0x1da   : > { %v226_v36 = vadd.f32 %v224_v35, %v216_v34 }
 0x1dc   : > { %354 = vtanh.f32 %v226_v36 }
 0x1e6   : > { %v355_v37 = vpop.eup %354 }
 0x1e7   : > { %229 = vrot.lane.b32.xlu1 %v355_v37, %s391_s30 }
 0x1eb   : > { %239 = vrot.lane.b32.xlu1 %v226_v36, %s393_s11 }
 0x259   : > { %v230_v38 = vpop.permute.xlu1 %229 }
 0x25a   : > { %v232_v39 = vmul.f32 %v353_v30, %v230_v38 }
 0x25c   : > { %234 = vrot.lane.b32.xlu0 %v232_v39, %s392_s10 }
 0x25d   : > { %v240_v40 = vpop.permute.xlu1 %239 }
 0x25e   : > { %242 = vst.msk [vmem:[#allocation3] sm:$0xff] %vm28_vm0, %v240_v40 }
 0x265   :  { %v247_v43 = vld [vmem:[#allocation3] sm:$0xff] (%p34_p0) }
 0x266   :  { %248 = vst.msk [vmem:[%s526_s8] sm:$0xff] (%p34_p0), %vm28_vm0, %v247_v43 }
 0x2c9   :  { %36 = sbr.rel (!%p34_p0) target bundleno = 4 (0x4), region = 69 }
 0x2ce   : > { %v235_v41 = vpop.permute.xlu0 %234 }
 0x2cf   : > { %237 = vst.msk [vmem:[#allocation2] sm:$0xff] %vm28_vm0, %v235_v41  ;;  %244 = vst.msk [vmem:[%s243_s1] sm:$0xff] %vm28_vm0, %v235_v41 }
 0x2d6   :  { %v245_v42 = vld [vmem:[#allocation2] sm:$0xff] }
 0x2d7   :  { %246 = vst.msk [vmem:[%s525_s7] sm:$0xff] %vm28_vm0, %v245_v42 }
 0x2d8   :  { %367 = shalt.err (!%p364_p5)
}
 0x2d9   :  { %s368_s4 = scalar_lea.hbm %s524_s6, 256 }
 0x2da   :  { %p369_p6 = scmp.ne.s32.totalorder %s524_s6, %s368_s4  ;;  %p372_p7 = scmp.lt.u32.totalorder %s368_s4, %s524_s6 }
 0x2dc   :  { %p374_p8 = pnand %p372_p7, %p369_p6 }
 0x2de   :  { %377 = shalt.err (!%p374_p8)
}
 0x2df   :  { %s395_s18 = smov 128   ;;  %s396_s19 = smov 8  }
 0x2e0   :  { %260 = dma.vmem_to_hbm [thread:$0]  %s255_s16, 256, %s524_s6, [#allocation5], %s395_s18, %s395_s18, %s396_s19  }
 0x2e1   :  { %382 = dma.done.wait [#allocation5], 256  }
 0x2e2   :  { %383 = vsyncadd [#allocation5], 4294967040 }
 0x2e3   :  { %272 = vsyncpa [#allocation5], 1 }

// kernel: resnet18_rnn_forward.87
= control target key start
LH: loop header
LB: loop body
LE: loop exit
PB: predicated region body
PF: predicated region fallthrough
CT: control target
= control target key end

     0   :  { %vm27_vm0 = vcmask 261120   ;;  %s653_s9 = smov 0   ;;  %s894_s0 = inlined_call_operand.vmem [shape: f32[2,8,512], index: 0, kind: input, shape index: {}]   ;;  %s895_s1 = inlined_call_operand.vmem [shape: f32[8,32], index: 1, kind: input, shape index: {}, may-alias: {1,2}]   ;;  %s896_s3 = inlined_call_operand.vmem [shape: f32[512,128], index: 3, kind: input, shape index: {}]   ;;  %s897_s4 = inlined_call_operand.vmem [shape: f32[32,128], index: 4, kind: input, shape index: {}]   ;;  %s898_s5 = inlined_call_operand.vmem [shape: f32[1,128], index: 5, kind: input, shape index: {}]   ;;  %s899_s6 = inlined_call_operand.vmem [shape: f32[2,8,32], index: 6, kind: output, shape index: {0}]   ;;  %s900_s7 = inlined_call_operand.vmem [shape: f32[8,32], index: 7, kind: output, shape index: {1}]   ;;  %s901_s8 = inlined_call_operand.vmem [shape: f32[8,32], index: 8, kind: output, shape index: {2}]   ;;  %s902_s2 = inlined_call_operand.vmem [shape: f32[8,32], index: 2, kind: input, shape index: {}, may-alias: {1,2}]  }
   0x1   :  { %v26_v0 = vld [vmem:[%s895_s1] sm:$0xff] }
   0x2   :  { %v29_v1 = vld [vmem:[%s902_s2] sm:$0xff]  ;;  %28 = vst.msk [vmem:[#allocation2] sm:$0xff] %vm27_vm0, %v26_v0 }
   0x3   :  { %30 = vst.msk [vmem:[#allocation3] sm:$0xff] %vm27_vm0, %v29_v1 }
   0x4 LB: > { %v109_v2 = vld [vmem:[%s897_s4] sm:$0xff]  ;;  %v110_v3 = vld [vmem:[%s897_s4 + $0x8] sm:$0xff]  ;;  %v594_v5 = vmov 0.0|0.0   ;;  %vm595_vm1 = vmmov 0   ;;  %v596_v10 = vmov 0.0   ;;  %v111_v13 = vld [vmem:[%s897_s4 + $0x10] sm:$0xff]  ;;  %s592_s9 = sphi %s653_s9, %s36_s9  }
   0x5   : > { %v61_v4 = vld [vmem:[%s896_s3 + $0x80] sm:$0xff]  ;;  %494 = vmatprep.subr.bf16.mxu0 %v594_v5  ;;  %v495_v6 = vpack.c.bf16 %v110_v3, %v109_v2  ;;  %v62_v7 = vld [vmem:[%s896_s3 + $0x88] sm:$0xff]  ;;  %491 = vmatprep.mubr.msk.f32.mxu0 %vm595_vm1, %v596_v10  ;;  %v112_v14 = vld [vmem:[%s897_s4 + $0x18] sm:$0xff]  ;;  %s407_s15 = sshll.u32 %s592_s9, 5  ;;  %s597_s14 = smov 64  }
   0x6   : > { %v45_v8 = vld [vmem:[%s896_s3] sm:$0xff]  ;;  %v46_v9 = vld [vmem:[%s896_s3 + $0x8] sm:$0xff]  ;;  %v500_v11 = vpack.c.bf16 %v62_v7, %v61_v4  ;;  %v63_v15 = vld [vmem:[%s896_s3 + $0x90] sm:$0xff]  ;;  %v498_v16 = vpack.c.bf16 %v112_v14, %v111_v13  ;;  %s795_s30 = scalar_lea.vmem %s894_s0, %s407_s15  ;;  %s599_s15 = smov 96  }
   0x7   : > { %v502_v12 = vpack.c.bf16 %v46_v9, %v45_v8  ;;  %496 = vmatpush3.bf16.msra.mxu0 %v495_v6  ;;  %v64_v17 = vld [vmem:[%s896_s3 + $0x98] sm:$0xff]  ;;  %v47_v18 = vld [vmem:[%s896_s3 + $0x10] sm:$0xff]  ;;  %v93_v21 = vld [vmem:[%s896_s3 + $0x180] sm:$0xff]  ;;  %s406_s16 = sshll.u32 %s592_s9, 3  ;;  %s36_s9 = sadd.s32 1, %s592_s9  }
   0x8   : > { %v48_v19 = vld [vmem:[%s896_s3 + $0x18] sm:$0xff]  ;;  %501 = vmatprep.subr.bf16.mxu1 %v500_v11  ;;  %497 = vmatprep.subr.bf16.mxu0 %v594_v5  ;;  %v504_v20 = vpack.c.bf16 %v64_v17, %v63_v15  ;;  %v94_v22 = vld [vmem:[%s896_s3 + $0x188] sm:$0xff]  ;;  %v65_v26 = vld [vmem:[%s896_s3 + $0xa0] sm:$0xff]  ;;  %s374_s19 = scalar_lea.vmem %s899_s6, %s406_s16  ;;  %p33_p0 = scmp.ge.s32.totalorder %s36_s9, 2  }
   0x9   : > { %503 = vmatpush3.bf16.msra.mxu1 %v502_v12  ;;  %v506_v23 = vpack.c.bf16 %v48_v19, %v47_v18  ;;  %v44_v24 = vld [vmem:[#allocation2] sm:$0xff]  ;;  %v532_v25 = vpack.c.bf16 %v94_v22, %v93_v21  ;;  %v66_v27 = vld [vmem:[%s896_s3 + $0xa8] sm:$0xff]  ;;  %v95_v34 = vld [vmem:[%s896_s3 + $0x190] sm:$0xff] }
   0xa   : > { %v77_v28 = vld [vmem:[%s896_s3 + $0x100] sm:$0xff]  ;;  %505 = vmatprep.subr.bf16.mxu1 %v504_v20  ;;  %v508_v29 = vpack.c.bf16 %v66_v27, %v65_v26  ;;  %v78_v30 = vld [vmem:[%s896_s3 + $0x108] sm:$0xff]  ;;  %v96_v35 = vld [vmem:[%s896_s3 + $0x198] sm:$0xff] }
   0xb   : > { %v49_v31 = vld [vmem:[%s896_s3 + $0x20] sm:$0xff]  ;;  %v50_v32 = vld [vmem:[%s896_s3 + $0x28] sm:$0xff]  ;;  %499 = vmatpush3.bf16.msra.mxu0 %v498_v16  ;;  %v534_v33 = vpack.c.bf16 %v78_v30, %v77_v28  ;;  %v67_v36 = vld [vmem:[%s896_s3 + $0xb0] sm:$0xff]  ;;  %v536_v37 = vpack.c.bf16 %v96_v35, %v95_v34 }
   0xc   : > { %533 = vmatprep.subr.bf16.mxu0 %v532_v25  ;;  %v68_v38 = vld [vmem:[%s896_s3 + $0xb8] sm:$0xff]  ;;  %v79_v39 = vld [vmem:[%s896_s3 + $0x110] sm:$0xff]  ;;  %v510_v41 = vpack.c.bf16 %v50_v32, %v49_v31  ;;  %v97_v42 = vld [vmem:[%s896_s3 + $0x1a0] sm:$0xff] }
   0xd   : > { %v80_v40 = vld [vmem:[%s896_s3 + $0x118] sm:$0xff]  ;;  %507 = vmatpush3.bf16.msra.mxu1 %v506_v23  ;;  %v512_v43 = vpack.c.bf16 %v68_v38, %v67_v36  ;;  %v51_v44 = vld [vmem:[%s896_s3 + $0x30] sm:$0xff]  ;;  %v98_v46 = vld [vmem:[%s896_s3 + $0x1a8] sm:$0xff] }
   0xe   : > { %492 = vmatmul.mubr.msk.f32.vlgmr.msra.gmra.mrb[0].mxu0 %vm27_vm0, %v44_v24  ;;  %509 = vmatprep.subr.bf16.mxu1 %v508_v29  ;;  %v52_v45 = vld [vmem:[%s896_s3 + $0x38] sm:$0xff]  ;;  %v538_v47 = vpack.c.bf16 %v80_v40, %v79_v39  ;;  %v69_v48 = vld [vmem:[%s896_s3 + $0xc0] sm:$0xff]  ;;  %v70_v49 = vld [vmem:[%s896_s3 + $0xc8] sm:$0xff]  ;;  %v540_v50 = vpack.c.bf16 %v98_v46, %v97_v42 }
   0xf   : > { %535 = vmatpush3.bf16.msra.mxu0 %v534_v33  ;;  %v81_v51 = vld [vmem:[%s896_s3 + $0x120] sm:$0xff]  ;;  %v82_v52 = vld [vmem:[%s896_s3 + $0x128] sm:$0xff]  ;;  %v514_v53 = vpack.c.bf16 %v52_v45, %v51_v44  ;;  %v99_v54 = vld [vmem:[%s896_s3 + $0x1b0] sm:$0xff]  ;;  %v516_v56 = vpack.c.bf16 %v70_v49, %v69_v48 }
  0x10   : > { %537 = vmatprep.subr.bf16.mxu0 %v536_v37  ;;  %v100_v55 = vld [vmem:[%s896_s3 + $0x1b8] sm:$0xff]  ;;  %v53_v57 = vld [vmem:[%s896_s3 + $0x40] sm:$0xff]  ;;  %v54_v58 = vld [vmem:[%s896_s3 + $0x48] sm:$0xff]  ;;  %v542_v59 = vpack.c.bf16 %v82_v52, %v81_v51 }
  0x11   : > { %511 = vmatpush3.bf16.msra.mxu1 %v510_v41  ;;  %v71_v60 = vld [vmem:[%s896_s3 + $0xd0] sm:$0xff]  ;;  %v72_v61 = vld [vmem:[%s896_s3 + $0xd8] sm:$0xff]  ;;  %v544_v62 = vpack.c.bf16 %v100_v55, %v99_v54  ;;  %v518_v1 = vpack.c.bf16 %v54_v58, %v53_v57  ;;  %v101_v2 = vld [vmem:[%s896_s3 + $0x1c0] sm:$0xff] }
  0x12   : > { %513 = vmatprep.subr.bf16.mxu1 %v512_v43  ;;  %v83_v63 = vld [vmem:[%s896_s3 + $0x130] sm:$0xff]  ;;  %v84_v0 = vld [vmem:[%s896_s3 + $0x138] sm:$0xff]  ;;  %v102_v3 = vld [vmem:[%s896_s3 + $0x1c8] sm:$0xff]  ;;  %v520_v4 = vpack.c.bf16 %v72_v61, %v71_v60 }
  0x13   : > { %539 = vmatpush3.bf16.msra.mxu0 %v538_v47  ;;  %v55_v5 = vld [vmem:[%s896_s3 + $0x50] sm:$0xff]  ;;  %v56_v6 = vld [vmem:[%s896_s3 + $0x58] sm:$0xff]  ;;  %v546_v7 = vpack.c.bf16 %v84_v0, %v83_v63  ;;  %v73_v8 = vld [vmem:[%s896_s3 + $0xe0] sm:$0xff]  ;;  %v548_v10 = vpack.c.bf16 %v102_v3, %v101_v2 }
  0x14   : > { %541 = vmatprep.subr.bf16.mxu0 %v540_v50  ;;  %v74_v9 = vld [vmem:[%s896_s3 + $0xe8] sm:$0xff]  ;;  %v85_v11 = vld [vmem:[%s896_s3 + $0x140] sm:$0xff]  ;;  %v522_v14 = vpack.c.bf16 %v56_v6, %v55_v5  ;;  %v103_v15 = vld [vmem:[%s896_s3 + $0x1d0] sm:$0xff] }
  0x15   : > { %515 = vmatpush3.bf16.msra.mxu1 %v514_v53  ;;  %v86_v12 = vld [vmem:[%s896_s3 + $0x148] sm:$0xff]  ;;  %v104_v16 = vld [vmem:[%s896_s3 + $0x1d8] sm:$0xff]  ;;  %v524_v17 = vpack.c.bf16 %v74_v9, %v73_v8  ;;  %v57_v18 = vld [vmem:[%s896_s3 + $0x60] sm:$0xff] }
  0x16   : > { %517 = vmatprep.subr.bf16.mxu1 %v516_v56  ;;  %v41_v13 = vld [vmem:[%s795_s30 + $0x8] sm:$0xff]  ;;  %v550_v20 = vpack.c.bf16 %v86_v12, %v85_v11  ;;  %v75_v21 = vld [vmem:[%s896_s3 + $0xf0] sm:$0xff]  ;;  %v76_v22 = vld [vmem:[%s896_s3 + $0xf8] sm:$0xff]  ;;  %v552_v24 = vpack.c.bf16 %v104_v16, %v103_v15 }
  0x17   : > { %543 = vmatpush3.bf16.msra.mxu0 %v542_v59  ;;  %250 = vmatprep.mubr.f32.mxu1 %v41_v13  ;;  %v58_v19 = vld [vmem:[%s896_s3 + $0x68] sm:$0xff]  ;;  %v43_v23 = vld [vmem:[%s795_s30 + $0x18] sm:$0xff]  ;;  %v87_v25 = vld [vmem:[%s896_s3 + $0x150] sm:$0xff]  ;;  %v528_v30 = vpack.c.bf16 %v76_v22, %v75_v21 }
  0x18   : > { %545 = vmatprep.subr.bf16.mxu0 %v544_v62  ;;  %v88_v26 = vld [vmem:[%s896_s3 + $0x158] sm:$0xff]  ;;  %320 = vmatprep.mubr.f32.mxu0 %v43_v23  ;;  %v526_v27 = vpack.c.bf16 %v58_v19, %v57_v18  ;;  %v105_v28 = vld [vmem:[%s896_s3 + $0x1e0] sm:$0xff]  ;;  %v106_v29 = vld [vmem:[%s896_s3 + $0x1e8] sm:$0xff] }
  0x19   : > { %519 = vmatpush3.bf16.msra.mxu1 %v518_v1  ;;  %v59_v31 = vld [vmem:[%s896_s3 + $0x70] sm:$0xff]  ;;  %v60_v32 = vld [vmem:[%s896_s3 + $0x78] sm:$0xff]  ;;  %v554_v33 = vpack.c.bf16 %v88_v26, %v87_v25  ;;  %v556_v34 = vpack.c.bf16 %v106_v29, %v105_v28  ;;  %v89_v35 = vld [vmem:[%s896_s3 + $0x160] sm:$0xff] }
  0x1a   : > { %521 = vmatprep.subr.bf16.mxu1 %v520_v4  ;;  %v90_v36 = vld [vmem:[%s896_s3 + $0x168] sm:$0xff]  ;;  %v530_v37 = vpack.c.bf16 %v60_v32, %v59_v31  ;;  %v107_v38 = vld [vmem:[%s896_s3 + $0x1f0] sm:$0xff]  ;;  %v108_v39 = vld [vmem:[%s896_s3 + $0x1f8] sm:$0xff] }
  0x1b   : > { %547 = vmatpush3.bf16.msra.mxu0 %v546_v7  ;;  %v558_v40 = vpack.c.bf16 %v90_v36, %v89_v35  ;;  %v560_v41 = vpack.c.bf16 %v108_v39, %v107_v38  ;;  %v91_v42 = vld [vmem:[%s896_s3 + $0x170] sm:$0xff]  ;;  %v92_v43 = vld [vmem:[%s896_s3 + $0x178] sm:$0xff]  ;;  %v40_v44 = vld [vmem:[%s795_s30] sm:$0xff] }
  0x1c   : > { %549 = vmatprep.subr.bf16.mxu0 %v548_v10  ;;  %v562_v45 = vpack.c.bf16 %v92_v43, %v91_v42  ;;  %v42_v46 = vld [vmem:[%s795_s30 + $0x10] sm:$0xff]  ;;  %v404_v56 = vld [vmem:[%s898_s5] ss:$0 sm:$0xff]  ;;  %v341_v60 = vld [vmem:[#allocation3] sm:$0xff]  ;;  %s598_s30 = smov 32  }
  0x1d   : > { %523 = vmatpush3.bf16.msra.mxu1 %v522_v14 }
  0x1e   : > { %525 = vmatprep.subr.bf16.mxu1 %v524_v17 }
  0x1f   : > { %551 = vmatpush3.bf16.msra.mxu0 %v550_v20 }
  0x20   : > { %553 = vmatprep.subr.bf16.mxu0 %v552_v24 }
  0x21   : > { %527 = vmatpush3.bf16.msra.mxu1 %v526_v27 }
  0x22   : > { %529 = vmatprep.subr.bf16.mxu1 %v528_v30 }
  0x23   : > { %555 = vmatpush3.bf16.msra.mxu0 %v554_v33 }
  0x24   : > { %557 = vmatprep.subr.bf16.mxu0 %v556_v34 }
  0x25   : > { %531 = vmatpush3.bf16.msra.mxu1 %v530_v37 }
  0x27   : > { %559 = vmatpush3.bf16.msra.mxu0 %v558_v40 }
  0x28   : > { %251 = vmatmul.mubr.f32.vlgmr.msra.gmra.mrb[0].mxu1 %v40_v44  ;;  %561 = vmatprep.subr.bf16.mxu0 %v560_v41 }
  0x2b   : > { %563 = vmatpush3.bf16.msra.mxu0 %v562_v45 }
  0x2e   : > { %321 = vmatmul.mubr.f32.vlgmr.msra.gmra.mrb[2].mxu0 %v42_v46 }
  0xe1   : > { %v182_v47 = vpop.f32.mrb[0].mxu0 }
  0xe2   : > { %v493_v48 = vpop.f32.mrb[1].mxu0 }
  0xfb   : > { %v445_v49 = vpop.f32.mrb[0].mxu1 }
  0xfc   : > { %v446_v50 = vpop.f32.mrb[1].mxu1 }
  0xfd   : > { %v447_v51 = vadd.f32 %v446_v50, %v445_v49 }
  0xff   : > { %v253_v52 = vadd.f32 %v447_v51, %v182_v47 }
 0x101   : > { %v480_v53 = vpop.f32.mrb[2].mxu0 }
 0x102   : > { %v481_v54 = vpop.f32.mrb[3].mxu0 }
 0x103   : > { %v482_v55 = vadd.f32 %v481_v54, %v480_v53 }
 0x105   : > { %v323_v57 = vadd.f32 %v482_v55, %v253_v52 }
 0x107   : > { %v333_v58 = vadd.f32 %v404_v56, %v323_v57 }
 0x109   : > { %578 = vtanh.f32 %v333_v58  ;;  %v405_v61 = vmul.f32 -1.442695, %v333_v58 }
 0x10b   : > { %580 = vpow2.f32 %v405_v61 }
 0x113   : > { %v579_v59 = vpop.eup %578 }
 0x114   : > { %348 = vrot.lane.b32.xlu0 %v579_v59, %s597_s14 }
 0x115   : > { %v581_v62 = vpop.eup %580 }
 0x116   : > { %v337_v63 = vadd.f32 1.0, %v581_v62 }
 0x118   : > { %343 = vrot.lane.b32.xlu0 %v341_v60, %s598_s30  ;;  %582 = vrcp.f32 %v337_v63 }
 0x122   : > { %v583_v0 = vpop.eup %582 }
 0x186   : > { %v349_v1 = vpop.permute.xlu0 %348 }
 0x187   : > { %v351_v2 = vmul.f32 %v583_v0, %v349_v1 }
 0x189   : > { %353 = vrot.lane.b32.xlu1 %v351_v2, %s598_s30 }
 0x18a   : > { %v344_v3 = vpop.permute.xlu0 %343 }
 0x18b   : > { %v346_v4 = vmul.f32 %v583_v0, %v344_v3 }
 0x1fb   : > { %v354_v5 = vpop.permute.xlu1 %353 }
 0x1fc   : > { %v356_v6 = vadd.f32 %v354_v5, %v346_v4 }
 0x1fe   : > { %584 = vtanh.f32 %v356_v6 }
 0x208   : > { %v585_v7 = vpop.eup %584 }
 0x209   : > { %359 = vrot.lane.b32.xlu1 %v585_v7, %s597_s14 }
 0x20d   : > { %369 = vrot.lane.b32.xlu1 %v356_v6, %s599_s15 }
 0x27b   : > { %v360_v8 = vpop.permute.xlu1 %359 }
 0x27c   : > { %v362_v9 = vmul.f32 %v583_v0, %v360_v8 }
 0x27e   : > { %364 = vrot.lane.b32.xlu0 %v362_v9, %s598_s30 }
 0x27f   : > { %v370_v10 = vpop.permute.xlu1 %369 }
 0x280   : > { %372 = vst.msk [vmem:[#allocation3] sm:$0xff] %vm27_vm0, %v370_v10 }
 0x287   :  { %v378_v13 = vld [vmem:[#allocation3] sm:$0xff] (%p33_p0) }
 0x288   :  { %379 = vst.msk [vmem:[%s901_s8] sm:$0xff] (%p33_p0), %vm27_vm0, %v378_v13 }
 0x2eb   :  { %35 = sbr.rel (!%p33_p0) target bundleno = 4 (0x4), region = 69 }
 0x2f0   : > { %v365_v11 = vpop.permute.xlu0 %364 }
 0x2f1   : > { %367 = vst.msk [vmem:[#allocation2] sm:$0xff] %vm27_vm0, %v365_v11  ;;  %375 = vst.msk [vmem:[%s374_s19] sm:$0xff] %vm27_vm0, %v365_v11 }
 0x2f8   :  { %v376_v12 = vld [vmem:[#allocation2] sm:$0xff] }
 0x2f9   :  { %377 = vst.msk [vmem:[%s900_s7] sm:$0xff] %vm27_vm0, %v376_v12 }

// kernel: resnet18_rnn_forward.131
= control target key start
LH: loop header
LB: loop body
LE: loop exit
PB: predicated region body
PF: predicated region fallthrough
CT: control target
= control target key end

     0   :  { %14 = vsyncpa [#allocation5], 0  ;;  %s986_s0 = inlined_call_operand.vmem [shape: f32[2,8,512], index: 0, kind: input, shape index: {}]   ;;  %s987_s1 = inlined_call_operand.vmem [shape: f32[8,32], index: 1, kind: input, shape index: {}]   ;;  %s988_s2 = inlined_call_operand.vmem [shape: f32[8,32], index: 2, kind: input, shape index: {}]   ;;  %s989_s3 = inlined_call_operand.vmem [shape: f32[512,128], index: 3, kind: input, shape index: {}]   ;;  %s990_s4 = inlined_call_operand.vmem [shape: f32[32,128], index: 4, kind: input, shape index: {}]   ;;  %s991_s5 = inlined_call_operand.vmem [shape: f32[1,128], index: 5, kind: input, shape index: {}]   ;;  %s992_s6 = inlined_call_operand.vmem [shape: f32[2,8,32], index: 6, kind: output, shape index: {0}]   ;;  %s993_s7 = inlined_call_operand.hbm [shape: f32[8,32], index: 7, kind: output, shape index: {1}]   ;;  %s994_s8 = inlined_call_operand.hbm [shape: f32[8,32], index: 8, kind: output, shape index: {2}]  }
   0x1   :  { %15 = vsyncpa [#allocation7], 0  ;;  %v28_v0 = vld [vmem:[%s987_s1] sm:$0xff]  ;;  %vm29_vm0 = vcmask 261120   ;;  %s727_s9 = smov 0  }
   0x2   :  { %v31_v1 = vld [vmem:[%s988_s2] sm:$0xff]  ;;  %30 = vst.msk [vmem:[#allocation2] sm:$0xff] %vm29_vm0, %v28_v0 }
   0x3   :  { %32 = vst.msk [vmem:[#allocation3] sm:$0xff] %vm29_vm0, %v31_v1 }
   0x4 LB: > { %v111_v2 = vld [vmem:[%s990_s4] sm:$0xff]  ;;  %v112_v3 = vld [vmem:[%s990_s4 + $0x8] sm:$0xff]  ;;  %v666_v5 = vmov 0.0|0.0   ;;  %vm667_vm1 = vmmov 0   ;;  %v668_v10 = vmov 0.0   ;;  %v113_v13 = vld [vmem:[%s990_s4 + $0x10] sm:$0xff]  ;;  %s664_s9 = sphi %s727_s9, %s38_s9  }
   0x5   : > { %v63_v4 = vld [vmem:[%s989_s3 + $0x80] sm:$0xff]  ;;  %516 = vmatprep.subr.bf16.mxu0 %v666_v5  ;;  %v517_v6 = vpack.c.bf16 %v112_v3, %v111_v2  ;;  %v64_v7 = vld [vmem:[%s989_s3 + $0x88] sm:$0xff]  ;;  %513 = vmatprep.mubr.msk.f32.mxu0 %vm667_vm1, %v668_v10  ;;  %v114_v14 = vld [vmem:[%s990_s4 + $0x18] sm:$0xff]  ;;  %s429_s15 = sshll.u32 %s664_s9, 5  ;;  %s669_s14 = smov 64  }
   0x6   : > { %v47_v8 = vld [vmem:[%s989_s3] sm:$0xff]  ;;  %v48_v9 = vld [vmem:[%s989_s3 + $0x8] sm:$0xff]  ;;  %v522_v11 = vpack.c.bf16 %v64_v7, %v63_v4  ;;  %v65_v15 = vld [vmem:[%s989_s3 + $0x90] sm:$0xff]  ;;  %v520_v16 = vpack.c.bf16 %v114_v14, %v113_v13  ;;  %s869_s30 = scalar_lea.vmem %s986_s0, %s429_s15  ;;  %s671_s15 = smov 96  }
   0x7   : > { %v524_v12 = vpack.c.bf16 %v48_v9, %v47_v8  ;;  %518 = vmatpush3.bf16.msra.mxu0 %v517_v6  ;;  %v66_v17 = vld [vmem:[%s989_s3 + $0x98] sm:$0xff]  ;;  %v49_v18 = vld [vmem:[%s989_s3 + $0x10] sm:$0xff]  ;;  %v95_v21 = vld [vmem:[%s989_s3 + $0x180] sm:$0xff]  ;;  %s428_s16 = sshll.u32 %s664_s9, 3  ;;  %s38_s9 = sadd.s32 1, %s664_s9  }
   0x8   : > { %v50_v19 = vld [vmem:[%s989_s3 + $0x18] sm:$0xff]  ;;  %523 = vmatprep.subr.bf16.mxu1 %v522_v11  ;;  %519 = vmatprep.subr.bf16.mxu0 %v666_v5  ;;  %v526_v20 = vpack.c.bf16 %v66_v17, %v65_v15  ;;  %v96_v22 = vld [vmem:[%s989_s3 + $0x188] sm:$0xff]  ;;  %v67_v26 = vld [vmem:[%s989_s3 + $0xa0] sm:$0xff]  ;;  %s376_s19 = scalar_lea.vmem %s992_s6, %s428_s16  ;;  %p35_p0 = scmp.ge.s32.totalorder %s38_s9, 2  }
   0x9   : > { %525 = vmatpush3.bf16.msra.mxu1 %v524_v12  ;;  %v528_v23 = vpack.c.bf16 %v50_v19, %v49_v18  ;;  %v46_v24 = vld [vmem:[#allocation2] sm:$0xff]  ;;  %v554_v25 = vpack.c.bf16 %v96_v22, %v95_v21  ;;  %v68_v27 = vld [vmem:[%s989_s3 + $0xa8] sm:$0xff]  ;;  %v97_v34 = vld [vmem:[%s989_s3 + $0x190] sm:$0xff]  ;;  %s672_s20 = smov (%p35_p0), [#allocation4]   ;;  %s673_s22 = smov (%p35_p0), [#allocation6]  }
   0xa   : > { %v79_v28 = vld [vmem:[%s989_s3 + $0x100] sm:$0xff]  ;;  %527 = vmatprep.subr.bf16.mxu1 %v526_v20  ;;  %v530_v29 = vpack.c.bf16 %v68_v27, %v67_v26  ;;  %v80_v30 = vld [vmem:[%s989_s3 + $0x108] sm:$0xff]  ;;  %v98_v35 = vld [vmem:[%s989_s3 + $0x198] sm:$0xff]  ;;  %s390_s21 = sshll.u32 (%p35_p0), %s672_s20, 4  ;;  %s400_s23 = sshll.u32 (%p35_p0), %s673_s22, 4  ;;  %s391_s21 = int_to_ptr.vmem [resolvable:$true] %s390_s21  ;;  %s401_s23 = int_to_ptr.vmem [resolvable:$true] %s400_s23 }
   0xb   : > { %v51_v31 = vld [vmem:[%s989_s3 + $0x20] sm:$0xff]  ;;  %v52_v32 = vld [vmem:[%s989_s3 + $0x28] sm:$0xff]  ;;  %521 = vmatpush3.bf16.msra.mxu0 %v520_v16  ;;  %v556_v33 = vpack.c.bf16 %v80_v30, %v79_v28  ;;  %v69_v36 = vld [vmem:[%s989_s3 + $0xb0] sm:$0xff]  ;;  %v558_v37 = vpack.c.bf16 %v98_v35, %v97_v34  ;;  %s610_s24 = scalar_lea.vmem (%p35_p0), %s391_s21, 128  ;;  %p615_p2 = scmp.lt.s32.totalorder (%p35_p0), %s391_s21, %s391_s21 }
   0xc   : > { %555 = vmatprep.subr.bf16.mxu0 %v554_v25  ;;  %v70_v38 = vld [vmem:[%s989_s3 + $0xb8] sm:$0xff]  ;;  %v81_v39 = vld [vmem:[%s989_s3 + $0x110] sm:$0xff]  ;;  %v532_v41 = vpack.c.bf16 %v52_v32, %v51_v31  ;;  %v99_v42 = vld [vmem:[%s989_s3 + $0x1a0] sm:$0xff]  ;;  %p611_p1 = scmp.ne.s32.totalorder (%p35_p0), %s391_s21, %s610_s24  ;;  %p616_p3 = scmp.lt.s32.totalorder (%p35_p0), %s610_s24, %s610_s24 }
   0xd   : > { %v82_v40 = vld [vmem:[%s989_s3 + $0x118] sm:$0xff]  ;;  %529 = vmatpush3.bf16.msra.mxu1 %v528_v23  ;;  %v534_v43 = vpack.c.bf16 %v70_v38, %v69_v36  ;;  %v53_v44 = vld [vmem:[%s989_s3 + $0x30] sm:$0xff]  ;;  %v100_v46 = vld [vmem:[%s989_s3 + $0x1a8] sm:$0xff] }
   0xe   : > { %514 = vmatmul.mubr.msk.f32.vlgmr.msra.gmra.mrb[0].mxu0 %vm29_vm0, %v46_v24  ;;  %531 = vmatprep.subr.bf16.mxu1 %v530_v29  ;;  %v54_v45 = vld [vmem:[%s989_s3 + $0x38] sm:$0xff]  ;;  %v560_v47 = vpack.c.bf16 %v82_v40, %v81_v39  ;;  %v71_v48 = vld [vmem:[%s989_s3 + $0xc0] sm:$0xff]  ;;  %v72_v49 = vld [vmem:[%s989_s3 + $0xc8] sm:$0xff]  ;;  %v562_v50 = vpack.c.bf16 %v100_v46, %v99_v42  ;;  %p617_p4 = por (%p35_p0), %p616_p3, %p615_p2 }
   0xf   : > { %557 = vmatpush3.bf16.msra.mxu0 %v556_v33  ;;  %v83_v51 = vld [vmem:[%s989_s3 + $0x120] sm:$0xff]  ;;  %v84_v52 = vld [vmem:[%s989_s3 + $0x128] sm:$0xff]  ;;  %v536_v53 = vpack.c.bf16 %v54_v45, %v53_v44  ;;  %v101_v54 = vld [vmem:[%s989_s3 + $0x1b0] sm:$0xff]  ;;  %v538_v56 = vpack.c.bf16 %v72_v49, %v71_v48 }
  0x10   : > { %559 = vmatprep.subr.bf16.mxu0 %v558_v37  ;;  %v102_v55 = vld [vmem:[%s989_s3 + $0x1b8] sm:$0xff]  ;;  %v55_v57 = vld [vmem:[%s989_s3 + $0x40] sm:$0xff]  ;;  %v56_v58 = vld [vmem:[%s989_s3 + $0x48] sm:$0xff]  ;;  %v564_v59 = vpack.c.bf16 %v84_v52, %v83_v51  ;;  %p618_p5 = pnand (%p35_p0), %p617_p4, %p611_p1 }
  0x11   : > { %533 = vmatpush3.bf16.msra.mxu1 %v532_v41  ;;  %v73_v60 = vld [vmem:[%s989_s3 + $0xd0] sm:$0xff]  ;;  %v74_v61 = vld [vmem:[%s989_s3 + $0xd8] sm:$0xff]  ;;  %v566_v62 = vpack.c.bf16 %v102_v55, %v101_v54  ;;  %v540_v1 = vpack.c.bf16 %v56_v58, %v55_v57  ;;  %v103_v2 = vld [vmem:[%s989_s3 + $0x1c0] sm:$0xff] }
  0x12   : > { %535 = vmatprep.subr.bf16.mxu1 %v534_v43  ;;  %v85_v63 = vld [vmem:[%s989_s3 + $0x130] sm:$0xff]  ;;  %v86_v0 = vld [vmem:[%s989_s3 + $0x138] sm:$0xff]  ;;  %v104_v3 = vld [vmem:[%s989_s3 + $0x1c8] sm:$0xff]  ;;  %v542_v4 = vpack.c.bf16 %v74_v61, %v73_v60 }
  0x13   : > { %561 = vmatpush3.bf16.msra.mxu0 %v560_v47  ;;  %v57_v5 = vld [vmem:[%s989_s3 + $0x50] sm:$0xff]  ;;  %v58_v6 = vld [vmem:[%s989_s3 + $0x58] sm:$0xff]  ;;  %v568_v7 = vpack.c.bf16 %v86_v0, %v85_v63  ;;  %v75_v8 = vld [vmem:[%s989_s3 + $0xe0] sm:$0xff]  ;;  %v570_v10 = vpack.c.bf16 %v104_v3, %v103_v2 }
  0x14   : > { %563 = vmatprep.subr.bf16.mxu0 %v562_v50  ;;  %v76_v9 = vld [vmem:[%s989_s3 + $0xe8] sm:$0xff]  ;;  %v87_v11 = vld [vmem:[%s989_s3 + $0x140] sm:$0xff]  ;;  %v544_v14 = vpack.c.bf16 %v58_v6, %v57_v5  ;;  %v105_v15 = vld [vmem:[%s989_s3 + $0x1d0] sm:$0xff] }
  0x15   : > { %537 = vmatpush3.bf16.msra.mxu1 %v536_v53  ;;  %v88_v12 = vld [vmem:[%s989_s3 + $0x148] sm:$0xff]  ;;  %v106_v16 = vld [vmem:[%s989_s3 + $0x1d8] sm:$0xff]  ;;  %v546_v17 = vpack.c.bf16 %v76_v9, %v75_v8  ;;  %v59_v18 = vld [vmem:[%s989_s3 + $0x60] sm:$0xff] }
  0x16   : > { %539 = vmatprep.subr.bf16.mxu1 %v538_v56  ;;  %v43_v13 = vld [vmem:[%s869_s30 + $0x8] sm:$0xff]  ;;  %v572_v20 = vpack.c.bf16 %v88_v12, %v87_v11  ;;  %v77_v21 = vld [vmem:[%s989_s3 + $0xf0] sm:$0xff]  ;;  %v78_v22 = vld [vmem:[%s989_s3 + $0xf8] sm:$0xff]  ;;  %v574_v24 = vpack.c.bf16 %v106_v16, %v105_v15 }
  0x17   : > { %565 = vmatpush3.bf16.msra.mxu0 %v564_v59  ;;  %252 = vmatprep.mubr.f32.mxu1 %v43_v13  ;;  %v60_v19 = vld [vmem:[%s989_s3 + $0x68] sm:$0xff]  ;;  %v45_v23 = vld [vmem:[%s869_s30 + $0x18] sm:$0xff]  ;;  %v89_v25 = vld [vmem:[%s989_s3 + $0x150] sm:$0xff]  ;;  %v550_v30 = vpack.c.bf16 %v78_v22, %v77_v21 }
  0x18   : > { %567 = vmatprep.subr.bf16.mxu0 %v566_v62  ;;  %v90_v26 = vld [vmem:[%s989_s3 + $0x158] sm:$0xff]  ;;  %322 = vmatprep.mubr.f32.mxu0 %v45_v23  ;;  %v548_v27 = vpack.c.bf16 %v60_v19, %v59_v18  ;;  %v107_v28 = vld [vmem:[%s989_s3 + $0x1e0] sm:$0xff]  ;;  %v108_v29 = vld [vmem:[%s989_s3 + $0x1e8] sm:$0xff] }
  0x19   : > { %541 = vmatpush3.bf16.msra.mxu1 %v540_v1  ;;  %v61_v31 = vld [vmem:[%s989_s3 + $0x70] sm:$0xff]  ;;  %v62_v32 = vld [vmem:[%s989_s3 + $0x78] sm:$0xff]  ;;  %v576_v33 = vpack.c.bf16 %v90_v26, %v89_v25  ;;  %v578_v34 = vpack.c.bf16 %v108_v29, %v107_v28  ;;  %v91_v35 = vld [vmem:[%s989_s3 + $0x160] sm:$0xff] }
  0x1a   : > { %543 = vmatprep.subr.bf16.mxu1 %v542_v4  ;;  %v92_v36 = vld [vmem:[%s989_s3 + $0x168] sm:$0xff]  ;;  %v552_v37 = vpack.c.bf16 %v62_v32, %v61_v31  ;;  %v109_v38 = vld [vmem:[%s989_s3 + $0x1f0] sm:$0xff]  ;;  %v110_v39 = vld [vmem:[%s989_s3 + $0x1f8] sm:$0xff] }
  0x1b   : > { %569 = vmatpush3.bf16.msra.mxu0 %v568_v7  ;;  %v580_v40 = vpack.c.bf16 %v92_v36, %v91_v35  ;;  %v582_v41 = vpack.c.bf16 %v110_v39, %v109_v38  ;;  %v93_v42 = vld [vmem:[%s989_s3 + $0x170] sm:$0xff]  ;;  %v94_v43 = vld [vmem:[%s989_s3 + $0x178] sm:$0xff]  ;;  %v42_v44 = vld [vmem:[%s869_s30] sm:$0xff] }
  0x1c   : > { %571 = vmatprep.subr.bf16.mxu0 %v570_v10  ;;  %v584_v45 = vpack.c.bf16 %v94_v43, %v93_v42  ;;  %v44_v46 = vld [vmem:[%s869_s30 + $0x10] sm:$0xff]  ;;  %v426_v56 = vld [vmem:[%s991_s5] ss:$0 sm:$0xff]  ;;  %v343_v60 = vld [vmem:[#allocation3] sm:$0xff]  ;;  %s670_s30 = smov 32  }
  0x1d   : > { %545 = vmatpush3.bf16.msra.mxu1 %v544_v14 }
  0x1e   : > { %547 = vmatprep.subr.bf16.mxu1 %v546_v17 }
  0x1f   : > { %573 = vmatpush3.bf16.msra.mxu0 %v572_v20 }
  0x20   : > { %575 = vmatprep.subr.bf16.mxu0 %v574_v24 }
  0x21   : > { %549 = vmatpush3.bf16.msra.mxu1 %v548_v27 }
  0x22   : > { %551 = vmatprep.subr.bf16.mxu1 %v550_v30 }
  0x23   : > { %577 = vmatpush3.bf16.msra.mxu0 %v576_v33 }
  0x24   : > { %579 = vmatprep.subr.bf16.mxu0 %v578_v34 }
  0x25   : > { %553 = vmatpush3.bf16.msra.mxu1 %v552_v37 }
  0x27   : > { %581 = vmatpush3.bf16.msra.mxu0 %v580_v40 }
  0x28   : > { %253 = vmatmul.mubr.f32.vlgmr.msra.gmra.mrb[0].mxu1 %v42_v44  ;;  %583 = vmatprep.subr.bf16.mxu0 %v582_v41 }
  0x2b   : > { %585 = vmatpush3.bf16.msra.mxu0 %v584_v45 }
  0x2e   : > { %323 = vmatmul.mubr.f32.vlgmr.msra.gmra.mrb[2].mxu0 %v44_v46 }
  0xe1   : > { %v184_v47 = vpop.f32.mrb[0].mxu0 }
  0xe2   : > { %v515_v48 = vpop.f32.mrb[1].mxu0 }
  0xfb   : > { %v467_v49 = vpop.f32.mrb[0].mxu1 }
  0xfc   : > { %v468_v50 = vpop.f32.mrb[1].mxu1 }
  0xfd   : > { %v469_v51 = vadd.f32 %v468_v50, %v467_v49 }
  0xff   : > { %v255_v52 = vadd.f32 %v469_v51, %v184_v47 }
 0x101   : > { %v502_v53 = vpop.f32.mrb[2].mxu0 }
 0x102   : > { %v503_v54 = vpop.f32.mrb[3].mxu0 }
 0x103   : > { %v504_v55 = vadd.f32 %v503_v54, %v502_v53 }
 0x105   : > { %v325_v57 = vadd.f32 %v504_v55, %v255_v52 }
 0x107   : > { %v335_v58 = vadd.f32 %v426_v56, %v325_v57 }
 0x109   : > { %602 = vtanh.f32 %v335_v58  ;;  %v427_v61 = vmul.f32 -1.442695, %v335_v58 }
 0x10b   : > { %604 = vpow2.f32 %v427_v61 }
 0x113   : > { %v603_v59 = vpop.eup %602 }
 0x114   : > { %350 = vrot.lane.b32.xlu0 %v603_v59, %s669_s14 }
 0x115   : > { %v605_v62 = vpop.eup %604 }
 0x116   : > { %v339_v63 = vadd.f32 1.0, %v605_v62 }
 0x118   : > { %345 = vrot.lane.b32.xlu0 %v343_v60, %s670_s30  ;;  %606 = vrcp.f32 %v339_v63 }
 0x122   : > { %v607_v0 = vpop.eup %606 }
 0x186   : > { %v351_v1 = vpop.permute.xlu0 %350 }
 0x187   : > { %v353_v2 = vmul.f32 %v607_v0, %v351_v1 }
 0x189   : > { %355 = vrot.lane.b32.xlu1 %v353_v2, %s670_s30 }
 0x18a   : > { %v346_v3 = vpop.permute.xlu0 %345 }
 0x18b   : > { %v348_v4 = vmul.f32 %v607_v0, %v346_v3 }
 0x1fb   : > { %v356_v5 = vpop.permute.xlu1 %355 }
 0x1fc   : > { %v358_v6 = vadd.f32 %v356_v5, %v348_v4 }
 0x1fe   : > { %608 = vtanh.f32 %v358_v6 }
 0x208   : > { %v609_v7 = vpop.eup %608 }
 0x209   : > { %361 = vrot.lane.b32.xlu1 %v609_v7, %s669_s14 }
 0x20d   : > { %371 = vrot.lane.b32.xlu1 %v358_v6, %s671_s15 }
 0x27b   : > { %v362_v8 = vpop.permute.xlu1 %361 }
 0x27c   : > { %v364_v9 = vmul.f32 %v607_v0, %v362_v8 }
 0x27e   : > { %366 = vrot.lane.b32.xlu0 %v364_v9, %s670_s30 }
 0x27f   : > { %v372_v10 = vpop.permute.xlu1 %371 }
 0x280   : > { %374 = vst.msk [vmem:[#allocation3] sm:$0xff] %vm29_vm0, %v372_v10 }
 0x287   :  { %v380_v13 = vld [vmem:[#allocation3] sm:$0xff] (%p35_p0) }
 0x288   :  { %381 = vst.msk [vmem:[#allocation6] sm:$0xff] (%p35_p0), %vm29_vm0, %v380_v13 }
 0x2eb   :  { %37 = sbr.rel (!%p35_p0) target bundleno = 4 (0x4), region = 69 }
 0x2f0   : > { %v367_v11 = vpop.permute.xlu0 %366 }
 0x2f1   : > { %369 = vst.msk [vmem:[#allocation2] sm:$0xff] %vm29_vm0, %v367_v11  ;;  %377 = vst.msk [vmem:[%s376_s19] sm:$0xff] %vm29_vm0, %v367_v11 }
 0x2f8   :  { %v378_v12 = vld [vmem:[#allocation2] sm:$0xff] }
 0x2f9   :  { %379 = vst.msk [vmem:[#allocation4] sm:$0xff] %vm29_vm0, %v378_v12 }
 0x2fa   :  { %621 = shalt.err (!%p618_p5)
}
 0x2fb   :  { %s622_s3 = scalar_lea.hbm %s993_s7, 128 }
 0x2fc   :  { %p623_p6 = scmp.ne.s32.totalorder %s993_s7, %s622_s3  ;;  %p626_p7 = scmp.lt.u32.totalorder %s622_s3, %s993_s7 }
 0x2fe   :  { %p628_p8 = pnand %p626_p7, %p623_p6 }
 0x300   :  { %631 = shalt.err (!%p628_p8)
}
 0x301   :  { %393 = dma.vmem_to_hbm [thread:$0]  %s391_s21, 128, %s993_s7, [#allocation5]  }
 0x302   :  { %s632_s28 = scalar_lea.vmem %s401_s23, 128  ;;  %p637_p10 = scmp.lt.s32.totalorder %s401_s23, %s401_s23 }
 0x303   :  { %p633_p9 = scmp.ne.s32.totalorder %s401_s23, %s632_s28  ;;  %p638_p11 = scmp.lt.s32.totalorder %s632_s28, %s632_s28 }
 0x305   :  { %p639_p12 = por %p638_p11, %p637_p10 }
 0x307   :  { %p640_p13 = pnand %p639_p12, %p633_p9 }
 0x309   :  { %643 = shalt.err (!%p640_p13)
}
 0x30a   :  { %s644_s11 = scalar_lea.hbm %s994_s8, 128 }
 0x30b   :  { %p645_p0 = scmp.ne.s32.totalorder %s994_s8, %s644_s11  ;;  %p648_p1 = scmp.lt.u32.totalorder %s644_s11, %s994_s8 }
 0x30d   :  { %p650_p2 = pnand %p648_p1, %p645_p0 }
 0x30f   :  { %653 = shalt.err (!%p650_p2)
}
 0x310   :  { %403 = dma.vmem_to_hbm [thread:$0]  %s401_s23, 128, %s994_s8, [#allocation7]  }
 0x311   :  { %658 = dma.done.wait [#allocation5], 128  }
 0x312   :  { %659 = vsyncadd [#allocation5], 4294967168 }
 0x313   :  { %660 = dma.done.wait [#allocation7], 128  }
 0x314   :  { %661 = vsyncadd [#allocation7], 4294967168 }
 0x315   :  { %412 = vsyncpa [#allocation5], 1 }
 0x316   :  { %413 = vsyncpa [#allocation7], 1 }

// kernel: resnet18_rnn_forward.132
= control target key start
LH: loop header
LB: loop body
LE: loop exit
PB: predicated region body
PF: predicated region fallthrough
CT: control target
= control target key end

     0   :  { %14 = vsyncpa [#allocation5], 0  ;;  %s558_s0 = inlined_call_operand.vmem [shape: f32[2,8,32], index: 0, kind: input, shape index: {}]   ;;  %s559_s1 = inlined_call_operand.vmem [shape: f32[8,32], index: 1, kind: input, shape index: {}]   ;;  %s560_s2 = inlined_call_operand.vmem [shape: f32[8,32], index: 2, kind: input, shape index: {}]   ;;  %s561_s3 = inlined_call_operand.vmem [shape: f32[32,128], index: 3, kind: input, shape index: {}]   ;;  %s562_s4 = inlined_call_operand.vmem [shape: f32[32,128], index: 4, kind: input, shape index: {}]   ;;  %s563_s5 = inlined_call_operand.vmem [shape: f32[1,128], index: 5, kind: input, shape index: {}]   ;;  %s564_s6 = inlined_call_operand.vmem [shape: f32[2,8,32], index: 6, kind: output, shape index: {0}]   ;;  %s565_s7 = inlined_call_operand.hbm [shape: f32[8,32], index: 7, kind: output, shape index: {1}]   ;;  %s566_s8 = inlined_call_operand.hbm [shape: f32[8,32], index: 8, kind: output, shape index: {2}]  }
   0x1   :  { %15 = vsyncpa [#allocation7], 0  ;;  %v28_v0 = vld [vmem:[%s559_s1] sm:$0xff]  ;;  %vm29_vm0 = vcmask 261120   ;;  %s481_s9 = smov 0  }
   0x2   :  { %v31_v1 = vld [vmem:[%s560_s2] sm:$0xff]  ;;  %30 = vst.msk [vmem:[#allocation2] sm:$0xff] %vm29_vm0, %v28_v0 }
   0x3   :  { %32 = vst.msk [vmem:[#allocation3] sm:$0xff] %vm29_vm0, %v31_v1 }
   0x4 LB: > { %v47_v2 = vld [vmem:[%s562_s4] sm:$0xff]  ;;  %v48_v3 = vld [vmem:[%s562_s4 + $0x8] sm:$0xff]  ;;  %v420_v5 = vmov 0.0|0.0   ;;  %v49_v8 = vld [vmem:[%s562_s4 + $0x10] sm:$0xff]  ;;  %vm421_vm1 = vmmov 0   ;;  %v422_v13 = vmov 0.0   ;;  %s418_s9 = sphi %s481_s9, %s38_s9  }
   0x5   : > { %v43_v4 = vld [vmem:[%s561_s3] sm:$0xff]  ;;  %328 = vmatprep.subr.bf16.mxu0 %v420_v5  ;;  %334 = vmatprep.subr.bf16.mxu1 %v420_v5  ;;  %v329_v6 = vpack.c.bf16 %v48_v3, %v47_v2  ;;  %v44_v7 = vld [vmem:[%s561_s3 + $0x8] sm:$0xff]  ;;  %v50_v9 = vld [vmem:[%s562_s4 + $0x18] sm:$0xff]  ;;  %s291_s24 = sshll.u32 %s418_s9, 3  ;;  %s423_s30 = smov 64  }
   0x6   : > { %v335_v10 = vpack.c.bf16 %v44_v7, %v43_v4  ;;  %v45_v11 = vld [vmem:[%s561_s3 + $0x10] sm:$0xff]  ;;  %v46_v12 = vld [vmem:[%s561_s3 + $0x18] sm:$0xff]  ;;  %314 = vmatprep.mubr.msk.f32.mxu0 %vm421_vm1, %v422_v13  ;;  %325 = vmatprep.mubr.msk.f32.mxu1 %vm421_vm1, %v422_v13  ;;  %v332_v14 = vpack.c.bf16 %v50_v9, %v49_v8  ;;  %s40_s27 = scalar_lea.vmem %s558_s0, %s291_s24  ;;  %v294_v20 = vld [vmem:[%s563_s5] ss:$0 sm:$0xff]  ;;  %s424_s10 = smov 32  }
   0x7   : > { %330 = vmatpush3.bf16.msra.mxu0 %v329_v6  ;;  %v338_v15 = vpack.c.bf16 %v46_v12, %v45_v11  ;;  %v41_v17 = vld [vmem:[%s40_s27] sm:$0xff]  ;;  %s425_s11 = smov 96   ;;  %s244_s2 = scalar_lea.vmem %s564_s6, %s291_s24 }
   0x8   : > { %336 = vmatpush3.bf16.msra.mxu1 %v335_v10  ;;  %331 = vmatprep.subr.bf16.mxu0 %v420_v5  ;;  %s38_s9 = sadd.s32 1, %s418_s9  }
   0x9   : > { %337 = vmatprep.subr.bf16.mxu1 %v420_v5  ;;  %v42_v16 = vld [vmem:[#allocation2] sm:$0xff]  ;;  %p35_p0 = scmp.ge.s32.totalorder %s38_s9, 2  }
   0xa   : > { %v212_v26 = vld [vmem:[#allocation3] sm:$0xff]  ;;  %s426_s13 = smov (%p35_p0), [#allocation4]   ;;  %s427_s15 = smov (%p35_p0), [#allocation6]  }
   0xb   : > { %333 = vmatpush3.bf16.msra.mxu0 %v332_v14  ;;  %s258_s14 = sshll.u32 (%p35_p0), %s426_s13, 4  ;;  %s268_s16 = sshll.u32 (%p35_p0), %s427_s15, 4  ;;  %s259_s14 = int_to_ptr.vmem [resolvable:$true] %s258_s14  ;;  %s269_s16 = int_to_ptr.vmem [resolvable:$true] %s268_s16 }
   0xc   : > { %339 = vmatpush3.bf16.msra.mxu1 %v338_v15  ;;  %s364_s17 = scalar_lea.vmem (%p35_p0), %s259_s14, 128  ;;  %p369_p2 = scmp.lt.s32.totalorder (%p35_p0), %s259_s14, %s259_s14 }
   0xd   :  { %p365_p1 = scmp.ne.s32.totalorder (%p35_p0), %s259_s14, %s364_s17  ;;  %p370_p3 = scmp.lt.s32.totalorder (%p35_p0), %s364_s17, %s364_s17 }
   0xe   : > { %315 = vmatmul.mubr.msk.f32.vlgmr.msra.gmra.mrb[0].mxu0 %vm29_vm0, %v42_v16 }
   0xf   : > { %326 = vmatmul.mubr.msk.f32.vlgmr.msra.gmra.mrb[0].mxu1 %vm29_vm0, %v41_v17  ;;  %p371_p4 = por (%p35_p0), %p370_p3, %p369_p2 }
  0x11   :  { %p372_p5 = pnand (%p35_p0), %p371_p4, %p365_p1 }
  0xe1   : > { %v120_v18 = vpop.f32.mrb[0].mxu0 }
  0xe2   : > { %v193_v19 = vpop.f32.mrb[0].mxu1  ;;  %v316_v21 = vpop.f32.mrb[1].mxu0 }
  0xe3   : > { %v194_v22 = vadd.f32 %v193_v19, %v120_v18  ;;  %v327_v23 = vpop.f32.mrb[1].mxu1 }
  0xe5   : > { %v204_v24 = vadd.f32 %v294_v20, %v194_v22 }
  0xe7   : > { %356 = vtanh.f32 %v204_v24  ;;  %v295_v27 = vmul.f32 -1.442695, %v204_v24 }
  0xe9   : > { %358 = vpow2.f32 %v295_v27 }
  0xf1   : > { %v357_v25 = vpop.eup %356 }
  0xf2   : > { %219 = vrot.lane.b32.xlu0 %v357_v25, %s423_s30 }
  0xf3   : > { %v359_v28 = vpop.eup %358 }
  0xf4   : > { %v208_v29 = vadd.f32 1.0, %v359_v28 }
  0xf6   : > { %214 = vrot.lane.b32.xlu0 %v212_v26, %s424_s10  ;;  %360 = vrcp.f32 %v208_v29 }
 0x100   : > { %v361_v30 = vpop.eup %360 }
 0x164   : > { %v220_v31 = vpop.permute.xlu0 %219 }
 0x165   : > { %v222_v32 = vmul.f32 %v361_v30, %v220_v31 }
 0x167   : > { %224 = vrot.lane.b32.xlu1 %v222_v32, %s424_s10 }
 0x168   : > { %v215_v33 = vpop.permute.xlu0 %214 }
 0x169   : > { %v217_v34 = vmul.f32 %v361_v30, %v215_v33 }
 0x1d9   : > { %v225_v35 = vpop.permute.xlu1 %224 }
 0x1da   : > { %v227_v36 = vadd.f32 %v225_v35, %v217_v34 }
 0x1dc   : > { %362 = vtanh.f32 %v227_v36 }
 0x1e6   : > { %v363_v37 = vpop.eup %362 }
 0x1e7   : > { %230 = vrot.lane.b32.xlu1 %v363_v37, %s423_s30 }
 0x1eb   : > { %240 = vrot.lane.b32.xlu1 %v227_v36, %s425_s11 }
 0x259   : > { %v231_v38 = vpop.permute.xlu1 %230 }
 0x25a   : > { %v233_v39 = vmul.f32 %v361_v30, %v231_v38 }
 0x25c   : > { %235 = vrot.lane.b32.xlu0 %v233_v39, %s424_s10 }
 0x25d   : > { %v241_v40 = vpop.permute.xlu1 %240 }
 0x25e   : > { %243 = vst.msk [vmem:[#allocation3] sm:$0xff] %vm29_vm0, %v241_v40 }
 0x265   :  { %v248_v43 = vld [vmem:[#allocation3] sm:$0xff] (%p35_p0) }
 0x266   :  { %249 = vst.msk [vmem:[#allocation6] sm:$0xff] (%p35_p0), %vm29_vm0, %v248_v43 }
 0x2c9   :  { %37 = sbr.rel (!%p35_p0) target bundleno = 4 (0x4), region = 69 }
 0x2ce   : > { %v236_v41 = vpop.permute.xlu0 %235 }
 0x2cf   : > { %238 = vst.msk [vmem:[#allocation2] sm:$0xff] %vm29_vm0, %v236_v41  ;;  %245 = vst.msk [vmem:[%s244_s2] sm:$0xff] %vm29_vm0, %v236_v41 }
 0x2d6   :  { %v246_v42 = vld [vmem:[#allocation2] sm:$0xff] }
 0x2d7   :  { %247 = vst.msk [vmem:[#allocation4] sm:$0xff] %vm29_vm0, %v246_v42 }
 0x2d8   :  { %375 = shalt.err (!%p372_p5)
}
 0x2d9   :  { %s376_s3 = scalar_lea.hbm %s565_s7, 128 }
 0x2da   :  { %p377_p6 = scmp.ne.s32.totalorder %s565_s7, %s376_s3  ;;  %p380_p7 = scmp.lt.u32.totalorder %s376_s3, %s565_s7 }
 0x2dc   :  { %p382_p8 = pnand %p380_p7, %p377_p6 }
 0x2de   :  { %385 = shalt.err (!%p382_p8)
}
 0x2df   :  { %261 = dma.vmem_to_hbm [thread:$0]  %s259_s14, 128, %s565_s7, [#allocation5]  }
 0x2e0   :  { %s386_s21 = scalar_lea.vmem %s269_s16, 128  ;;  %p391_p10 = scmp.lt.s32.totalorder %s269_s16, %s269_s16 }
 0x2e1   :  { %p387_p9 = scmp.ne.s32.totalorder %s269_s16, %s386_s21  ;;  %p392_p11 = scmp.lt.s32.totalorder %s386_s21, %s386_s21 }
 0x2e3   :  { %p393_p12 = por %p392_p11, %p391_p10 }
 0x2e5   :  { %p394_p13 = pnand %p393_p12, %p387_p9 }
 0x2e7   :  { %397 = shalt.err (!%p394_p13)
}
 0x2e8   :  { %s398_s24 = scalar_lea.hbm %s566_s8, 128 }
 0x2e9   :  { %p399_p0 = scmp.ne.s32.totalorder %s566_s8, %s398_s24  ;;  %p402_p1 = scmp.lt.u32.totalorder %s398_s24, %s566_s8 }
 0x2eb   :  { %p404_p2 = pnand %p402_p1, %p399_p0 }
 0x2ed   :  { %407 = shalt.err (!%p404_p2)
}
 0x2ee   :  { %271 = dma.vmem_to_hbm [thread:$0]  %s269_s16, 128, %s566_s8, [#allocation7]  }
 0x2ef   :  { %412 = dma.done.wait [#allocation5], 128  }
 0x2f0   :  { %413 = vsyncadd [#allocation5], 4294967168 }
 0x2f1   :  { %414 = dma.done.wait [#allocation7], 128  }
 0x2f2   :  { %415 = vsyncadd [#allocation7], 4294967168 }
 0x2f3   :  { %280 = vsyncpa [#allocation5], 1 }
 0x2f4   :  { %281 = vsyncpa [#allocation7], 1 }

</bundles_post_ra>
